<compile_context>
chip_gen: v5e
topology: v5e:2x2
jax: 0.10.0
libtpu: 0.0.40
codegen_flags: <defaults>
</compile_context>

<pallas_src>
import numpy as np
import jax
import jax.numpy as jnp
from jax.experimental import pallas as pl
from jax.experimental.pallas import tpu as pltpu

# vocabulary constants (mirror the original `constants` module)
ENC_PAD = 0
DEC_PAD = 0
DEC_SOS = 1
DEC_EOS = 2

# small model hyper-parameters consistent with the module's __init__
D_SRC_EMB = 16
ENC_NHID = 16
D_TRG_EMB = 16
DEC_NHID = 32
DEC_NATT = 32
NREADOUT = 32
ENC_NTOK = 20
DEC_NTOK = 20


def _full_spec(shape):
    n = len(shape)
    return pl.BlockSpec(shape, lambda i, n=n: (0,) * n)


# ------------------------- GRU helpers (kernel side) -------------------------
def _fused_gru_step(x, h, w, b):
    """PyTorch GRUCell (gate order r,z,n) with ONE fused matmul on concat([x,h]).

    w has 4H columns: [r|z pre-acts (x- and h-parts summed), gx_n, gh_n].
    """
    H = h.shape[-1]
    g = jnp.dot(jnp.concatenate([x, h], axis=-1), w,
                preferred_element_type=jnp.float32) + b
    r = jax.nn.sigmoid(g[:, :H])
    z = jax.nn.sigmoid(g[:, H:2 * H])
    n = jnp.tanh(g[:, 2 * H:3 * H] + r * g[:, 3 * H:4 * H])
    return (1.0 - z) * n + z * h


def _gru_step_from_gx(gx, h, wh, bh):
    """GRUCell step where the input projection gx = x @ wx + bx is precomputed."""
    H = h.shape[-1]
    gh = jnp.dot(h, wh, preferred_element_type=jnp.float32) + bh
    r = jax.nn.sigmoid(gx[:, :H] + gh[:, :H])
    z = jax.nn.sigmoid(gx[:, H:2 * H] + gh[:, H:2 * H])
    n = jnp.tanh(gx[:, 2 * H:] + r * gh[:, 2 * H:])
    return (1.0 - z) * n + z * h


def _gru_cell(x, h, wx, wh, bx, bh):
    """Reference (pure-JAX) PyTorch GRUCell math, gate order (r, z, n)."""
    nh = h.shape[-1]
    gx = jnp.dot(x, wx, preferred_element_type=jnp.float32) + bx
    gh = jnp.dot(h, wh, preferred_element_type=jnp.float32) + bh
    r = jax.nn.sigmoid(gx[:, :nh] + gh[:, :nh])
    z = jax.nn.sigmoid(gx[:, nh:2 * nh] + gh[:, nh:2 * nh])
    n = jnp.tanh(gx[:, 2 * nh:] + r * gh[:, 2 * nh:])
    return (1.0 - z) * n + z * h


# ------------------------- weight fusion (wrapper side) ----------------------
def _fuse_gru_weights(wx, wh, bx, bh):
    """Build the 4H-column fused GRU weight/bias used by _fused_gru_step."""
    H = wh.shape[0]
    din = wx.shape[0]
    w = jnp.concatenate([
        jnp.concatenate([wx[:, :2 * H], wx[:, 2 * H:],
                         jnp.zeros((din, H), wx.dtype)], axis=1),
        jnp.concatenate([wh[:, :2 * H], jnp.zeros((H, H), wh.dtype),
                         wh[:, 2 * H:]], axis=1),
    ], axis=0)
    b = jnp.concatenate([bx[:, :2 * H] + bh[:, :2 * H],
                         bx[:, 2 * H:], bh[:, 2 * H:]], axis=1)
    return w, b


# ------------------------------ fused kernel --------------------------------
def _rnnsearch_kernel(src_emb_ref, mask_ref, trg_emb_ref, onehot_ref, valid_ref,
                      wxfb_ref, bxfb_ref, whf_ref, bhf_ref, whb_ref, bhb_ref,
                      winit_ref, binit_ref,
                      w1f_ref, b1f_ref,
                      ws2s_ref, bs2s_ref, wh2s_ref, bh2s_ref, wa2o_ref, ba2o_ref,
                      w2f_ref, b2f_ref, wro_ref, bro_ref, waff_ref, baff_ref,
                      loss_ref,
                      ctxf_scr, ctxb_scr):
    B, S, Dsrc = src_emb_ref.shape
    Henc = whf_ref.shape[0]
    nsteps = trg_emb_ref.shape[1]

    mask = mask_ref[...]                                   # (B, S) float

    # ---------------- encoder: masked bidirectional GRU ----------------
    # Input projections for both directions & all timesteps in ONE matmul.
    x_flat = src_emb_ref[...].reshape(B * S, Dsrc)
    gx_all = (jnp.dot(x_flat, wxfb_ref[...], preferred_element_type=jnp.float32)
              + bxfb_ref[...]).reshape(B, S, 6 * Henc)

    whf, bhf = whf_ref[...], bhf_ref[...]
    whb, bhb = whb_ref[...], bhb_ref[...]

    # forward direction (masked: emulates pack_padded_sequence; pads -> 0)
    h = jnp.zeros((B, Henc), jnp.float32)
    for t in range(S):
        gx = gx_all[:, t, :3 * Henc]
        m = mask[:, t:t + 1]
        hn = _gru_step_from_gx(gx, h, whf, bhf)
        ctxf_scr[:, t, :] = m * hn
        h = m * hn + (1.0 - m) * h

    # backward direction (starts at the last valid token of each sentence)
    h = jnp.zeros((B, Henc), jnp.float32)
    for t in range(S - 1, -1, -1):
        gx = gx_all[:, t, 3 * Henc:]
        m = mask[:, t:t + 1]
        hn = _gru_step_from_gx(gx, h, whb, bhb)
        ctxb_scr[:, t, :] = m * hn
        h = m * hn + (1.0 - m) * h

    ctx = jnp.concatenate([ctxf_scr[...], ctxb_scr[...]], axis=-1)   # (B,S,2H)
    C = 2 * Henc

    # ---------------- decoder init hidden ----------------
    sum_h = jnp.sum(ctx, axis=1)                           # padded slots are 0
    src_len = jnp.maximum(jnp.sum(mask, axis=1, keepdims=True), 1.0)
    avg = sum_h * pl.reciprocal(src_len, approx=True)
    h = jnp.tanh(jnp.dot(avg, winit_ref[...], preferred_element_type=jnp.float32)
                 + binit_ref[...])

    # ---------------- loop-invariant attention keys ----------------
    natt = ws2s_ref.shape[1]
    att_keys = (jnp.dot(ctx.reshape(B * S, C), ws2s_ref[...],
                        preferred_element_type=jnp.float32)
                + bs2s_ref[...]).reshape(B, S, natt)

    emb_all = trg_emb_ref[...]                             # (B, T-1, d_trg)
    wa_row = wa2o_ref[...]                                 # (1, natt) pre-transposed
    ba2o = ba2o_ref[...]                                   # (1, 1)
    w1f, b1f = w1f_ref[...], b1f_ref[...]
    w2f, b2f = w2f_ref[...], b2f_ref[...]
    wh2s, bh2s = wh2s_ref[...], bh2s_ref[...]
    wro, bro = wro_ref[...], bro_ref[...]
    waff, baff = waff_ref[...], baff_ref[...]
    neg_big = jnp.float32(-1e30)

    # ---------------- decoder recurrence (static unroll over T-1) ----------------
    total = jnp.zeros((1, 1), jnp.float32)
    for i in range(nsteps):
        x = emb_all[:, i, :]                               # (B, d_trg)

        # GRUCell 1 (input = target embedding), single fused matmul
        h1 = _fused_gru_step(x, h, w1f, b1f)

        # additive attention over encoder hiddens
        q = jnp.dot(h1, wh2s, preferred_element_type=jnp.float32) + bh2s
        att = jnp.tanh(att_keys + q[:, None, :])           # (B, S, natt)
        logit = jnp.sum(att * wa_row[None, :, :], axis=-1) + ba2o   # (B, S)
        logit = jnp.where(mask > 0.0, logit, neg_big)      # masked_fill(-inf)
        mx = jnp.max(logit, axis=1, keepdims=True)
        e = jnp.exp(logit - mx)
        alpha = e * pl.reciprocal(jnp.sum(e, axis=1, keepdims=True), approx=True)
        c = jnp.sum(alpha[:, :, None] * ctx, axis=1)       # (B, 2*enc_nhid)

        # GRUCell 2 (input = attention context), single fused matmul
        h2 = _fused_gru_step(c, h1, w2f, b2f)

        # readout (single fused matmul) + output projection
        ro_in = jnp.concatenate([x, h2, c], axis=-1)
        out = jnp.tanh(jnp.dot(ro_in, wro, preferred_element_type=jnp.float32) + bro)
        logits = jnp.dot(out, waff, preferred_element_type=jnp.float32) + baff

        # cross entropy, ignore_index = DEC_PAD, mean over valid targets per step
        onehot = onehot_ref[:, i, :]                       # (B, V), ignored rows are zero
        valid = valid_ref[:, i:i + 1]                      # (B, 1)
        mxl = jnp.max(logits, axis=1, keepdims=True)
        lse = jnp.log(jnp.sum(jnp.exp(logits - mxl), axis=1, keepdims=True)) + mxl
        tgt = jnp.sum(onehot * logits, axis=1, keepdims=True)
        n_valid = jnp.maximum(jnp.sum(valid, axis=0, keepdims=True), 1.0)  # (1,1)
        numer = jnp.sum(valid * (lse - tgt))
        total = total + numer * pl.reciprocal(n_valid, approx=True)

        h = h2

    loss_ref[...] = total * (1.0 / nsteps)


# ------------------------------ wrapper --------------------------------------
def rnnsearch_loss(params, src, src_mask, f_trg, f_trg_mask=None):
    # f_trg_mask is unused in the original forward (kept for signature parity)
    src_mask = src_mask.astype(jnp.float32)
    src_emb = jnp.take(params['src_emb'], src, axis=0)           # (B, S, d_src)
    B, S, _ = src_emb.shape
    T = f_trg.shape[1]
    nsteps = T - 1

    trg_emb_seq = jnp.take(params['dec_emb'], f_trg[:, :-1], axis=0)   # (B, T-1, d)
    labels = f_trg[:, 1:]                                              # (B, T-1)
    valid_seq = (labels != DEC_PAD).astype(jnp.float32)                # (B, T-1)
    onehot_seq = (jax.nn.one_hot(labels, DEC_NTOK, dtype=jnp.float32)
                  * valid_seq[..., None])                              # (B, T-1, V)

    # fused / pre-transposed weights (layout plumbing only, done once)
    enc_wx_fb = jnp.concatenate([params['enc_wxf'], params['enc_wxb']], axis=1)
    enc_bx_fb = jnp.concatenate([params['enc_bxf'], params['enc_bxb']], axis=1)
    w1f, b1f = _fuse_gru_weights(params['wx1'], params['wh1'],
                                 params['bx1'], params['bh1'])
    w2f, b2f = _fuse_gru_weights(params['wx2'], params['wh2'],
                                 params['bx2'], params['bh2'])
    w_ro = jnp.concatenate([params['we2o'], params['wh2o'], params['wc2o']], axis=0)
    b_ro = params['be2o'] + params['bh2o'] + params['bc2o']
    wa2o_t = jnp.transpose(params['wa2o'])                             # (1, natt)

    args = [src_emb, src_mask, trg_emb_seq, onehot_seq, valid_seq,
            enc_wx_fb, enc_bx_fb,
            params['enc_whf'], params['enc_bhf'],
            params['enc_whb'], params['enc_bhb'],
            params['w_init'], params['b_init'],
            w1f, b1f,
            params['ws2s'], params['bs2s'], params['wh2s'], params['bh2s'],
            wa2o_t, params['ba2o'],
            w2f, b2f, w_ro, b_ro,
            params['waff'], params['baff']]

    loss = pl.pallas_call(
        _rnnsearch_kernel,
        out_shape=jax.ShapeDtypeStruct((1, 1), jnp.float32),
        grid_spec=pltpu.PrefetchScalarGridSpec(
            num_scalar_prefetch=0,
            grid=(1,),
            in_specs=[_full_spec(a.shape) for a in args],
            out_specs=pl.BlockSpec((1, 1), lambda i: (0, 0)),
            scratch_shapes=[pltpu.VMEM((B, S, ENC_NHID), jnp.float32),
                            pltpu.VMEM((B, S, ENC_NHID), jnp.float32)],
        ),
        compiler_params=pltpu.CompilerParams(
            dimension_semantics=("arbitrary",),
            vmem_limit_bytes=32 * 1024 * 1024),
    )(*args)

    return loss[0, 0]


# ---------------------- deterministic parameter init ------------------------
def init_params(key):
    names_shapes = [
        ('src_emb', (ENC_NTOK, D_SRC_EMB)),
        ('enc_wxf', (D_SRC_EMB, 3 * ENC_NHID)), ('enc_whf', (ENC_NHID, 3 * ENC_NHID)),
        ('enc_bxf', (1, 3 * ENC_NHID)), ('enc_bhf', (1, 3 * ENC_NHID)),
        ('enc_wxb', (D_SRC_EMB, 3 * ENC_NHID)), ('enc_whb', (ENC_NHID, 3 * ENC_NHID)),
        ('enc_bxb', (1, 3 * ENC_NHID)), ('enc_bhb', (1, 3 * ENC_NHID)),
        ('dec_emb', (DEC_NTOK, D_TRG_EMB)),
        ('w_init', (2 * ENC_NHID, DEC_NHID)), ('b_init', (1, DEC_NHID)),
        ('wx1', (D_TRG_EMB, 3 * DEC_NHID)), ('wh1', (DEC_NHID, 3 * DEC_NHID)),
        ('bx1', (1, 3 * DEC_NHID)), ('bh1', (1, 3 * DEC_NHID)),
        ('ws2s', (2 * ENC_NHID, DEC_NATT)), ('bs2s', (1, DEC_NATT)),
        ('wh2s', (DEC_NHID, DEC_NATT)), ('bh2s', (1, DEC_NATT)),
        ('wa2o', (DEC_NATT, 1)), ('ba2o', (1, 1)),
        ('wx2', (2 * ENC_NHID, 3 * DEC_NHID)), ('wh2', (DEC_NHID, 3 * DEC_NHID)),
        ('bx2', (1, 3 * DEC_NHID)), ('bh2', (1, 3 * DEC_NHID)),
        ('we2o', (D_TRG_EMB, NREADOUT)), ('be2o', (1, NREADOUT)),
        ('wh2o', (DEC_NHID, NREADOUT)), ('bh2o', (1, NREADOUT)),
        ('wc2o', (2 * ENC_NHID, NREADOUT)), ('bc2o', (1, NREADOUT)),
        ('waff', (NREADOUT, DEC_NTOK)), ('baff', (1, DEC_NTOK)),
    ]
    keys = jax.random.split(key, len(names_shapes))
    params = {n: jax.random.uniform(k, s, jnp.float32, -0.1, 0.1)
              for (n, s), k in zip(names_shapes, keys)}
    # embedding padding_idx rows are zero
    params['src_emb'] = params['src_emb'].at[ENC_PAD].set(0.0)
    params['dec_emb'] = params['dec_emb'].at[DEC_PAD].set(0.0)
    return params


# ------------------------- pure-JAX reference (check) ------------------------
def reference_loss(params, src, src_mask, f_trg):
    src_mask = src_mask.astype(jnp.float32)
    src_emb = jnp.take(params['src_emb'], src, axis=0)
    B, S, _ = src_emb.shape
    hf = jnp.zeros((B, ENC_NHID), jnp.float32)
    hb = jnp.zeros((B, ENC_NHID), jnp.float32)
    outs_f = [None] * S
    outs_b = [None] * S
    for t in range(S):
        m = src_mask[:, t:t + 1]
        hn = _gru_cell(src_emb[:, t, :], hf, params['enc_wxf'], params['enc_whf'],
                       params['enc_bxf'], params['enc_bhf'])
        outs_f[t] = m * hn
        hf = m * hn + (1 - m) * hf
    for t in range(S - 1, -1, -1):
        m = src_mask[:, t:t + 1]
        hn = _gru_cell(src_emb[:, t, :], hb, params['enc_wxb'], params['enc_whb'],
                       params['enc_bxb'], params['enc_bhb'])
        outs_b[t] = m * hn
        hb = m * hn + (1 - m) * hb
    enc = jnp.concatenate([jnp.stack(outs_f, 1), jnp.stack(outs_b, 1)], axis=-1)
    avg = jnp.sum(enc, axis=1) / jnp.sum(src_mask, axis=1, keepdims=True)
    h = jnp.tanh(avg @ params['w_init'] + params['b_init'])
    T = f_trg.shape[1]
    total = jnp.float32(0.0)
    for i in range(T - 1):
        x = jnp.take(params['dec_emb'], f_trg[:, i], axis=0)
        h1 = _gru_cell(x, h, params['wx1'], params['wh1'], params['bx1'], params['bh1'])
        att = jnp.einsum('bsc,cn->bsn', enc, params['ws2s']) + params['bs2s']
        att = att + (h1 @ params['wh2s'] + params['bh2s'])[:, None, :]
        wa = jnp.transpose(params['wa2o'])
        logit = jnp.sum(jnp.tanh(att) * wa[None, :, :], axis=-1) + params['ba2o']
        logit = jnp.where(src_mask > 0, logit, -1e30)
        alpha = jax.nn.softmax(logit, axis=1)
        c = jnp.sum(alpha[:, :, None] * enc, axis=1)
        h2 = _gru_cell(c, h1, params['wx2'], params['wh2'], params['bx2'], params['bh2'])
        out = jnp.tanh(x @ params['we2o'] + params['be2o']
                       + h2 @ params['wh2o'] + params['bh2o']
                       + c @ params['wc2o'] + params['bc2o'])
        logits = out @ params['waff'] + params['baff']
        labels = f_trg[:, i + 1]
        valid = (labels != DEC_PAD).astype(jnp.float32)
        lse = jax.scipy.special.logsumexp(logits, axis=1)
        tgt = jnp.take_along_axis(logits, labels[:, None], axis=1)[:, 0]
        total = total + jnp.sum(valid * (lse - tgt)) / jnp.maximum(jnp.sum(valid), 1.0)
        h = h2
    return total / (T - 1)


if __name__ == "__main__":
    key = jax.random.PRNGKey(0)
    pkey, skey, tkey = jax.random.split(key, 3)
    params = init_params(pkey)

    B, S, T = 2, 8, 6

    # source batch with lengths [8, 6]
    src_lens = [8, 6]
    src_np = np.array(jax.random.randint(skey, (B, S), 3, ENC_NTOK))
    src_mask_np = np.zeros((B, S), np.float32)
    for b in range(B):
        src_mask_np[b, :src_lens[b]] = 1.0
        src_np[b, src_lens[b]:] = ENC_PAD
    src = jnp.asarray(src_np, jnp.int32)
    src_mask = jnp.asarray(src_mask_np)

    # forward target batch with lengths [6, 5]: <sos> ... <eos> <pad>
    trg_lens = [6, 5]
    f_trg_np = np.array(jax.random.randint(tkey, (B, T), 3, DEC_NTOK))
    f_trg_mask_np = np.zeros((B, T), np.float32)
    for b in range(B):
        L = trg_lens[b]
        f_trg_np[b, 0] = DEC_SOS
        f_trg_np[b, L - 1] = DEC_EOS
        f_trg_np[b, L:] = DEC_PAD
        f_trg_mask_np[b, :L] = 1.0
    f_trg = jnp.asarray(f_trg_np, jnp.int32)
    f_trg_mask = jnp.asarray(f_trg_mask_np)

    loss = rnnsearch_loss(params, src, src_mask, f_trg, f_trg_mask)
    loss = jax.block_until_ready(loss)

    ref = jax.block_until_ready(reference_loss(params, src, src_mask, f_trg))
    np.testing.assert_allclose(np.asarray(loss), np.asarray(ref), rtol=2e-2, atol=2e-2)

    print("KERNEL_OK")
</pallas_src>

<mosaic_0001>
module attributes {stable_mosaic.version = 11 : i64} {
  func.func @_rnnsearch_kernel(%arg0: i32, %arg1: memref<2x8x16xf32, #tpu.memory_space<vmem>>, %arg2: memref<2x8xf32, #tpu.memory_space<vmem>>, %arg3: memref<2x5x16xf32, #tpu.memory_space<vmem>>, %arg4: memref<2x5x20xf32, #tpu.memory_space<vmem>>, %arg5: memref<2x5xf32, #tpu.memory_space<vmem>>, %arg6: memref<16x96xf32, #tpu.memory_space<vmem>>, %arg7: memref<1x96xf32, #tpu.memory_space<vmem>>, %arg8: memref<16x48xf32, #tpu.memory_space<vmem>>, %arg9: memref<1x48xf32, #tpu.memory_space<vmem>>, %arg10: memref<16x48xf32, #tpu.memory_space<vmem>>, %arg11: memref<1x48xf32, #tpu.memory_space<vmem>>, %arg12: memref<32x32xf32, #tpu.memory_space<vmem>>, %arg13: memref<1x32xf32, #tpu.memory_space<vmem>>, %arg14: memref<48x128xf32, #tpu.memory_space<vmem>>, %arg15: memref<1x128xf32, #tpu.memory_space<vmem>>, %arg16: memref<32x32xf32, #tpu.memory_space<vmem>>, %arg17: memref<1x32xf32, #tpu.memory_space<vmem>>, %arg18: memref<32x32xf32, #tpu.memory_space<vmem>>, %arg19: memref<1x32xf32, #tpu.memory_space<vmem>>, %arg20: memref<1x32xf32, #tpu.memory_space<vmem>>, %arg21: memref<1x1xf32, #tpu.memory_space<vmem>>, %arg22: memref<64x128xf32, #tpu.memory_space<vmem>>, %arg23: memref<1x128xf32, #tpu.memory_space<vmem>>, %arg24: memref<80x32xf32, #tpu.memory_space<vmem>>, %arg25: memref<1x32xf32, #tpu.memory_space<vmem>>, %arg26: memref<32x20xf32, #tpu.memory_space<vmem>>, %arg27: memref<1x20xf32, #tpu.memory_space<vmem>>, %arg28: memref<1x1xf32, #tpu.memory_space<vmem>>, %arg29: memref<2x8x16xf32, #tpu.memory_space<vmem>>, %arg30: memref<2x8x16xf32, #tpu.memory_space<vmem>>) attributes {dimension_semantics = [#tpu.dimension_semantics<arbitrary>], iteration_bounds = array<i64: 1>, scalar_prefetch = 0 : i64, scratch_operands = 2 : i64, tpu.core_type = #tpu.core_type<tc>, window_params = [{pipeline_mode = #tpu.pipeline_mode<synchronous>, transform_indices = @transform_0, window_bounds = array<i64: 2, 8, 16>}, {pipeline_mode = #tpu.pipeline_mode<synchronous>, transform_indices = @transform_1, window_bounds = array<i64: 2, 8>}, {pipeline_mode = #tpu.pipeline_mode<synchronous>, transform_indices = @transform_2, window_bounds = array<i64: 2, 5, 16>}, {pipeline_mode = #tpu.pipeline_mode<synchronous>, transform_indices = @transform_3, window_bounds = array<i64: 2, 5, 20>}, {pipeline_mode = #tpu.pipeline_mode<synchronous>, transform_indices = @transform_4, window_bounds = array<i64: 2, 5>}, {pipeline_mode = #tpu.pipeline_mode<synchronous>, transform_indices = @transform_5, window_bounds = array<i64: 16, 96>}, {pipeline_mode = #tpu.pipeline_mode<synchronous>, transform_indices = @transform_6, window_bounds = array<i64: 1, 96>}, {pipeline_mode = #tpu.pipeline_mode<synchronous>, transform_indices = @transform_7, window_bounds = array<i64: 16, 48>}, {pipeline_mode = #tpu.pipeline_mode<synchronous>, transform_indices = @transform_8, window_bounds = array<i64: 1, 48>}, {pipeline_mode = #tpu.pipeline_mode<synchronous>, transform_indices = @transform_9, window_bounds = array<i64: 16, 48>}, {pipeline_mode = #tpu.pipeline_mode<synchronous>, transform_indices = @transform_10, window_bounds = array<i64: 1, 48>}, {pipeline_mode = #tpu.pipeline_mode<synchronous>, transform_indices = @transform_11, window_bounds = array<i64: 32, 32>}, {pipeline_mode = #tpu.pipeline_mode<synchronous>, transform_indices = @transform_12, window_bounds = array<i64: 1, 32>}, {pipeline_mode = #tpu.pipeline_mode<synchronous>, transform_indices = @transform_13, window_bounds = array<i64: 48, 128>}, {pipeline_mode = #tpu.pipeline_mode<synchronous>, transform_indices = @transform_14, window_bounds = array<i64: 1, 128>}, {pipeline_mode = #tpu.pipeline_mode<synchronous>, transform_indices = @transform_15, window_bounds = array<i64: 32, 32>}, {pipeline_mode = #tpu.pipeline_mode<synchronous>, transform_indices = @transform_16, window_bounds = array<i64: 1, 32>}, {pipeline_mode = #tpu.pipeline_mode<synchronous>, transform_indices = @transform_17, window_bounds = array<i64: 32, 32>}, {pipeline_mode = #tpu.pipeline_mode<synchronous>, transform_indices = @transform_18, window_bounds = array<i64: 1, 32>}, {pipeline_mode = #tpu.pipeline_mode<synchronous>, transform_indices = @transform_19, window_bounds = array<i64: 1, 32>}, {pipeline_mode = #tpu.pipeline_mode<synchronous>, transform_indices = @transform_20, window_bounds = array<i64: 1, 1>}, {pipeline_mode = #tpu.pipeline_mode<synchronous>, transform_indices = @transform_21, window_bounds = array<i64: 64, 128>}, {pipeline_mode = #tpu.pipeline_mode<synchronous>, transform_indices = @transform_22, window_bounds = array<i64: 1, 128>}, {pipeline_mode = #tpu.pipeline_mode<synchronous>, transform_indices = @transform_23, window_bounds = array<i64: 80, 32>}, {pipeline_mode = #tpu.pipeline_mode<synchronous>, transform_indices = @transform_24, window_bounds = array<i64: 1, 32>}, {pipeline_mode = #tpu.pipeline_mode<synchronous>, transform_indices = @transform_25, window_bounds = array<i64: 32, 20>}, {pipeline_mode = #tpu.pipeline_mode<synchronous>, transform_indices = @transform_26, window_bounds = array<i64: 1, 20>}, {pipeline_mode = #tpu.pipeline_mode<synchronous>, transform_indices = @transform_27, window_bounds = array<i64: 1, 1>}]} {
    %c0 = arith.constant 0 : index
    %c0_0 = arith.constant 0 : index
    %0 = vector.load %arg2[%c0, %c0_0] : memref<2x8xf32, #tpu.memory_space<vmem>>, vector<2x8xf32>
    %c0_1 = arith.constant 0 : index
    %c0_2 = arith.constant 0 : index
    %c0_3 = arith.constant 0 : index
    %1 = vector.load %arg1[%c0_1, %c0_2, %c0_3] : memref<2x8x16xf32, #tpu.memory_space<vmem>>, vector<2x8x16xf32>
    %2 = vector.shape_cast %1 : vector<2x8x16xf32> to vector<16x16xf32>
    %c0_4 = arith.constant 0 : index
    %c0_5 = arith.constant 0 : index
    %3 = vector.load %arg6[%c0_4, %c0_5] : memref<16x96xf32, #tpu.memory_space<vmem>>, vector<16x96xf32>
    %cst = arith.constant dense<0.000000e+00> : vector<16x96xf32>
    %4 = tpu.matmul %2, %3, %cst {dimension_numbers = #tpu.dot_dimension_numbers<[1], [0], [0], [1], [0, 0, 1, 1], [], []>} : vector<16x16xf32>, vector<16x96xf32>, vector<16x96xf32> -> vector<16x96xf32>
    %c0_6 = arith.constant 0 : index
    %c0_7 = arith.constant 0 : index
    %5 = vector.load %arg7[%c0_6, %c0_7] : memref<1x96xf32, #tpu.memory_space<vmem>>, vector<1x96xf32>
    %6 = vector.broadcast %5 : vector<1x96xf32> to vector<16x96xf32>
    %7 = arith.addf %4, %6 : vector<16x96xf32>
    %8 = vector.shape_cast %7 : vector<16x96xf32> to vector<2x8x96xf32>
    %c0_8 = arith.constant 0 : index
    %c0_9 = arith.constant 0 : index
    %9 = vector.load %arg8[%c0_8, %c0_9] : memref<16x48xf32, #tpu.memory_space<vmem>>, vector<16x48xf32>
    %c0_10 = arith.constant 0 : index
    %c0_11 = arith.constant 0 : index
    %10 = vector.load %arg9[%c0_10, %c0_11] : memref<1x48xf32, #tpu.memory_space<vmem>>, vector<1x48xf32>
    %c0_12 = arith.constant 0 : index
    %c0_13 = arith.constant 0 : index
    %11 = vector.load %arg10[%c0_12, %c0_13] : memref<16x48xf32, #tpu.memory_space<vmem>>, vector<16x48xf32>
    %c0_14 = arith.constant 0 : index
    %c0_15 = arith.constant 0 : index
    %12 = vector.load %arg11[%c0_14, %c0_15] : memref<1x48xf32, #tpu.memory_space<vmem>>, vector<1x48xf32>
    %cst_16 = arith.constant 0.000000e+00 : f32
    %13 = vector.broadcast %cst_16 : f32 to vector<2x16xf32>
    %14 = vector.extract_strided_slice %8 {offsets = [0, 0, 0], sizes = [2, 1, 48], strides = [1, 1, 1]} : vector<2x8x96xf32> to vector<2x1x48xf32>
    %15 = vector.shape_cast %14 : vector<2x1x48xf32> to vector<2x48xf32>
    %16 = vector.extract_strided_slice %0 {offsets = [0, 0], sizes = [2, 1], strides = [1, 1]} : vector<2x8xf32> to vector<2x1xf32>
    %cst_17 = arith.constant dense<0.000000e+00> : vector<2x48xf32>
    %17 = tpu.matmul %13, %9, %cst_17 {dimension_numbers = #tpu.dot_dimension_numbers<[1], [0], [0], [1], [0, 0, 1, 1], [], []>} : vector<2x16xf32>, vector<16x48xf32>, vector<2x48xf32> -> vector<2x48xf32>
    %18 = vector.broadcast %10 : vector<1x48xf32> to vector<2x48xf32>
    %19 = arith.addf %17, %18 : vector<2x48xf32>
    %20 = vector.extract_strided_slice %15 {offsets = [0, 0], sizes = [2, 16], strides = [1, 1]} : vector<2x48xf32> to vector<2x16xf32>
    %21 = vector.extract_strided_slice %19 {offsets = [0, 0], sizes = [2, 16], strides = [1, 1]} : vector<2x48xf32> to vector<2x16xf32>
    %22 = arith.addf %20, %21 : vector<2x16xf32>
    %23 = arith.negf %22 : vector<2x16xf32>
    %24 = math.exp %23 : vector<2x16xf32>
    %cst_18 = arith.constant 1.000000e+00 : f32
    %25 = vector.broadcast %cst_18 : f32 to vector<2x16xf32>
    %26 = arith.addf %25, %24 : vector<2x16xf32>
    %27 = arith.divf %25, %26 : vector<2x16xf32>
    %28 = vector.extract_strided_slice %15 {offsets = [0, 16], sizes = [2, 16], strides = [1, 1]} : vector<2x48xf32> to vector<2x16xf32>
    %29 = vector.extract_strided_slice %19 {offsets = [0, 16], sizes = [2, 16], strides = [1, 1]} : vector<2x48xf32> to vector<2x16xf32>
    %30 = arith.addf %28, %29 : vector<2x16xf32>
    %31 = arith.negf %30 : vector<2x16xf32>
    %32 = math.exp %31 : vector<2x16xf32>
    %cst_19 = arith.constant 1.000000e+00 : f32
    %33 = vector.broadcast %cst_19 : f32 to vector<2x16xf32>
    %34 = arith.addf %33, %32 : vector<2x16xf32>
    %35 = arith.divf %33, %34 : vector<2x16xf32>
    %36 = vector.extract_strided_slice %15 {offsets = [0, 32], sizes = [2, 16], strides = [1, 1]} : vector<2x48xf32> to vector<2x16xf32>
    %37 = vector.extract_strided_slice %19 {offsets = [0, 32], sizes = [2, 16], strides = [1, 1]} : vector<2x48xf32> to vector<2x16xf32>
    %38 = arith.mulf %27, %37 : vector<2x16xf32>
    %39 = arith.addf %36, %38 : vector<2x16xf32>
    %40 = math.tanh %39 : vector<2x16xf32>
    %cst_20 = arith.constant 1.000000e+00 : f32
    %41 = vector.broadcast %cst_20 : f32 to vector<2x16xf32>
    %42 = arith.subf %41, %35 : vector<2x16xf32>
    %43 = arith.mulf %42, %40 : vector<2x16xf32>
    %44 = arith.mulf %35, %13 : vector<2x16xf32>
    %45 = arith.addf %43, %44 : vector<2x16xf32>
    %46 = vector.broadcast %16 : vector<2x1xf32> to vector<2x16xf32>
    %47 = arith.mulf %46, %45 : vector<2x16xf32>
    %c0_21 = arith.constant 0 : index
    %c0_22 = arith.constant 0 : index
    %c0_23 = arith.constant 0 : index
    %48 = vector.load %arg29[%c0_21, %c0_22, %c0_23] : memref<2x8x16xf32, #tpu.memory_space<vmem>>, vector<2x1x16xf32>
    %49 = vector.shape_cast %48 : vector<2x1x16xf32> to vector<2x16xf32>
    %50 = vector.shape_cast %47 : vector<2x16xf32> to vector<2x1x16xf32>
    tpu.vector_store %arg29[%c0_21, %c0_22, %c0_23], %50 {strides = array<i32>} : memref<2x8x16xf32, #tpu.memory_space<vmem>>, vector<2x1x16xf32>,
    %51 = vector.broadcast %16 : vector<2x1xf32> to vector<2x16xf32>
    %52 = arith.mulf %51, %45 : vector<2x16xf32>
    %cst_24 = arith.constant 1.000000e+00 : f32
    %53 = vector.broadcast %cst_24 : f32 to vector<2x1xf32>
    %54 = arith.subf %53, %16 : vector<2x1xf32>
    %55 = vector.broadcast %54 : vector<2x1xf32> to vector<2x16xf32>
    %56 = arith.mulf %55, %13 : vector<2x16xf32>
    %57 = arith.addf %52, %56 : vector<2x16xf32>
    %58 = vector.extract_strided_slice %8 {offsets = [0, 1, 0], sizes = [2, 1, 48], strides = [1, 1, 1]} : vector<2x8x96xf32> to vector<2x1x48xf32>
    %59 = vector.shape_cast %58 : vector<2x1x48xf32> to vector<2x48xf32>
    %60 = vector.extract_strided_slice %0 {offsets = [0, 1], sizes = [2, 1], strides = [1, 1]} : vector<2x8xf32> to vector<2x1xf32>
    %cst_25 = arith.constant dense<0.000000e+00> : vector<2x48xf32>
    %61 = tpu.matmul %57, %9, %cst_25 {dimension_numbers = #tpu.dot_dimension_numbers<[1], [0], [0], [1], [0, 0, 1, 1], [], []>} : vector<2x16xf32>, vector<16x48xf32>, vector<2x48xf32> -> vector<2x48xf32>
    %62 = vector.broadcast %10 : vector<1x48xf32> to vector<2x48xf32>
    %63 = arith.addf %61, %62 : vector<2x48xf32>
    %64 = vector.extract_strided_slice %59 {offsets = [0, 0], sizes = [2, 16], strides = [1, 1]} : vector<2x48xf32> to vector<2x16xf32>
    %65 = vector.extract_strided_slice %63 {offsets = [0, 0], sizes = [2, 16], strides = [1, 1]} : vector<2x48xf32> to vector<2x16xf32>
    %66 = arith.addf %64, %65 : vector<2x16xf32>
    %67 = arith.negf %66 : vector<2x16xf32>
    %68 = math.exp %67 : vector<2x16xf32>
    %cst_26 = arith.constant 1.000000e+00 : f32
    %69 = vector.broadcast %cst_26 : f32 to vector<2x16xf32>
    %70 = arith.addf %69, %68 : vector<2x16xf32>
    %71 = arith.divf %69, %70 : vector<2x16xf32>
    %72 = vector.extract_strided_slice %59 {offsets = [0, 16], sizes = [2, 16], strides = [1, 1]} : vector<2x48xf32> to vector<2x16xf32>
    %73 = vector.extract_strided_slice %63 {offsets = [0, 16], sizes = [2, 16], strides = [1, 1]} : vector<2x48xf32> to vector<2x16xf32>
    %74 = arith.addf %72, %73 : vector<2x16xf32>
    %75 = arith.negf %74 : vector<2x16xf32>
    %76 = math.exp %75 : vector<2x16xf32>
    %cst_27 = arith.constant 1.000000e+00 : f32
    %77 = vector.broadcast %cst_27 : f32 to vector<2x16xf32>
    %78 = arith.addf %77, %76 : vector<2x16xf32>
    %79 = arith.divf %77, %78 : vector<2x16xf32>
    %80 = vector.extract_strided_slice %59 {offsets = [0, 32], sizes = [2, 16], strides = [1, 1]} : vector<2x48xf32> to vector<2x16xf32>
    %81 = vector.extract_strided_slice %63 {offsets = [0, 32], sizes = [2, 16], strides = [1, 1]} : vector<2x48xf32> to vector<2x16xf32>
    %82 = arith.mulf %71, %81 : vector<2x16xf32>
    %83 = arith.addf %80, %82 : vector<2x16xf32>
    %84 = math.tanh %83 : vector<2x16xf32>
    %cst_28 = arith.constant 1.000000e+00 : f32
    %85 = vector.broadcast %cst_28 : f32 to vector<2x16xf32>
    %86 = arith.subf %85, %79 : vector<2x16xf32>
    %87 = arith.mulf %86, %84 : vector<2x16xf32>
    %88 = arith.mulf %79, %57 : vector<2x16xf32>
    %89 = arith.addf %87, %88 : vector<2x16xf32>
    %90 = vector.broadcast %60 : vector<2x1xf32> to vector<2x16xf32>
    %91 = arith.mulf %90, %89 : vector<2x16xf32>
    %c0_29 = arith.constant 0 : index
    %c1 = arith.constant 1 : index
    %c0_30 = arith.constant 0 : index
    %92 = vector.load %arg29[%c0_29, %c1, %c0_30] : memref<2x8x16xf32, #tpu.memory_space<vmem>>, vector<2x1x16xf32>
    %93 = vector.shape_cast %92 : vector<2x1x16xf32> to vector<2x16xf32>
    %94 = vector.shape_cast %91 : vector<2x16xf32> to vector<2x1x16xf32>
    tpu.vector_store %arg29[%c0_29, %c1, %c0_30], %94 {strides = array<i32>} : memref<2x8x16xf32, #tpu.memory_space<vmem>>, vector<2x1x16xf32>,
    %95 = vector.broadcast %60 : vector<2x1xf32> to vector<2x16xf32>
    %96 = arith.mulf %95, %89 : vector<2x16xf32>
    %cst_31 = arith.constant 1.000000e+00 : f32
    %97 = vector.broadcast %cst_31 : f32 to vector<2x1xf32>
    %98 = arith.subf %97, %60 : vector<2x1xf32>
    %99 = vector.broadcast %98 : vector<2x1xf32> to vector<2x16xf32>
    %100 = arith.mulf %99, %57 : vector<2x16xf32>
    %101 = arith.addf %96, %100 : vector<2x16xf32>
    %102 = vector.extract_strided_slice %8 {offsets = [0, 2, 0], sizes = [2, 1, 48], strides = [1, 1, 1]} : vector<2x8x96xf32> to vector<2x1x48xf32>
    %103 = vector.shape_cast %102 : vector<2x1x48xf32> to vector<2x48xf32>
    %104 = vector.extract_strided_slice %0 {offsets = [0, 2], sizes = [2, 1], strides = [1, 1]} : vector<2x8xf32> to vector<2x1xf32>
    %cst_32 = arith.constant dense<0.000000e+00> : vector<2x48xf32>
    %105 = tpu.matmul %101, %9, %cst_32 {dimension_numbers = #tpu.dot_dimension_numbers<[1], [0], [0], [1], [0, 0, 1, 1], [], []>} : vector<2x16xf32>, vector<16x48xf32>, vector<2x48xf32> -> vector<2x48xf32>
    %106 = vector.broadcast %10 : vector<1x48xf32> to vector<2x48xf32>
    %107 = arith.addf %105, %106 : vector<2x48xf32>
    %108 = vector.extract_strided_slice %103 {offsets = [0, 0], sizes = [2, 16], strides = [1, 1]} : vector<2x48xf32> to vector<2x16xf32>
    %109 = vector.extract_strided_slice %107 {offsets = [0, 0], sizes = [2, 16], strides = [1, 1]} : vector<2x48xf32> to vector<2x16xf32>
    %110 = arith.addf %108, %109 : vector<2x16xf32>
    %111 = arith.negf %110 : vector<2x16xf32>
    %112 = math.exp %111 : vector<2x16xf32>
    %cst_33 = arith.constant 1.000000e+00 : f32
    %113 = vector.broadcast %cst_33 : f32 to vector<2x16xf32>
    %114 = arith.addf %113, %112 : vector<2x16xf32>
    %115 = arith.divf %113, %114 : vector<2x16xf32>
    %116 = vector.extract_strided_slice %103 {offsets = [0, 16], sizes = [2, 16], strides = [1, 1]} : vector<2x48xf32> to vector<2x16xf32>
    %117 = vector.extract_strided_slice %107 {offsets = [0, 16], sizes = [2, 16], strides = [1, 1]} : vector<2x48xf32> to vector<2x16xf32>
    %118 = arith.addf %116, %117 : vector<2x16xf32>
    %119 = arith.negf %118 : vector<2x16xf32>
    %120 = math.exp %119 : vector<2x16xf32>
    %cst_34 = arith.constant 1.000000e+00 : f32
    %121 = vector.broadcast %cst_34 : f32 to vector<2x16xf32>
    %122 = arith.addf %121, %120 : vector<2x16xf32>
    %123 = arith.divf %121, %122 : vector<2x16xf32>
    %124 = vector.extract_strided_slice %103 {offsets = [0, 32], sizes = [2, 16], strides = [1, 1]} : vector<2x48xf32> to vector<2x16xf32>
    %125 = vector.extract_strided_slice %107 {offsets = [0, 32], sizes = [2, 16], strides = [1, 1]} : vector<2x48xf32> to vector<2x16xf32>
    %126 = arith.mulf %115, %125 : vector<2x16xf32>
    %127 = arith.addf %124, %126 : vector<2x16xf32>
    %128 = math.tanh %127 : vector<2x16xf32>
    %cst_35 = arith.constant 1.000000e+00 : f32
    %129 = vector.broadcast %cst_35 : f32 to vector<2x16xf32>
    %130 = arith.subf %129, %123 : vector<2x16xf32>
    %131 = arith.mulf %130, %128 : vector<2x16xf32>
    %132 = arith.mulf %123, %101 : vector<2x16xf32>
    %133 = arith.addf %131, %132 : vector<2x16xf32>
    %134 = vector.broadcast %104 : vector<2x1xf32> to vector<2x16xf32>
    %135 = arith.mulf %134, %133 : vector<2x16xf32>
    %c0_36 = arith.constant 0 : index
    %c2 = arith.constant 2 : index
    %c0_37 = arith.constant 0 : index
    %136 = vector.load %arg29[%c0_36, %c2, %c0_37] : memref<2x8x16xf32, #tpu.memory_space<vmem>>, vector<2x1x16xf32>
    %137 = vector.shape_cast %136 : vector<2x1x16xf32> to vector<2x16xf32>
    %138 = vector.shape_cast %135 : vector<2x16xf32> to vector<2x1x16xf32>
    tpu.vector_store %arg29[%c0_36, %c2, %c0_37], %138 {strides = array<i32>} : memref<2x8x16xf32, #tpu.memory_space<vmem>>, vector<2x1x16xf32>,
    %139 = vector.broadcast %104 : vector<2x1xf32> to vector<2x16xf32>
    %140 = arith.mulf %139, %133 : vector<2x16xf32>
    %cst_38 = arith.constant 1.000000e+00 : f32
    %141 = vector.broadcast %cst_38 : f32 to vector<2x1xf32>
    %142 = arith.subf %141, %104 : vector<2x1xf32>
    %143 = vector.broadcast %142 : vector<2x1xf32> to vector<2x16xf32>
    %144 = arith.mulf %143, %101 : vector<2x16xf32>
    %145 = arith.addf %140, %144 : vector<2x16xf32>
    %146 = vector.extract_strided_slice %8 {offsets = [0, 3, 0], sizes = [2, 1, 48], strides = [1, 1, 1]} : vector<2x8x96xf32> to vector<2x1x48xf32>
    %147 = vector.shape_cast %146 : vector<2x1x48xf32> to vector<2x48xf32>
    %148 = vector.extract_strided_slice %0 {offsets = [0, 3], sizes = [2, 1], strides = [1, 1]} : vector<2x8xf32> to vector<2x1xf32>
    %cst_39 = arith.constant dense<0.000000e+00> : vector<2x48xf32>
    %149 = tpu.matmul %145, %9, %cst_39 {dimension_numbers = #tpu.dot_dimension_numbers<[1], [0], [0], [1], [0, 0, 1, 1], [], []>} : vector<2x16xf32>, vector<16x48xf32>, vector<2x48xf32> -> vector<2x48xf32>
    %150 = vector.broadcast %10 : vector<1x48xf32> to vector<2x48xf32>
    %151 = arith.addf %149, %150 : vector<2x48xf32>
    %152 = vector.extract_strided_slice %147 {offsets = [0, 0], sizes = [2, 16], strides = [1, 1]} : vector<2x48xf32> to vector<2x16xf32>
    %153 = vector.extract_strided_slice %151 {offsets = [0, 0], sizes = [2, 16], strides = [1, 1]} : vector<2x48xf32> to vector<2x16xf32>
    %154 = arith.addf %152, %153 : vector<2x16xf32>
    %155 = arith.negf %154 : vector<2x16xf32>
    %156 = math.exp %155 : vector<2x16xf32>
    %cst_40 = arith.constant 1.000000e+00 : f32
    %157 = vector.broadcast %cst_40 : f32 to vector<2x16xf32>
    %158 = arith.addf %157, %156 : vector<2x16xf32>
    %159 = arith.divf %157, %158 : vector<2x16xf32>
    %160 = vector.extract_strided_slice %147 {offsets = [0, 16], sizes = [2, 16], strides = [1, 1]} : vector<2x48xf32> to vector<2x16xf32>
    %161 = vector.extract_strided_slice %151 {offsets = [0, 16], sizes = [2, 16], strides = [1, 1]} : vector<2x48xf32> to vector<2x16xf32>
    %162 = arith.addf %160, %161 : vector<2x16xf32>
    %163 = arith.negf %162 : vector<2x16xf32>
    %164 = math.exp %163 : vector<2x16xf32>
    %cst_41 = arith.constant 1.000000e+00 : f32
    %165 = vector.broadcast %cst_41 : f32 to vector<2x16xf32>
    %166 = arith.addf %165, %164 : vector<2x16xf32>
    %167 = arith.divf %165, %166 : vector<2x16xf32>
    %168 = vector.extract_strided_slice %147 {offsets = [0, 32], sizes = [2, 16], strides = [1, 1]} : vector<2x48xf32> to vector<2x16xf32>
    %169 = vector.extract_strided_slice %151 {offsets = [0, 32], sizes = [2, 16], strides = [1, 1]} : vector<2x48xf32> to vector<2x16xf32>
    %170 = arith.mulf %159, %169 : vector<2x16xf32>
    %171 = arith.addf %168, %170 : vector<2x16xf32>
    %172 = math.tanh %171 : vector<2x16xf32>
    %cst_42 = arith.constant 1.000000e+00 : f32
    %173 = vector.broadcast %cst_42 : f32 to vector<2x16xf32>
    %174 = arith.subf %173, %167 : vector<2x16xf32>
    %175 = arith.mulf %174, %172 : vector<2x16xf32>
    %176 = arith.mulf %167, %145 : vector<2x16xf32>
    %177 = arith.addf %175, %176 : vector<2x16xf32>
    %178 = vector.broadcast %148 : vector<2x1xf32> to vector<2x16xf32>
    %179 = arith.mulf %178, %177 : vector<2x16xf32>
    %c0_43 = arith.constant 0 : index
    %c3 = arith.constant 3 : index
    %c0_44 = arith.constant 0 : index
    %180 = vector.load %arg29[%c0_43, %c3, %c0_44] : memref<2x8x16xf32, #tpu.memory_space<vmem>>, vector<2x1x16xf32>
    %181 = vector.shape_cast %180 : vector<2x1x16xf32> to vector<2x16xf32>
    %182 = vector.shape_cast %179 : vector<2x16xf32> to vector<2x1x16xf32>
    tpu.vector_store %arg29[%c0_43, %c3, %c0_44], %182 {strides = array<i32>} : memref<2x8x16xf32, #tpu.memory_space<vmem>>, vector<2x1x16xf32>,
    %183 = vector.broadcast %148 : vector<2x1xf32> to vector<2x16xf32>
    %184 = arith.mulf %183, %177 : vector<2x16xf32>
    %cst_45 = arith.constant 1.000000e+00 : f32
    %185 = vector.broadcast %cst_45 : f32 to vector<2x1xf32>
    %186 = arith.subf %185, %148 : vector<2x1xf32>
    %187 = vector.broadcast %186 : vector<2x1xf32> to vector<2x16xf32>
    %188 = arith.mulf %187, %145 : vector<2x16xf32>
    %189 = arith.addf %184, %188 : vector<2x16xf32>
    %190 = vector.extract_strided_slice %8 {offsets = [0, 4, 0], sizes = [2, 1, 48], strides = [1, 1, 1]} : vector<2x8x96xf32> to vector<2x1x48xf32>
    %191 = vector.shape_cast %190 : vector<2x1x48xf32> to vector<2x48xf32>
    %192 = vector.extract_strided_slice %0 {offsets = [0, 4], sizes = [2, 1], strides = [1, 1]} : vector<2x8xf32> to vector<2x1xf32>
    %cst_46 = arith.constant dense<0.000000e+00> : vector<2x48xf32>
    %193 = tpu.matmul %189, %9, %cst_46 {dimension_numbers = #tpu.dot_dimension_numbers<[1], [0], [0], [1], [0, 0, 1, 1], [], []>} : vector<2x16xf32>, vector<16x48xf32>, vector<2x48xf32> -> vector<2x48xf32>
    %194 = vector.broadcast %10 : vector<1x48xf32> to vector<2x48xf32>
    %195 = arith.addf %193, %194 : vector<2x48xf32>
    %196 = vector.extract_strided_slice %191 {offsets = [0, 0], sizes = [2, 16], strides = [1, 1]} : vector<2x48xf32> to vector<2x16xf32>
    %197 = vector.extract_strided_slice %195 {offsets = [0, 0], sizes = [2, 16], strides = [1, 1]} : vector<2x48xf32> to vector<2x16xf32>
    %198 = arith.addf %196, %197 : vector<2x16xf32>
    %199 = arith.negf %198 : vector<2x16xf32>
    %200 = math.exp %199 : vector<2x16xf32>
    %cst_47 = arith.constant 1.000000e+00 : f32
    %201 = vector.broadcast %cst_47 : f32 to vector<2x16xf32>
    %202 = arith.addf %201, %200 : vector<2x16xf32>
    %203 = arith.divf %201, %202 : vector<2x16xf32>
    %204 = vector.extract_strided_slice %191 {offsets = [0, 16], sizes = [2, 16], strides = [1, 1]} : vector<2x48xf32> to vector<2x16xf32>
    %205 = vector.extract_strided_slice %195 {offsets = [0, 16], sizes = [2, 16], strides = [1, 1]} : vector<2x48xf32> to vector<2x16xf32>
    %206 = arith.addf %204, %205 : vector<2x16xf32>
    %207 = arith.negf %206 : vector<2x16xf32>
    %208 = math.exp %207 : vector<2x16xf32>
    %cst_48 = arith.constant 1.000000e+00 : f32
    %209 = vector.broadcast %cst_48 : f32 to vector<2x16xf32>
    %210 = arith.addf %209, %208 : vector<2x16xf32>
    %211 = arith.divf %209, %210 : vector<2x16xf32>
    %212 = vector.extract_strided_slice %191 {offsets = [0, 32], sizes = [2, 16], strides = [1, 1]} : vector<2x48xf32> to vector<2x16xf32>
    %213 = vector.extract_strided_slice %195 {offsets = [0, 32], sizes = [2, 16], strides = [1, 1]} : vector<2x48xf32> to vector<2x16xf32>
    %214 = arith.mulf %203, %213 : vector<2x16xf32>
    %215 = arith.addf %212, %214 : vector<2x16xf32>
    %216 = math.tanh %215 : vector<2x16xf32>
    %cst_49 = arith.constant 1.000000e+00 : f32
    %217 = vector.broadcast %cst_49 : f32 to vector<2x16xf32>
    %218 = arith.subf %217, %211 : vector<2x16xf32>
    %219 = arith.mulf %218, %216 : vector<2x16xf32>
    %220 = arith.mulf %211, %189 : vector<2x16xf32>
    %221 = arith.addf %219, %220 : vector<2x16xf32>
    %222 = vector.broadcast %192 : vector<2x1xf32> to vector<2x16xf32>
    %223 = arith.mulf %222, %221 : vector<2x16xf32>
    %c0_50 = arith.constant 0 : index
    %c4 = arith.constant 4 : index
    %c0_51 = arith.constant 0 : index
    %224 = vector.load %arg29[%c0_50, %c4, %c0_51] : memref<2x8x16xf32, #tpu.memory_space<vmem>>, vector<2x1x16xf32>
    %225 = vector.shape_cast %224 : vector<2x1x16xf32> to vector<2x16xf32>
    %226 = vector.shape_cast %223 : vector<2x16xf32> to vector<2x1x16xf32>
    tpu.vector_store %arg29[%c0_50, %c4, %c0_51], %226 {strides = array<i32>} : memref<2x8x16xf32, #tpu.memory_space<vmem>>, vector<2x1x16xf32>,
    %227 = vector.broadcast %192 : vector<2x1xf32> to vector<2x16xf32>
    %228 = arith.mulf %227, %221 : vector<2x16xf32>
    %cst_52 = arith.constant 1.000000e+00 : f32
    %229 = vector.broadcast %cst_52 : f32 to vector<2x1xf32>
    %230 = arith.subf %229, %192 : vector<2x1xf32>
    %231 = vector.broadcast %230 : vector<2x1xf32> to vector<2x16xf32>
    %232 = arith.mulf %231, %189 : vector<2x16xf32>
    %233 = arith.addf %228, %232 : vector<2x16xf32>
    %234 = vector.extract_strided_slice %8 {offsets = [0, 5, 0], sizes = [2, 1, 48], strides = [1, 1, 1]} : vector<2x8x96xf32> to vector<2x1x48xf32>
    %235 = vector.shape_cast %234 : vector<2x1x48xf32> to vector<2x48xf32>
    %236 = vector.extract_strided_slice %0 {offsets = [0, 5], sizes = [2, 1], strides = [1, 1]} : vector<2x8xf32> to vector<2x1xf32>
    %cst_53 = arith.constant dense<0.000000e+00> : vector<2x48xf32>
    %237 = tpu.matmul %233, %9, %cst_53 {dimension_numbers = #tpu.dot_dimension_numbers<[1], [0], [0], [1], [0, 0, 1, 1], [], []>} : vector<2x16xf32>, vector<16x48xf32>, vector<2x48xf32> -> vector<2x48xf32>
    %238 = vector.broadcast %10 : vector<1x48xf32> to vector<2x48xf32>
    %239 = arith.addf %237, %238 : vector<2x48xf32>
    %240 = vector.extract_strided_slice %235 {offsets = [0, 0], sizes = [2, 16], strides = [1, 1]} : vector<2x48xf32> to vector<2x16xf32>
    %241 = vector.extract_strided_slice %239 {offsets = [0, 0], sizes = [2, 16], strides = [1, 1]} : vector<2x48xf32> to vector<2x16xf32>
    %242 = arith.addf %240, %241 : vector<2x16xf32>
    %243 = arith.negf %242 : vector<2x16xf32>
    %244 = math.exp %243 : vector<2x16xf32>
    %cst_54 = arith.constant 1.000000e+00 : f32
    %245 = vector.broadcast %cst_54 : f32 to vector<2x16xf32>
    %246 = arith.addf %245, %244 : vector<2x16xf32>
    %247 = arith.divf %245, %246 : vector<2x16xf32>
    %248 = vector.extract_strided_slice %235 {offsets = [0, 16], sizes = [2, 16], strides = [1, 1]} : vector<2x48xf32> to vector<2x16xf32>
    %249 = vector.extract_strided_slice %239 {offsets = [0, 16], sizes = [2, 16], strides = [1, 1]} : vector<2x48xf32> to vector<2x16xf32>
    %250 = arith.addf %248, %249 : vector<2x16xf32>
    %251 = arith.negf %250 : vector<2x16xf32>
    %252 = math.exp %251 : vector<2x16xf32>
    %cst_55 = arith.constant 1.000000e+00 : f32
    %253 = vector.broadcast %cst_55 : f32 to vector<2x16xf32>
    %254 = arith.addf %253, %252 : vector<2x16xf32>
    %255 = arith.divf %253, %254 : vector<2x16xf32>
    %256 = vector.extract_strided_slice %235 {offsets = [0, 32], sizes = [2, 16], strides = [1, 1]} : vector<2x48xf32> to vector<2x16xf32>
    %257 = vector.extract_strided_slice %239 {offsets = [0, 32], sizes = [2, 16], strides = [1, 1]} : vector<2x48xf32> to vector<2x16xf32>
    %258 = arith.mulf %247, %257 : vector<2x16xf32>
    %259 = arith.addf %256, %258 : vector<2x16xf32>
    %260 = math.tanh %259 : vector<2x16xf32>
    %cst_56 = arith.constant 1.000000e+00 : f32
    %261 = vector.broadcast %cst_56 : f32 to vector<2x16xf32>
    %262 = arith.subf %261, %255 : vector<2x16xf32>
    %263 = arith.mulf %262, %260 : vector<2x16xf32>
    %264 = arith.mulf %255, %233 : vector<2x16xf32>
    %265 = arith.addf %263, %264 : vector<2x16xf32>
    %266 = vector.broadcast %236 : vector<2x1xf32> to vector<2x16xf32>
    %267 = arith.mulf %266, %265 : vector<2x16xf32>
    %c0_57 = arith.constant 0 : index
    %c5 = arith.constant 5 : index
    %c0_58 = arith.constant 0 : index
    %268 = vector.load %arg29[%c0_57, %c5, %c0_58] : memref<2x8x16xf32, #tpu.memory_space<vmem>>, vector<2x1x16xf32>
    %269 = vector.shape_cast %268 : vector<2x1x16xf32> to vector<2x16xf32>
    %270 = vector.shape_cast %267 : vector<2x16xf32> to vector<2x1x16xf32>
    tpu.vector_store %arg29[%c0_57, %c5, %c0_58], %270 {strides = array<i32>} : memref<2x8x16xf32, #tpu.memory_space<vmem>>, vector<2x1x16xf32>,
    %271 = vector.broadcast %236 : vector<2x1xf32> to vector<2x16xf32>
    %272 = arith.mulf %271, %265 : vector<2x16xf32>
    %cst_59 = arith.constant 1.000000e+00 : f32
    %273 = vector.broadcast %cst_59 : f32 to vector<2x1xf32>
    %274 = arith.subf %273, %236 : vector<2x1xf32>
    %275 = vector.broadcast %274 : vector<2x1xf32> to vector<2x16xf32>
    %276 = arith.mulf %275, %233 : vector<2x16xf32>
    %277 = arith.addf %272, %276 : vector<2x16xf32>
    %278 = vector.extract_strided_slice %8 {offsets = [0, 6, 0], sizes = [2, 1, 48], strides = [1, 1, 1]} : vector<2x8x96xf32> to vector<2x1x48xf32>
    %279 = vector.shape_cast %278 : vector<2x1x48xf32> to vector<2x48xf32>
    %280 = vector.extract_strided_slice %0 {offsets = [0, 6], sizes = [2, 1], strides = [1, 1]} : vector<2x8xf32> to vector<2x1xf32>
    %cst_60 = arith.constant dense<0.000000e+00> : vector<2x48xf32>
    %281 = tpu.matmul %277, %9, %cst_60 {dimension_numbers = #tpu.dot_dimension_numbers<[1], [0], [0], [1], [0, 0, 1, 1], [], []>} : vector<2x16xf32>, vector<16x48xf32>, vector<2x48xf32> -> vector<2x48xf32>
    %282 = vector.broadcast %10 : vector<1x48xf32> to vector<2x48xf32>
    %283 = arith.addf %281, %282 : vector<2x48xf32>
    %284 = vector.extract_strided_slice %279 {offsets = [0, 0], sizes = [2, 16], strides = [1, 1]} : vector<2x48xf32> to vector<2x16xf32>
    %285 = vector.extract_strided_slice %283 {offsets = [0, 0], sizes = [2, 16], strides = [1, 1]} : vector<2x48xf32> to vector<2x16xf32>
    %286 = arith.addf %284, %285 : vector<2x16xf32>
    %287 = arith.negf %286 : vector<2x16xf32>
    %288 = math.exp %287 : vector<2x16xf32>
    %cst_61 = arith.constant 1.000000e+00 : f32
    %289 = vector.broadcast %cst_61 : f32 to vector<2x16xf32>
    %290 = arith.addf %289, %288 : vector<2x16xf32>
    %291 = arith.divf %289, %290 : vector<2x16xf32>
    %292 = vector.extract_strided_slice %279 {offsets = [0, 16], sizes = [2, 16], strides = [1, 1]} : vector<2x48xf32> to vector<2x16xf32>
    %293 = vector.extract_strided_slice %283 {offsets = [0, 16], sizes = [2, 16], strides = [1, 1]} : vector<2x48xf32> to vector<2x16xf32>
    %294 = arith.addf %292, %293 : vector<2x16xf32>
    %295 = arith.negf %294 : vector<2x16xf32>
    %296 = math.exp %295 : vector<2x16xf32>
    %cst_62 = arith.constant 1.000000e+00 : f32
    %297 = vector.broadcast %cst_62 : f32 to vector<2x16xf32>
    %298 = arith.addf %297, %296 : vector<2x16xf32>
    %299 = arith.divf %297, %298 : vector<2x16xf32>
    %300 = vector.extract_strided_slice %279 {offsets = [0, 32], sizes = [2, 16], strides = [1, 1]} : vector<2x48xf32> to vector<2x16xf32>
    %301 = vector.extract_strided_slice %283 {offsets = [0, 32], sizes = [2, 16], strides = [1, 1]} : vector<2x48xf32> to vector<2x16xf32>
    %302 = arith.mulf %291, %301 : vector<2x16xf32>
    %303 = arith.addf %300, %302 : vector<2x16xf32>
    %304 = math.tanh %303 : vector<2x16xf32>
    %cst_63 = arith.constant 1.000000e+00 : f32
    %305 = vector.broadcast %cst_63 : f32 to vector<2x16xf32>
    %306 = arith.subf %305, %299 : vector<2x16xf32>
    %307 = arith.mulf %306, %304 : vector<2x16xf32>
    %308 = arith.mulf %299, %277 : vector<2x16xf32>
    %309 = arith.addf %307, %308 : vector<2x16xf32>
    %310 = vector.broadcast %280 : vector<2x1xf32> to vector<2x16xf32>
    %311 = arith.mulf %310, %309 : vector<2x16xf32>
    %c0_64 = arith.constant 0 : index
    %c6 = arith.constant 6 : index
    %c0_65 = arith.constant 0 : index
    %312 = vector.load %arg29[%c0_64, %c6, %c0_65] : memref<2x8x16xf32, #tpu.memory_space<vmem>>, vector<2x1x16xf32>
    %313 = vector.shape_cast %312 : vector<2x1x16xf32> to vector<2x16xf32>
    %314 = vector.shape_cast %311 : vector<2x16xf32> to vector<2x1x16xf32>
    tpu.vector_store %arg29[%c0_64, %c6, %c0_65], %314 {strides = array<i32>} : memref<2x8x16xf32, #tpu.memory_space<vmem>>, vector<2x1x16xf32>,
    %315 = vector.broadcast %280 : vector<2x1xf32> to vector<2x16xf32>
    %316 = arith.mulf %315, %309 : vector<2x16xf32>
    %cst_66 = arith.constant 1.000000e+00 : f32
    %317 = vector.broadcast %cst_66 : f32 to vector<2x1xf32>
    %318 = arith.subf %317, %280 : vector<2x1xf32>
    %319 = vector.broadcast %318 : vector<2x1xf32> to vector<2x16xf32>
    %320 = arith.mulf %319, %277 : vector<2x16xf32>
    %321 = arith.addf %316, %320 : vector<2x16xf32>
    %322 = vector.extract_strided_slice %8 {offsets = [0, 7, 0], sizes = [2, 1, 48], strides = [1, 1, 1]} : vector<2x8x96xf32> to vector<2x1x48xf32>
    %323 = vector.shape_cast %322 : vector<2x1x48xf32> to vector<2x48xf32>
    %324 = vector.extract_strided_slice %0 {offsets = [0, 7], sizes = [2, 1], strides = [1, 1]} : vector<2x8xf32> to vector<2x1xf32>
    %cst_67 = arith.constant dense<0.000000e+00> : vector<2x48xf32>
    %325 = tpu.matmul %321, %9, %cst_67 {dimension_numbers = #tpu.dot_dimension_numbers<[1], [0], [0], [1], [0, 0, 1, 1], [], []>} : vector<2x16xf32>, vector<16x48xf32>, vector<2x48xf32> -> vector<2x48xf32>
    %326 = vector.broadcast %10 : vector<1x48xf32> to vector<2x48xf32>
    %327 = arith.addf %325, %326 : vector<2x48xf32>
    %328 = vector.extract_strided_slice %323 {offsets = [0, 0], sizes = [2, 16], strides = [1, 1]} : vector<2x48xf32> to vector<2x16xf32>
    %329 = vector.extract_strided_slice %327 {offsets = [0, 0], sizes = [2, 16], strides = [1, 1]} : vector<2x48xf32> to vector<2x16xf32>
    %330 = arith.addf %328, %329 : vector<2x16xf32>
    %331 = arith.negf %330 : vector<2x16xf32>
    %332 = math.exp %331 : vector<2x16xf32>
    %cst_68 = arith.constant 1.000000e+00 : f32
    %333 = vector.broadcast %cst_68 : f32 to vector<2x16xf32>
    %334 = arith.addf %333, %332 : vector<2x16xf32>
    %335 = arith.divf %333, %334 : vector<2x16xf32>
    %336 = vector.extract_strided_slice %323 {offsets = [0, 16], sizes = [2, 16], strides = [1, 1]} : vector<2x48xf32> to vector<2x16xf32>
    %337 = vector.extract_strided_slice %327 {offsets = [0, 16], sizes = [2, 16], strides = [1, 1]} : vector<2x48xf32> to vector<2x16xf32>
    %338 = arith.addf %336, %337 : vector<2x16xf32>
    %339 = arith.negf %338 : vector<2x16xf32>
    %340 = math.exp %339 : vector<2x16xf32>
    %cst_69 = arith.constant 1.000000e+00 : f32
    %341 = vector.broadcast %cst_69 : f32 to vector<2x16xf32>
    %342 = arith.addf %341, %340 : vector<2x16xf32>
    %343 = arith.divf %341, %342 : vector<2x16xf32>
    %344 = vector.extract_strided_slice %323 {offsets = [0, 32], sizes = [2, 16], strides = [1, 1]} : vector<2x48xf32> to vector<2x16xf32>
    %345 = vector.extract_strided_slice %327 {offsets = [0, 32], sizes = [2, 16], strides = [1, 1]} : vector<2x48xf32> to vector<2x16xf32>
    %346 = arith.mulf %335, %345 : vector<2x16xf32>
    %347 = arith.addf %344, %346 : vector<2x16xf32>
    %348 = math.tanh %347 : vector<2x16xf32>
    %cst_70 = arith.constant 1.000000e+00 : f32
    %349 = vector.broadcast %cst_70 : f32 to vector<2x16xf32>
    %350 = arith.subf %349, %343 : vector<2x16xf32>
    %351 = arith.mulf %350, %348 : vector<2x16xf32>
    %352 = arith.mulf %343, %321 : vector<2x16xf32>
    %353 = arith.addf %351, %352 : vector<2x16xf32>
    %354 = vector.broadcast %324 : vector<2x1xf32> to vector<2x16xf32>
    %355 = arith.mulf %354, %353 : vector<2x16xf32>
    %c0_71 = arith.constant 0 : index
    %c7 = arith.constant 7 : index
    %c0_72 = arith.constant 0 : index
    %356 = vector.load %arg29[%c0_71, %c7, %c0_72] : memref<2x8x16xf32, #tpu.memory_space<vmem>>, vector<2x1x16xf32>
    %357 = vector.shape_cast %356 : vector<2x1x16xf32> to vector<2x16xf32>
    %358 = vector.shape_cast %355 : vector<2x16xf32> to vector<2x1x16xf32>
    tpu.vector_store %arg29[%c0_71, %c7, %c0_72], %358 {strides = array<i32>} : memref<2x8x16xf32, #tpu.memory_space<vmem>>, vector<2x1x16xf32>,
    %cst_73 = arith.constant 0.000000e+00 : f32
    %359 = vector.broadcast %cst_73 : f32 to vector<2x16xf32>
    %360 = vector.extract_strided_slice %8 {offsets = [0, 7, 48], sizes = [2, 1, 48], strides = [1, 1, 1]} : vector<2x8x96xf32> to vector<2x1x48xf32>
    %361 = vector.shape_cast %360 : vector<2x1x48xf32> to vector<2x48xf32>
    %362 = vector.extract_strided_slice %0 {offsets = [0, 7], sizes = [2, 1], strides = [1, 1]} : vector<2x8xf32> to vector<2x1xf32>
    %cst_74 = arith.constant dense<0.000000e+00> : vector<2x48xf32>
    %363 = tpu.matmul %359, %11, %cst_74 {dimension_numbers = #tpu.dot_dimension_numbers<[1], [0], [0], [1], [0, 0, 1, 1], [], []>} : vector<2x16xf32>, vector<16x48xf32>, vector<2x48xf32> -> vector<2x48xf32>
    %364 = vector.broadcast %12 : vector<1x48xf32> to vector<2x48xf32>
    %365 = arith.addf %363, %364 : vector<2x48xf32>
    %366 = vector.extract_strided_slice %361 {offsets = [0, 0], sizes = [2, 16], strides = [1, 1]} : vector<2x48xf32> to vector<2x16xf32>
    %367 = vector.extract_strided_slice %365 {offsets = [0, 0], sizes = [2, 16], strides = [1, 1]} : vector<2x48xf32> to vector<2x16xf32>
    %368 = arith.addf %366, %367 : vector<2x16xf32>
    %369 = arith.negf %368 : vector<2x16xf32>
    %370 = math.exp %369 : vector<2x16xf32>
    %cst_75 = arith.constant 1.000000e+00 : f32
    %371 = vector.broadcast %cst_75 : f32 to vector<2x16xf32>
    %372 = arith.addf %371, %370 : vector<2x16xf32>
    %373 = arith.divf %371, %372 : vector<2x16xf32>
    %374 = vector.extract_strided_slice %361 {offsets = [0, 16], sizes = [2, 16], strides = [1, 1]} : vector<2x48xf32> to vector<2x16xf32>
    %375 = vector.extract_strided_slice %365 {offsets = [0, 16], sizes = [2, 16], strides = [1, 1]} : vector<2x48xf32> to vector<2x16xf32>
    %376 = arith.addf %374, %375 : vector<2x16xf32>
    %377 = arith.negf %376 : vector<2x16xf32>
    %378 = math.exp %377 : vector<2x16xf32>
    %cst_76 = arith.constant 1.000000e+00 : f32
    %379 = vector.broadcast %cst_76 : f32 to vector<2x16xf32>
    %380 = arith.addf %379, %378 : vector<2x16xf32>
    %381 = arith.divf %379, %380 : vector<2x16xf32>
    %382 = vector.extract_strided_slice %361 {offsets = [0, 32], sizes = [2, 16], strides = [1, 1]} : vector<2x48xf32> to vector<2x16xf32>
    %383 = vector.extract_strided_slice %365 {offsets = [0, 32], sizes = [2, 16], strides = [1, 1]} : vector<2x48xf32> to vector<2x16xf32>
    %384 = arith.mulf %373, %383 : vector<2x16xf32>
    %385 = arith.addf %382, %384 : vector<2x16xf32>
    %386 = math.tanh %385 : vector<2x16xf32>
    %cst_77 = arith.constant 1.000000e+00 : f32
    %387 = vector.broadcast %cst_77 : f32 to vector<2x16xf32>
    %388 = arith.subf %387, %381 : vector<2x16xf32>
    %389 = arith.mulf %388, %386 : vector<2x16xf32>
    %390 = arith.mulf %381, %359 : vector<2x16xf32>
    %391 = arith.addf %389, %390 : vector<2x16xf32>
    %392 = vector.broadcast %362 : vector<2x1xf32> to vector<2x16xf32>
    %393 = arith.mulf %392, %391 : vector<2x16xf32>
    %c0_78 = arith.constant 0 : index
    %c7_79 = arith.constant 7 : index
    %c0_80 = arith.constant 0 : index
    %394 = vector.load %arg30[%c0_78, %c7_79, %c0_80] : memref<2x8x16xf32, #tpu.memory_space<vmem>>, vector<2x1x16xf32>
    %395 = vector.shape_cast %394 : vector<2x1x16xf32> to vector<2x16xf32>
    %396 = vector.shape_cast %393 : vector<2x16xf32> to vector<2x1x16xf32>
    tpu.vector_store %arg30[%c0_78, %c7_79, %c0_80], %396 {strides = array<i32>} : memref<2x8x16xf32, #tpu.memory_space<vmem>>, vector<2x1x16xf32>,
    %397 = vector.broadcast %362 : vector<2x1xf32> to vector<2x16xf32>
    %398 = arith.mulf %397, %391 : vector<2x16xf32>
    %cst_81 = arith.constant 1.000000e+00 : f32
    %399 = vector.broadcast %cst_81 : f32 to vector<2x1xf32>
    %400 = arith.subf %399, %362 : vector<2x1xf32>
    %401 = vector.broadcast %400 : vector<2x1xf32> to vector<2x16xf32>
    %402 = arith.mulf %401, %359 : vector<2x16xf32>
    %403 = arith.addf %398, %402 : vector<2x16xf32>
    %404 = vector.extract_strided_slice %8 {offsets = [0, 6, 48], sizes = [2, 1, 48], strides = [1, 1, 1]} : vector<2x8x96xf32> to vector<2x1x48xf32>
    %405 = vector.shape_cast %404 : vector<2x1x48xf32> to vector<2x48xf32>
    %406 = vector.extract_strided_slice %0 {offsets = [0, 6], sizes = [2, 1], strides = [1, 1]} : vector<2x8xf32> to vector<2x1xf32>
    %cst_82 = arith.constant dense<0.000000e+00> : vector<2x48xf32>
    %407 = tpu.matmul %403, %11, %cst_82 {dimension_numbers = #tpu.dot_dimension_numbers<[1], [0], [0], [1], [0, 0, 1, 1], [], []>} : vector<2x16xf32>, vector<16x48xf32>, vector<2x48xf32> -> vector<2x48xf32>
    %408 = vector.broadcast %12 : vector<1x48xf32> to vector<2x48xf32>
    %409 = arith.addf %407, %408 : vector<2x48xf32>
    %410 = vector.extract_strided_slice %405 {offsets = [0, 0], sizes = [2, 16], strides = [1, 1]} : vector<2x48xf32> to vector<2x16xf32>
    %411 = vector.extract_strided_slice %409 {offsets = [0, 0], sizes = [2, 16], strides = [1, 1]} : vector<2x48xf32> to vector<2x16xf32>
    %412 = arith.addf %410, %411 : vector<2x16xf32>
    %413 = arith.negf %412 : vector<2x16xf32>
    %414 = math.exp %413 : vector<2x16xf32>
    %cst_83 = arith.constant 1.000000e+00 : f32
    %415 = vector.broadcast %cst_83 : f32 to vector<2x16xf32>
    %416 = arith.addf %415, %414 : vector<2x16xf32>
    %417 = arith.divf %415, %416 : vector<2x16xf32>
    %418 = vector.extract_strided_slice %405 {offsets = [0, 16], sizes = [2, 16], strides = [1, 1]} : vector<2x48xf32> to vector<2x16xf32>
    %419 = vector.extract_strided_slice %409 {offsets = [0, 16], sizes = [2, 16], strides = [1, 1]} : vector<2x48xf32> to vector<2x16xf32>
    %420 = arith.addf %418, %419 : vector<2x16xf32>
    %421 = arith.negf %420 : vector<2x16xf32>
    %422 = math.exp %421 : vector<2x16xf32>
    %cst_84 = arith.constant 1.000000e+00 : f32
    %423 = vector.broadcast %cst_84 : f32 to vector<2x16xf32>
    %424 = arith.addf %423, %422 : vector<2x16xf32>
    %425 = arith.divf %423, %424 : vector<2x16xf32>
    %426 = vector.extract_strided_slice %405 {offsets = [0, 32], sizes = [2, 16], strides = [1, 1]} : vector<2x48xf32> to vector<2x16xf32>
    %427 = vector.extract_strided_slice %409 {offsets = [0, 32], sizes = [2, 16], strides = [1, 1]} : vector<2x48xf32> to vector<2x16xf32>
    %428 = arith.mulf %417, %427 : vector<2x16xf32>
    %429 = arith.addf %426, %428 : vector<2x16xf32>
    %430 = math.tanh %429 : vector<2x16xf32>
    %cst_85 = arith.constant 1.000000e+00 : f32
    %431 = vector.broadcast %cst_85 : f32 to vector<2x16xf32>
    %432 = arith.subf %431, %425 : vector<2x16xf32>
    %433 = arith.mulf %432, %430 : vector<2x16xf32>
    %434 = arith.mulf %425, %403 : vector<2x16xf32>
    %435 = arith.addf %433, %434 : vector<2x16xf32>
    %436 = vector.broadcast %406 : vector<2x1xf32> to vector<2x16xf32>
    %437 = arith.mulf %436, %435 : vector<2x16xf32>
    %c0_86 = arith.constant 0 : index
    %c6_87 = arith.constant 6 : index
    %c0_88 = arith.constant 0 : index
    %438 = vector.load %arg30[%c0_86, %c6_87, %c0_88] : memref<2x8x16xf32, #tpu.memory_space<vmem>>, vector<2x1x16xf32>
    %439 = vector.shape_cast %438 : vector<2x1x16xf32> to vector<2x16xf32>
    %440 = vector.shape_cast %437 : vector<2x16xf32> to vector<2x1x16xf32>
    tpu.vector_store %arg30[%c0_86, %c6_87, %c0_88], %440 {strides = array<i32>} : memref<2x8x16xf32, #tpu.memory_space<vmem>>, vector<2x1x16xf32>,
    %441 = vector.broadcast %406 : vector<2x1xf32> to vector<2x16xf32>
    %442 = arith.mulf %441, %435 : vector<2x16xf32>
    %cst_89 = arith.constant 1.000000e+00 : f32
    %443 = vector.broadcast %cst_89 : f32 to vector<2x1xf32>
    %444 = arith.subf %443, %406 : vector<2x1xf32>
    %445 = vector.broadcast %444 : vector<2x1xf32> to vector<2x16xf32>
    %446 = arith.mulf %445, %403 : vector<2x16xf32>
    %447 = arith.addf %442, %446 : vector<2x16xf32>
    %448 = vector.extract_strided_slice %8 {offsets = [0, 5, 48], sizes = [2, 1, 48], strides = [1, 1, 1]} : vector<2x8x96xf32> to vector<2x1x48xf32>
    %449 = vector.shape_cast %448 : vector<2x1x48xf32> to vector<2x48xf32>
    %450 = vector.extract_strided_slice %0 {offsets = [0, 5], sizes = [2, 1], strides = [1, 1]} : vector<2x8xf32> to vector<2x1xf32>
    %cst_90 = arith.constant dense<0.000000e+00> : vector<2x48xf32>
    %451 = tpu.matmul %447, %11, %cst_90 {dimension_numbers = #tpu.dot_dimension_numbers<[1], [0], [0], [1], [0, 0, 1, 1], [], []>} : vector<2x16xf32>, vector<16x48xf32>, vector<2x48xf32> -> vector<2x48xf32>
    %452 = vector.broadcast %12 : vector<1x48xf32> to vector<2x48xf32>
    %453 = arith.addf %451, %452 : vector<2x48xf32>
    %454 = vector.extract_strided_slice %449 {offsets = [0, 0], sizes = [2, 16], strides = [1, 1]} : vector<2x48xf32> to vector<2x16xf32>
    %455 = vector.extract_strided_slice %453 {offsets = [0, 0], sizes = [2, 16], strides = [1, 1]} : vector<2x48xf32> to vector<2x16xf32>
    %456 = arith.addf %454, %455 : vector<2x16xf32>
    %457 = arith.negf %456 : vector<2x16xf32>
    %458 = math.exp %457 : vector<2x16xf32>
    %cst_91 = arith.constant 1.000000e+00 : f32
    %459 = vector.broadcast %cst_91 : f32 to vector<2x16xf32>
    %460 = arith.addf %459, %458 : vector<2x16xf32>
    %461 = arith.divf %459, %460 : vector<2x16xf32>
    %462 = vector.extract_strided_slice %449 {offsets = [0, 16], sizes = [2, 16], strides = [1, 1]} : vector<2x48xf32> to vector<2x16xf32>
    %463 = vector.extract_strided_slice %453 {offsets = [0, 16], sizes = [2, 16], strides = [1, 1]} : vector<2x48xf32> to vector<2x16xf32>
    %464 = arith.addf %462, %463 : vector<2x16xf32>
    %465 = arith.negf %464 : vector<2x16xf32>
    %466 = math.exp %465 : vector<2x16xf32>
    %cst_92 = arith.constant 1.000000e+00 : f32
    %467 = vector.broadcast %cst_92 : f32 to vector<2x16xf32>
    %468 = arith.addf %467, %466 : vector<2x16xf32>
    %469 = arith.divf %467, %468 : vector<2x16xf32>
    %470 = vector.extract_strided_slice %449 {offsets = [0, 32], sizes = [2, 16], strides = [1, 1]} : vector<2x48xf32> to vector<2x16xf32>
    %471 = vector.extract_strided_slice %453 {offsets = [0, 32], sizes = [2, 16], strides = [1, 1]} : vector<2x48xf32> to vector<2x16xf32>
    %472 = arith.mulf %461, %471 : vector<2x16xf32>
    %473 = arith.addf %470, %472 : vector<2x16xf32>
    %474 = math.tanh %473 : vector<2x16xf32>
    %cst_93 = arith.constant 1.000000e+00 : f32
    %475 = vector.broadcast %cst_93 : f32 to vector<2x16xf32>
    %476 = arith.subf %475, %469 : vector<2x16xf32>
    %477 = arith.mulf %476, %474 : vector<2x16xf32>
    %478 = arith.mulf %469, %447 : vector<2x16xf32>
    %479 = arith.addf %477, %478 : vector<2x16xf32>
    %480 = vector.broadcast %450 : vector<2x1xf32> to vector<2x16xf32>
    %481 = arith.mulf %480, %479 : vector<2x16xf32>
    %c0_94 = arith.constant 0 : index
    %c5_95 = arith.constant 5 : index
    %c0_96 = arith.constant 0 : index
    %482 = vector.load %arg30[%c0_94, %c5_95, %c0_96] : memref<2x8x16xf32, #tpu.memory_space<vmem>>, vector<2x1x16xf32>
    %483 = vector.shape_cast %482 : vector<2x1x16xf32> to vector<2x16xf32>
    %484 = vector.shape_cast %481 : vector<2x16xf32> to vector<2x1x16xf32>
    tpu.vector_store %arg30[%c0_94, %c5_95, %c0_96], %484 {strides = array<i32>} : memref<2x8x16xf32, #tpu.memory_space<vmem>>, vector<2x1x16xf32>,
    %485 = vector.broadcast %450 : vector<2x1xf32> to vector<2x16xf32>
    %486 = arith.mulf %485, %479 : vector<2x16xf32>
    %cst_97 = arith.constant 1.000000e+00 : f32
    %487 = vector.broadcast %cst_97 : f32 to vector<2x1xf32>
    %488 = arith.subf %487, %450 : vector<2x1xf32>
    %489 = vector.broadcast %488 : vector<2x1xf32> to vector<2x16xf32>
    %490 = arith.mulf %489, %447 : vector<2x16xf32>
    %491 = arith.addf %486, %490 : vector<2x16xf32>
    %492 = vector.extract_strided_slice %8 {offsets = [0, 4, 48], sizes = [2, 1, 48], strides = [1, 1, 1]} : vector<2x8x96xf32> to vector<2x1x48xf32>
    %493 = vector.shape_cast %492 : vector<2x1x48xf32> to vector<2x48xf32>
    %494 = vector.extract_strided_slice %0 {offsets = [0, 4], sizes = [2, 1], strides = [1, 1]} : vector<2x8xf32> to vector<2x1xf32>
    %cst_98 = arith.constant dense<0.000000e+00> : vector<2x48xf32>
    %495 = tpu.matmul %491, %11, %cst_98 {dimension_numbers = #tpu.dot_dimension_numbers<[1], [0], [0], [1], [0, 0, 1, 1], [], []>} : vector<2x16xf32>, vector<16x48xf32>, vector<2x48xf32> -> vector<2x48xf32>
    %496 = vector.broadcast %12 : vector<1x48xf32> to vector<2x48xf32>
    %497 = arith.addf %495, %496 : vector<2x48xf32>
    %498 = vector.extract_strided_slice %493 {offsets = [0, 0], sizes = [2, 16], strides = [1, 1]} : vector<2x48xf32> to vector<2x16xf32>
    %499 = vector.extract_strided_slice %497 {offsets = [0, 0], sizes = [2, 16], strides = [1, 1]} : vector<2x48xf32> to vector<2x16xf32>
    %500 = arith.addf %498, %499 : vector<2x16xf32>
    %501 = arith.negf %500 : vector<2x16xf32>
    %502 = math.exp %501 : vector<2x16xf32>
    %cst_99 = arith.constant 1.000000e+00 : f32
    %503 = vector.broadcast %cst_99 : f32 to vector<2x16xf32>
    %504 = arith.addf %503, %502 : vector<2x16xf32>
    %505 = arith.divf %503, %504 : vector<2x16xf32>
    %506 = vector.extract_strided_slice %493 {offsets = [0, 16], sizes = [2, 16], strides = [1, 1]} : vector<2x48xf32> to vector<2x16xf32>
    %507 = vector.extract_strided_slice %497 {offsets = [0, 16], sizes = [2, 16], strides = [1, 1]} : vector<2x48xf32> to vector<2x16xf32>
    %508 = arith.addf %506, %507 : vector<2x16xf32>
    %509 = arith.negf %508 : vector<2x16xf32>
    %510 = math.exp %509 : vector<2x16xf32>
    %cst_100 = arith.constant 1.000000e+00 : f32
    %511 = vector.broadcast %cst_100 : f32 to vector<2x16xf32>
    %512 = arith.addf %511, %510 : vector<2x16xf32>
    %513 = arith.divf %511, %512 : vector<2x16xf32>
    %514 = vector.extract_strided_slice %493 {offsets = [0, 32], sizes = [2, 16], strides = [1, 1]} : vector<2x48xf32> to vector<2x16xf32>
    %515 = vector.extract_strided_slice %497 {offsets = [0, 32], sizes = [2, 16], strides = [1, 1]} : vector<2x48xf32> to vector<2x16xf32>
    %516 = arith.mulf %505, %515 : vector<2x16xf32>
    %517 = arith.addf %514, %516 : vector<2x16xf32>
    %518 = math.tanh %517 : vector<2x16xf32>
    %cst_101 = arith.constant 1.000000e+00 : f32
    %519 = vector.broadcast %cst_101 : f32 to vector<2x16xf32>
    %520 = arith.subf %519, %513 : vector<2x16xf32>
    %521 = arith.mulf %520, %518 : vector<2x16xf32>
    %522 = arith.mulf %513, %491 : vector<2x16xf32>
    %523 = arith.addf %521, %522 : vector<2x16xf32>
    %524 = vector.broadcast %494 : vector<2x1xf32> to vector<2x16xf32>
    %525 = arith.mulf %524, %523 : vector<2x16xf32>
    %c0_102 = arith.constant 0 : index
    %c4_103 = arith.constant 4 : index
    %c0_104 = arith.constant 0 : index
    %526 = vector.load %arg30[%c0_102, %c4_103, %c0_104] : memref<2x8x16xf32, #tpu.memory_space<vmem>>, vector<2x1x16xf32>
    %527 = vector.shape_cast %526 : vector<2x1x16xf32> to vector<2x16xf32>
    %528 = vector.shape_cast %525 : vector<2x16xf32> to vector<2x1x16xf32>
    tpu.vector_store %arg30[%c0_102, %c4_103, %c0_104], %528 {strides = array<i32>} : memref<2x8x16xf32, #tpu.memory_space<vmem>>, vector<2x1x16xf32>,
    %529 = vector.broadcast %494 : vector<2x1xf32> to vector<2x16xf32>
    %530 = arith.mulf %529, %523 : vector<2x16xf32>
    %cst_105 = arith.constant 1.000000e+00 : f32
    %531 = vector.broadcast %cst_105 : f32 to vector<2x1xf32>
    %532 = arith.subf %531, %494 : vector<2x1xf32>
    %533 = vector.broadcast %532 : vector<2x1xf32> to vector<2x16xf32>
    %534 = arith.mulf %533, %491 : vector<2x16xf32>
    %535 = arith.addf %530, %534 : vector<2x16xf32>
    %536 = vector.extract_strided_slice %8 {offsets = [0, 3, 48], sizes = [2, 1, 48], strides = [1, 1, 1]} : vector<2x8x96xf32> to vector<2x1x48xf32>
    %537 = vector.shape_cast %536 : vector<2x1x48xf32> to vector<2x48xf32>
    %538 = vector.extract_strided_slice %0 {offsets = [0, 3], sizes = [2, 1], strides = [1, 1]} : vector<2x8xf32> to vector<2x1xf32>
    %cst_106 = arith.constant dense<0.000000e+00> : vector<2x48xf32>
    %539 = tpu.matmul %535, %11, %cst_106 {dimension_numbers = #tpu.dot_dimension_numbers<[1], [0], [0], [1], [0, 0, 1, 1], [], []>} : vector<2x16xf32>, vector<16x48xf32>, vector<2x48xf32> -> vector<2x48xf32>
    %540 = vector.broadcast %12 : vector<1x48xf32> to vector<2x48xf32>
    %541 = arith.addf %539, %540 : vector<2x48xf32>
    %542 = vector.extract_strided_slice %537 {offsets = [0, 0], sizes = [2, 16], strides = [1, 1]} : vector<2x48xf32> to vector<2x16xf32>
    %543 = vector.extract_strided_slice %541 {offsets = [0, 0], sizes = [2, 16], strides = [1, 1]} : vector<2x48xf32> to vector<2x16xf32>
    %544 = arith.addf %542, %543 : vector<2x16xf32>
    %545 = arith.negf %544 : vector<2x16xf32>
    %546 = math.exp %545 : vector<2x16xf32>
    %cst_107 = arith.constant 1.000000e+00 : f32
    %547 = vector.broadcast %cst_107 : f32 to vector<2x16xf32>
    %548 = arith.addf %547, %546 : vector<2x16xf32>
    %549 = arith.divf %547, %548 : vector<2x16xf32>
    %550 = vector.extract_strided_slice %537 {offsets = [0, 16], sizes = [2, 16], strides = [1, 1]} : vector<2x48xf32> to vector<2x16xf32>
    %551 = vector.extract_strided_slice %541 {offsets = [0, 16], sizes = [2, 16], strides = [1, 1]} : vector<2x48xf32> to vector<2x16xf32>
    %552 = arith.addf %550, %551 : vector<2x16xf32>
    %553 = arith.negf %552 : vector<2x16xf32>
    %554 = math.exp %553 : vector<2x16xf32>
    %cst_108 = arith.constant 1.000000e+00 : f32
    %555 = vector.broadcast %cst_108 : f32 to vector<2x16xf32>
    %556 = arith.addf %555, %554 : vector<2x16xf32>
    %557 = arith.divf %555, %556 : vector<2x16xf32>
    %558 = vector.extract_strided_slice %537 {offsets = [0, 32], sizes = [2, 16], strides = [1, 1]} : vector<2x48xf32> to vector<2x16xf32>
    %559 = vector.extract_strided_slice %541 {offsets = [0, 32], sizes = [2, 16], strides = [1, 1]} : vector<2x48xf32> to vector<2x16xf32>
    %560 = arith.mulf %549, %559 : vector<2x16xf32>
    %561 = arith.addf %558, %560 : vector<2x16xf32>
    %562 = math.tanh %561 : vector<2x16xf32>
    %cst_109 = arith.constant 1.000000e+00 : f32
    %563 = vector.broadcast %cst_109 : f32 to vector<2x16xf32>
    %564 = arith.subf %563, %557 : vector<2x16xf32>
    %565 = arith.mulf %564, %562 : vector<2x16xf32>
    %566 = arith.mulf %557, %535 : vector<2x16xf32>
    %567 = arith.addf %565, %566 : vector<2x16xf32>
    %568 = vector.broadcast %538 : vector<2x1xf32> to vector<2x16xf32>
    %569 = arith.mulf %568, %567 : vector<2x16xf32>
    %c0_110 = arith.constant 0 : index
    %c3_111 = arith.constant 3 : index
    %c0_112 = arith.constant 0 : index
    %570 = vector.load %arg30[%c0_110, %c3_111, %c0_112] : memref<2x8x16xf32, #tpu.memory_space<vmem>>, vector<2x1x16xf32>
    %571 = vector.shape_cast %570 : vector<2x1x16xf32> to vector<2x16xf32>
    %572 = vector.shape_cast %569 : vector<2x16xf32> to vector<2x1x16xf32>
    tpu.vector_store %arg30[%c0_110, %c3_111, %c0_112], %572 {strides = array<i32>} : memref<2x8x16xf32, #tpu.memory_space<vmem>>, vector<2x1x16xf32>,
    %573 = vector.broadcast %538 : vector<2x1xf32> to vector<2x16xf32>
    %574 = arith.mulf %573, %567 : vector<2x16xf32>
    %cst_113 = arith.constant 1.000000e+00 : f32
    %575 = vector.broadcast %cst_113 : f32 to vector<2x1xf32>
    %576 = arith.subf %575, %538 : vector<2x1xf32>
    %577 = vector.broadcast %576 : vector<2x1xf32> to vector<2x16xf32>
    %578 = arith.mulf %577, %535 : vector<2x16xf32>
    %579 = arith.addf %574, %578 : vector<2x16xf32>
    %580 = vector.extract_strided_slice %8 {offsets = [0, 2, 48], sizes = [2, 1, 48], strides = [1, 1, 1]} : vector<2x8x96xf32> to vector<2x1x48xf32>
    %581 = vector.shape_cast %580 : vector<2x1x48xf32> to vector<2x48xf32>
    %582 = vector.extract_strided_slice %0 {offsets = [0, 2], sizes = [2, 1], strides = [1, 1]} : vector<2x8xf32> to vector<2x1xf32>
    %cst_114 = arith.constant dense<0.000000e+00> : vector<2x48xf32>
    %583 = tpu.matmul %579, %11, %cst_114 {dimension_numbers = #tpu.dot_dimension_numbers<[1], [0], [0], [1], [0, 0, 1, 1], [], []>} : vector<2x16xf32>, vector<16x48xf32>, vector<2x48xf32> -> vector<2x48xf32>
    %584 = vector.broadcast %12 : vector<1x48xf32> to vector<2x48xf32>
    %585 = arith.addf %583, %584 : vector<2x48xf32>
    %586 = vector.extract_strided_slice %581 {offsets = [0, 0], sizes = [2, 16], strides = [1, 1]} : vector<2x48xf32> to vector<2x16xf32>
    %587 = vector.extract_strided_slice %585 {offsets = [0, 0], sizes = [2, 16], strides = [1, 1]} : vector<2x48xf32> to vector<2x16xf32>
    %588 = arith.addf %586, %587 : vector<2x16xf32>
    %589 = arith.negf %588 : vector<2x16xf32>
    %590 = math.exp %589 : vector<2x16xf32>
    %cst_115 = arith.constant 1.000000e+00 : f32
    %591 = vector.broadcast %cst_115 : f32 to vector<2x16xf32>
    %592 = arith.addf %591, %590 : vector<2x16xf32>
    %593 = arith.divf %591, %592 : vector<2x16xf32>
    %594 = vector.extract_strided_slice %581 {offsets = [0, 16], sizes = [2, 16], strides = [1, 1]} : vector<2x48xf32> to vector<2x16xf32>
    %595 = vector.extract_strided_slice %585 {offsets = [0, 16], sizes = [2, 16], strides = [1, 1]} : vector<2x48xf32> to vector<2x16xf32>
    %596 = arith.addf %594, %595 : vector<2x16xf32>
    %597 = arith.negf %596 : vector<2x16xf32>
    %598 = math.exp %597 : vector<2x16xf32>
    %cst_116 = arith.constant 1.000000e+00 : f32
    %599 = vector.broadcast %cst_116 : f32 to vector<2x16xf32>
    %600 = arith.addf %599, %598 : vector<2x16xf32>
    %601 = arith.divf %599, %600 : vector<2x16xf32>
    %602 = vector.extract_strided_slice %581 {offsets = [0, 32], sizes = [2, 16], strides = [1, 1]} : vector<2x48xf32> to vector<2x16xf32>
    %603 = vector.extract_strided_slice %585 {offsets = [0, 32], sizes = [2, 16], strides = [1, 1]} : vector<2x48xf32> to vector<2x16xf32>
    %604 = arith.mulf %593, %603 : vector<2x16xf32>
    %605 = arith.addf %602, %604 : vector<2x16xf32>
    %606 = math.tanh %605 : vector<2x16xf32>
    %cst_117 = arith.constant 1.000000e+00 : f32
    %607 = vector.broadcast %cst_117 : f32 to vector<2x16xf32>
    %608 = arith.subf %607, %601 : vector<2x16xf32>
    %609 = arith.mulf %608, %606 : vector<2x16xf32>
    %610 = arith.mulf %601, %579 : vector<2x16xf32>
    %611 = arith.addf %609, %610 : vector<2x16xf32>
    %612 = vector.broadcast %582 : vector<2x1xf32> to vector<2x16xf32>
    %613 = arith.mulf %612, %611 : vector<2x16xf32>
    %c0_118 = arith.constant 0 : index
    %c2_119 = arith.constant 2 : index
    %c0_120 = arith.constant 0 : index
    %614 = vector.load %arg30[%c0_118, %c2_119, %c0_120] : memref<2x8x16xf32, #tpu.memory_space<vmem>>, vector<2x1x16xf32>
    %615 = vector.shape_cast %614 : vector<2x1x16xf32> to vector<2x16xf32>
    %616 = vector.shape_cast %613 : vector<2x16xf32> to vector<2x1x16xf32>
    tpu.vector_store %arg30[%c0_118, %c2_119, %c0_120], %616 {strides = array<i32>} : memref<2x8x16xf32, #tpu.memory_space<vmem>>, vector<2x1x16xf32>,
    %617 = vector.broadcast %582 : vector<2x1xf32> to vector<2x16xf32>
    %618 = arith.mulf %617, %611 : vector<2x16xf32>
    %cst_121 = arith.constant 1.000000e+00 : f32
    %619 = vector.broadcast %cst_121 : f32 to vector<2x1xf32>
    %620 = arith.subf %619, %582 : vector<2x1xf32>
    %621 = vector.broadcast %620 : vector<2x1xf32> to vector<2x16xf32>
    %622 = arith.mulf %621, %579 : vector<2x16xf32>
    %623 = arith.addf %618, %622 : vector<2x16xf32>
    %624 = vector.extract_strided_slice %8 {offsets = [0, 1, 48], sizes = [2, 1, 48], strides = [1, 1, 1]} : vector<2x8x96xf32> to vector<2x1x48xf32>
    %625 = vector.shape_cast %624 : vector<2x1x48xf32> to vector<2x48xf32>
    %626 = vector.extract_strided_slice %0 {offsets = [0, 1], sizes = [2, 1], strides = [1, 1]} : vector<2x8xf32> to vector<2x1xf32>
    %cst_122 = arith.constant dense<0.000000e+00> : vector<2x48xf32>
    %627 = tpu.matmul %623, %11, %cst_122 {dimension_numbers = #tpu.dot_dimension_numbers<[1], [0], [0], [1], [0, 0, 1, 1], [], []>} : vector<2x16xf32>, vector<16x48xf32>, vector<2x48xf32> -> vector<2x48xf32>
    %628 = vector.broadcast %12 : vector<1x48xf32> to vector<2x48xf32>
    %629 = arith.addf %627, %628 : vector<2x48xf32>
    %630 = vector.extract_strided_slice %625 {offsets = [0, 0], sizes = [2, 16], strides = [1, 1]} : vector<2x48xf32> to vector<2x16xf32>
    %631 = vector.extract_strided_slice %629 {offsets = [0, 0], sizes = [2, 16], strides = [1, 1]} : vector<2x48xf32> to vector<2x16xf32>
    %632 = arith.addf %630, %631 : vector<2x16xf32>
    %633 = arith.negf %632 : vector<2x16xf32>
    %634 = math.exp %633 : vector<2x16xf32>
    %cst_123 = arith.constant 1.000000e+00 : f32
    %635 = vector.broadcast %cst_123 : f32 to vector<2x16xf32>
    %636 = arith.addf %635, %634 : vector<2x16xf32>
    %637 = arith.divf %635, %636 : vector<2x16xf32>
    %638 = vector.extract_strided_slice %625 {offsets = [0, 16], sizes = [2, 16], strides = [1, 1]} : vector<2x48xf32> to vector<2x16xf32>
    %639 = vector.extract_strided_slice %629 {offsets = [0, 16], sizes = [2, 16], strides = [1, 1]} : vector<2x48xf32> to vector<2x16xf32>
    %640 = arith.addf %638, %639 : vector<2x16xf32>
    %641 = arith.negf %640 : vector<2x16xf32>
    %642 = math.exp %641 : vector<2x16xf32>
    %cst_124 = arith.constant 1.000000e+00 : f32
    %643 = vector.broadcast %cst_124 : f32 to vector<2x16xf32>
    %644 = arith.addf %643, %642 : vector<2x16xf32>
    %645 = arith.divf %643, %644 : vector<2x16xf32>
    %646 = vector.extract_strided_slice %625 {offsets = [0, 32], sizes = [2, 16], strides = [1, 1]} : vector<2x48xf32> to vector<2x16xf32>
    %647 = vector.extract_strided_slice %629 {offsets = [0, 32], sizes = [2, 16], strides = [1, 1]} : vector<2x48xf32> to vector<2x16xf32>
    %648 = arith.mulf %637, %647 : vector<2x16xf32>
    %649 = arith.addf %646, %648 : vector<2x16xf32>
    %650 = math.tanh %649 : vector<2x16xf32>
    %cst_125 = arith.constant 1.000000e+00 : f32
    %651 = vector.broadcast %cst_125 : f32 to vector<2x16xf32>
    %652 = arith.subf %651, %645 : vector<2x16xf32>
    %653 = arith.mulf %652, %650 : vector<2x16xf32>
    %654 = arith.mulf %645, %623 : vector<2x16xf32>
    %655 = arith.addf %653, %654 : vector<2x16xf32>
    %656 = vector.broadcast %626 : vector<2x1xf32> to vector<2x16xf32>
    %657 = arith.mulf %656, %655 : vector<2x16xf32>
    %c0_126 = arith.constant 0 : index
    %c1_127 = arith.constant 1 : index
    %c0_128 = arith.constant 0 : index
    %658 = vector.load %arg30[%c0_126, %c1_127, %c0_128] : memref<2x8x16xf32, #tpu.memory_space<vmem>>, vector<2x1x16xf32>
    %659 = vector.shape_cast %658 : vector<2x1x16xf32> to vector<2x16xf32>
    %660 = vector.shape_cast %657 : vector<2x16xf32> to vector<2x1x16xf32>
    tpu.vector_store %arg30[%c0_126, %c1_127, %c0_128], %660 {strides = array<i32>} : memref<2x8x16xf32, #tpu.memory_space<vmem>>, vector<2x1x16xf32>,
    %661 = vector.broadcast %626 : vector<2x1xf32> to vector<2x16xf32>
    %662 = arith.mulf %661, %655 : vector<2x16xf32>
    %cst_129 = arith.constant 1.000000e+00 : f32
    %663 = vector.broadcast %cst_129 : f32 to vector<2x1xf32>
    %664 = arith.subf %663, %626 : vector<2x1xf32>
    %665 = vector.broadcast %664 : vector<2x1xf32> to vector<2x16xf32>
    %666 = arith.mulf %665, %623 : vector<2x16xf32>
    %667 = arith.addf %662, %666 : vector<2x16xf32>
    %668 = vector.extract_strided_slice %8 {offsets = [0, 0, 48], sizes = [2, 1, 48], strides = [1, 1, 1]} : vector<2x8x96xf32> to vector<2x1x48xf32>
    %669 = vector.shape_cast %668 : vector<2x1x48xf32> to vector<2x48xf32>
    %670 = vector.extract_strided_slice %0 {offsets = [0, 0], sizes = [2, 1], strides = [1, 1]} : vector<2x8xf32> to vector<2x1xf32>
    %cst_130 = arith.constant dense<0.000000e+00> : vector<2x48xf32>
    %671 = tpu.matmul %667, %11, %cst_130 {dimension_numbers = #tpu.dot_dimension_numbers<[1], [0], [0], [1], [0, 0, 1, 1], [], []>} : vector<2x16xf32>, vector<16x48xf32>, vector<2x48xf32> -> vector<2x48xf32>
    %672 = vector.broadcast %12 : vector<1x48xf32> to vector<2x48xf32>
    %673 = arith.addf %671, %672 : vector<2x48xf32>
    %674 = vector.extract_strided_slice %669 {offsets = [0, 0], sizes = [2, 16], strides = [1, 1]} : vector<2x48xf32> to vector<2x16xf32>
    %675 = vector.extract_strided_slice %673 {offsets = [0, 0], sizes = [2, 16], strides = [1, 1]} : vector<2x48xf32> to vector<2x16xf32>
    %676 = arith.addf %674, %675 : vector<2x16xf32>
    %677 = arith.negf %676 : vector<2x16xf32>
    %678 = math.exp %677 : vector<2x16xf32>
    %cst_131 = arith.constant 1.000000e+00 : f32
    %679 = vector.broadcast %cst_131 : f32 to vector<2x16xf32>
    %680 = arith.addf %679, %678 : vector<2x16xf32>
    %681 = arith.divf %679, %680 : vector<2x16xf32>
    %682 = vector.extract_strided_slice %669 {offsets = [0, 16], sizes = [2, 16], strides = [1, 1]} : vector<2x48xf32> to vector<2x16xf32>
    %683 = vector.extract_strided_slice %673 {offsets = [0, 16], sizes = [2, 16], strides = [1, 1]} : vector<2x48xf32> to vector<2x16xf32>
    %684 = arith.addf %682, %683 : vector<2x16xf32>
    %685 = arith.negf %684 : vector<2x16xf32>
    %686 = math.exp %685 : vector<2x16xf32>
    %cst_132 = arith.constant 1.000000e+00 : f32
    %687 = vector.broadcast %cst_132 : f32 to vector<2x16xf32>
    %688 = arith.addf %687, %686 : vector<2x16xf32>
    %689 = arith.divf %687, %688 : vector<2x16xf32>
    %690 = vector.extract_strided_slice %669 {offsets = [0, 32], sizes = [2, 16], strides = [1, 1]} : vector<2x48xf32> to vector<2x16xf32>
    %691 = vector.extract_strided_slice %673 {offsets = [0, 32], sizes = [2, 16], strides = [1, 1]} : vector<2x48xf32> to vector<2x16xf32>
    %692 = arith.mulf %681, %691 : vector<2x16xf32>
    %693 = arith.addf %690, %692 : vector<2x16xf32>
    %694 = math.tanh %693 : vector<2x16xf32>
    %cst_133 = arith.constant 1.000000e+00 : f32
    %695 = vector.broadcast %cst_133 : f32 to vector<2x16xf32>
    %696 = arith.subf %695, %689 : vector<2x16xf32>
    %697 = arith.mulf %696, %694 : vector<2x16xf32>
    %698 = arith.mulf %689, %667 : vector<2x16xf32>
    %699 = arith.addf %697, %698 : vector<2x16xf32>
    %700 = vector.broadcast %670 : vector<2x1xf32> to vector<2x16xf32>
    %701 = arith.mulf %700, %699 : vector<2x16xf32>
    %c0_134 = arith.constant 0 : index
    %c0_135 = arith.constant 0 : index
    %c0_136 = arith.constant 0 : index
    %702 = vector.load %arg30[%c0_134, %c0_135, %c0_136] : memref<2x8x16xf32, #tpu.memory_space<vmem>>, vector<2x1x16xf32>
    %703 = vector.shape_cast %702 : vector<2x1x16xf32> to vector<2x16xf32>
    %704 = vector.shape_cast %701 : vector<2x16xf32> to vector<2x1x16xf32>
    tpu.vector_store %arg30[%c0_134, %c0_135, %c0_136], %704 {strides = array<i32>} : memref<2x8x16xf32, #tpu.memory_space<vmem>>, vector<2x1x16xf32>,
    %c0_137 = arith.constant 0 : index
    %c0_138 = arith.constant 0 : index
    %c0_139 = arith.constant 0 : index
    %705 = vector.load %arg29[%c0_137, %c0_138, %c0_139] : memref<2x8x16xf32, #tpu.memory_space<vmem>>, vector<2x8x16xf32>
    %c0_140 = arith.constant 0 : index
    %c0_141 = arith.constant 0 : index
    %c0_142 = arith.constant 0 : index
    %706 = vector.load %arg30[%c0_140, %c0_141, %c0_142] : memref<2x8x16xf32, #tpu.memory_space<vmem>>, vector<2x8x16xf32>
    %707 = tpu.concatenate %705, %706 in 2 : vector<2x8x16xf32>, vector<2x8x16xf32> -> vector<2x8x32xf32>
    %cst_143 = arith.constant dense<0.000000e+00> : vector<2x32xf32>
    %708 = vector.multi_reduction <add>, %707, %cst_143 [1] : vector<2x8x32xf32> to vector<2x32xf32>
    %cst_144 = arith.constant dense<0.000000e+00> : vector<2xf32>
    %709 = vector.multi_reduction <add>, %0, %cst_144 [1] : vector<2x8xf32> to vector<2xf32>
    %710 = vector.shape_cast %709 : vector<2xf32> to vector<2x1xf32>
    %cst_145 = arith.constant 1.000000e+00 : f32
    %711 = vector.broadcast %cst_145 : f32 to vector<2x1xf32>
    %712 = arith.maximumf %710, %711 : vector<2x1xf32>
    %713 = tpu.reciprocal %712 {approx = true} : vector<2x1xf32> -> vector<2x1xf32>
    %714 = vector.broadcast %713 : vector<2x1xf32> to vector<2x32xf32>
    %715 = arith.mulf %708, %714 : vector<2x32xf32>
    %c0_146 = arith.constant 0 : index
    %c0_147 = arith.constant 0 : index
    %716 = vector.load %arg12[%c0_146, %c0_147] : memref<32x32xf32, #tpu.memory_space<vmem>>, vector<32x32xf32>
    %cst_148 = arith.constant dense<0.000000e+00> : vector<2x32xf32>
    %717 = tpu.matmul %715, %716, %cst_148 {dimension_numbers = #tpu.dot_dimension_numbers<[1], [0], [0], [1], [0, 0, 1, 1], [], []>} : vector<2x32xf32>, vector<32x32xf32>, vector<2x32xf32> -> vector<2x32xf32>
    %c0_149 = arith.constant 0 : index
    %c0_150 = arith.constant 0 : index
    %718 = vector.load %arg13[%c0_149, %c0_150] : memref<1x32xf32, #tpu.memory_space<vmem>>, vector<1x32xf32>
    %719 = vector.broadcast %718 : vector<1x32xf32> to vector<2x32xf32>
    %720 = arith.addf %717, %719 : vector<2x32xf32>
    %721 = math.tanh %720 : vector<2x32xf32>
    %722 = vector.shape_cast %707 : vector<2x8x32xf32> to vector<16x32xf32>
    %c0_151 = arith.constant 0 : index
    %c0_152 = arith.constant 0 : index
    %723 = vector.load %arg16[%c0_151, %c0_152] : memref<32x32xf32, #tpu.memory_space<vmem>>, vector<32x32xf32>
    %cst_153 = arith.constant dense<0.000000e+00> : vector<16x32xf32>
    %724 = tpu.matmul %722, %723, %cst_153 {dimension_numbers = #tpu.dot_dimension_numbers<[1], [0], [0], [1], [0, 0, 1, 1], [], []>} : vector<16x32xf32>, vector<32x32xf32>, vector<16x32xf32> -> vector<16x32xf32>
    %c0_154 = arith.constant 0 : index
    %c0_155 = arith.constant 0 : index
    %725 = vector.load %arg17[%c0_154, %c0_155] : memref<1x32xf32, #tpu.memory_space<vmem>>, vector<1x32xf32>
    %726 = vector.broadcast %725 : vector<1x32xf32> to vector<16x32xf32>
    %727 = arith.addf %724, %726 : vector<16x32xf32>
    %728 = vector.shape_cast %727 : vector<16x32xf32> to vector<2x8x32xf32>
    %c0_156 = arith.constant 0 : index
    %c0_157 = arith.constant 0 : index
    %c0_158 = arith.constant 0 : index
    %729 = vector.load %arg3[%c0_156, %c0_157, %c0_158] : memref<2x5x16xf32, #tpu.memory_space<vmem>>, vector<2x5x16xf32>
    %c0_159 = arith.constant 0 : index
    %c0_160 = arith.constant 0 : index
    %730 = vector.load %arg20[%c0_159, %c0_160] : memref<1x32xf32, #tpu.memory_space<vmem>>, vector<1x32xf32>
    %c0_161 = arith.constant 0 : index
    %c0_162 = arith.constant 0 : index
    %731 = vector.load %arg21[%c0_161, %c0_162] : memref<1x1xf32, #tpu.memory_space<vmem>>, vector<1x1xf32>
    %c0_163 = arith.constant 0 : index
    %c0_164 = arith.constant 0 : index
    %732 = vector.load %arg14[%c0_163, %c0_164] : memref<48x128xf32, #tpu.memory_space<vmem>>, vector<48x128xf32>
    %c0_165 = arith.constant 0 : index
    %c0_166 = arith.constant 0 : index
    %733 = vector.load %arg15[%c0_165, %c0_166] : memref<1x128xf32, #tpu.memory_space<vmem>>, vector<1x128xf32>
    %c0_167 = arith.constant 0 : index
    %c0_168 = arith.constant 0 : index
    %734 = vector.load %arg22[%c0_167, %c0_168] : memref<64x128xf32, #tpu.memory_space<vmem>>, vector<64x128xf32>
    %c0_169 = arith.constant 0 : index
    %c0_170 = arith.constant 0 : index
    %735 = vector.load %arg23[%c0_169, %c0_170] : memref<1x128xf32, #tpu.memory_space<vmem>>, vector<1x128xf32>
    %c0_171 = arith.constant 0 : index
    %c0_172 = arith.constant 0 : index
    %736 = vector.load %arg18[%c0_171, %c0_172] : memref<32x32xf32, #tpu.memory_space<vmem>>, vector<32x32xf32>
    %c0_173 = arith.constant 0 : index
    %c0_174 = arith.constant 0 : index
    %737 = vector.load %arg19[%c0_173, %c0_174] : memref<1x32xf32, #tpu.memory_space<vmem>>, vector<1x32xf32>
    %c0_175 = arith.constant 0 : index
    %c0_176 = arith.constant 0 : index
    %738 = vector.load %arg24[%c0_175, %c0_176] : memref<80x32xf32, #tpu.memory_space<vmem>>, vector<80x32xf32>
    %c0_177 = arith.constant 0 : index
    %c0_178 = arith.constant 0 : index
    %739 = vector.load %arg25[%c0_177, %c0_178] : memref<1x32xf32, #tpu.memory_space<vmem>>, vector<1x32xf32>
    %c0_179 = arith.constant 0 : index
    %c0_180 = arith.constant 0 : index
    %740 = vector.load %arg26[%c0_179, %c0_180] : memref<32x20xf32, #tpu.memory_space<vmem>>, vector<32x20xf32>
    %c0_181 = arith.constant 0 : index
    %c0_182 = arith.constant 0 : index
    %741 = vector.load %arg27[%c0_181, %c0_182] : memref<1x20xf32, #tpu.memory_space<vmem>>, vector<1x20xf32>
    %cst_183 = arith.constant 0.000000e+00 : f32
    %742 = vector.broadcast %cst_183 : f32 to vector<1x1xf32>
    %743 = vector.extract_strided_slice %729 {offsets = [0, 0, 0], sizes = [2, 1, 16], strides = [1, 1, 1]} : vector<2x5x16xf32> to vector<2x1x16xf32>
    %744 = vector.shape_cast %743 : vector<2x1x16xf32> to vector<2x16xf32>
    %745 = tpu.concatenate %744, %721 in 1 : vector<2x16xf32>, vector<2x32xf32> -> vector<2x48xf32>
    %cst_184 = arith.constant dense<0.000000e+00> : vector<2x128xf32>
    %746 = tpu.matmul %745, %732, %cst_184 {dimension_numbers = #tpu.dot_dimension_numbers<[1], [0], [0], [1], [0, 0, 1, 1], [], []>} : vector<2x48xf32>, vector<48x128xf32>, vector<2x128xf32> -> vector<2x128xf32>
    %747 = vector.broadcast %733 : vector<1x128xf32> to vector<2x128xf32>
    %748 = arith.addf %746, %747 : vector<2x128xf32>
    %749 = vector.extract_strided_slice %748 {offsets = [0, 0], sizes = [2, 32], strides = [1, 1]} : vector<2x128xf32> to vector<2x32xf32>
    %750 = arith.negf %749 : vector<2x32xf32>
    %751 = math.exp %750 : vector<2x32xf32>
    %cst_185 = arith.constant 1.000000e+00 : f32
    %752 = vector.broadcast %cst_185 : f32 to vector<2x32xf32>
    %753 = arith.addf %752, %751 : vector<2x32xf32>
    %754 = arith.divf %752, %753 : vector<2x32xf32>
    %755 = vector.extract_strided_slice %748 {offsets = [0, 32], sizes = [2, 32], strides = [1, 1]} : vector<2x128xf32> to vector<2x32xf32>
    %756 = arith.negf %755 : vector<2x32xf32>
    %757 = math.exp %756 : vector<2x32xf32>
    %cst_186 = arith.constant 1.000000e+00 : f32
    %758 = vector.broadcast %cst_186 : f32 to vector<2x32xf32>
    %759 = arith.addf %758, %757 : vector<2x32xf32>
    %760 = arith.divf %758, %759 : vector<2x32xf32>
    %761 = vector.extract_strided_slice %748 {offsets = [0, 64], sizes = [2, 32], strides = [1, 1]} : vector<2x128xf32> to vector<2x32xf32>
    %762 = vector.extract_strided_slice %748 {offsets = [0, 96], sizes = [2, 32], strides = [1, 1]} : vector<2x128xf32> to vector<2x32xf32>
    %763 = arith.mulf %754, %762 : vector<2x32xf32>
    %764 = arith.addf %761, %763 : vector<2x32xf32>
    %765 = math.tanh %764 : vector<2x32xf32>
    %cst_187 = arith.constant 1.000000e+00 : f32
    %766 = vector.broadcast %cst_187 : f32 to vector<2x32xf32>
    %767 = arith.subf %766, %760 : vector<2x32xf32>
    %768 = arith.mulf %767, %765 : vector<2x32xf32>
    %769 = arith.mulf %760, %721 : vector<2x32xf32>
    %770 = arith.addf %768, %769 : vector<2x32xf32>
    %cst_188 = arith.constant dense<0.000000e+00> : vector<2x32xf32>
    %771 = tpu.matmul %770, %736, %cst_188 {dimension_numbers = #tpu.dot_dimension_numbers<[1], [0], [0], [1], [0, 0, 1, 1], [], []>} : vector<2x32xf32>, vector<32x32xf32>, vector<2x32xf32> -> vector<2x32xf32>
    %772 = vector.broadcast %737 : vector<1x32xf32> to vector<2x32xf32>
    %773 = arith.addf %771, %772 : vector<2x32xf32>
    %774 = vector.shape_cast %773 : vector<2x32xf32> to vector<2x1x32xf32>
    %775 = vector.broadcast %774 : vector<2x1x32xf32> to vector<2x8x32xf32>
    %776 = arith.addf %728, %775 : vector<2x8x32xf32>
    %777 = math.tanh %776 : vector<2x8x32xf32>
    %778 = vector.shape_cast %730 : vector<1x32xf32> to vector<1x1x32xf32>
    %779 = vector.broadcast %778 : vector<1x1x32xf32> to vector<2x8x32xf32>
    %780 = arith.mulf %777, %779 : vector<2x8x32xf32>
    %cst_189 = arith.constant dense<0.000000e+00> : vector<2x8xf32>
    %781 = vector.multi_reduction <add>, %780, %cst_189 [2] : vector<2x8x32xf32> to vector<2x8xf32>
    %782 = vector.broadcast %731 : vector<1x1xf32> to vector<2x8xf32>
    %783 = arith.addf %781, %782 : vector<2x8xf32>
    %cst_190 = arith.constant 0.000000e+00 : f32
    %784 = vector.broadcast %cst_190 : f32 to vector<2x8xf32>
    %785 = arith.cmpf ogt, %0, %784 : vector<2x8xf32>
    %cst_191 = arith.constant -1.000000e+30 : f32
    %786 = vector.broadcast %cst_191 : f32 to vector<2x8xf32>
    %787 = arith.select %785, %783, %786 : vector<2x8xi1>, vector<2x8xf32>
    %cst_192 = arith.constant dense<0xFF800000> : vector<2xf32>
    %788 = vector.multi_reduction <maximumf>, %787, %cst_192 [1] : vector<2x8xf32> to vector<2xf32>
    %789 = vector.shape_cast %788 : vector<2xf32> to vector<2x1xf32>
    %790 = vector.broadcast %789 : vector<2x1xf32> to vector<2x8xf32>
    %791 = arith.subf %787, %790 : vector<2x8xf32>
    %792 = math.exp %791 : vector<2x8xf32>
    %cst_193 = arith.constant dense<0.000000e+00> : vector<2xf32>
    %793 = vector.multi_reduction <add>, %792, %cst_193 [1] : vector<2x8xf32> to vector<2xf32>
    %794 = vector.shape_cast %793 : vector<2xf32> to vector<2x1xf32>
    %795 = tpu.reciprocal %794 {approx = true} : vector<2x1xf32> -> vector<2x1xf32>
    %796 = vector.broadcast %795 : vector<2x1xf32> to vector<2x8xf32>
    %797 = arith.mulf %792, %796 : vector<2x8xf32>
    %798 = vector.shape_cast %797 : vector<2x8xf32> to vector<2x8x1xf32>
    %799 = vector.broadcast %798 : vector<2x8x1xf32> to vector<2x8x32xf32>
    %800 = arith.mulf %799, %707 : vector<2x8x32xf32>
    %cst_194 = arith.constant dense<0.000000e+00> : vector<2x32xf32>
    %801 = vector.multi_reduction <add>, %800, %cst_194 [1] : vector<2x8x32xf32> to vector<2x32xf32>
    %802 = tpu.concatenate %801, %770 in 1 : vector<2x32xf32>, vector<2x32xf32> -> vector<2x64xf32>
    %cst_195 = arith.constant dense<0.000000e+00> : vector<2x128xf32>
    %803 = tpu.matmul %802, %734, %cst_195 {dimension_numbers = #tpu.dot_dimension_numbers<[1], [0], [0], [1], [0, 0, 1, 1], [], []>} : vector<2x64xf32>, vector<64x128xf32>, vector<2x128xf32> -> vector<2x128xf32>
    %804 = vector.broadcast %735 : vector<1x128xf32> to vector<2x128xf32>
    %805 = arith.addf %803, %804 : vector<2x128xf32>
    %806 = vector.extract_strided_slice %805 {offsets = [0, 0], sizes = [2, 32], strides = [1, 1]} : vector<2x128xf32> to vector<2x32xf32>
    %807 = arith.negf %806 : vector<2x32xf32>
    %808 = math.exp %807 : vector<2x32xf32>
    %cst_196 = arith.constant 1.000000e+00 : f32
    %809 = vector.broadcast %cst_196 : f32 to vector<2x32xf32>
    %810 = arith.addf %809, %808 : vector<2x32xf32>
    %811 = arith.divf %809, %810 : vector<2x32xf32>
    %812 = vector.extract_strided_slice %805 {offsets = [0, 32], sizes = [2, 32], strides = [1, 1]} : vector<2x128xf32> to vector<2x32xf32>
    %813 = arith.negf %812 : vector<2x32xf32>
    %814 = math.exp %813 : vector<2x32xf32>
    %cst_197 = arith.constant 1.000000e+00 : f32
    %815 = vector.broadcast %cst_197 : f32 to vector<2x32xf32>
    %816 = arith.addf %815, %814 : vector<2x32xf32>
    %817 = arith.divf %815, %816 : vector<2x32xf32>
    %818 = vector.extract_strided_slice %805 {offsets = [0, 64], sizes = [2, 32], strides = [1, 1]} : vector<2x128xf32> to vector<2x32xf32>
    %819 = vector.extract_strided_slice %805 {offsets = [0, 96], sizes = [2, 32], strides = [1, 1]} : vector<2x128xf32> to vector<2x32xf32>
    %820 = arith.mulf %811, %819 : vector<2x32xf32>
    %821 = arith.addf %818, %820 : vector<2x32xf32>
    %822 = math.tanh %821 : vector<2x32xf32>
    %cst_198 = arith.constant 1.000000e+00 : f32
    %823 = vector.broadcast %cst_198 : f32 to vector<2x32xf32>
    %824 = arith.subf %823, %817 : vector<2x32xf32>
    %825 = arith.mulf %824, %822 : vector<2x32xf32>
    %826 = arith.mulf %817, %770 : vector<2x32xf32>
    %827 = arith.addf %825, %826 : vector<2x32xf32>
    %828 = tpu.concatenate %744, %827, %801 in 1 : vector<2x16xf32>, vector<2x32xf32>, vector<2x32xf32> -> vector<2x80xf32>
    %cst_199 = arith.constant dense<0.000000e+00> : vector<2x32xf32>
    %829 = tpu.matmul %828, %738, %cst_199 {dimension_numbers = #tpu.dot_dimension_numbers<[1], [0], [0], [1], [0, 0, 1, 1], [], []>} : vector<2x80xf32>, vector<80x32xf32>, vector<2x32xf32> -> vector<2x32xf32>
    %830 = vector.broadcast %739 : vector<1x32xf32> to vector<2x32xf32>
    %831 = arith.addf %829, %830 : vector<2x32xf32>
    %832 = math.tanh %831 : vector<2x32xf32>
    %cst_200 = arith.constant dense<0.000000e+00> : vector<2x20xf32>
    %833 = tpu.matmul %832, %740, %cst_200 {dimension_numbers = #tpu.dot_dimension_numbers<[1], [0], [0], [1], [0, 0, 1, 1], [], []>} : vector<2x32xf32>, vector<32x20xf32>, vector<2x20xf32> -> vector<2x20xf32>
    %834 = vector.broadcast %741 : vector<1x20xf32> to vector<2x20xf32>
    %835 = arith.addf %833, %834 : vector<2x20xf32>
    %c0_201 = arith.constant 0 : index
    %c0_202 = arith.constant 0 : index
    %c0_203 = arith.constant 0 : index
    %836 = vector.load %arg4[%c0_201, %c0_202, %c0_203] : memref<2x5x20xf32, #tpu.memory_space<vmem>>, vector<2x1x20xf32>
    %837 = vector.shape_cast %836 : vector<2x1x20xf32> to vector<2x20xf32>
    %c0_204 = arith.constant 0 : index
    %c0_205 = arith.constant 0 : index
    %838 = vector.load %arg5[%c0_204, %c0_205] : memref<2x5xf32, #tpu.memory_space<vmem>>, vector<2x1xf32>
    %cst_206 = arith.constant dense<0xFF800000> : vector<2xf32>
    %839 = vector.multi_reduction <maximumf>, %835, %cst_206 [1] : vector<2x20xf32> to vector<2xf32>
    %840 = vector.shape_cast %839 : vector<2xf32> to vector<2x1xf32>
    %841 = vector.broadcast %840 : vector<2x1xf32> to vector<2x20xf32>
    %842 = arith.subf %835, %841 : vector<2x20xf32>
    %843 = math.exp %842 : vector<2x20xf32>
    %cst_207 = arith.constant dense<0.000000e+00> : vector<2xf32>
    %844 = vector.multi_reduction <add>, %843, %cst_207 [1] : vector<2x20xf32> to vector<2xf32>
    %845 = vector.shape_cast %844 : vector<2xf32> to vector<2x1xf32>
    %846 = math.log %845 : vector<2x1xf32>
    %847 = arith.addf %846, %840 : vector<2x1xf32>
    %848 = arith.mulf %837, %835 : vector<2x20xf32>
    %cst_208 = arith.constant dense<0.000000e+00> : vector<2xf32>
    %849 = vector.multi_reduction <add>, %848, %cst_208 [1] : vector<2x20xf32> to vector<2xf32>
    %850 = vector.shape_cast %849 : vector<2xf32> to vector<2x1xf32>
    %cst_209 = arith.constant dense<0.000000e+00> : vector<1xf32>
    %851 = vector.multi_reduction <add>, %838, %cst_209 [0] : vector<2x1xf32> to vector<1xf32>
    %852 = vector.shape_cast %851 : vector<1xf32> to vector<1x1xf32>
    %cst_210 = arith.constant 1.000000e+00 : f32
    %853 = vector.broadcast %cst_210 : f32 to vector<1x1xf32>
    %854 = arith.maximumf %852, %853 : vector<1x1xf32>
    %855 = arith.subf %847, %850 : vector<2x1xf32>
    %856 = arith.mulf %838, %855 : vector<2x1xf32>
    %857 = vector.shape_cast %856 : vector<2x1xf32> to vector<1x2x1xf32>
    %cst_211 = arith.constant dense<0.000000e+00> : vector<1xf32>
    %858 = vector.multi_reduction <add>, %857, %cst_211 [1, 2] : vector<1x2x1xf32> to vector<1xf32>
    %859 = vector.shape_cast %858 : vector<1xf32> to vector<1x1x1xf32>
    %860 = vector.extract %859[0, 0, 0] : f32 from vector<1x1x1xf32>
    %861 = tpu.reciprocal %854 {approx = true} : vector<1x1xf32> -> vector<1x1xf32>
    %862 = vector.broadcast %860 : f32 to vector<1x1xf32>
    %863 = arith.mulf %862, %861 : vector<1x1xf32>
    %864 = arith.addf %742, %863 : vector<1x1xf32>
    %865 = vector.extract_strided_slice %729 {offsets = [0, 1, 0], sizes = [2, 1, 16], strides = [1, 1, 1]} : vector<2x5x16xf32> to vector<2x1x16xf32>
    %866 = vector.shape_cast %865 : vector<2x1x16xf32> to vector<2x16xf32>
    %867 = tpu.concatenate %866, %827 in 1 : vector<2x16xf32>, vector<2x32xf32> -> vector<2x48xf32>
    %cst_212 = arith.constant dense<0.000000e+00> : vector<2x128xf32>
    %868 = tpu.matmul %867, %732, %cst_212 {dimension_numbers = #tpu.dot_dimension_numbers<[1], [0], [0], [1], [0, 0, 1, 1], [], []>} : vector<2x48xf32>, vector<48x128xf32>, vector<2x128xf32> -> vector<2x128xf32>
    %869 = vector.broadcast %733 : vector<1x128xf32> to vector<2x128xf32>
    %870 = arith.addf %868, %869 : vector<2x128xf32>
    %871 = vector.extract_strided_slice %870 {offsets = [0, 0], sizes = [2, 32], strides = [1, 1]} : vector<2x128xf32> to vector<2x32xf32>
    %872 = arith.negf %871 : vector<2x32xf32>
    %873 = math.exp %872 : vector<2x32xf32>
    %cst_213 = arith.constant 1.000000e+00 : f32
    %874 = vector.broadcast %cst_213 : f32 to vector<2x32xf32>
    %875 = arith.addf %874, %873 : vector<2x32xf32>
    %876 = arith.divf %874, %875 : vector<2x32xf32>
    %877 = vector.extract_strided_slice %870 {offsets = [0, 32], sizes = [2, 32], strides = [1, 1]} : vector<2x128xf32> to vector<2x32xf32>
    %878 = arith.negf %877 : vector<2x32xf32>
    %879 = math.exp %878 : vector<2x32xf32>
    %cst_214 = arith.constant 1.000000e+00 : f32
    %880 = vector.broadcast %cst_214 : f32 to vector<2x32xf32>
    %881 = arith.addf %880, %879 : vector<2x32xf32>
    %882 = arith.divf %880, %881 : vector<2x32xf32>
    %883 = vector.extract_strided_slice %870 {offsets = [0, 64], sizes = [2, 32], strides = [1, 1]} : vector<2x128xf32> to vector<2x32xf32>
    %884 = vector.extract_strided_slice %870 {offsets = [0, 96], sizes = [2, 32], strides = [1, 1]} : vector<2x128xf32> to vector<2x32xf32>
    %885 = arith.mulf %876, %884 : vector<2x32xf32>
    %886 = arith.addf %883, %885 : vector<2x32xf32>
    %887 = math.tanh %886 : vector<2x32xf32>
    %cst_215 = arith.constant 1.000000e+00 : f32
    %888 = vector.broadcast %cst_215 : f32 to vector<2x32xf32>
    %889 = arith.subf %888, %882 : vector<2x32xf32>
    %890 = arith.mulf %889, %887 : vector<2x32xf32>
    %891 = arith.mulf %882, %827 : vector<2x32xf32>
    %892 = arith.addf %890, %891 : vector<2x32xf32>
    %cst_216 = arith.constant dense<0.000000e+00> : vector<2x32xf32>
    %893 = tpu.matmul %892, %736, %cst_216 {dimension_numbers = #tpu.dot_dimension_numbers<[1], [0], [0], [1], [0, 0, 1, 1], [], []>} : vector<2x32xf32>, vector<32x32xf32>, vector<2x32xf32> -> vector<2x32xf32>
    %894 = vector.broadcast %737 : vector<1x32xf32> to vector<2x32xf32>
    %895 = arith.addf %893, %894 : vector<2x32xf32>
    %896 = vector.shape_cast %895 : vector<2x32xf32> to vector<2x1x32xf32>
    %897 = vector.broadcast %896 : vector<2x1x32xf32> to vector<2x8x32xf32>
    %898 = arith.addf %728, %897 : vector<2x8x32xf32>
    %899 = math.tanh %898 : vector<2x8x32xf32>
    %900 = vector.shape_cast %730 : vector<1x32xf32> to vector<1x1x32xf32>
    %901 = vector.broadcast %900 : vector<1x1x32xf32> to vector<2x8x32xf32>
    %902 = arith.mulf %899, %901 : vector<2x8x32xf32>
    %cst_217 = arith.constant dense<0.000000e+00> : vector<2x8xf32>
    %903 = vector.multi_reduction <add>, %902, %cst_217 [2] : vector<2x8x32xf32> to vector<2x8xf32>
    %904 = vector.broadcast %731 : vector<1x1xf32> to vector<2x8xf32>
    %905 = arith.addf %903, %904 : vector<2x8xf32>
    %cst_218 = arith.constant 0.000000e+00 : f32
    %906 = vector.broadcast %cst_218 : f32 to vector<2x8xf32>
    %907 = arith.cmpf ogt, %0, %906 : vector<2x8xf32>
    %cst_219 = arith.constant -1.000000e+30 : f32
    %908 = vector.broadcast %cst_219 : f32 to vector<2x8xf32>
    %909 = arith.select %907, %905, %908 : vector<2x8xi1>, vector<2x8xf32>
    %cst_220 = arith.constant dense<0xFF800000> : vector<2xf32>
    %910 = vector.multi_reduction <maximumf>, %909, %cst_220 [1] : vector<2x8xf32> to vector<2xf32>
    %911 = vector.shape_cast %910 : vector<2xf32> to vector<2x1xf32>
    %912 = vector.broadcast %911 : vector<2x1xf32> to vector<2x8xf32>
    %913 = arith.subf %909, %912 : vector<2x8xf32>
    %914 = math.exp %913 : vector<2x8xf32>
    %cst_221 = arith.constant dense<0.000000e+00> : vector<2xf32>
    %915 = vector.multi_reduction <add>, %914, %cst_221 [1] : vector<2x8xf32> to vector<2xf32>
    %916 = vector.shape_cast %915 : vector<2xf32> to vector<2x1xf32>
    %917 = tpu.reciprocal %916 {approx = true} : vector<2x1xf32> -> vector<2x1xf32>
    %918 = vector.broadcast %917 : vector<2x1xf32> to vector<2x8xf32>
    %919 = arith.mulf %914, %918 : vector<2x8xf32>
    %920 = vector.shape_cast %919 : vector<2x8xf32> to vector<2x8x1xf32>
    %921 = vector.broadcast %920 : vector<2x8x1xf32> to vector<2x8x32xf32>
    %922 = arith.mulf %921, %707 : vector<2x8x32xf32>
    %cst_222 = arith.constant dense<0.000000e+00> : vector<2x32xf32>
    %923 = vector.multi_reduction <add>, %922, %cst_222 [1] : vector<2x8x32xf32> to vector<2x32xf32>
    %924 = tpu.concatenate %923, %892 in 1 : vector<2x32xf32>, vector<2x32xf32> -> vector<2x64xf32>
    %cst_223 = arith.constant dense<0.000000e+00> : vector<2x128xf32>
    %925 = tpu.matmul %924, %734, %cst_223 {dimension_numbers = #tpu.dot_dimension_numbers<[1], [0], [0], [1], [0, 0, 1, 1], [], []>} : vector<2x64xf32>, vector<64x128xf32>, vector<2x128xf32> -> vector<2x128xf32>
    %926 = vector.broadcast %735 : vector<1x128xf32> to vector<2x128xf32>
    %927 = arith.addf %925, %926 : vector<2x128xf32>
    %928 = vector.extract_strided_slice %927 {offsets = [0, 0], sizes = [2, 32], strides = [1, 1]} : vector<2x128xf32> to vector<2x32xf32>
    %929 = arith.negf %928 : vector<2x32xf32>
    %930 = math.exp %929 : vector<2x32xf32>
    %cst_224 = arith.constant 1.000000e+00 : f32
    %931 = vector.broadcast %cst_224 : f32 to vector<2x32xf32>
    %932 = arith.addf %931, %930 : vector<2x32xf32>
    %933 = arith.divf %931, %932 : vector<2x32xf32>
    %934 = vector.extract_strided_slice %927 {offsets = [0, 32], sizes = [2, 32], strides = [1, 1]} : vector<2x128xf32> to vector<2x32xf32>
    %935 = arith.negf %934 : vector<2x32xf32>
    %936 = math.exp %935 : vector<2x32xf32>
    %cst_225 = arith.constant 1.000000e+00 : f32
    %937 = vector.broadcast %cst_225 : f32 to vector<2x32xf32>
    %938 = arith.addf %937, %936 : vector<2x32xf32>
    %939 = arith.divf %937, %938 : vector<2x32xf32>
    %940 = vector.extract_strided_slice %927 {offsets = [0, 64], sizes = [2, 32], strides = [1, 1]} : vector<2x128xf32> to vector<2x32xf32>
    %941 = vector.extract_strided_slice %927 {offsets = [0, 96], sizes = [2, 32], strides = [1, 1]} : vector<2x128xf32> to vector<2x32xf32>
    %942 = arith.mulf %933, %941 : vector<2x32xf32>
    %943 = arith.addf %940, %942 : vector<2x32xf32>
    %944 = math.tanh %943 : vector<2x32xf32>
    %cst_226 = arith.constant 1.000000e+00 : f32
    %945 = vector.broadcast %cst_226 : f32 to vector<2x32xf32>
    %946 = arith.subf %945, %939 : vector<2x32xf32>
    %947 = arith.mulf %946, %944 : vector<2x32xf32>
    %948 = arith.mulf %939, %892 : vector<2x32xf32>
    %949 = arith.addf %947, %948 : vector<2x32xf32>
    %950 = tpu.concatenate %866, %949, %923 in 1 : vector<2x16xf32>, vector<2x32xf32>, vector<2x32xf32> -> vector<2x80xf32>
    %cst_227 = arith.constant dense<0.000000e+00> : vector<2x32xf32>
    %951 = tpu.matmul %950, %738, %cst_227 {dimension_numbers = #tpu.dot_dimension_numbers<[1], [0], [0], [1], [0, 0, 1, 1], [], []>} : vector<2x80xf32>, vector<80x32xf32>, vector<2x32xf32> -> vector<2x32xf32>
    %952 = vector.broadcast %739 : vector<1x32xf32> to vector<2x32xf32>
    %953 = arith.addf %951, %952 : vector<2x32xf32>
    %954 = math.tanh %953 : vector<2x32xf32>
    %cst_228 = arith.constant dense<0.000000e+00> : vector<2x20xf32>
    %955 = tpu.matmul %954, %740, %cst_228 {dimension_numbers = #tpu.dot_dimension_numbers<[1], [0], [0], [1], [0, 0, 1, 1], [], []>} : vector<2x32xf32>, vector<32x20xf32>, vector<2x20xf32> -> vector<2x20xf32>
    %956 = vector.broadcast %741 : vector<1x20xf32> to vector<2x20xf32>
    %957 = arith.addf %955, %956 : vector<2x20xf32>
    %c0_229 = arith.constant 0 : index
    %c1_230 = arith.constant 1 : index
    %c0_231 = arith.constant 0 : index
    %958 = vector.load %arg4[%c0_229, %c1_230, %c0_231] : memref<2x5x20xf32, #tpu.memory_space<vmem>>, vector<2x1x20xf32>
    %959 = vector.shape_cast %958 : vector<2x1x20xf32> to vector<2x20xf32>
    %c0_232 = arith.constant 0 : index
    %c1_233 = arith.constant 1 : index
    %960 = vector.load %arg5[%c0_232, %c1_233] : memref<2x5xf32, #tpu.memory_space<vmem>>, vector<2x1xf32>
    %cst_234 = arith.constant dense<0xFF800000> : vector<2xf32>
    %961 = vector.multi_reduction <maximumf>, %957, %cst_234 [1] : vector<2x20xf32> to vector<2xf32>
    %962 = vector.shape_cast %961 : vector<2xf32> to vector<2x1xf32>
    %963 = vector.broadcast %962 : vector<2x1xf32> to vector<2x20xf32>
    %964 = arith.subf %957, %963 : vector<2x20xf32>
    %965 = math.exp %964 : vector<2x20xf32>
    %cst_235 = arith.constant dense<0.000000e+00> : vector<2xf32>
    %966 = vector.multi_reduction <add>, %965, %cst_235 [1] : vector<2x20xf32> to vector<2xf32>
    %967 = vector.shape_cast %966 : vector<2xf32> to vector<2x1xf32>
    %968 = math.log %967 : vector<2x1xf32>
    %969 = arith.addf %968, %962 : vector<2x1xf32>
    %970 = arith.mulf %959, %957 : vector<2x20xf32>
    %cst_236 = arith.constant dense<0.000000e+00> : vector<2xf32>
    %971 = vector.multi_reduction <add>, %970, %cst_236 [1] : vector<2x20xf32> to vector<2xf32>
    %972 = vector.shape_cast %971 : vector<2xf32> to vector<2x1xf32>
    %cst_237 = arith.constant dense<0.000000e+00> : vector<1xf32>
    %973 = vector.multi_reduction <add>, %960, %cst_237 [0] : vector<2x1xf32> to vector<1xf32>
    %974 = vector.shape_cast %973 : vector<1xf32> to vector<1x1xf32>
    %cst_238 = arith.constant 1.000000e+00 : f32
    %975 = vector.broadcast %cst_238 : f32 to vector<1x1xf32>
    %976 = arith.maximumf %974, %975 : vector<1x1xf32>
    %977 = arith.subf %969, %972 : vector<2x1xf32>
    %978 = arith.mulf %960, %977 : vector<2x1xf32>
    %979 = vector.shape_cast %978 : vector<2x1xf32> to vector<1x2x1xf32>
    %cst_239 = arith.constant dense<0.000000e+00> : vector<1xf32>
    %980 = vector.multi_reduction <add>, %979, %cst_239 [1, 2] : vector<1x2x1xf32> to vector<1xf32>
    %981 = vector.shape_cast %980 : vector<1xf32> to vector<1x1x1xf32>
    %982 = vector.extract %981[0, 0, 0] : f32 from vector<1x1x1xf32>
    %983 = tpu.reciprocal %976 {approx = true} : vector<1x1xf32> -> vector<1x1xf32>
    %984 = vector.broadcast %982 : f32 to vector<1x1xf32>
    %985 = arith.mulf %984, %983 : vector<1x1xf32>
    %986 = arith.addf %864, %985 : vector<1x1xf32>
    %987 = vector.extract_strided_slice %729 {offsets = [0, 2, 0], sizes = [2, 1, 16], strides = [1, 1, 1]} : vector<2x5x16xf32> to vector<2x1x16xf32>
    %988 = vector.shape_cast %987 : vector<2x1x16xf32> to vector<2x16xf32>
    %989 = tpu.concatenate %988, %949 in 1 : vector<2x16xf32>, vector<2x32xf32> -> vector<2x48xf32>
    %cst_240 = arith.constant dense<0.000000e+00> : vector<2x128xf32>
    %990 = tpu.matmul %989, %732, %cst_240 {dimension_numbers = #tpu.dot_dimension_numbers<[1], [0], [0], [1], [0, 0, 1, 1], [], []>} : vector<2x48xf32>, vector<48x128xf32>, vector<2x128xf32> -> vector<2x128xf32>
    %991 = vector.broadcast %733 : vector<1x128xf32> to vector<2x128xf32>
    %992 = arith.addf %990, %991 : vector<2x128xf32>
    %993 = vector.extract_strided_slice %992 {offsets = [0, 0], sizes = [2, 32], strides = [1, 1]} : vector<2x128xf32> to vector<2x32xf32>
    %994 = arith.negf %993 : vector<2x32xf32>
    %995 = math.exp %994 : vector<2x32xf32>
    %cst_241 = arith.constant 1.000000e+00 : f32
    %996 = vector.broadcast %cst_241 : f32 to vector<2x32xf32>
    %997 = arith.addf %996, %995 : vector<2x32xf32>
    %998 = arith.divf %996, %997 : vector<2x32xf32>
    %999 = vector.extract_strided_slice %992 {offsets = [0, 32], sizes = [2, 32], strides = [1, 1]} : vector<2x128xf32> to vector<2x32xf32>
    %1000 = arith.negf %999 : vector<2x32xf32>
    %1001 = math.exp %1000 : vector<2x32xf32>
    %cst_242 = arith.constant 1.000000e+00 : f32
    %1002 = vector.broadcast %cst_242 : f32 to vector<2x32xf32>
    %1003 = arith.addf %1002, %1001 : vector<2x32xf32>
    %1004 = arith.divf %1002, %1003 : vector<2x32xf32>
    %1005 = vector.extract_strided_slice %992 {offsets = [0, 64], sizes = [2, 32], strides = [1, 1]} : vector<2x128xf32> to vector<2x32xf32>
    %1006 = vector.extract_strided_slice %992 {offsets = [0, 96], sizes = [2, 32], strides = [1, 1]} : vector<2x128xf32> to vector<2x32xf32>
    %1007 = arith.mulf %998, %1006 : vector<2x32xf32>
    %1008 = arith.addf %1005, %1007 : vector<2x32xf32>
    %1009 = math.tanh %1008 : vector<2x32xf32>
    %cst_243 = arith.constant 1.000000e+00 : f32
    %1010 = vector.broadcast %cst_243 : f32 to vector<2x32xf32>
    %1011 = arith.subf %1010, %1004 : vector<2x32xf32>
    %1012 = arith.mulf %1011, %1009 : vector<2x32xf32>
    %1013 = arith.mulf %1004, %949 : vector<2x32xf32>
    %1014 = arith.addf %1012, %1013 : vector<2x32xf32>
    %cst_244 = arith.constant dense<0.000000e+00> : vector<2x32xf32>
    %1015 = tpu.matmul %1014, %736, %cst_244 {dimension_numbers = #tpu.dot_dimension_numbers<[1], [0], [0], [1], [0, 0, 1, 1], [], []>} : vector<2x32xf32>, vector<32x32xf32>, vector<2x32xf32> -> vector<2x32xf32>
    %1016 = vector.broadcast %737 : vector<1x32xf32> to vector<2x32xf32>
    %1017 = arith.addf %1015, %1016 : vector<2x32xf32>
    %1018 = vector.shape_cast %1017 : vector<2x32xf32> to vector<2x1x32xf32>
    %1019 = vector.broadcast %1018 : vector<2x1x32xf32> to vector<2x8x32xf32>
    %1020 = arith.addf %728, %1019 : vector<2x8x32xf32>
    %1021 = math.tanh %1020 : vector<2x8x32xf32>
    %1022 = vector.shape_cast %730 : vector<1x32xf32> to vector<1x1x32xf32>
    %1023 = vector.broadcast %1022 : vector<1x1x32xf32> to vector<2x8x32xf32>
    %1024 = arith.mulf %1021, %1023 : vector<2x8x32xf32>
    %cst_245 = arith.constant dense<0.000000e+00> : vector<2x8xf32>
    %1025 = vector.multi_reduction <add>, %1024, %cst_245 [2] : vector<2x8x32xf32> to vector<2x8xf32>
    %1026 = vector.broadcast %731 : vector<1x1xf32> to vector<2x8xf32>
    %1027 = arith.addf %1025, %1026 : vector<2x8xf32>
    %cst_246 = arith.constant 0.000000e+00 : f32
    %1028 = vector.broadcast %cst_246 : f32 to vector<2x8xf32>
    %1029 = arith.cmpf ogt, %0, %1028 : vector<2x8xf32>
    %cst_247 = arith.constant -1.000000e+30 : f32
    %1030 = vector.broadcast %cst_247 : f32 to vector<2x8xf32>
    %1031 = arith.select %1029, %1027, %1030 : vector<2x8xi1>, vector<2x8xf32>
    %cst_248 = arith.constant dense<0xFF800000> : vector<2xf32>
    %1032 = vector.multi_reduction <maximumf>, %1031, %cst_248 [1] : vector<2x8xf32> to vector<2xf32>
    %1033 = vector.shape_cast %1032 : vector<2xf32> to vector<2x1xf32>
    %1034 = vector.broadcast %1033 : vector<2x1xf32> to vector<2x8xf32>
    %1035 = arith.subf %1031, %1034 : vector<2x8xf32>
    %1036 = math.exp %1035 : vector<2x8xf32>
    %cst_249 = arith.constant dense<0.000000e+00> : vector<2xf32>
    %1037 = vector.multi_reduction <add>, %1036, %cst_249 [1] : vector<2x8xf32> to vector<2xf32>
    %1038 = vector.shape_cast %1037 : vector<2xf32> to vector<2x1xf32>
    %1039 = tpu.reciprocal %1038 {approx = true} : vector<2x1xf32> -> vector<2x1xf32>
    %1040 = vector.broadcast %1039 : vector<2x1xf32> to vector<2x8xf32>
    %1041 = arith.mulf %1036, %1040 : vector<2x8xf32>
    %1042 = vector.shape_cast %1041 : vector<2x8xf32> to vector<2x8x1xf32>
    %1043 = vector.broadcast %1042 : vector<2x8x1xf32> to vector<2x8x32xf32>
    %1044 = arith.mulf %1043, %707 : vector<2x8x32xf32>
    %cst_250 = arith.constant dense<0.000000e+00> : vector<2x32xf32>
    %1045 = vector.multi_reduction <add>, %1044, %cst_250 [1] : vector<2x8x32xf32> to vector<2x32xf32>
    %1046 = tpu.concatenate %1045, %1014 in 1 : vector<2x32xf32>, vector<2x32xf32> -> vector<2x64xf32>
    %cst_251 = arith.constant dense<0.000000e+00> : vector<2x128xf32>
    %1047 = tpu.matmul %1046, %734, %cst_251 {dimension_numbers = #tpu.dot_dimension_numbers<[1], [0], [0], [1], [0, 0, 1, 1], [], []>} : vector<2x64xf32>, vector<64x128xf32>, vector<2x128xf32> -> vector<2x128xf32>
    %1048 = vector.broadcast %735 : vector<1x128xf32> to vector<2x128xf32>
    %1049 = arith.addf %1047, %1048 : vector<2x128xf32>
    %1050 = vector.extract_strided_slice %1049 {offsets = [0, 0], sizes = [2, 32], strides = [1, 1]} : vector<2x128xf32> to vector<2x32xf32>
    %1051 = arith.negf %1050 : vector<2x32xf32>
    %1052 = math.exp %1051 : vector<2x32xf32>
    %cst_252 = arith.constant 1.000000e+00 : f32
    %1053 = vector.broadcast %cst_252 : f32 to vector<2x32xf32>
    %1054 = arith.addf %1053, %1052 : vector<2x32xf32>
    %1055 = arith.divf %1053, %1054 : vector<2x32xf32>
    %1056 = vector.extract_strided_slice %1049 {offsets = [0, 32], sizes = [2, 32], strides = [1, 1]} : vector<2x128xf32> to vector<2x32xf32>
    %1057 = arith.negf %1056 : vector<2x32xf32>
    %1058 = math.exp %1057 : vector<2x32xf32>
    %cst_253 = arith.constant 1.000000e+00 : f32
    %1059 = vector.broadcast %cst_253 : f32 to vector<2x32xf32>
    %1060 = arith.addf %1059, %1058 : vector<2x32xf32>
    %1061 = arith.divf %1059, %1060 : vector<2x32xf32>
    %1062 = vector.extract_strided_slice %1049 {offsets = [0, 64], sizes = [2, 32], strides = [1, 1]} : vector<2x128xf32> to vector<2x32xf32>
    %1063 = vector.extract_strided_slice %1049 {offsets = [0, 96], sizes = [2, 32], strides = [1, 1]} : vector<2x128xf32> to vector<2x32xf32>
    %1064 = arith.mulf %1055, %1063 : vector<2x32xf32>
    %1065 = arith.addf %1062, %1064 : vector<2x32xf32>
    %1066 = math.tanh %1065 : vector<2x32xf32>
    %cst_254 = arith.constant 1.000000e+00 : f32
    %1067 = vector.broadcast %cst_254 : f32 to vector<2x32xf32>
    %1068 = arith.subf %1067, %1061 : vector<2x32xf32>
    %1069 = arith.mulf %1068, %1066 : vector<2x32xf32>
    %1070 = arith.mulf %1061, %1014 : vector<2x32xf32>
    %1071 = arith.addf %1069, %1070 : vector<2x32xf32>
    %1072 = tpu.concatenate %988, %1071, %1045 in 1 : vector<2x16xf32>, vector<2x32xf32>, vector<2x32xf32> -> vector<2x80xf32>
    %cst_255 = arith.constant dense<0.000000e+00> : vector<2x32xf32>
    %1073 = tpu.matmul %1072, %738, %cst_255 {dimension_numbers = #tpu.dot_dimension_numbers<[1], [0], [0], [1], [0, 0, 1, 1], [], []>} : vector<2x80xf32>, vector<80x32xf32>, vector<2x32xf32> -> vector<2x32xf32>
    %1074 = vector.broadcast %739 : vector<1x32xf32> to vector<2x32xf32>
    %1075 = arith.addf %1073, %1074 : vector<2x32xf32>
    %1076 = math.tanh %1075 : vector<2x32xf32>
    %cst_256 = arith.constant dense<0.000000e+00> : vector<2x20xf32>
    %1077 = tpu.matmul %1076, %740, %cst_256 {dimension_numbers = #tpu.dot_dimension_numbers<[1], [0], [0], [1], [0, 0, 1, 1], [], []>} : vector<2x32xf32>, vector<32x20xf32>, vector<2x20xf32> -> vector<2x20xf32>
    %1078 = vector.broadcast %741 : vector<1x20xf32> to vector<2x20xf32>
    %1079 = arith.addf %1077, %1078 : vector<2x20xf32>
    %c0_257 = arith.constant 0 : index
    %c2_258 = arith.constant 2 : index
    %c0_259 = arith.constant 0 : index
    %1080 = vector.load %arg4[%c0_257, %c2_258, %c0_259] : memref<2x5x20xf32, #tpu.memory_space<vmem>>, vector<2x1x20xf32>
    %1081 = vector.shape_cast %1080 : vector<2x1x20xf32> to vector<2x20xf32>
    %c0_260 = arith.constant 0 : index
    %c2_261 = arith.constant 2 : index
    %1082 = vector.load %arg5[%c0_260, %c2_261] : memref<2x5xf32, #tpu.memory_space<vmem>>, vector<2x1xf32>
    %cst_262 = arith.constant dense<0xFF800000> : vector<2xf32>
    %1083 = vector.multi_reduction <maximumf>, %1079, %cst_262 [1] : vector<2x20xf32> to vector<2xf32>
    %1084 = vector.shape_cast %1083 : vector<2xf32> to vector<2x1xf32>
    %1085 = vector.broadcast %1084 : vector<2x1xf32> to vector<2x20xf32>
    %1086 = arith.subf %1079, %1085 : vector<2x20xf32>
    %1087 = math.exp %1086 : vector<2x20xf32>
    %cst_263 = arith.constant dense<0.000000e+00> : vector<2xf32>
    %1088 = vector.multi_reduction <add>, %1087, %cst_263 [1] : vector<2x20xf32> to vector<2xf32>
    %1089 = vector.shape_cast %1088 : vector<2xf32> to vector<2x1xf32>
    %1090 = math.log %1089 : vector<2x1xf32>
    %1091 = arith.addf %1090, %1084 : vector<2x1xf32>
    %1092 = arith.mulf %1081, %1079 : vector<2x20xf32>
    %cst_264 = arith.constant dense<0.000000e+00> : vector<2xf32>
    %1093 = vector.multi_reduction <add>, %1092, %cst_264 [1] : vector<2x20xf32> to vector<2xf32>
    %1094 = vector.shape_cast %1093 : vector<2xf32> to vector<2x1xf32>
    %cst_265 = arith.constant dense<0.000000e+00> : vector<1xf32>
    %1095 = vector.multi_reduction <add>, %1082, %cst_265 [0] : vector<2x1xf32> to vector<1xf32>
    %1096 = vector.shape_cast %1095 : vector<1xf32> to vector<1x1xf32>
    %cst_266 = arith.constant 1.000000e+00 : f32
    %1097 = vector.broadcast %cst_266 : f32 to vector<1x1xf32>
    %1098 = arith.maximumf %1096, %1097 : vector<1x1xf32>
    %1099 = arith.subf %1091, %1094 : vector<2x1xf32>
    %1100 = arith.mulf %1082, %1099 : vector<2x1xf32>
    %1101 = vector.shape_cast %1100 : vector<2x1xf32> to vector<1x2x1xf32>
    %cst_267 = arith.constant dense<0.000000e+00> : vector<1xf32>
    %1102 = vector.multi_reduction <add>, %1101, %cst_267 [1, 2] : vector<1x2x1xf32> to vector<1xf32>
    %1103 = vector.shape_cast %1102 : vector<1xf32> to vector<1x1x1xf32>
    %1104 = vector.extract %1103[0, 0, 0] : f32 from vector<1x1x1xf32>
    %1105 = tpu.reciprocal %1098 {approx = true} : vector<1x1xf32> -> vector<1x1xf32>
    %1106 = vector.broadcast %1104 : f32 to vector<1x1xf32>
    %1107 = arith.mulf %1106, %1105 : vector<1x1xf32>
    %1108 = arith.addf %986, %1107 : vector<1x1xf32>
    %1109 = vector.extract_strided_slice %729 {offsets = [0, 3, 0], sizes = [2, 1, 16], strides = [1, 1, 1]} : vector<2x5x16xf32> to vector<2x1x16xf32>
    %1110 = vector.shape_cast %1109 : vector<2x1x16xf32> to vector<2x16xf32>
    %1111 = tpu.concatenate %1110, %1071 in 1 : vector<2x16xf32>, vector<2x32xf32> -> vector<2x48xf32>
    %cst_268 = arith.constant dense<0.000000e+00> : vector<2x128xf32>
    %1112 = tpu.matmul %1111, %732, %cst_268 {dimension_numbers = #tpu.dot_dimension_numbers<[1], [0], [0], [1], [0, 0, 1, 1], [], []>} : vector<2x48xf32>, vector<48x128xf32>, vector<2x128xf32> -> vector<2x128xf32>
    %1113 = vector.broadcast %733 : vector<1x128xf32> to vector<2x128xf32>
    %1114 = arith.addf %1112, %1113 : vector<2x128xf32>
    %1115 = vector.extract_strided_slice %1114 {offsets = [0, 0], sizes = [2, 32], strides = [1, 1]} : vector<2x128xf32> to vector<2x32xf32>
    %1116 = arith.negf %1115 : vector<2x32xf32>
    %1117 = math.exp %1116 : vector<2x32xf32>
    %cst_269 = arith.constant 1.000000e+00 : f32
    %1118 = vector.broadcast %cst_269 : f32 to vector<2x32xf32>
    %1119 = arith.addf %1118, %1117 : vector<2x32xf32>
    %1120 = arith.divf %1118, %1119 : vector<2x32xf32>
    %1121 = vector.extract_strided_slice %1114 {offsets = [0, 32], sizes = [2, 32], strides = [1, 1]} : vector<2x128xf32> to vector<2x32xf32>
    %1122 = arith.negf %1121 : vector<2x32xf32>
    %1123 = math.exp %1122 : vector<2x32xf32>
    %cst_270 = arith.constant 1.000000e+00 : f32
    %1124 = vector.broadcast %cst_270 : f32 to vector<2x32xf32>
    %1125 = arith.addf %1124, %1123 : vector<2x32xf32>
    %1126 = arith.divf %1124, %1125 : vector<2x32xf32>
    %1127 = vector.extract_strided_slice %1114 {offsets = [0, 64], sizes = [2, 32], strides = [1, 1]} : vector<2x128xf32> to vector<2x32xf32>
    %1128 = vector.extract_strided_slice %1114 {offsets = [0, 96], sizes = [2, 32], strides = [1, 1]} : vector<2x128xf32> to vector<2x32xf32>
    %1129 = arith.mulf %1120, %1128 : vector<2x32xf32>
    %1130 = arith.addf %1127, %1129 : vector<2x32xf32>
    %1131 = math.tanh %1130 : vector<2x32xf32>
    %cst_271 = arith.constant 1.000000e+00 : f32
    %1132 = vector.broadcast %cst_271 : f32 to vector<2x32xf32>
    %1133 = arith.subf %1132, %1126 : vector<2x32xf32>
    %1134 = arith.mulf %1133, %1131 : vector<2x32xf32>
    %1135 = arith.mulf %1126, %1071 : vector<2x32xf32>
    %1136 = arith.addf %1134, %1135 : vector<2x32xf32>
    %cst_272 = arith.constant dense<0.000000e+00> : vector<2x32xf32>
    %1137 = tpu.matmul %1136, %736, %cst_272 {dimension_numbers = #tpu.dot_dimension_numbers<[1], [0], [0], [1], [0, 0, 1, 1], [], []>} : vector<2x32xf32>, vector<32x32xf32>, vector<2x32xf32> -> vector<2x32xf32>
    %1138 = vector.broadcast %737 : vector<1x32xf32> to vector<2x32xf32>
    %1139 = arith.addf %1137, %1138 : vector<2x32xf32>
    %1140 = vector.shape_cast %1139 : vector<2x32xf32> to vector<2x1x32xf32>
    %1141 = vector.broadcast %1140 : vector<2x1x32xf32> to vector<2x8x32xf32>
    %1142 = arith.addf %728, %1141 : vector<2x8x32xf32>
    %1143 = math.tanh %1142 : vector<2x8x32xf32>
    %1144 = vector.shape_cast %730 : vector<1x32xf32> to vector<1x1x32xf32>
    %1145 = vector.broadcast %1144 : vector<1x1x32xf32> to vector<2x8x32xf32>
    %1146 = arith.mulf %1143, %1145 : vector<2x8x32xf32>
    %cst_273 = arith.constant dense<0.000000e+00> : vector<2x8xf32>
    %1147 = vector.multi_reduction <add>, %1146, %cst_273 [2] : vector<2x8x32xf32> to vector<2x8xf32>
    %1148 = vector.broadcast %731 : vector<1x1xf32> to vector<2x8xf32>
    %1149 = arith.addf %1147, %1148 : vector<2x8xf32>
    %cst_274 = arith.constant 0.000000e+00 : f32
    %1150 = vector.broadcast %cst_274 : f32 to vector<2x8xf32>
    %1151 = arith.cmpf ogt, %0, %1150 : vector<2x8xf32>
    %cst_275 = arith.constant -1.000000e+30 : f32
    %1152 = vector.broadcast %cst_275 : f32 to vector<2x8xf32>
    %1153 = arith.select %1151, %1149, %1152 : vector<2x8xi1>, vector<2x8xf32>
    %cst_276 = arith.constant dense<0xFF800000> : vector<2xf32>
    %1154 = vector.multi_reduction <maximumf>, %1153, %cst_276 [1] : vector<2x8xf32> to vector<2xf32>
    %1155 = vector.shape_cast %1154 : vector<2xf32> to vector<2x1xf32>
    %1156 = vector.broadcast %1155 : vector<2x1xf32> to vector<2x8xf32>
    %1157 = arith.subf %1153, %1156 : vector<2x8xf32>
    %1158 = math.exp %1157 : vector<2x8xf32>
    %cst_277 = arith.constant dense<0.000000e+00> : vector<2xf32>
    %1159 = vector.multi_reduction <add>, %1158, %cst_277 [1] : vector<2x8xf32> to vector<2xf32>
    %1160 = vector.shape_cast %1159 : vector<2xf32> to vector<2x1xf32>
    %1161 = tpu.reciprocal %1160 {approx = true} : vector<2x1xf32> -> vector<2x1xf32>
    %1162 = vector.broadcast %1161 : vector<2x1xf32> to vector<2x8xf32>
    %1163 = arith.mulf %1158, %1162 : vector<2x8xf32>
    %1164 = vector.shape_cast %1163 : vector<2x8xf32> to vector<2x8x1xf32>
    %1165 = vector.broadcast %1164 : vector<2x8x1xf32> to vector<2x8x32xf32>
    %1166 = arith.mulf %1165, %707 : vector<2x8x32xf32>
    %cst_278 = arith.constant dense<0.000000e+00> : vector<2x32xf32>
    %1167 = vector.multi_reduction <add>, %1166, %cst_278 [1] : vector<2x8x32xf32> to vector<2x32xf32>
    %1168 = tpu.concatenate %1167, %1136 in 1 : vector<2x32xf32>, vector<2x32xf32> -> vector<2x64xf32>
    %cst_279 = arith.constant dense<0.000000e+00> : vector<2x128xf32>
    %1169 = tpu.matmul %1168, %734, %cst_279 {dimension_numbers = #tpu.dot_dimension_numbers<[1], [0], [0], [1], [0, 0, 1, 1], [], []>} : vector<2x64xf32>, vector<64x128xf32>, vector<2x128xf32> -> vector<2x128xf32>
    %1170 = vector.broadcast %735 : vector<1x128xf32> to vector<2x128xf32>
    %1171 = arith.addf %1169, %1170 : vector<2x128xf32>
    %1172 = vector.extract_strided_slice %1171 {offsets = [0, 0], sizes = [2, 32], strides = [1, 1]} : vector<2x128xf32> to vector<2x32xf32>
    %1173 = arith.negf %1172 : vector<2x32xf32>
    %1174 = math.exp %1173 : vector<2x32xf32>
    %cst_280 = arith.constant 1.000000e+00 : f32
    %1175 = vector.broadcast %cst_280 : f32 to vector<2x32xf32>
    %1176 = arith.addf %1175, %1174 : vector<2x32xf32>
    %1177 = arith.divf %1175, %1176 : vector<2x32xf32>
    %1178 = vector.extract_strided_slice %1171 {offsets = [0, 32], sizes = [2, 32], strides = [1, 1]} : vector<2x128xf32> to vector<2x32xf32>
    %1179 = arith.negf %1178 : vector<2x32xf32>
    %1180 = math.exp %1179 : vector<2x32xf32>
    %cst_281 = arith.constant 1.000000e+00 : f32
    %1181 = vector.broadcast %cst_281 : f32 to vector<2x32xf32>
    %1182 = arith.addf %1181, %1180 : vector<2x32xf32>
    %1183 = arith.divf %1181, %1182 : vector<2x32xf32>
    %1184 = vector.extract_strided_slice %1171 {offsets = [0, 64], sizes = [2, 32], strides = [1, 1]} : vector<2x128xf32> to vector<2x32xf32>
    %1185 = vector.extract_strided_slice %1171 {offsets = [0, 96], sizes = [2, 32], strides = [1, 1]} : vector<2x128xf32> to vector<2x32xf32>
    %1186 = arith.mulf %1177, %1185 : vector<2x32xf32>
    %1187 = arith.addf %1184, %1186 : vector<2x32xf32>
    %1188 = math.tanh %1187 : vector<2x32xf32>
    %cst_282 = arith.constant 1.000000e+00 : f32
    %1189 = vector.broadcast %cst_282 : f32 to vector<2x32xf32>
    %1190 = arith.subf %1189, %1183 : vector<2x32xf32>
    %1191 = arith.mulf %1190, %1188 : vector<2x32xf32>
    %1192 = arith.mulf %1183, %1136 : vector<2x32xf32>
    %1193 = arith.addf %1191, %1192 : vector<2x32xf32>
    %1194 = tpu.concatenate %1110, %1193, %1167 in 1 : vector<2x16xf32>, vector<2x32xf32>, vector<2x32xf32> -> vector<2x80xf32>
    %cst_283 = arith.constant dense<0.000000e+00> : vector<2x32xf32>
    %1195 = tpu.matmul %1194, %738, %cst_283 {dimension_numbers = #tpu.dot_dimension_numbers<[1], [0], [0], [1], [0, 0, 1, 1], [], []>} : vector<2x80xf32>, vector<80x32xf32>, vector<2x32xf32> -> vector<2x32xf32>
    %1196 = vector.broadcast %739 : vector<1x32xf32> to vector<2x32xf32>
    %1197 = arith.addf %1195, %1196 : vector<2x32xf32>
    %1198 = math.tanh %1197 : vector<2x32xf32>
    %cst_284 = arith.constant dense<0.000000e+00> : vector<2x20xf32>
    %1199 = tpu.matmul %1198, %740, %cst_284 {dimension_numbers = #tpu.dot_dimension_numbers<[1], [0], [0], [1], [0, 0, 1, 1], [], []>} : vector<2x32xf32>, vector<32x20xf32>, vector<2x20xf32> -> vector<2x20xf32>
    %1200 = vector.broadcast %741 : vector<1x20xf32> to vector<2x20xf32>
    %1201 = arith.addf %1199, %1200 : vector<2x20xf32>
    %c0_285 = arith.constant 0 : index
    %c3_286 = arith.constant 3 : index
    %c0_287 = arith.constant 0 : index
    %1202 = vector.load %arg4[%c0_285, %c3_286, %c0_287] : memref<2x5x20xf32, #tpu.memory_space<vmem>>, vector<2x1x20xf32>
    %1203 = vector.shape_cast %1202 : vector<2x1x20xf32> to vector<2x20xf32>
    %c0_288 = arith.constant 0 : index
    %c3_289 = arith.constant 3 : index
    %1204 = vector.load %arg5[%c0_288, %c3_289] : memref<2x5xf32, #tpu.memory_space<vmem>>, vector<2x1xf32>
    %cst_290 = arith.constant dense<0xFF800000> : vector<2xf32>
    %1205 = vector.multi_reduction <maximumf>, %1201, %cst_290 [1] : vector<2x20xf32> to vector<2xf32>
    %1206 = vector.shape_cast %1205 : vector<2xf32> to vector<2x1xf32>
    %1207 = vector.broadcast %1206 : vector<2x1xf32> to vector<2x20xf32>
    %1208 = arith.subf %1201, %1207 : vector<2x20xf32>
    %1209 = math.exp %1208 : vector<2x20xf32>
    %cst_291 = arith.constant dense<0.000000e+00> : vector<2xf32>
    %1210 = vector.multi_reduction <add>, %1209, %cst_291 [1] : vector<2x20xf32> to vector<2xf32>
    %1211 = vector.shape_cast %1210 : vector<2xf32> to vector<2x1xf32>
    %1212 = math.log %1211 : vector<2x1xf32>
    %1213 = arith.addf %1212, %1206 : vector<2x1xf32>
    %1214 = arith.mulf %1203, %1201 : vector<2x20xf32>
    %cst_292 = arith.constant dense<0.000000e+00> : vector<2xf32>
    %1215 = vector.multi_reduction <add>, %1214, %cst_292 [1] : vector<2x20xf32> to vector<2xf32>
    %1216 = vector.shape_cast %1215 : vector<2xf32> to vector<2x1xf32>
    %cst_293 = arith.constant dense<0.000000e+00> : vector<1xf32>
    %1217 = vector.multi_reduction <add>, %1204, %cst_293 [0] : vector<2x1xf32> to vector<1xf32>
    %1218 = vector.shape_cast %1217 : vector<1xf32> to vector<1x1xf32>
    %cst_294 = arith.constant 1.000000e+00 : f32
    %1219 = vector.broadcast %cst_294 : f32 to vector<1x1xf32>
    %1220 = arith.maximumf %1218, %1219 : vector<1x1xf32>
    %1221 = arith.subf %1213, %1216 : vector<2x1xf32>
    %1222 = arith.mulf %1204, %1221 : vector<2x1xf32>
    %1223 = vector.shape_cast %1222 : vector<2x1xf32> to vector<1x2x1xf32>
    %cst_295 = arith.constant dense<0.000000e+00> : vector<1xf32>
    %1224 = vector.multi_reduction <add>, %1223, %cst_295 [1, 2] : vector<1x2x1xf32> to vector<1xf32>
    %1225 = vector.shape_cast %1224 : vector<1xf32> to vector<1x1x1xf32>
    %1226 = vector.extract %1225[0, 0, 0] : f32 from vector<1x1x1xf32>
    %1227 = tpu.reciprocal %1220 {approx = true} : vector<1x1xf32> -> vector<1x1xf32>
    %1228 = vector.broadcast %1226 : f32 to vector<1x1xf32>
    %1229 = arith.mulf %1228, %1227 : vector<1x1xf32>
    %1230 = arith.addf %1108, %1229 : vector<1x1xf32>
    %1231 = vector.extract_strided_slice %729 {offsets = [0, 4, 0], sizes = [2, 1, 16], strides = [1, 1, 1]} : vector<2x5x16xf32> to vector<2x1x16xf32>
    %1232 = vector.shape_cast %1231 : vector<2x1x16xf32> to vector<2x16xf32>
    %1233 = tpu.concatenate %1232, %1193 in 1 : vector<2x16xf32>, vector<2x32xf32> -> vector<2x48xf32>
    %cst_296 = arith.constant dense<0.000000e+00> : vector<2x128xf32>
    %1234 = tpu.matmul %1233, %732, %cst_296 {dimension_numbers = #tpu.dot_dimension_numbers<[1], [0], [0], [1], [0, 0, 1, 1], [], []>} : vector<2x48xf32>, vector<48x128xf32>, vector<2x128xf32> -> vector<2x128xf32>
    %1235 = vector.broadcast %733 : vector<1x128xf32> to vector<2x128xf32>
    %1236 = arith.addf %1234, %1235 : vector<2x128xf32>
    %1237 = vector.extract_strided_slice %1236 {offsets = [0, 0], sizes = [2, 32], strides = [1, 1]} : vector<2x128xf32> to vector<2x32xf32>
    %1238 = arith.negf %1237 : vector<2x32xf32>
    %1239 = math.exp %1238 : vector<2x32xf32>
    %cst_297 = arith.constant 1.000000e+00 : f32
    %1240 = vector.broadcast %cst_297 : f32 to vector<2x32xf32>
    %1241 = arith.addf %1240, %1239 : vector<2x32xf32>
    %1242 = arith.divf %1240, %1241 : vector<2x32xf32>
    %1243 = vector.extract_strided_slice %1236 {offsets = [0, 32], sizes = [2, 32], strides = [1, 1]} : vector<2x128xf32> to vector<2x32xf32>
    %1244 = arith.negf %1243 : vector<2x32xf32>
    %1245 = math.exp %1244 : vector<2x32xf32>
    %cst_298 = arith.constant 1.000000e+00 : f32
    %1246 = vector.broadcast %cst_298 : f32 to vector<2x32xf32>
    %1247 = arith.addf %1246, %1245 : vector<2x32xf32>
    %1248 = arith.divf %1246, %1247 : vector<2x32xf32>
    %1249 = vector.extract_strided_slice %1236 {offsets = [0, 64], sizes = [2, 32], strides = [1, 1]} : vector<2x128xf32> to vector<2x32xf32>
    %1250 = vector.extract_strided_slice %1236 {offsets = [0, 96], sizes = [2, 32], strides = [1, 1]} : vector<2x128xf32> to vector<2x32xf32>
    %1251 = arith.mulf %1242, %1250 : vector<2x32xf32>
    %1252 = arith.addf %1249, %1251 : vector<2x32xf32>
    %1253 = math.tanh %1252 : vector<2x32xf32>
    %cst_299 = arith.constant 1.000000e+00 : f32
    %1254 = vector.broadcast %cst_299 : f32 to vector<2x32xf32>
    %1255 = arith.subf %1254, %1248 : vector<2x32xf32>
    %1256 = arith.mulf %1255, %1253 : vector<2x32xf32>
    %1257 = arith.mulf %1248, %1193 : vector<2x32xf32>
    %1258 = arith.addf %1256, %1257 : vector<2x32xf32>
    %cst_300 = arith.constant dense<0.000000e+00> : vector<2x32xf32>
    %1259 = tpu.matmul %1258, %736, %cst_300 {dimension_numbers = #tpu.dot_dimension_numbers<[1], [0], [0], [1], [0, 0, 1, 1], [], []>} : vector<2x32xf32>, vector<32x32xf32>, vector<2x32xf32> -> vector<2x32xf32>
    %1260 = vector.broadcast %737 : vector<1x32xf32> to vector<2x32xf32>
    %1261 = arith.addf %1259, %1260 : vector<2x32xf32>
    %1262 = vector.shape_cast %1261 : vector<2x32xf32> to vector<2x1x32xf32>
    %1263 = vector.broadcast %1262 : vector<2x1x32xf32> to vector<2x8x32xf32>
    %1264 = arith.addf %728, %1263 : vector<2x8x32xf32>
    %1265 = math.tanh %1264 : vector<2x8x32xf32>
    %1266 = vector.shape_cast %730 : vector<1x32xf32> to vector<1x1x32xf32>
    %1267 = vector.broadcast %1266 : vector<1x1x32xf32> to vector<2x8x32xf32>
    %1268 = arith.mulf %1265, %1267 : vector<2x8x32xf32>
    %cst_301 = arith.constant dense<0.000000e+00> : vector<2x8xf32>
    %1269 = vector.multi_reduction <add>, %1268, %cst_301 [2] : vector<2x8x32xf32> to vector<2x8xf32>
    %1270 = vector.broadcast %731 : vector<1x1xf32> to vector<2x8xf32>
    %1271 = arith.addf %1269, %1270 : vector<2x8xf32>
    %cst_302 = arith.constant 0.000000e+00 : f32
    %1272 = vector.broadcast %cst_302 : f32 to vector<2x8xf32>
    %1273 = arith.cmpf ogt, %0, %1272 : vector<2x8xf32>
    %cst_303 = arith.constant -1.000000e+30 : f32
    %1274 = vector.broadcast %cst_303 : f32 to vector<2x8xf32>
    %1275 = arith.select %1273, %1271, %1274 : vector<2x8xi1>, vector<2x8xf32>
    %cst_304 = arith.constant dense<0xFF800000> : vector<2xf32>
    %1276 = vector.multi_reduction <maximumf>, %1275, %cst_304 [1] : vector<2x8xf32> to vector<2xf32>
    %1277 = vector.shape_cast %1276 : vector<2xf32> to vector<2x1xf32>
    %1278 = vector.broadcast %1277 : vector<2x1xf32> to vector<2x8xf32>
    %1279 = arith.subf %1275, %1278 : vector<2x8xf32>
    %1280 = math.exp %1279 : vector<2x8xf32>
    %cst_305 = arith.constant dense<0.000000e+00> : vector<2xf32>
    %1281 = vector.multi_reduction <add>, %1280, %cst_305 [1] : vector<2x8xf32> to vector<2xf32>
    %1282 = vector.shape_cast %1281 : vector<2xf32> to vector<2x1xf32>
    %1283 = tpu.reciprocal %1282 {approx = true} : vector<2x1xf32> -> vector<2x1xf32>
    %1284 = vector.broadcast %1283 : vector<2x1xf32> to vector<2x8xf32>
    %1285 = arith.mulf %1280, %1284 : vector<2x8xf32>
    %1286 = vector.shape_cast %1285 : vector<2x8xf32> to vector<2x8x1xf32>
    %1287 = vector.broadcast %1286 : vector<2x8x1xf32> to vector<2x8x32xf32>
    %1288 = arith.mulf %1287, %707 : vector<2x8x32xf32>
    %cst_306 = arith.constant dense<0.000000e+00> : vector<2x32xf32>
    %1289 = vector.multi_reduction <add>, %1288, %cst_306 [1] : vector<2x8x32xf32> to vector<2x32xf32>
    %1290 = tpu.concatenate %1289, %1258 in 1 : vector<2x32xf32>, vector<2x32xf32> -> vector<2x64xf32>
    %cst_307 = arith.constant dense<0.000000e+00> : vector<2x128xf32>
    %1291 = tpu.matmul %1290, %734, %cst_307 {dimension_numbers = #tpu.dot_dimension_numbers<[1], [0], [0], [1], [0, 0, 1, 1], [], []>} : vector<2x64xf32>, vector<64x128xf32>, vector<2x128xf32> -> vector<2x128xf32>
    %1292 = vector.broadcast %735 : vector<1x128xf32> to vector<2x128xf32>
    %1293 = arith.addf %1291, %1292 : vector<2x128xf32>
    %1294 = vector.extract_strided_slice %1293 {offsets = [0, 0], sizes = [2, 32], strides = [1, 1]} : vector<2x128xf32> to vector<2x32xf32>
    %1295 = arith.negf %1294 : vector<2x32xf32>
    %1296 = math.exp %1295 : vector<2x32xf32>
    %cst_308 = arith.constant 1.000000e+00 : f32
    %1297 = vector.broadcast %cst_308 : f32 to vector<2x32xf32>
    %1298 = arith.addf %1297, %1296 : vector<2x32xf32>
    %1299 = arith.divf %1297, %1298 : vector<2x32xf32>
    %1300 = vector.extract_strided_slice %1293 {offsets = [0, 32], sizes = [2, 32], strides = [1, 1]} : vector<2x128xf32> to vector<2x32xf32>
    %1301 = arith.negf %1300 : vector<2x32xf32>
    %1302 = math.exp %1301 : vector<2x32xf32>
    %cst_309 = arith.constant 1.000000e+00 : f32
    %1303 = vector.broadcast %cst_309 : f32 to vector<2x32xf32>
    %1304 = arith.addf %1303, %1302 : vector<2x32xf32>
    %1305 = arith.divf %1303, %1304 : vector<2x32xf32>
    %1306 = vector.extract_strided_slice %1293 {offsets = [0, 64], sizes = [2, 32], strides = [1, 1]} : vector<2x128xf32> to vector<2x32xf32>
    %1307 = vector.extract_strided_slice %1293 {offsets = [0, 96], sizes = [2, 32], strides = [1, 1]} : vector<2x128xf32> to vector<2x32xf32>
    %1308 = arith.mulf %1299, %1307 : vector<2x32xf32>
    %1309 = arith.addf %1306, %1308 : vector<2x32xf32>
    %1310 = math.tanh %1309 : vector<2x32xf32>
    %cst_310 = arith.constant 1.000000e+00 : f32
    %1311 = vector.broadcast %cst_310 : f32 to vector<2x32xf32>
    %1312 = arith.subf %1311, %1305 : vector<2x32xf32>
    %1313 = arith.mulf %1312, %1310 : vector<2x32xf32>
    %1314 = arith.mulf %1305, %1258 : vector<2x32xf32>
    %1315 = arith.addf %1313, %1314 : vector<2x32xf32>
    %1316 = tpu.concatenate %1232, %1315, %1289 in 1 : vector<2x16xf32>, vector<2x32xf32>, vector<2x32xf32> -> vector<2x80xf32>
    %cst_311 = arith.constant dense<0.000000e+00> : vector<2x32xf32>
    %1317 = tpu.matmul %1316, %738, %cst_311 {dimension_numbers = #tpu.dot_dimension_numbers<[1], [0], [0], [1], [0, 0, 1, 1], [], []>} : vector<2x80xf32>, vector<80x32xf32>, vector<2x32xf32> -> vector<2x32xf32>
    %1318 = vector.broadcast %739 : vector<1x32xf32> to vector<2x32xf32>
    %1319 = arith.addf %1317, %1318 : vector<2x32xf32>
    %1320 = math.tanh %1319 : vector<2x32xf32>
    %cst_312 = arith.constant dense<0.000000e+00> : vector<2x20xf32>
    %1321 = tpu.matmul %1320, %740, %cst_312 {dimension_numbers = #tpu.dot_dimension_numbers<[1], [0], [0], [1], [0, 0, 1, 1], [], []>} : vector<2x32xf32>, vector<32x20xf32>, vector<2x20xf32> -> vector<2x20xf32>
    %1322 = vector.broadcast %741 : vector<1x20xf32> to vector<2x20xf32>
    %1323 = arith.addf %1321, %1322 : vector<2x20xf32>
    %c0_313 = arith.constant 0 : index
    %c4_314 = arith.constant 4 : index
    %c0_315 = arith.constant 0 : index
    %1324 = vector.load %arg4[%c0_313, %c4_314, %c0_315] : memref<2x5x20xf32, #tpu.memory_space<vmem>>, vector<2x1x20xf32>
    %1325 = vector.shape_cast %1324 : vector<2x1x20xf32> to vector<2x20xf32>
    %c0_316 = arith.constant 0 : index
    %c4_317 = arith.constant 4 : index
    %1326 = vector.load %arg5[%c0_316, %c4_317] : memref<2x5xf32, #tpu.memory_space<vmem>>, vector<2x1xf32>
    %cst_318 = arith.constant dense<0xFF800000> : vector<2xf32>
    %1327 = vector.multi_reduction <maximumf>, %1323, %cst_318 [1] : vector<2x20xf32> to vector<2xf32>
    %1328 = vector.shape_cast %1327 : vector<2xf32> to vector<2x1xf32>
    %1329 = vector.broadcast %1328 : vector<2x1xf32> to vector<2x20xf32>
    %1330 = arith.subf %1323, %1329 : vector<2x20xf32>
    %1331 = math.exp %1330 : vector<2x20xf32>
    %cst_319 = arith.constant dense<0.000000e+00> : vector<2xf32>
    %1332 = vector.multi_reduction <add>, %1331, %cst_319 [1] : vector<2x20xf32> to vector<2xf32>
    %1333 = vector.shape_cast %1332 : vector<2xf32> to vector<2x1xf32>
    %1334 = math.log %1333 : vector<2x1xf32>
    %1335 = arith.addf %1334, %1328 : vector<2x1xf32>
    %1336 = arith.mulf %1325, %1323 : vector<2x20xf32>
    %cst_320 = arith.constant dense<0.000000e+00> : vector<2xf32>
    %1337 = vector.multi_reduction <add>, %1336, %cst_320 [1] : vector<2x20xf32> to vector<2xf32>
    %1338 = vector.shape_cast %1337 : vector<2xf32> to vector<2x1xf32>
    %cst_321 = arith.constant dense<0.000000e+00> : vector<1xf32>
    %1339 = vector.multi_reduction <add>, %1326, %cst_321 [0] : vector<2x1xf32> to vector<1xf32>
    %1340 = vector.shape_cast %1339 : vector<1xf32> to vector<1x1xf32>
    %cst_322 = arith.constant 1.000000e+00 : f32
    %1341 = vector.broadcast %cst_322 : f32 to vector<1x1xf32>
    %1342 = arith.maximumf %1340, %1341 : vector<1x1xf32>
    %1343 = arith.subf %1335, %1338 : vector<2x1xf32>
    %1344 = arith.mulf %1326, %1343 : vector<2x1xf32>
    %1345 = vector.shape_cast %1344 : vector<2x1xf32> to vector<1x2x1xf32>
    %cst_323 = arith.constant dense<0.000000e+00> : vector<1xf32>
    %1346 = vector.multi_reduction <add>, %1345, %cst_323 [1, 2] : vector<1x2x1xf32> to vector<1xf32>
    %1347 = vector.shape_cast %1346 : vector<1xf32> to vector<1x1x1xf32>
    %1348 = vector.extract %1347[0, 0, 0] : f32 from vector<1x1x1xf32>
    %1349 = tpu.reciprocal %1342 {approx = true} : vector<1x1xf32> -> vector<1x1xf32>
    %1350 = vector.broadcast %1348 : f32 to vector<1x1xf32>
    %1351 = arith.mulf %1350, %1349 : vector<1x1xf32>
    %1352 = arith.addf %1230, %1351 : vector<1x1xf32>
    %cst_324 = arith.constant 2.000000e-01 : f32
    %1353 = vector.broadcast %cst_324 : f32 to vector<1x1xf32>
    %1354 = arith.mulf %1352, %1353 : vector<1x1xf32>
    %c0_325 = arith.constant 0 : index
    %c0_326 = arith.constant 0 : index
    %1355 = vector.load %arg28[%c0_325, %c0_326] : memref<1x1xf32, #tpu.memory_space<vmem>>, vector<1x1xf32>
    tpu.vector_store %arg28[%c0_325, %c0_326], %1354 {strides = array<i32>} : memref<1x1xf32, #tpu.memory_space<vmem>>, vector<1x1xf32>,
    return
  }
  func.func @transform_0(%arg0: i32) -> (i32, i32, i32) {
    %c0_i32 = arith.constant 0 : i32
    %c0_i32_0 = arith.constant 0 : i32
    %c0_i32_1 = arith.constant 0 : i32
    %c0_i32_2 = arith.constant 0 : i32
    return %c0_i32, %c0_i32_0, %c0_i32_1 : i32, i32, i32
  }
  func.func @transform_1(%arg0: i32) -> (i32, i32) {
    %c0_i32 = arith.constant 0 : i32
    %c0_i32_0 = arith.constant 0 : i32
    %c0_i32_1 = arith.constant 0 : i32
    return %c0_i32, %c0_i32_0 : i32, i32
  }
  func.func @transform_2(%arg0: i32) -> (i32, i32, i32) {
    %c0_i32 = arith.constant 0 : i32
    %c0_i32_0 = arith.constant 0 : i32
    %c0_i32_1 = arith.constant 0 : i32
    %c0_i32_2 = arith.constant 0 : i32
    return %c0_i32, %c0_i32_0, %c0_i32_1 : i32, i32, i32
  }
  func.func @transform_3(%arg0: i32) -> (i32, i32, i32) {
    %c0_i32 = arith.constant 0 : i32
    %c0_i32_0 = arith.constant 0 : i32
    %c0_i32_1 = arith.constant 0 : i32
    %c0_i32_2 = arith.constant 0 : i32
    return %c0_i32, %c0_i32_0, %c0_i32_1 : i32, i32, i32
  }
  func.func @transform_4(%arg0: i32) -> (i32, i32) {
    %c0_i32 = arith.constant 0 : i32
    %c0_i32_0 = arith.constant 0 : i32
    %c0_i32_1 = arith.constant 0 : i32
    return %c0_i32, %c0_i32_0 : i32, i32
  }
  func.func @transform_5(%arg0: i32) -> (i32, i32) {
    %c0_i32 = arith.constant 0 : i32
    %c0_i32_0 = arith.constant 0 : i32
    %c0_i32_1 = arith.constant 0 : i32
    return %c0_i32, %c0_i32_0 : i32, i32
  }
  func.func @transform_6(%arg0: i32) -> (i32, i32) {
    %c0_i32 = arith.constant 0 : i32
    %c0_i32_0 = arith.constant 0 : i32
    %c0_i32_1 = arith.constant 0 : i32
    return %c0_i32, %c0_i32_0 : i32, i32
  }
  func.func @transform_7(%arg0: i32) -> (i32, i32) {
    %c0_i32 = arith.constant 0 : i32
    %c0_i32_0 = arith.constant 0 : i32
    %c0_i32_1 = arith.constant 0 : i32
    return %c0_i32, %c0_i32_0 : i32, i32
  }
  func.func @transform_8(%arg0: i32) -> (i32, i32) {
    %c0_i32 = arith.constant 0 : i32
    %c0_i32_0 = arith.constant 0 : i32
    %c0_i32_1 = arith.constant 0 : i32
    return %c0_i32, %c0_i32_0 : i32, i32
  }
  func.func @transform_9(%arg0: i32) -> (i32, i32) {
    %c0_i32 = arith.constant 0 : i32
    %c0_i32_0 = arith.constant 0 : i32
    %c0_i32_1 = arith.constant 0 : i32
    return %c0_i32, %c0_i32_0 : i32, i32
  }
  func.func @transform_10(%arg0: i32) -> (i32, i32) {
    %c0_i32 = arith.constant 0 : i32
    %c0_i32_0 = arith.constant 0 : i32
    %c0_i32_1 = arith.constant 0 : i32
    return %c0_i32, %c0_i32_0 : i32, i32
  }
  func.func @transform_11(%arg0: i32) -> (i32, i32) {
    %c0_i32 = arith.constant 0 : i32
    %c0_i32_0 = arith.constant 0 : i32
    %c0_i32_1 = arith.constant 0 : i32
    return %c0_i32, %c0_i32_0 : i32, i32
  }
  func.func @transform_12(%arg0: i32) -> (i32, i32) {
    %c0_i32 = arith.constant 0 : i32
    %c0_i32_0 = arith.constant 0 : i32
    %c0_i32_1 = arith.constant 0 : i32
    return %c0_i32, %c0_i32_0 : i32, i32
  }
  func.func @transform_13(%arg0: i32) -> (i32, i32) {
    %c0_i32 = arith.constant 0 : i32
    %c0_i32_0 = arith.constant 0 : i32
    %c0_i32_1 = arith.constant 0 : i32
    return %c0_i32, %c0_i32_0 : i32, i32
  }
  func.func @transform_14(%arg0: i32) -> (i32, i32) {
    %c0_i32 = arith.constant 0 : i32
    %c0_i32_0 = arith.constant 0 : i32
    %c0_i32_1 = arith.constant 0 : i32
    return %c0_i32, %c0_i32_0 : i32, i32
  }
  func.func @transform_15(%arg0: i32) -> (i32, i32) {
    %c0_i32 = arith.constant 0 : i32
    %c0_i32_0 = arith.constant 0 : i32
    %c0_i32_1 = arith.constant 0 : i32
    return %c0_i32, %c0_i32_0 : i32, i32
  }
  func.func @transform_16(%arg0: i32) -> (i32, i32) {
    %c0_i32 = arith.constant 0 : i32
    %c0_i32_0 = arith.constant 0 : i32
    %c0_i32_1 = arith.constant 0 : i32
    return %c0_i32, %c0_i32_0 : i32, i32
  }
  func.func @transform_17(%arg0: i32) -> (i32, i32) {
    %c0_i32 = arith.constant 0 : i32
    %c0_i32_0 = arith.constant 0 : i32
    %c0_i32_1 = arith.constant 0 : i32
    return %c0_i32, %c0_i32_0 : i32, i32
  }
  func.func @transform_18(%arg0: i32) -> (i32, i32) {
    %c0_i32 = arith.constant 0 : i32
    %c0_i32_0 = arith.constant 0 : i32
    %c0_i32_1 = arith.constant 0 : i32
    return %c0_i32, %c0_i32_0 : i32, i32
  }
  func.func @transform_19(%arg0: i32) -> (i32, i32) {
    %c0_i32 = arith.constant 0 : i32
    %c0_i32_0 = arith.constant 0 : i32
    %c0_i32_1 = arith.constant 0 : i32
    return %c0_i32, %c0_i32_0 : i32, i32
  }
  func.func @transform_20(%arg0: i32) -> (i32, i32) {
    %c0_i32 = arith.constant 0 : i32
    %c0_i32_0 = arith.constant 0 : i32
    %c0_i32_1 = arith.constant 0 : i32
    return %c0_i32, %c0_i32_0 : i32, i32
  }
  func.func @transform_21(%arg0: i32) -> (i32, i32) {
    %c0_i32 = arith.constant 0 : i32
    %c0_i32_0 = arith.constant 0 : i32
    %c0_i32_1 = arith.constant 0 : i32
    return %c0_i32, %c0_i32_0 : i32, i32
  }
  func.func @transform_22(%arg0: i32) -> (i32, i32) {
    %c0_i32 = arith.constant 0 : i32
    %c0_i32_0 = arith.constant 0 : i32
    %c0_i32_1 = arith.constant 0 : i32
    return %c0_i32, %c0_i32_0 : i32, i32
  }
  func.func @transform_23(%arg0: i32) -> (i32, i32) {
    %c0_i32 = arith.constant 0 : i32
    %c0_i32_0 = arith.constant 0 : i32
    %c0_i32_1 = arith.constant 0 : i32
    return %c0_i32, %c0_i32_0 : i32, i32
  }
  func.func @transform_24(%arg0: i32) -> (i32, i32) {
    %c0_i32 = arith.constant 0 : i32
    %c0_i32_0 = arith.constant 0 : i32
    %c0_i32_1 = arith.constant 0 : i32
    return %c0_i32, %c0_i32_0 : i32, i32
  }
  func.func @transform_25(%arg0: i32) -> (i32, i32) {
    %c0_i32 = arith.constant 0 : i32
    %c0_i32_0 = arith.constant 0 : i32
    %c0_i32_1 = arith.constant 0 : i32
    return %c0_i32, %c0_i32_0 : i32, i32
  }
  func.func @transform_26(%arg0: i32) -> (i32, i32) {
    %c0_i32 = arith.constant 0 : i32
    %c0_i32_0 = arith.constant 0 : i32
    %c0_i32_1 = arith.constant 0 : i32
    return %c0_i32, %c0_i32_0 : i32, i32
  }
  func.func @transform_27(%arg0: i32) -> (i32, i32) {
    %c0_i32 = arith.constant 0 : i32
    %c0_i32_0 = arith.constant 0 : i32
    %c0_i32_1 = arith.constant 0 : i32
    return %c0_i32, %c0_i32_0 : i32, i32
  }
}

</mosaic_0001>

<bundles_post_ra>
// kernel: tpu_custom_call.1
= control target key start
LH: loop header
LB: loop body
LE: loop exit
PB: predicated region body
PF: predicated region fallthrough
CT: control target
= control target key end

     0   :  { %s6716_s0 = inlined_call_operand.hbm [shape: f32[2,8,16], index: 0, kind: input, shape index: {}]   ;;  %s6717_s1 = inlined_call_operand.vmem [shape: f32[2,8], index: 1, kind: input, shape index: {}]   ;;  %s6718_s2 = inlined_call_operand.vmem [shape: f32[2,5,16], index: 2, kind: input, shape index: {}]   ;;  %s6719_s3 = inlined_call_operand.vmem [shape: f32[2,5,20], index: 3, kind: input, shape index: {}]   ;;  %s6720_s4 = inlined_call_operand.hbm [shape: f32[2,5], index: 4, kind: input, shape index: {}]   ;;  %s6721_s5 = inlined_call_operand.hbm [shape: f32[16,96], index: 5, kind: input, shape index: {}]   ;;  %s6722_s6 = inlined_call_operand.hbm [shape: f32[1,96], index: 6, kind: input, shape index: {}]   ;;  %s6723_s7 = inlined_call_operand.vmem [shape: f32[16,48], index: 7, kind: input, shape index: {}]   ;;  %s6724_s8 = inlined_call_operand.hbm [shape: f32[1,48], index: 8, kind: input, shape index: {}]   ;;  %s6725_s9 = inlined_call_operand.hbm [shape: f32[16,48], index: 9, kind: input, shape index: {}]   ;;  %s6726_s10 = inlined_call_operand.vmem [shape: f32[1,48], index: 10, kind: input, shape index: {}]   ;;  %s6727_s11 = inlined_call_operand.vmem [shape: f32[32,32], index: 11, kind: input, shape index: {}]   ;;  %s6728_s12 = inlined_call_operand.vmem [shape: f32[1,32], index: 12, kind: input, shape index: {}]   ;;  %s6729_s13 = inlined_call_operand.vmem [shape: f32[48,128], index: 13, kind: input, shape index: {}]   ;;  %s6730_s14 = inlined_call_operand.vmem [shape: f32[1,128], index: 14, kind: input, shape index: {}]   ;;  %s6731_s15 = inlined_call_operand.hbm [shape: f32[32,32], index: 15, kind: input, shape index: {}]   ;;  %s6732_s16 = inlined_call_operand.vmem [shape: f32[1,32], index: 16, kind: input, shape index: {}]   ;;  %s6733_s17 = inlined_call_operand.hbm [shape: f32[32,32], index: 17, kind: input, shape index: {}]   ;;  %s6734_s18 = inlined_call_operand.vmem [shape: f32[1,32], index: 18, kind: input, shape index: {}]   ;;  %s6735_s19 = inlined_call_operand.vmem [shape: f32[1,32], index: 19, kind: input, shape index: {}]   ;;  %s6736_s20 = inlined_call_operand.<no memory space> [shape: f32[1,1], index: 20, kind: input, shape index: {}]   ;;  %s6737_s21 = inlined_call_operand.vmem [shape: f32[64,128], index: 21, kind: input, shape index: {}]   ;;  %s6738_s22 = inlined_call_operand.vmem [shape: f32[1,128], index: 22, kind: input, shape index: {}]   ;;  %s6739_s23 = inlined_call_operand.vmem [shape: f32[80,32], index: 23, kind: input, shape index: {}]   ;;  %s6740_s24 = inlined_call_operand.vmem [shape: f32[1,32], index: 24, kind: input, shape index: {}]   ;;  %s6741_s25 = inlined_call_operand.vmem [shape: f32[32,20], index: 25, kind: input, shape index: {}]   ;;  %s6742_s26 = inlined_call_operand.vmem [shape: f32[1,20], index: 26, kind: input, shape index: {}]   ;;  %s6743_s27 = inlined_call_operand.hbm [shape: f32[1,1], index: 27, kind: output, shape index: {}]  }
   0x1   :  { %6752 = sst [smem:[#allocation29_spill]] %s6716_s0  ;;  %v32_v0 = vstv %s6736_s20 }
   0x2   :  { %6753 = sst [smem:[#allocation30_spill]] %s6717_s1  ;;  %33 = vst [vmem:[#allocation4] sm:$0x1] %v32_v0 }
   0x3   :  { %6754 = sst [smem:[#allocation31_spill]] %s6718_s2 }
   0x4   :  { %6755 = sst [smem:[#allocation32_spill]] %s6719_s3 }
   0x5   :  { %6756 = sst [smem:[#allocation33_spill]] %s6720_s4 }
   0x6   :  { %6757 = sst [smem:[#allocation34_spill]] %s6721_s5 }
   0x7   :  { %6758 = sst [smem:[#allocation35_spill]] %s6722_s6 }
   0x8   :  { %6759 = sst [smem:[#allocation36_spill]] %s6723_s7 }
   0x9   :  { %6760 = sst [smem:[#allocation37_spill]] %s6724_s8 }
   0xa   :  { %6761 = sst [smem:[#allocation38_spill]] %s6725_s9 }
   0xb   :  { %6762 = sst [smem:[#allocation39_spill]] %s6726_s10 }
   0xc   :  { %6763 = sst [smem:[#allocation40_spill]] %s6727_s11 }
   0xd   :  { %6764 = sst [smem:[#allocation41_spill]] %s6742_s26 }
   0xe   :  { %6765 = sst [smem:[#allocation42_spill]] %s6743_s27 }
   0xf   :  { %34 = vsyncpa [#allocation6], 0 }
  0x10   :  { %35 = vsyncpa [#allocation9], 0 }
  0x11   :  { %36 = vsyncpa [#allocation12], 0 }
  0x12   :  { %37 = vsyncpa [#allocation15], 0 }
  0x13   :  { %38 = vsyncpa [#allocation18], 0  ;;  %s6766_s9 = sld [smem:[#allocation33_spill]] }
  0x19   :  { %s64_s5 = sshll.u32 %s6766_s9, 4  ;;  %s65_s5 = int_to_ptr.hbm [resolvable:$true] %s64_s5 }
  0x1a   :  { %39 = vsyncpa [#allocation7], 0  ;;  %s5065_s28 = smov [#allocation8]   ;;  %s6767_s1 = sld [smem:[#allocation35_spill]] }
  0x1b   :  { %s66_s0 = sshll.u32 %s5065_s28, 4  ;;  %s5066_s20 = smov [#allocation11]   ;;  %s67_s0 = int_to_ptr.vmem [resolvable:$true] %s66_s0 }
  0x1c   :  { %69 = dma.hbm_to_vmem [thread:$0]  %s65_s5, 32, %s67_s0, [#allocation9]  }
  0x1d   :  { %s90_s11 = sshll.u32 %s5066_s20, 4  ;;  %s6768_s7 = sld [smem:[#allocation38_spill]]  ;;  %s91_s11 = int_to_ptr.vmem [resolvable:$true] %s90_s11 }
  0x1e   :  { %s5067_s8 = smov [#allocation14]   ;;  %s6769_s27 = sld [smem:[#allocation29_spill]] }
  0x1f   :  { %s113_s30 = sshll.u32 %s5067_s8, 4  ;;  %s5068_s10 = smov 128   ;;  %s114_s30 = int_to_ptr.vmem [resolvable:$true] %s113_s30 }
  0x20   :  { %s88_s6 = sshll.u32 %s6767_s1, 4  ;;  %s5069_s29 = smov 8   ;;  %s89_s6 = int_to_ptr.hbm [resolvable:$true] %s88_s6 }
  0x21   :  { %93 = dma.hbm_to_vmem [thread:$0]  %s89_s6, 16, %s91_s11, [#allocation12]  }
  0x22   :  { %s5070_s5 = smov [#allocation5]   ;;  %s6770_s20 = sld [smem:[#allocation34_spill]] }
  0x23   :  { %s111_s4 = sshll.u32 %s6768_s7, 4  ;;  %s46_s0 = sshll.u32 %s5070_s5, 4  ;;  %s112_s4 = int_to_ptr.hbm [resolvable:$true] %s111_s4  ;;  %s47_s0 = int_to_ptr.vmem [resolvable:$true] %s46_s0 }
  0x24   :  { %s44_s26 = sshll.u32 %s6769_s27, 4  ;;  %s6771_s3 = sld [smem:[#allocation37_spill]]  ;;  %s45_s26 = int_to_ptr.hbm [resolvable:$true] %s44_s26 }
  0x25   :  { %119 = dma.hbm_to_vmem [thread:$0]  %s112_s4, 256, %s114_s30, [#allocation15], %s5068_s10, %s5068_s10, %s5069_s29  }
  0x26   :  { %52 = dma.hbm_to_vmem [thread:$0]  %s45_s26, 256, %s47_s0, [#allocation6], %s5068_s10, %s5068_s10, %s5069_s29  }
  0x27   :  { %s5071_s8 = smov [#allocation10]   ;;  %s5072_s4 = smov [#allocation13]  }
  0x28   :  { %s74_s11 = sshll.u32 %s6770_s20, 4  ;;  %s76_s9 = sshll.u32 %s5071_s8, 4  ;;  %s75_s11 = int_to_ptr.hbm [resolvable:$true] %s74_s11  ;;  %s77_s9 = int_to_ptr.vmem [resolvable:$true] %s76_s9 }
  0x29   :  { %82 = dma.hbm_to_vmem [thread:$0]  %s75_s11, 256, %s77_s9, [#allocation9], %s5068_s10, %s5068_s10, %s5069_s29  }
  0x2a   :  { %s101_s7 = sshll.u32 %s6771_s3, 4  ;;  %s103_s30 = sshll.u32 %s5072_s4, 4  ;;  %s102_s7 = int_to_ptr.hbm [resolvable:$true] %s101_s7  ;;  %s104_s30 = int_to_ptr.vmem [resolvable:$true] %s103_s30 }
  0x2b   :  { %s134_s1 = sshll.u32 %s6731_s15, 4  ;;  %s149_s6 = sshll.u32 %s6733_s17, 4  ;;  %s135_s1 = int_to_ptr.hbm [resolvable:$true] %s134_s1  ;;  %s150_s6 = int_to_ptr.hbm [resolvable:$true] %s149_s6 }
  0x2c   :  { %106 = dma.hbm_to_vmem [thread:$0]  %s102_s7, 16, %s104_s30, [#allocation12]  }
  0x2d   :  { %s5073_s20 = smov [#allocation16]   ;;  %s5074_s11 = smov [#allocation17]  }
  0x2e   :  { %s136_s27 = sshll.u32 %s5073_s20, 4  ;;  %s151_s2 = sshll.u32 %s5074_s11, 4  ;;  %s137_s27 = int_to_ptr.vmem [resolvable:$true] %s136_s27  ;;  %s152_s2 = int_to_ptr.vmem [resolvable:$true] %s151_s2 }
  0x2f   :  { %142 = dma.hbm_to_vmem [thread:$0]  %s135_s1, 512, %s137_s27, [#allocation15], %s5068_s10, %s5068_s10, %s5069_s29  }
  0x30   :  { %157 = dma.hbm_to_vmem [thread:$0]  %s150_s6, 512, %s152_s2, [#allocation18], %s5068_s10, %s5068_s10, %s5069_s29  }
  0x31   :  { %5053 = dma.done.wait [#allocation6], 256  }
  0x32   :  { %5054 = vsyncadd [#allocation6], 4294967040 }
  0x33   :  { %5055 = dma.done.wait [#allocation9], 288  }
  0x34   :  { %5056 = vsyncadd [#allocation9], 4294967008 }
  0x35   :  { %5057 = dma.done.wait [#allocation12], 32  }
  0x36   :  { %5058 = vsyncadd [#allocation12], 4294967264 }
  0x37   :  { %5059 = dma.done.wait [#allocation15], 768  }
  0x38   :  { %5060 = vsyncadd [#allocation15], 4294966528 }
  0x39   :  { %5061 = dma.done.wait [#allocation18], 512  }
  0x3a   :  { %5062 = vsyncadd [#allocation18], 4294966784  ;;  %v212_v1 = vld [vmem:[#allocation10 + $0x8] sm:$0xff]  ;;  %s6772_s3 = sld [smem:[#allocation36_spill]]  ;;  %v211_v3 = vld [vmem:[#allocation10] sm:$0xff]  ;;  %vm217_vm0 = vcmask 130048  }
  0x3b   :  { %238 = vmatpush.msra.mxu0 %v212_v1  ;;  %v209_v5 = vld [vmem:[#allocation5] sm:$0xff]  ;;  %v5075_v6 = vmov 0.0   ;;  %v210_v7 = vld [vmem:[#allocation5 + $0x8] sm:$0xff]  ;;  %s5076_s29 = smov 96   ;;  %s5077_s8 = smov 32   ;;  %v5079_v55 = vmov 0  }
  0x3c   :  { %v5286_v8 = vld [vmem:[#allocation13] ss:$0 sm:$0xff]  ;;  %v4468_v14 = vld [vmem:[#allocation11] ss:$0 sm:$0xff]  ;;  %s5078_s9 = smov 112   ;;  %4448 = vset.pattern.permute.xlu0 %v5079_v55  ;;  %4449 = vset.pattern.permute.xlu2 %v5079_v55  ;;  %s6773_s28 = sld [smem:[#allocation30_spill]] }
  0x3d   :  { %239 = vmatpush.msra.mxu0 %v211_v3  ;;  %vm367_vm9 = vcmask 1041409   ;;  %vm376_vm10 = vcmask 122880   ;;  %s5080_s5 = smov 16   ;;  %s6774_s0 = sld [smem:[#allocation39_spill]] }
  0x3e   :  { %4322 = vmatmul.msk.f32.vlgmr.msra.gmra.mxu0 %vm217_vm0, %v209_v5  ;;  %s5084_s6 = smov 48   ;;  %s5087_s20 = smov 64  }
  0x3f   :  { %s6775_s4 = sld [smem:[#allocation40_spill]]  ;;  %s5090_s1 = smov 127  }
  0x40   :  { %v248_v2 = vld [vmem:[%s6772_s3 + $0x8] sm:$0xff]  ;;  %v247_v4 = vld [vmem:[%s6772_s3] sm:$0xff]  ;;  %s6776_s11 = sld [smem:[#allocation31_spill]]  ;;  %s5092_s26 = smov 125  }
  0x41   :  { %273 = vmatpush.msra.mxu3 %v248_v2  ;;  %404 = vmatpush.msra.mxu2 %v248_v2 }
  0x42   :  { %673 = vmatpush.msra.mxu1 %v248_v2  ;;  %1081 = vmatpush.msrb.mxu0 %v248_v2  ;;  %v5308_v56 = vld [vmem:[%s6773_s28] sm:$0x3] }
  0x43   :  { %274 = vmatpush.msra.mxu3 %v247_v4  ;;  %405 = vmatpush.msra.mxu2 %v247_v4  ;;  %v5312_v57 = vsub.f32 1.0, %v5308_v56 }
  0x44   :  { %275 = vmatmul.f32.vlgmr.msra.gmra.mxu3 %v5075_v6  ;;  %674 = vmatpush.msra.mxu1 %v247_v4 }
  0x45   :  { %537 = vmatpush.msrb.mxu3 %v248_v2  ;;  %809 = vmatpush.msrb.mxu2 %v248_v2 }
  0x46   :  { %1082 = vmatpush.msrb.mxu0 %v247_v4  ;;  %1217 = vmatpush.msrb.mxu1 %v248_v2 }
  0x47   :  { %538 = vmatpush.msrb.mxu3 %v247_v4  ;;  %810 = vmatpush.msrb.mxu2 %v247_v4 }
  0x48   :  { %1218 = vmatpush.msrb.mxu1 %v247_v4  ;;  %4323 = vmatmul.msk.f32.gmra.mxu0 %vm217_vm0, %v210_v7 }
  0x49   :  { %945 = vmatpush.msra.mxu3 %v248_v2 }
  0x4b   :  { %946 = vmatpush.msra.mxu3 %v247_v4 }
  0xbb   :  { %v241_v12 = vpop.f32.mrf.mxu0 }
  0xbc   :  { %v5294_v17 = vadd.f32 %v4468_v14, %v241_v12 }
  0xc5   :  { %v244_v13 = vpop.f32.mrf.mxu0 }
  0xc6   :  { %v5291_v15 = vadd.f32 %v4468_v14, %v244_v13 }
  0xc7   :  { %v276_v9 = vpop.f32.mrf.mxu3 }
  0xc8   :  { %v277_v10 = vadd.f32 %v5286_v8, %v276_v9 }
  0xca   :  { %v280_v11 = vrot.slane %v277_v10, 1  ;;  %v283_v19 = vadd.f32 %v277_v10, %v5294_v17 }
  0xcc   :  { %325 = vrot.lane.b32.xlu0 %v280_v11, %s5076_s29  ;;  %v284_v16 = vadd.f32 %v280_v11, %v5291_v15  ;;  %v4324_v20 = vmul.f32 -1.442695, %v283_v19 }
  0xce   :  { %v4325_v18 = vmul.f32 -1.442695, %v284_v16 }
  0xd0   :  { %4480 = vpow2.f32 %v4325_v18 }
  0xd1   :  { %4482 = vpow2.f32 %v4324_v20 }
  0xd4   :  { %323 = vrot.lane.b32.xlu0 %v277_v10, %s5076_s29 }
  0xd6   :  { %v4481_v21 = vpop.eup %4480 }
  0xd7   :  { %v292_v22 = vadd.f32 1.0, %v4481_v21  ;;  %v4483_v23 = vpop.eup %4482 }
  0xd8   :  { %v291_v24 = vadd.f32 1.0, %v4483_v23 }
  0xd9   :  { %4484 = vrcp.f32 %v292_v22  ;;  %v319_v33 = vand.u32 2147483648, %v292_v22  ;;  %vm313_vm2 = vweird.f32 %v292_v22  ;;  %v317_v34 = vand.u32 2147483647, %v292_v22 }
  0xda   :  { %4486 = vrcp.f32 %v291_v24  ;;  %v304_v42 = vand.u32 2147483648, %v291_v24  ;;  %vm298_vm6 = vweird.f32 %v291_v24  ;;  %v302_v43 = vand.u32 2147483647, %v291_v24 }
  0xdb   :  { %v320_v37 = vor.u32 1.1754944e-38, %v319_v33  ;;  %vm318_vm4 = vcmp.eq.f32.partialorder %v317_v34, 8.507059e+37 }
  0xdc   :  { %v305_v45 = vor.u32 1.1754944e-38, %v304_v42  ;;  %vm303_vm8 = vcmp.eq.f32.partialorder %v302_v43, 8.507059e+37  ;;  %361 = vperm.xlu0 %4448, %v5308_v56  }
  0xdf   :  { %v4485_v25 = vpop.eup %4484 }
  0xe0   :  { %v309_v26 = vmul.f32 %v4485_v25, %v292_v22  ;;  %v4487_v28 = vpop.eup %4486  ;;  %vm314_vm1 = vweird.f32 %v4485_v25 }
  0xe1   :  { %v294_v30 = vmul.f32 %v4487_v28, %v291_v24  ;;  %vm315_vm3 = vmor %vm313_vm2, %vm314_vm1  ;;  %vm299_vm5 = vweird.f32 %v4487_v28 }
  0xe2   :  { %v310_v27 = vsub.f32 1.0, %v309_v26  ;;  %vm300_vm7 = vmor %vm298_vm6, %vm299_vm5 }
  0xe3   :  { %v295_v32 = vsub.f32 1.0, %v294_v30 }
  0xe4   :  { %v311_v29 = vmul.f32 %v4485_v25, %v310_v27 }
  0xe5   :  { %v296_v36 = vmul.f32 %v4487_v28, %v295_v32 }
  0xe6   :  { %v312_v31 = vadd.f32 %v4485_v25, %v311_v29 }
  0xe7   :  { %v297_v41 = vadd.f32 %v4487_v28, %v296_v36 }
  0xe8   :  { %v316_v35 = vsel %vm315_vm3, %v4485_v25, %v312_v31 }
  0xe9   :  { %v321_v39 = vsel %vm318_vm4, %v320_v37, %v316_v35  ;;  %v301_v44 = vsel %vm300_vm7, %v4487_v28, %v297_v41 }
  0xea   :  { %v306_v47 = vsel %vm303_vm8, %v305_v45, %v301_v44  ;;  %v344_v59 = vsub.f32 1.0, %v321_v39  ;;  %v356_v61 = vmul.f32 0.0, %v321_v39 }
  0xeb   :  { %v343_v63 = vsub.f32 1.0, %v306_v47  ;;  %v355_v1 = vmul.f32 0.0, %v306_v47 }
 0x13e   :  { %v326_v38 = vpop.permute.xlu0 %325 }
 0x13f   :  { %v330_v40 = vmul.f32 %v326_v38, %v321_v39 }
 0x141   :  { %335 = vrot.lane.b32.xlu1 %v330_v40, %s5077_s8 }
 0x146   :  { %v324_v46 = vpop.permute.xlu0 %323 }
 0x147   :  { %v329_v48 = vmul.f32 %v324_v46, %v306_v47 }
 0x149   :  { %333 = vrot.lane.b32.xlu1 %v329_v48, %s5077_s8 }
 0x14e   :  { %v5317_v9 = vpop.permute.xlu0 %361 }
 0x1b3   :  { %v336_v49 = vpop.permute.xlu1 %335 }
 0x1b4   :  { %v340_v50 = vadd.f32 %v336_v49, %v5291_v15 }
 0x1b6   :  { %4488 = vtanh.f32 %v340_v50 }
 0x1bb   :  { %v334_v51 = vpop.permute.xlu1 %333 }
 0x1bc   :  { %v4489_v52 = vpop.eup %4488  ;;  %v339_v53 = vadd.f32 %v334_v51, %v5294_v17 }
 0x1bd   :  { %349 = vrot.lane.b32.xlu2 %v4489_v52, %s5078_s9 }
 0x1be   :  { %4490 = vtanh.f32 %v339_v53 }
 0x1c4   :  { %v4491_v54 = vpop.eup %4490 }
 0x1c5   :  { %347 = vrot.lane.b32.xlu2 %v4491_v54, %s5078_s9 }
 0x1cd   :  { %382 = vperm.xlu2 %4449, %v5312_v57  }
 0x217   :  { %v350_v58 = vpop.permute.xlu2 %349 }
 0x218   :  { %v354_v60 = vmul.f32 %v350_v58, %v344_v59  ;;  %v5081_v59 = vmov 1  }
 0x219   :  { %4451 = vset.pattern.permute.xlu2 %v5081_v59  ;;  %4450 = vset.pattern.permute.xlu0 %v5081_v59 }
 0x21a   :  { %v358_v62 = vadd.f32 %v356_v61, %v354_v60 }
 0x21c   :  { %v366_v3 = vrot.slane %v358_v62, 7 }
 0x21f   :  { %v348_v0 = vpop.permute.xlu2 %347 }
 0x220   :  { %v353_v2 = vmul.f32 %v348_v0, %v343_v63 }
 0x222   :  { %v357_v4 = vadd.f32 %v355_v1, %v353_v2 }
 0x224   :  { %v368_v5 = vsel %vm367_vm9, %v366_v3, %v357_v4 }
 0x225   :  { %369 = vrot.lane.b32.xlu1 %v368_v5, %s5078_s9 }
 0x227   :  { %v383_v7 = vpop.permute.xlu2 %382 }
 0x228   :  { %v385_v10 = vmul.f32 0.0, %v383_v7 }
 0x297   :  { %v370_v11 = vpop.permute.xlu1 %369 }
 0x298   :  { %v372_v12 = vmul.f32 %v370_v11, %v5317_v9 }
 0x29a   :  { %v374_v13 = vrot.slane %v372_v12, 1  ;;  %377 = vst.msk [vmem:[#allocation2] sm:$0x1] %vm376_vm10, %v372_v12  ;;  %v5321_v14 = vadd.f32 %v385_v10, %v372_v12 }
 0x29c   :  { %378 = vst.msk [vmem:[#allocation2 + $0x8] sm:$0x1] %vm376_vm10, %v374_v13  ;;  %4326 = vmatmul.msk.f32.vlgmr.msra.gmra.mxu2 %vm217_vm0, %v5321_v14  ;;  %v486_v52 = vrot.slane %v5321_v14, 7 }
 0x31f   :  { %v407_v16 = vpop.f32.mrf.mxu2 }
 0x320   :  { %v408_v18 = vadd.f32 %v5286_v8, %v407_v16 }
 0x322   :  { %456 = vrot.lane.b32.xlu2 %v408_v18, %s5076_s29  ;;  %v411_v19 = vrot.slane %v408_v18, 7  ;;  %v415_v20 = vadd.f32 %v408_v18, %v5291_v15 }
 0x324   :  { %454 = vrot.lane.b32.xlu1 %v411_v19, %s5076_s29  ;;  %v4328_v21 = vmul.f32 -1.442695, %v415_v20  ;;  %v414_v24 = vadd.f32 %v411_v19, %v5294_v17 }
 0x326   :  { %4492 = vpow2.f32 %v4328_v21  ;;  %v4327_v26 = vmul.f32 -1.442695, %v414_v24 }
 0x32c   :  { %v4493_v22 = vpop.eup %4492 }
 0x32d   :  { %v423_v23 = vadd.f32 1.0, %v4493_v22 }
 0x32f   :  { %4494 = vrcp.f32 %v423_v23  ;;  %v450_v33 = vand.u32 2147483648, %v423_v23  ;;  %vm444_vm12 = vweird.f32 %v423_v23  ;;  %v448_v34 = vand.u32 2147483647, %v423_v23 }
 0x330   :  { %4496 = vpow2.f32 %v4327_v26 }
 0x331   :  { %v451_v36 = vor.u32 1.1754944e-38, %v450_v33  ;;  %vm449_vm14 = vcmp.eq.f32.partialorder %v448_v34, 8.507059e+37 }
 0x335   :  { %v4495_v25 = vpop.eup %4494 }
 0x336   :  { %v440_v27 = vmul.f32 %v4495_v25, %v423_v23  ;;  %v4497_v30 = vpop.eup %4496  ;;  %vm445_vm11 = vweird.f32 %v4495_v25 }
 0x337   :  { %v422_v32 = vadd.f32 1.0, %v4497_v30  ;;  %vm446_vm13 = vmor %vm444_vm12, %vm445_vm11 }
 0x338   :  { %v441_v28 = vsub.f32 1.0, %v440_v27 }
 0x339   :  { %4498 = vrcp.f32 %v422_v32  ;;  %v435_v45 = vand.u32 2147483648, %v422_v32  ;;  %vm429_vm1 = vweird.f32 %v422_v32  ;;  %v433_v46 = vand.u32 2147483647, %v422_v32 }
 0x33a   :  { %v442_v29 = vmul.f32 %v4495_v25, %v441_v28 }
 0x33b   :  { %v436_v48 = vor.u32 1.1754944e-38, %v435_v45  ;;  %vm434_vm3 = vcmp.eq.f32.partialorder %v433_v46, 8.507059e+37 }
 0x33c   :  { %v443_v31 = vadd.f32 %v4495_v25, %v442_v29 }
 0x33e   :  { %v447_v35 = vsel %vm446_vm13, %v4495_v25, %v443_v31 }
 0x33f   :  { %v452_v38 = vsel %vm449_vm14, %v451_v36, %v447_v35  ;;  %v4499_v40 = vpop.eup %4498 }
 0x340   :  { %v425_v41 = vmul.f32 %v4499_v40, %v422_v32  ;;  %vm430_vm15 = vweird.f32 %v4499_v40  ;;  %v475_v5 = vsub.f32 1.0, %v452_v38 }
 0x341   :  { %vm431_vm2 = vmor %vm429_vm1, %vm430_vm15 }
 0x342   :  { %v426_v42 = vsub.f32 1.0, %v425_v41 }
 0x344   :  { %v427_v43 = vmul.f32 %v4499_v40, %v426_v42 }
 0x346   :  { %v428_v44 = vadd.f32 %v4499_v40, %v427_v43 }
 0x348   :  { %v432_v47 = vsel %vm431_vm2, %v4499_v40, %v428_v44 }
 0x349   :  { %v437_v50 = vsel %vm434_vm3, %v436_v48, %v432_v47 }
 0x34a   :  { %v474_v0 = vsub.f32 1.0, %v437_v50 }
 0x37c   :  { %v457_v37 = vpop.permute.xlu2 %456 }
 0x37d   :  { %v461_v39 = vmul.f32 %v457_v37, %v452_v38 }
 0x37f   :  { %466 = vrot.lane.b32.xlu1 %v461_v39, %s5077_s8 }
 0x396   :  { %v455_v49 = vpop.permute.xlu1 %454 }
 0x397   :  { %v460_v51 = vmul.f32 %v455_v49, %v437_v50 }
 0x399   :  { %464 = vrot.lane.b32.xlu0 %v460_v51, %s5077_s8 }
 0x3a1   :  { %487 = vrot.lane.b32.xlu0 %v486_v52, %s5080_s5 }
 0x3a9   :  { %498 = vperm.xlu0 %4450, %v5308_v56  }
 0x3f1   :  { %v467_v53 = vpop.permute.xlu1 %466 }
 0x3f2   :  { %v471_v54 = vadd.f32 %v467_v53, %v5291_v15 }
 0x3f4   :  { %4500 = vtanh.f32 %v471_v54 }
 0x3fa   :  { %v4501_v58 = vpop.eup %4500 }
 0x3fb   :  { %480 = vrot.lane.b32.xlu1 %v4501_v58, %s5078_s9 }
 0x40b   :  { %v465_v60 = vpop.permute.xlu0 %464 }
 0x40c   :  { %v470_v61 = vadd.f32 %v465_v60, %v5294_v17 }
 0x40e   :  { %4502 = vtanh.f32 %v470_v61 }
 0x413   :  { %v488_v1 = vpop.permute.xlu0 %487 }
 0x414   :  { %v4503_v62 = vpop.eup %4502  ;;  %v493_v3 = vmul.f32 %v488_v1, %v437_v50 }
 0x415   :  { %478 = vrot.lane.b32.xlu2 %v4503_v62, %s5078_s9 }
 0x41b   :  { %v5347_v20 = vpop.permute.xlu0 %498 }
 0x41d   :  { %489 = vrot.lane.b32.xlu2 %v5321_v14, %s5080_s5 }
 0x425   :  { %515 = vperm.xlu2 %4451, %v5312_v57  }
 0x46d   :  { %v481_v4 = vpop.permute.xlu1 %480 }
 0x46e   :  { %v485_v11 = vmul.f32 %v481_v4, %v475_v5  ;;  %v5082_v4 = vmov 2  }
 0x46f   :  { %v479_v63 = vpop.permute.xlu2 %478  ;;  %4453 = vset.pattern.permute.xlu2 %v5082_v4  ;;  %4452 = vset.pattern.permute.xlu0 %v5082_v4 }
 0x470   :  { %v484_v2 = vmul.f32 %v479_v63, %v474_v0 }
 0x472   :  { %v495_v7 = vadd.f32 %v493_v3, %v484_v2 }
 0x474   :  { %v503_v13 = vrot.slane %v495_v7, 1 }
 0x477   :  { %v490_v10 = vpop.permute.xlu2 %489 }
 0x478   :  { %v494_v12 = vmul.f32 %v490_v10, %v452_v38 }
 0x47a   :  { %v496_v16 = vadd.f32 %v494_v12, %v485_v11 }
 0x47c   :  { %v504_v18 = vsel %vm367_vm9, %v496_v16, %v503_v13 }
 0x47d   :  { %505 = vrot.lane.b32.xlu1 %v504_v18, %s5078_s9 }
 0x47f   :  { %v5345_v19 = vpop.permute.xlu2 %515 }
 0x480   :  { %v518_v22 = vmul.f32 %v5345_v19, %v5321_v14 }
 0x4ef   :  { %v506_v21 = vpop.permute.xlu1 %505 }
 0x4f0   :  { %v508_v23 = vmul.f32 %v506_v21, %v5347_v20 }
 0x4f2   :  { %v510_v24 = vrot.slane %v508_v23, 1  ;;  %512 = vst.msk [vmem:[#allocation2 + $0x1] sm:$0x1] %vm376_vm10, %v508_v23  ;;  %v5353_v25 = vadd.f32 %v518_v22, %v508_v23 }
 0x4f4   :  { %513 = vst.msk [vmem:[#allocation2 + $0x9] sm:$0x1] %vm376_vm10, %v510_v24  ;;  %4329 = vmatmul.msk.f32.vlgmr.msrb.gmra.mxu3 %vm217_vm0, %v5353_v25  ;;  %v620_v51 = vrot.slane %v5353_v25, 6  ;;  %v621_v11 = vrot.slane %v5353_v25, 7 }
 0x577   :  { %v540_v26 = vpop.f32.mrf.mxu3 }
 0x578   :  { %v541_v27 = vadd.f32 %v5286_v8, %v540_v26 }
 0x57a   :  { %v544_v28 = vrot.slane %v541_v27, 6  ;;  %v545_v29 = vrot.slane %v541_v27, 7 }
 0x57c   :  { %590 = vrot.lane.b32.xlu2 %v545_v29, %s5076_s29  ;;  %588 = vrot.lane.b32.xlu1 %v544_v28, %s5076_s29  ;;  %v549_v14 = vadd.f32 %v545_v29, %v5291_v15  ;;  %v548_v33 = vadd.f32 %v544_v28, %v5294_v17 }
 0x57e   :  { %v4331_v30 = vmul.f32 -1.442695, %v549_v14  ;;  %v4330_v35 = vmul.f32 -1.442695, %v548_v33 }
 0x580   :  { %4504 = vpow2.f32 %v4331_v30 }
 0x586   :  { %v4505_v31 = vpop.eup %4504 }
 0x587   :  { %v557_v32 = vadd.f32 1.0, %v4505_v31 }
 0x589   :  { %4506 = vrcp.f32 %v557_v32  ;;  %v584_v42 = vand.u32 2147483648, %v557_v32  ;;  %vm578_vm5 = vweird.f32 %v557_v32  ;;  %v582_v43 = vand.u32 2147483647, %v557_v32 }
 0x58a   :  { %4508 = vpow2.f32 %v4330_v35 }
 0x58b   :  { %v585_v45 = vor.u32 1.1754944e-38, %v584_v42  ;;  %vm583_vm7 = vcmp.eq.f32.partialorder %v582_v43, 8.507059e+37 }
 0x58f   :  { %v4507_v34 = vpop.eup %4506 }
 0x590   :  { %v574_v36 = vmul.f32 %v4507_v34, %v557_v32  ;;  %v4509_v38 = vpop.eup %4508  ;;  %vm579_vm4 = vweird.f32 %v4507_v34 }
 0x591   :  { %v556_v40 = vadd.f32 1.0, %v4509_v38  ;;  %vm580_vm6 = vmor %vm578_vm5, %vm579_vm4 }
 0x592   :  { %v575_v37 = vsub.f32 1.0, %v574_v36 }
 0x593   :  { %4510 = vrcp.f32 %v556_v40  ;;  %v569_v58 = vand.u32 2147483648, %v556_v40  ;;  %vm563_vm11 = vweird.f32 %v556_v40  ;;  %v567_v59 = vand.u32 2147483647, %v556_v40 }
 0x594   :  { %v576_v39 = vmul.f32 %v4507_v34, %v575_v37 }
 0x595   :  { %v570_v61 = vor.u32 1.1754944e-38, %v569_v58  ;;  %vm568_vm13 = vcmp.eq.f32.partialorder %v567_v59, 8.507059e+37 }
 0x596   :  { %v577_v41 = vadd.f32 %v4507_v34, %v576_v39 }
 0x598   :  { %v581_v44 = vsel %vm580_vm6, %v4507_v34, %v577_v41 }
 0x599   :  { %v586_v47 = vsel %vm583_vm7, %v585_v45, %v581_v44  ;;  %v4511_v49 = vpop.eup %4510 }
 0x59a   :  { %v559_v50 = vmul.f32 %v4511_v49, %v556_v40  ;;  %vm564_vm8 = vweird.f32 %v4511_v49  ;;  %v609_v23 = vsub.f32 1.0, %v586_v47 }
 0x59b   :  { %vm565_vm12 = vmor %vm563_vm11, %vm564_vm8 }
 0x59c   :  { %v560_v52 = vsub.f32 1.0, %v559_v50 }
 0x59e   :  { %v561_v53 = vmul.f32 %v4511_v49, %v560_v52 }
 0x5a0   :  { %v562_v54 = vadd.f32 %v4511_v49, %v561_v53 }
 0x5a2   :  { %v566_v60 = vsel %vm565_vm12, %v4511_v49, %v562_v54 }
 0x5a3   :  { %v571_v63 = vsel %vm568_vm13, %v570_v61, %v566_v60 }
 0x5a4   :  { %v608_v13 = vsub.f32 1.0, %v571_v63 }
 0x5d6   :  { %v591_v46 = vpop.permute.xlu2 %590 }
 0x5d7   :  { %v595_v48 = vmul.f32 %v591_v46, %v586_v47 }
 0x5d9   :  { %600 = vrot.lane.b32.xlu1 %v595_v48, %s5077_s8 }
 0x5e1   :  { %622 = vrot.lane.b32.xlu1 %v620_v51, %s5080_s5 }
 0x5ee   :  { %v589_v62 = vpop.permute.xlu1 %588 }
 0x5ef   :  { %v594_v0 = vmul.f32 %v589_v62, %v571_v63 }
 0x5f1   :  { %598 = vrot.lane.b32.xlu0 %v594_v0, %s5077_s8 }
 0x64b   :  { %v601_v1 = vpop.permute.xlu1 %600 }
 0x64c   :  { %v605_v2 = vadd.f32 %v601_v1, %v5291_v15 }
 0x64e   :  { %4512 = vtanh.f32 %v605_v2 }
 0x653   :  { %v623_v16 = vpop.permute.xlu1 %622 }
 0x654   :  { %v4513_v3 = vpop.eup %4512  ;;  %v628_v22 = vmul.f32 %v623_v16, %v571_v63 }
 0x655   :  { %614 = vrot.lane.b32.xlu0 %v4513_v3, %s5078_s9 }
 0x65d   :  { %633 = vperm.xlu0 %4452, %v5308_v56  }
 0x663   :  { %v599_v5 = vpop.permute.xlu0 %598 }
 0x664   :  { %v604_v7 = vadd.f32 %v599_v5, %v5294_v17 }
 0x666   :  { %4514 = vtanh.f32 %v604_v7 }
 0x66c   :  { %v4515_v10 = vpop.eup %4514 }
 0x66d   :  { %612 = vrot.lane.b32.xlu2 %v4515_v10, %s5078_s9 }
 0x675   :  { %624 = vrot.lane.b32.xlu2 %v621_v11, %s5080_s5 }
 0x67d   :  { %651 = vperm.xlu2 %4453, %v5312_v57  }
 0x6c7   :  { %v613_v12 = vpop.permute.xlu2 %612  ;;  %v615_v21 = vpop.permute.xlu0 %614 }
 0x6c8   :  { %v618_v18 = vmul.f32 %v613_v12, %v608_v13  ;;  %v619_v27 = vmul.f32 %v615_v21, %v609_v23 }
 0x6ca   :  { %v630_v26 = vadd.f32 %v628_v22, %v618_v18 }
 0x6cc   :  { %v638_v14 = vrot.slane %v630_v26, 2  ;;  %v5083_v26 = vmov 3  }
 0x6cd   :  { %4455 = vset.pattern.permute.xlu2 %v5083_v26  ;;  %4454 = vset.pattern.permute.xlu0 %v5083_v26 }
 0x6cf   :  { %v625_v24 = vpop.permute.xlu2 %624  ;;  %v5379_v33 = vpop.permute.xlu0 %633 }
 0x6d0   :  { %v629_v28 = vmul.f32 %v625_v24, %v586_v47 }
 0x6d2   :  { %v631_v29 = vadd.f32 %v629_v28, %v619_v27 }
 0x6d4   :  { %v639_v30 = vrot.slane %v631_v29, 1 }
 0x6d6   :  { %v640_v31 = vsel %vm367_vm9, %v639_v30, %v638_v14 }
 0x6d7   :  { %641 = vrot.lane.b32.xlu1 %v640_v31, %s5078_s9  ;;  %v5377_v32 = vpop.permute.xlu2 %651 }
 0x6d8   :  { %v654_v35 = vmul.f32 %v5377_v32, %v5353_v25 }
 0x749   :  { %v642_v34 = vpop.permute.xlu1 %641 }
 0x74a   :  { %v644_v36 = vmul.f32 %v642_v34, %v5379_v33 }
 0x74c   :  { %v646_v37 = vrot.slane %v644_v36, 1  ;;  %648 = vst.msk [vmem:[#allocation2 + $0x2] sm:$0x1] %vm376_vm10, %v644_v36  ;;  %v5385_v38 = vadd.f32 %v654_v35, %v644_v36 }
 0x74e   :  { %649 = vst.msk [vmem:[#allocation2 + $0xa] sm:$0x1] %vm376_vm10, %v646_v37  ;;  %4332 = vmatmul.msk.f32.vlgmr.msra.gmra.mxu1 %vm217_vm0, %v5385_v38  ;;  %v756_v3 = vrot.slane %v5385_v38, 5  ;;  %v757_v14 = vrot.slane %v5385_v38, 6 }
 0x7cb   :  { %v676_v39 = vpop.f32.mrf.mxu1 }
 0x7cc   :  { %v677_v40 = vadd.f32 %v5286_v8, %v676_v39 }
 0x7ce   :  { %v680_v41 = vrot.slane %v677_v40, 5  ;;  %v681_v42 = vrot.slane %v677_v40, 6 }
 0x7d0   :  { %726 = vrot.lane.b32.xlu2 %v681_v42, %s5076_s29  ;;  %724 = vrot.lane.b32.xlu1 %v680_v41, %s5076_s29  ;;  %v685_v25 = vadd.f32 %v681_v42, %v5291_v15  ;;  %v684_v46 = vadd.f32 %v680_v41, %v5294_v17 }
 0x7d2   :  { %v4334_v43 = vmul.f32 -1.442695, %v685_v25  ;;  %v4333_v48 = vmul.f32 -1.442695, %v684_v46 }
 0x7d4   :  { %4516 = vpow2.f32 %v4334_v43 }
 0x7da   :  { %v4517_v44 = vpop.eup %4516 }
 0x7db   :  { %v693_v45 = vadd.f32 1.0, %v4517_v44 }
 0x7dd   :  { %4518 = vrcp.f32 %v693_v45  ;;  %v720_v58 = vand.u32 2147483648, %v693_v45  ;;  %vm714_vm15 = vweird.f32 %v693_v45  ;;  %v718_v59 = vand.u32 2147483647, %v693_v45 }
 0x7de   :  { %4520 = vpow2.f32 %v4333_v48  ;;  %v5411_v48 = vld [vmem:[#allocation14] sm:$0xff] }
 0x7df   :  { %v721_v61 = vor.u32 1.1754944e-38, %v720_v58  ;;  %vm719_vm2 = vcmp.eq.f32.partialorder %v718_v59, 8.507059e+37 }
 0x7e3   :  { %v4519_v47 = vpop.eup %4518 }
 0x7e4   :  { %v710_v49 = vmul.f32 %v4519_v47, %v693_v45  ;;  %v4521_v51 = vpop.eup %4520  ;;  %vm715_vm14 = vweird.f32 %v4519_v47 }
 0x7e5   :  { %v692_v53 = vadd.f32 1.0, %v4521_v51  ;;  %vm716_vm1 = vmor %vm714_vm15, %vm715_vm14 }
 0x7e6   :  { %v711_v50 = vsub.f32 1.0, %v710_v49 }
 0x7e7   :  { %4522 = vrcp.f32 %v692_v53  ;;  %v705_v10 = vand.u32 2147483648, %v692_v53  ;;  %vm699_vm4 = vweird.f32 %v692_v53  ;;  %v703_v11 = vand.u32 2147483647, %v692_v53 }
 0x7e8   :  { %v712_v52 = vmul.f32 %v4519_v47, %v711_v50 }
 0x7e9   :  { %v706_v13 = vor.u32 1.1754944e-38, %v705_v10  ;;  %vm704_vm6 = vcmp.eq.f32.partialorder %v703_v11, 8.507059e+37 }
 0x7ea   :  { %v713_v54 = vadd.f32 %v4519_v47, %v712_v52 }
 0x7ec   :  { %v717_v60 = vsel %vm716_vm1, %v4519_v47, %v713_v54  ;;  %v5409_v47 = vld [vmem:[#allocation14 + $0x8] sm:$0xff] }
 0x7ed   :  { %v722_v63 = vsel %vm719_vm2, %v721_v61, %v717_v60  ;;  %v4523_v1 = vpop.eup %4522  ;;  %1347 = vmatpush.msra.mxu2 %v5409_v47  ;;  %1475 = vmatpush.msrb.mxu3 %v5409_v47  ;;  %v5442_v61 = vld [vmem:[%s6774_s0] ss:$0 sm:$0xff] }
 0x7ee   :  { %v695_v2 = vmul.f32 %v4523_v1, %v692_v53  ;;  %vm700_vm3 = vweird.f32 %v4523_v1  ;;  %v745_v39 = vsub.f32 1.0, %v722_v63  ;;  %1607 = vmatpush.msra.mxu0 %v5409_v47  ;;  %1739 = vmatpush.msra.mxu1 %v5409_v47 }
 0x7ef   :  { %vm701_vm5 = vmor %vm699_vm4, %vm700_vm3  ;;  %1348 = vmatpush.msra.mxu2 %v5411_v48  ;;  %1476 = vmatpush.msrb.mxu3 %v5411_v48 }
 0x7f0   :  { %v696_v4 = vsub.f32 1.0, %v695_v2  ;;  %1608 = vmatpush.msra.mxu0 %v5411_v48  ;;  %1740 = vmatpush.msra.mxu1 %v5411_v48 }
 0x7f2   :  { %v697_v5 = vmul.f32 %v4523_v1, %v696_v4 }
 0x7f4   :  { %v698_v7 = vadd.f32 %v4523_v1, %v697_v5 }
 0x7f6   :  { %v702_v12 = vsel %vm701_vm5, %v4523_v1, %v698_v7 }
 0x7f7   :  { %v707_v18 = vsel %vm704_vm6, %v706_v13, %v702_v12 }
 0x7f8   :  { %v744_v31 = vsub.f32 1.0, %v707_v18 }
 0x82a   :  { %v727_v62 = vpop.permute.xlu2 %726 }
 0x82b   :  { %v731_v0 = vmul.f32 %v727_v62, %v722_v63 }
 0x82d   :  { %736 = vrot.lane.b32.xlu1 %v731_v0, %s5077_s8 }
 0x835   :  { %758 = vrot.lane.b32.xlu1 %v756_v3, %s5080_s5 }
 0x842   :  { %v725_v16 = vpop.permute.xlu1 %724 }
 0x843   :  { %v730_v21 = vmul.f32 %v725_v16, %v707_v18 }
 0x845   :  { %734 = vrot.lane.b32.xlu0 %v730_v21, %s5077_s8 }
 0x89f   :  { %v737_v22 = vpop.permute.xlu1 %736 }
 0x8a0   :  { %v741_v23 = vadd.f32 %v737_v22, %v5291_v15 }
 0x8a2   :  { %4524 = vtanh.f32 %v741_v23 }
 0x8a7   :  { %v759_v34 = vpop.permute.xlu1 %758 }
 0x8a8   :  { %v4525_v24 = vpop.eup %4524  ;;  %v764_v37 = vmul.f32 %v759_v34, %v707_v18 }
 0x8a9   :  { %750 = vrot.lane.b32.xlu0 %v4525_v24, %s5078_s9 }
 0x8b1   :  { %769 = vperm.xlu0 %4454, %v5308_v56  }
 0x8b7   :  { %v735_v27 = vpop.permute.xlu0 %734 }
 0x8b8   :  { %v740_v28 = vadd.f32 %v735_v27, %v5294_v17 }
 0x8ba   :  { %4526 = vtanh.f32 %v740_v28 }
 0x8c0   :  { %v4527_v29 = vpop.eup %4526 }
 0x8c1   :  { %748 = vrot.lane.b32.xlu2 %v4527_v29, %s5078_s9 }
 0x8c9   :  { %760 = vrot.lane.b32.xlu2 %v757_v14, %s5080_s5 }
 0x8d1   :  { %787 = vperm.xlu2 %4455, %v5312_v57  }
 0x91b   :  { %v749_v30 = vpop.permute.xlu2 %748  ;;  %v751_v36 = vpop.permute.xlu0 %750 }
 0x91c   :  { %v754_v35 = vmul.f32 %v749_v30, %v744_v31  ;;  %v755_v42 = vmul.f32 %v751_v36, %v745_v39 }
 0x91e   :  { %v766_v41 = vadd.f32 %v764_v37, %v754_v35 }
 0x920   :  { %v774_v44 = vrot.slane %v766_v41, 3 }
 0x923   :  { %v761_v40 = vpop.permute.xlu2 %760  ;;  %v5423_v50 = vpop.permute.xlu0 %769 }
 0x924   :  { %v765_v25 = vmul.f32 %v761_v40, %v722_v63 }
 0x926   :  { %v767_v43 = vadd.f32 %v765_v25, %v755_v42 }
 0x928   :  { %v775_v45 = vrot.slane %v767_v43, 2 }
 0x92a   :  { %v776_v46 = vsel %vm367_vm9, %v775_v45, %v774_v44 }
 0x92b   :  { %777 = vrot.lane.b32.xlu1 %v776_v46, %s5078_s9  ;;  %v5421_v49 = vpop.permute.xlu2 %787 }
 0x92c   :  { %v790_v52 = vmul.f32 %v5421_v49, %v5385_v38 }
 0x99d   :  { %v778_v51 = vpop.permute.xlu1 %777 }
 0x99e   :  { %v780_v53 = vmul.f32 %v778_v51, %v5423_v50 }
 0x9a0   :  { %v782_v54 = vrot.slane %v780_v53, 1  ;;  %784 = vst.msk [vmem:[#allocation2 + $0x3] sm:$0x1] %vm376_vm10, %v780_v53  ;;  %v5429_v58 = vadd.f32 %v790_v52, %v780_v53 }
 0x9a2   :  { %785 = vst.msk [vmem:[#allocation2 + $0xb] sm:$0x1] %vm376_vm10, %v782_v54  ;;  %4335 = vmatmul.msk.f32.vlgmr.msrb.gmra.mxu2 %vm217_vm0, %v5429_v58 }
 0x9a3   :  { %1871 = vmatpush.msrb.mxu2 %v5409_v47 }
 0x9a5   :  { %1872 = vmatpush.msrb.mxu2 %v5411_v48 }
 0x9aa   :  { %1349 = vmatmul.f32.vlgmr.msra.gmra.mxu2 %v5075_v6 }
 0xa25   :  { %v812_v59 = vpop.f32.mrf.mxu2 }
 0xa26   :  { %v813_v38 = vadd.f32 %v5286_v8, %v812_v59 }
 0xa28   :  { %v816_v60 = vrot.slane %v813_v38, 4  ;;  %v817_v6 = vrot.slane %v813_v38, 5 }
 0xa2a   :  { %860 = vrot.lane.b32.xlu0 %v816_v60, %s5076_s29  ;;  %v820_v8 = vadd.f32 %v816_v60, %v5294_v17  ;;  %v821_v4 = vadd.f32 %v817_v6, %v5291_v15 }
 0xa2c   :  { %v4336_v2 = vmul.f32 -1.442695, %v820_v8  ;;  %v4337_v7 = vmul.f32 -1.442695, %v821_v4 }
 0xa2d   :  { %v1350_v62 = vpop.f32.mrf.mxu2 }
 0xa2e   :  { %v1351_v63 = vadd.f32 %v5442_v61, %v1350_v62  ;;  %4528 = vpow2.f32 %v4336_v2 }
 0xa30   :  { %v1354_v0 = vrot.slane %v1351_v63, 1  ;;  %v1355_v1 = vrot.slane %v1351_v63, 2 }
 0xa32   :  { %1358 = vrot.lane.b32.xlu2 %v1355_v1, %s5084_s6  ;;  %1356 = vrot.lane.b32.xlu1 %v1354_v0, %s5084_s6 }
 0xa33   :  { %1404 = vrot.lane.b32.xlu0 %v1355_v1, %s5080_s5 }
 0xa34   :  { %v4529_v3 = vpop.eup %4528 }
 0xa35   :  { %v828_v5 = vadd.f32 1.0, %v4529_v3 }
 0xa37   :  { %4530 = vrcp.f32 %v828_v5  ;;  %v841_v27 = vand.u32 2147483648, %v828_v5  ;;  %vm835_vm8 = vweird.f32 %v828_v5  ;;  %v839_v29 = vand.u32 2147483647, %v828_v5 }
 0xa38   :  { %4532 = vpow2.f32 %v4337_v7 }
 0xa39   :  { %v842_v34 = vor.u32 1.1754944e-38, %v841_v27  ;;  %vm840_vm12 = vcmp.eq.f32.partialorder %v839_v29, 8.507059e+37 }
 0xa3a   :  { %1402 = vrot.lane.b32.xlu2 %v1354_v0, %s5080_s5  ;;  %862 = vrot.lane.b32.xlu1 %v817_v6, %s5076_s29 }
 0xa3d   :  { %v4531_v10 = vpop.eup %4530 }
 0xa3e   :  { %v4533_v11 = vpop.eup %4532  ;;  %v831_v12 = vmul.f32 %v4531_v10, %v828_v5  ;;  %vm836_vm7 = vweird.f32 %v4531_v10 }
 0xa3f   :  { %v829_v13 = vadd.f32 1.0, %v4533_v11  ;;  %vm837_vm11 = vmor %vm835_vm8, %vm836_vm7 }
 0xa40   :  { %v832_v21 = vsub.f32 1.0, %v831_v12 }
 0xa41   :  { %4534 = vrcp.f32 %v829_v13  ;;  %vm850_vm15 = vweird.f32 %v829_v13  ;;  %v856_v53 = vand.u32 2147483648, %v829_v13  ;;  %v854_v38 = vand.u32 2147483647, %v829_v13 }
 0xa42   :  { %v833_v23 = vmul.f32 %v4531_v10, %v832_v21 }
 0xa43   :  { %v857_v6 = vor.u32 1.1754944e-38, %v856_v53  ;;  %vm855_vm5 = vcmp.eq.f32.partialorder %v854_v38, 8.507059e+37 }
 0xa44   :  { %v834_v26 = vadd.f32 %v4531_v10, %v833_v23 }
 0xa46   :  { %v838_v31 = vsel %vm837_vm11, %v4531_v10, %v834_v26  ;;  %v892_v10 = vrot.slane %v5429_v58, 4 }
 0xa47   :  { %v4535_v24 = vpop.eup %4534  ;;  %v5453_v36 = vsel %vm840_vm12, %v842_v34, %v838_v31 }
 0xa48   :  { %v846_v30 = vmul.f32 %v4535_v24, %v829_v13  ;;  %vm851_vm13 = vweird.f32 %v4535_v24 }
 0xa49   :  { %vm852_vm2 = vmor %vm850_vm15, %vm851_vm13 }
 0xa4a   :  { %v847_v37 = vsub.f32 1.0, %v846_v30  ;;  %v5085_v30 = vmov 4  }
 0xa4b   :  { %4457 = vset.pattern.permute.xlu1 %v5085_v30  ;;  %4456 = vset.pattern.permute.xlu2 %v5085_v30 }
 0xa4c   :  { %v848_v41 = vmul.f32 %v4535_v24, %v847_v37 }
 0xa4e   :  { %v849_v45 = vadd.f32 %v4535_v24, %v848_v41  ;;  %v893_v41 = vrot.slane %v5429_v58, 5 }
 0xa50   :  { %v853_v63 = vsel %vm852_vm2, %v4535_v24, %v849_v45 }
 0xa51   :  { %v5461_v3 = vsel %vm855_vm5, %v857_v6, %v853_v63 }
 0xa8c   :  { %v1359_v16 = vpop.permute.xlu2 %1358 }
 0xa8d   :  { %v1363_v18 = vadd.f32 %v1359_v16, %v5291_v15 }
 0xa8f   :  { %v4348_v22 = vmul.f32 -1.442695, %v1363_v18 }
 0xa91   :  { %4536 = vpow2.f32 %v4348_v22 }
 0xa94   :  { %v1403_v26 = vpop.permute.xlu2 %1402 }
 0xa97   :  { %v4537_v28 = vpop.eup %4536 }
 0xa98   :  { %v1371_v14 = vadd.f32 1.0, %v4537_v28 }
 0xa9a   :  { %4538 = vrcp.f32 %v1371_v14  ;;  %v1398_v44 = vand.u32 2147483648, %v1371_v14  ;;  %v1396_v52 = vand.u32 2147483647, %v1371_v14  ;;  %vm1392_vm1 = vweird.f32 %v1371_v14 }
 0xa9c   :  { %v861_v35 = vpop.permute.xlu0 %860  ;;  %v1399_v60 = vor.u32 1.1754944e-38, %v1398_v44  ;;  %vm1397_vm4 = vcmp.eq.f32.partialorder %v1396_v52, 8.507059e+37 }
 0xa9d   :  { %v866_v39 = vmul.f32 %v861_v35, %v5453_v36 }
 0xa9f   :  { %870 = vrot.lane.b32.xlu1 %v866_v39, %s5077_s8 }
 0xaa0   :  { %v4539_v40 = vpop.eup %4538 }
 0xaa1   :  { %v1388_v42 = vmul.f32 %v4539_v40, %v1371_v14  ;;  %vm1393_vm14 = vweird.f32 %v4539_v40 }
 0xaa2   :  { %vm1394_vm3 = vmor %vm1392_vm1, %vm1393_vm14 }
 0xaa3   :  { %v1389_v25 = vsub.f32 1.0, %v1388_v42 }
 0xaa4   :  { %v1357_v43 = vpop.permute.xlu1 %1356 }
 0xaa5   :  { %v1362_v46 = vadd.f32 %v1357_v43, %v5294_v17  ;;  %v1390_v51 = vmul.f32 %v4539_v40, %v1389_v25  ;;  %v1405_v1 = vpop.permute.xlu0 %1404 }
 0xaa7   :  { %v4347_v54 = vmul.f32 -1.442695, %v1362_v46  ;;  %v1391_v59 = vadd.f32 %v4539_v40, %v1390_v51  ;;  %v880_v46 = vsub.f32 1.0, %v5453_v36 }
 0xaa9   :  { %4540 = vpow2.f32 %v4347_v54  ;;  %v1395_v62 = vsel %vm1394_vm3, %v4539_v40, %v1391_v59  ;;  %v881_v59 = vsub.f32 1.0, %v5461_v3 }
 0xaaa   :  { %v5458_v0 = vsel %vm1397_vm4, %v1399_v60, %v1395_v62 }
 0xaab   :  { %v1409_v8 = vmul.f32 %v1405_v1, %v5458_v0 }
 0xaac   :  { %v863_v2 = vpop.permute.xlu1 %862 }
 0xaad   :  { %v867_v4 = vmul.f32 %v863_v2, %v5461_v3  ;;  %1414 = vrot.lane.b32.xlu1 %v1409_v8, %s5077_s8 }
 0xaaf   :  { %v4541_v5 = vpop.eup %4540  ;;  %872 = vrot.lane.b32.xlu2 %v867_v4, %s5077_s8  ;;  %v5086_v4 = vmov 7  }
 0xab0   :  { %v1370_v7 = vadd.f32 1.0, %v4541_v5  ;;  %v1423_v5 = vsub.f32 1.0, %v5458_v0 }
 0xab2   :  { %4542 = vrcp.f32 %v1370_v7  ;;  %v1383_v16 = vand.u32 2147483648, %v1370_v7  ;;  %v1381_v21 = vand.u32 2147483647, %v1370_v7  ;;  %vm1377_vm7 = vweird.f32 %v1370_v7 }
 0xab4   :  { %v1384_v23 = vor.u32 1.1754944e-38, %v1383_v16  ;;  %vm1382_vm11 = vcmp.eq.f32.partialorder %v1381_v21, 8.507059e+37 }
 0xab5   :  { %894 = vrot.lane.b32.xlu1 %v892_v10, %s5080_s5 }
 0xab8   :  { %v4543_v11 = vpop.eup %4542 }
 0xab9   :  { %v1373_v12 = vmul.f32 %v4543_v11, %v1370_v7  ;;  %vm1378_vm6 = vweird.f32 %v4543_v11 }
 0xaba   :  { %vm1379_vm8 = vmor %vm1377_vm7, %vm1378_vm6 }
 0xabb   :  { %v1374_v13 = vsub.f32 1.0, %v1373_v12 }
 0xabd   :  { %v1375_v18 = vmul.f32 %v4543_v11, %v1374_v13 }
 0xabf   :  { %v1376_v22 = vadd.f32 %v4543_v11, %v1375_v18 }
 0xac1   :  { %v1380_v24 = vsel %vm1379_vm8, %v4543_v11, %v1376_v22 }
 0xac2   :  { %v1385_v27 = vsel %vm1382_vm11, %v1384_v23, %v1380_v24 }
 0xac3   :  { %v1408_v28 = vmul.f32 %v1403_v26, %v1385_v27  ;;  %v1422_v10 = vsub.f32 1.0, %v1385_v27  ;;  %v1434_v13 = vmul.f32 0.0, %v1385_v27 }
 0xac5   :  { %1412 = vrot.lane.b32.xlu0 %v1408_v28, %s5077_s8 }
 0xb09   :  { %v873_v29 = vpop.permute.xlu2 %872 }
 0xb0a   :  { %v877_v14 = vadd.f32 %v873_v29, %v5291_v15 }
 0xb0c   :  { %4544 = vtanh.f32 %v877_v14 }
 0xb11   :  { %v871_v31 = vpop.permute.xlu1 %870 }
 0xb12   :  { %v4545_v34 = vpop.eup %4544  ;;  %v876_v35 = vadd.f32 %v871_v31, %v5294_v17 }
 0xb13   :  { %886 = vrot.lane.b32.xlu0 %v4545_v34, %s5078_s9 }
 0xb14   :  { %4546 = vtanh.f32 %v876_v35 }
 0xb1a   :  { %v4547_v37 = vpop.eup %4546 }
 0xb1b   :  { %884 = vrot.lane.b32.xlu2 %v4547_v37, %s5078_s9 }
 0xb1f   :  { %v1415_v39 = vpop.permute.xlu1 %1414 }
 0xb20   :  { %v1419_v40 = vadd.f32 %v1415_v39, %v5291_v15 }
 0xb22   :  { %4548 = vtanh.f32 %v1419_v40  ;;  %v5517_v40 = vld [vmem:[#allocation13] ss:$0 sm:$0xff] }
 0xb23   :  { %896 = vrot.lane.b32.xlu2 %v893_v41, %s5080_s5 }
 0xb27   :  { %v895_v51 = vpop.permute.xlu1 %894 }
 0xb28   :  { %v4549_v42 = vpop.eup %4548  ;;  %v900_v54 = vmul.f32 %v895_v51, %v5453_v36 }
 0xb29   :  { %1428 = vrot.lane.b32.xlu1 %v4549_v42, %s5078_s9 }
 0xb2b   :  { %905 = vperm.xlu2 %4456, %v5308_v56  }
 0xb31   :  { %923 = vperm.xlu1 %4457, %v5312_v57  }
 0xb33   :  { %4458 = vset.pattern.permute.xlu2 %v5086_v4 }
 0xb34   :  { %1313 = vperm.xlu2 %4458, %v5308_v56  }
 0xb37   :  { %v1413_v25 = vpop.permute.xlu0 %1412 }
 0xb38   :  { %v1418_v43 = vadd.f32 %v1413_v25, %v5294_v17 }
 0xb39   :  { %4459 = vset.pattern.permute.xlu1 %v5086_v4 }
 0xb3a   :  { %4550 = vtanh.f32 %v1418_v43  ;;  %1453 = vperm.xlu1 %4459, %v5312_v57  }
 0xb40   :  { %v4551_v44 = vpop.eup %4550 }
 0xb41   :  { %1426 = vrot.lane.b32.xlu0 %v4551_v44, %s5078_s9 }
 0xb75   :  { %v885_v45 = vpop.permute.xlu2 %884 }
 0xb76   :  { %v890_v52 = vmul.f32 %v885_v45, %v880_v46 }
 0xb78   :  { %v902_v60 = vadd.f32 %v900_v54, %v890_v52 }
 0xb7a   :  { %v910_v6 = vrot.slane %v902_v60, 4 }
 0xb7d   :  { %v897_v53 = vpop.permute.xlu2 %896 }
 0xb7e   :  { %v901_v62 = vmul.f32 %v897_v53, %v5461_v3  ;;  %v1435_v3 = vmul.f32 0.0, %v5458_v0 }
 0xb85   :  { %v887_v38 = vpop.permute.xlu0 %886  ;;  %v5495_v24 = vpop.permute.xlu2 %905 }
 0xb86   :  { %v891_v63 = vmul.f32 %v887_v38, %v881_v59 }
 0xb88   :  { %v903_v1 = vadd.f32 %v901_v62, %v891_v63 }
 0xb8a   :  { %v911_v8 = vrot.slane %v903_v1, 3 }
 0xb8c   :  { %v912_v2 = vsel %vm367_vm9, %v911_v8, %v910_v6 }
 0xb8d   :  { %913 = vrot.lane.b32.xlu0 %v912_v2, %s5078_s9 }
 0xb8e   :  { %v5508_v30 = vpop.permute.xlu2 %1313 }
 0xb9b   :  { %v1429_v36 = vpop.permute.xlu1 %1428 }
 0xb9c   :  { %v1433_v7 = vmul.f32 %v1429_v36, %v1423_v5 }
 0xb9e   :  { %v1437_v12 = vadd.f32 %v1435_v3, %v1433_v7 }
 0xba0   :  { %v1441_v21 = vrot.slane %v1437_v12, 6 }
 0xba3   :  { %v5493_v56 = vpop.permute.xlu1 %923 }
 0xba4   :  { %v926_v0 = vmul.f32 %v5493_v56, %v5429_v58 }
 0xbac   :  { %v1454_v14 = vpop.permute.xlu1 %1453 }
 0xbad   :  { %v1456_v58 = vmul.f32 0.0, %v1454_v14 }
 0xbb3   :  { %v1427_v11 = vpop.permute.xlu0 %1426 }
 0xbb4   :  { %v1432_v16 = vmul.f32 %v1427_v11, %v1422_v10 }
 0xbb6   :  { %v1436_v18 = vadd.f32 %v1434_v13, %v1432_v16 }
 0xbb8   :  { %v1440_v22 = vrot.slane %v1436_v18, 7 }
 0xbba   :  { %v1442_v23 = vsel %vm367_vm9, %v1441_v21, %v1440_v22 }
 0xbbb   :  { %1443 = vrot.lane.b32.xlu0 %v1442_v23, %s5087_s20 }
 0xbff   :  { %v914_v26 = vpop.permute.xlu0 %913 }
 0xc00   :  { %v916_v28 = vmul.f32 %v914_v26, %v5495_v24 }
 0xc02   :  { %v918_v27 = vrot.slane %v916_v28, 1  ;;  %920 = vst.msk [vmem:[#allocation2 + $0x4] sm:$0x1] %vm376_vm10, %v916_v28  ;;  %v5501_v29 = vadd.f32 %v926_v0, %v916_v28 }
 0xc04   :  { %921 = vst.msk [vmem:[#allocation2 + $0xc] sm:$0x1] %vm376_vm10, %v918_v27  ;;  %4338 = vmatmul.msk.f32.vlgmr.msra.gmra.mxu3 %vm217_vm0, %v5501_v29 }
 0xc05   :  { %2003 = vmatpush.msra.mxu3 %v5409_v47 }
 0xc07   :  { %2004 = vmatpush.msra.mxu3 %v5411_v48 }
 0xc2d   :  { %v1444_v31 = vpop.permute.xlu0 %1443 }
 0xc2e   :  { %v1446_v34 = vmul.f32 %v1444_v31, %v5508_v30 }
 0xc30   :  { %v1448_v35 = vrot.slane %v1446_v34, 1  ;;  %1450 = vst.msk [vmem:[#allocation3 + $0x7] sm:$0x1] %vm376_vm10, %v1446_v34  ;;  %v5512_v37 = vadd.f32 %v1456_v58, %v1446_v34 }
 0xc32   :  { %1451 = vst.msk [vmem:[#allocation3 + $0xf] sm:$0x1] %vm376_vm10, %v1448_v35  ;;  %4349 = vmatmul.msk.f32.vlgmr.msrb.gmra.mxu3 %vm217_vm0, %v5512_v37 }
 0xc87   :  { %v948_v39 = vpop.f32.mrf.mxu3 }
 0xc88   :  { %v949_v41 = vadd.f32 %v5517_v40, %v948_v39 }
 0xc8a   :  { %v952_v42 = vrot.slane %v949_v41, 3  ;;  %v953_v46 = vrot.slane %v949_v41, 4  ;;  %v1029_v41 = vrot.slane %v5501_v29, 4 }
 0xc8c   :  { %996 = vrot.lane.b32.xlu1 %v952_v42, %s5076_s29  ;;  %v956_v51 = vadd.f32 %v952_v42, %v5294_v17  ;;  %v957_v60 = vadd.f32 %v953_v46, %v5291_v15 }
 0xc8e   :  { %v4339_v52 = vmul.f32 -1.442695, %v956_v51  ;;  %v4340_v63 = vmul.f32 -1.442695, %v957_v60 }
 0xc90   :  { %4552 = vpow2.f32 %v4339_v52 }
 0xc96   :  { %v4553_v53 = vpop.eup %4552 }
 0xc97   :  { %v964_v54 = vadd.f32 1.0, %v4553_v53 }
 0xc99   :  { %4554 = vrcp.f32 %v964_v54  ;;  %v977_v8 = vand.u32 2147483648, %v964_v54  ;;  %vm971_vm13 = vweird.f32 %v964_v54  ;;  %v975_v2 = vand.u32 2147483647, %v964_v54 }
 0xc9a   :  { %4556 = vpow2.f32 %v4340_v63 }
 0xc9b   :  { %v978_v5 = vor.u32 1.1754944e-38, %v977_v8  ;;  %vm976_vm15 = vcmp.eq.f32.partialorder %v975_v2, 8.507059e+37 }
 0xc9f   :  { %v4555_v59 = vpop.eup %4554 }
 0xca0   :  { %v967_v38 = vmul.f32 %v4555_v59, %v964_v54  ;;  %vm972_vm12 = vweird.f32 %v4555_v59  ;;  %v4557_v4 = vpop.eup %4556 }
 0xca1   :  { %vm973_vm14 = vmor %vm971_vm13, %vm972_vm12  ;;  %v965_v7 = vadd.f32 1.0, %v4557_v4 }
 0xca2   :  { %v968_v62 = vsub.f32 1.0, %v967_v38 }
 0xca3   :  { %4558 = vrcp.f32 %v965_v7  ;;  %v992_v26 = vand.u32 2147483648, %v965_v7  ;;  %vm986_vm2 = vweird.f32 %v965_v7  ;;  %v990_v28 = vand.u32 2147483647, %v965_v7 }
 0xca4   :  { %v969_v1 = vmul.f32 %v4555_v59, %v968_v62 }
 0xca5   :  { %v993_v14 = vor.u32 1.1754944e-38, %v992_v26  ;;  %vm991_vm4 = vcmp.eq.f32.partialorder %v990_v28, 8.507059e+37 }
 0xca6   :  { %v970_v6 = vadd.f32 %v4555_v59, %v969_v1 }
 0xca8   :  { %v974_v36 = vsel %vm973_vm14, %v4555_v59, %v970_v6 }
 0xca9   :  { %v5529_v3 = vsel %vm976_vm15, %v978_v5, %v974_v36  ;;  %v4559_v12 = vpop.eup %4558 }
 0xcaa   :  { %v982_v13 = vmul.f32 %v4559_v12, %v965_v7  ;;  %vm987_vm1 = vweird.f32 %v4559_v12 }
 0xcab   :  { %vm988_vm3 = vmor %vm986_vm2, %vm987_vm1 }
 0xcac   :  { %v983_v16 = vsub.f32 1.0, %v982_v13 }
 0xcae   :  { %v984_v18 = vmul.f32 %v4559_v12, %v983_v16 }
 0xcb0   :  { %v985_v23 = vadd.f32 %v4559_v12, %v984_v18 }
 0xcb2   :  { %v989_v27 = vsel %vm988_vm3, %v4559_v12, %v985_v23 }
 0xcb3   :  { %v5534_v58 = vsel %vm991_vm4, %v993_v14, %v989_v27 }
 0xcb5   :  { %v1478_v25 = vpop.f32.mrf.mxu3 }
 0xcb6   :  { %v1479_v43 = vadd.f32 %v5442_v61, %v1478_v25 }
 0xcb8   :  { %v1482_v44 = vrot.slane %v1479_v43, 2  ;;  %v1483_v45 = vrot.slane %v1479_v43, 3 }
 0xcba   :  { %1532 = vrot.lane.b32.xlu1 %v1483_v45, %s5080_s5  ;;  %1486 = vrot.lane.b32.xlu0 %v1483_v45, %s5084_s6 }
 0xcbb   :  { %1484 = vrot.lane.b32.xlu2 %v1482_v44, %s5084_s6 }
 0xcc2   :  { %1530 = vrot.lane.b32.xlu0 %v1482_v44, %s5080_s5 }
 0xcc3   :  { %998 = vrot.lane.b32.xlu2 %v953_v46, %s5076_s29 }
 0xcfe   :  { %v997_v10 = vpop.permute.xlu1 %996 }
 0xcff   :  { %v1002_v11 = vmul.f32 %v997_v10, %v5529_v3 }
 0xd01   :  { %1006 = vrot.lane.b32.xlu2 %v1002_v11, %s5077_s8 }
 0xd15   :  { %v1485_v21 = vpop.permute.xlu2 %1484 }
 0xd16   :  { %v1490_v22 = vadd.f32 %v1485_v21, %v5294_v17  ;;  %v1028_v21 = vrot.slane %v5501_v29, 3 }
 0xd18   :  { %v4350_v0 = vmul.f32 -1.442695, %v1490_v22 }
 0xd1a   :  { %4560 = vpow2.f32 %v4350_v0  ;;  %v1562_v0 = vrot.slane %v5512_v37, 2 }
 0xd1d   :  { %v999_v31 = vpop.permute.xlu2 %998 }
 0xd1e   :  { %v1003_v34 = vmul.f32 %v999_v31, %v5534_v58  ;;  %v5088_v31 = vmov 5  }
 0xd1f   :  { %4460 = vset.pattern.permute.xlu2 %v5088_v31  ;;  %4461 = vset.pattern.permute.xlu1 %v5088_v31 }
 0xd20   :  { %v4561_v35 = vpop.eup %4560  ;;  %1008 = vrot.lane.b32.xlu0 %v1003_v34, %s5077_s8 }
 0xd21   :  { %v1498_v39 = vadd.f32 1.0, %v4561_v35 }
 0xd23   :  { %4562 = vrcp.f32 %v1498_v39  ;;  %v1511_v51 = vand.u32 2147483648, %v1498_v39  ;;  %v1509_v53 = vand.u32 2147483647, %v1498_v39  ;;  %vm1505_vm6 = vweird.f32 %v1498_v39 }
 0xd25   :  { %v1512_v38 = vor.u32 1.1754944e-38, %v1511_v51  ;;  %vm1510_vm8 = vcmp.eq.f32.partialorder %v1509_v53, 8.507059e+37 }
 0xd28   :  { %1032 = vrot.lane.b32.xlu0 %v1029_v41, %s5080_s5 }
 0xd29   :  { %v4563_v42 = vpop.eup %4562 }
 0xd2a   :  { %v1501_v25 = vmul.f32 %v4563_v42, %v1498_v39  ;;  %vm1506_vm5 = vweird.f32 %v4563_v42 }
 0xd2b   :  { %vm1507_vm7 = vmor %vm1505_vm6, %vm1506_vm5 }
 0xd2c   :  { %v1487_v43 = vpop.permute.xlu0 %1486  ;;  %v1502_v44 = vsub.f32 1.0, %v1501_v25  ;;  %v1533_v16 = vpop.permute.xlu1 %1532 }
 0xd2d   :  { %v1491_v45 = vadd.f32 %v1487_v43, %v5291_v15  ;;  %v1563_v43 = vrot.slane %v5512_v37, 3 }
 0xd2e   :  { %v1503_v46 = vmul.f32 %v4563_v42, %v1502_v44  ;;  %v4817_v44 = vld [vmem:[%s6773_s28] sm:$0x3] }
 0xd2f   :  { %v4351_v52 = vmul.f32 -1.442695, %v1491_v45  ;;  %v5089_v45 = vmov 6  }
 0xd30   :  { %v1504_v54 = vadd.f32 %v4563_v42, %v1503_v46  ;;  %4463 = vset.pattern.permute.xlu0 %v5089_v45 }
 0xd31   :  { %4564 = vpow2.f32 %v4351_v52  ;;  %v1016_v52 = vsub.f32 1.0, %v5529_v3 }
 0xd32   :  { %v1508_v59 = vsel %vm1507_vm7, %v4563_v42, %v1504_v54 }
 0xd33   :  { %v5541_v62 = vsel %vm1510_vm8, %v1512_v38, %v1508_v59  ;;  %v1017_v38 = vsub.f32 1.0, %v5534_v58 }
 0xd34   :  { %v1531_v60 = vpop.permute.xlu0 %1530 }
 0xd35   :  { %v1536_v63 = vmul.f32 %v1531_v60, %v5541_v62 }
 0xd37   :  { %v4565_v1 = vpop.eup %4564  ;;  %1540 = vrot.lane.b32.xlu1 %v1536_v63, %s5077_s8 }
 0xd38   :  { %v1499_v6 = vadd.f32 1.0, %v4565_v1 }
 0xd3a   :  { %4566 = vrcp.f32 %v1499_v6  ;;  %v1526_v36 = vand.u32 2147483648, %v1499_v6  ;;  %v1524_v7 = vand.u32 2147483647, %v1499_v6  ;;  %vm1520_vm12 = vweird.f32 %v1499_v6 }
 0xd3c   :  { %v1527_v11 = vor.u32 1.1754944e-38, %v1526_v36  ;;  %vm1525_vm14 = vcmp.eq.f32.partialorder %v1524_v7, 8.507059e+37 }
 0xd40   :  { %v4567_v8 = vpop.eup %4566 }
 0xd41   :  { %v1516_v2 = vmul.f32 %v4567_v8, %v1499_v6  ;;  %vm1521_vm11 = vweird.f32 %v4567_v8 }
 0xd42   :  { %vm1522_vm13 = vmor %vm1520_vm12, %vm1521_vm11 }
 0xd43   :  { %v1517_v4 = vsub.f32 1.0, %v1516_v2 }
 0xd45   :  { %v1518_v5 = vmul.f32 %v4567_v8, %v1517_v4 }
 0xd47   :  { %v1519_v10 = vadd.f32 %v4567_v8, %v1518_v5  ;;  %v1550_v5 = vsub.f32 1.0, %v5541_v62 }
 0xd49   :  { %v1523_v12 = vsel %vm1522_vm13, %v4567_v8, %v1519_v10 }
 0xd4a   :  { %v5545_v13 = vsel %vm1525_vm14, %v1527_v11, %v1523_v12 }
 0xd4b   :  { %v1537_v18 = vmul.f32 %v1533_v16, %v5545_v13 }
 0xd4d   :  { %1542 = vrot.lane.b32.xlu2 %v1537_v18, %s5077_s8 }
 0xd55   :  { %1030 = vrot.lane.b32.xlu2 %v1028_v21, %s5080_s5 }
 0xd5b   :  { %v1007_v22 = vpop.permute.xlu2 %1006 }
 0xd5c   :  { %v1012_v23 = vadd.f32 %v1007_v22, %v5294_v17 }
 0xd5e   :  { %4568 = vtanh.f32 %v1012_v23 }
 0xd64   :  { %v4569_v26 = vpop.eup %4568 }
 0xd65   :  { %1020 = vrot.lane.b32.xlu0 %v4569_v26, %s5078_s9 }
 0xd6d   :  { %1564 = vrot.lane.b32.xlu0 %v1562_v0, %s5087_s20 }
 0xd92   :  { %v1009_v28 = vpop.permute.xlu0 %1008 }
 0xd93   :  { %v1013_v27 = vadd.f32 %v1009_v28, %v5291_v15 }
 0xd95   :  { %4570 = vtanh.f32 %v1013_v27 }
 0xd9a   :  { %v1033_v46 = vpop.permute.xlu0 %1032 }
 0xd9b   :  { %v4571_v14 = vpop.eup %4570  ;;  %v1037_v63 = vmul.f32 %v1033_v46, %v5534_v58  ;;  %v1551_v58 = vsub.f32 1.0, %v5545_v13 }
 0xd9c   :  { %1022 = vrot.lane.b32.xlu1 %v4571_v14, %s5078_s9 }
 0xda7   :  { %v1543_v34 = vpop.permute.xlu2 %1542 }
 0xda8   :  { %v1547_v35 = vadd.f32 %v1543_v34, %v5291_v15 }
 0xda9   :  { %v1541_v39 = vpop.permute.xlu1 %1540 }
 0xdaa   :  { %4572 = vtanh.f32 %v1547_v35  ;;  %v1546_v41 = vadd.f32 %v1541_v39, %v5294_v17 }
 0xdac   :  { %4574 = vtanh.f32 %v1546_v41 }
 0xdaf   :  { %v1031_v53 = vpop.permute.xlu2 %1030 }
 0xdb0   :  { %v4573_v42 = vpop.eup %4572  ;;  %v1036_v59 = vmul.f32 %v1031_v53, %v5529_v3 }
 0xdb1   :  { %1556 = vrot.lane.b32.xlu2 %v4573_v42, %s5078_s9 }
 0xdb2   :  { %v4575_v25 = vpop.eup %4574 }
 0xdb3   :  { %1554 = vrot.lane.b32.xlu1 %v4575_v25, %s5078_s9 }
 0xdb9   :  { %1041 = vperm.xlu2 %4460, %v4817_v44  }
 0xdbb   :  { %1566 = vrot.lane.b32.xlu1 %v1563_v43, %s5087_s20 }
 0xdc1   :  { %4462 = vset.pattern.permute.xlu2 %v5089_v45 }
 0xdc2   :  { %1177 = vperm.xlu2 %4462, %v4817_v44  }
 0xdc3   :  { %1059 = vperm.xlu1 %4461, %v5312_v57  }
 0xdca   :  { %4464 = vset.pattern.permute.xlu2 %v5079_v55 }
 0xdd7   :  { %v1021_v51 = vpop.permute.xlu0 %1020 }
 0xdd8   :  { %v1026_v54 = vmul.f32 %v1021_v51, %v1016_v52 }
 0xdda   :  { %v1038_v1 = vadd.f32 %v1036_v59, %v1026_v54 }
 0xddc   :  { %v1046_v2 = vrot.slane %v1038_v1, 5 }
 0xddf   :  { %v1565_v3 = vpop.permute.xlu0 %1564 }
 0xde0   :  { %v1570_v11 = vmul.f32 %v1565_v3, %v5541_v62 }
 0xe0b   :  { %v1557_v10 = vpop.permute.xlu2 %1556 }
 0xe0c   :  { %v1561_v16 = vmul.f32 %v1557_v10, %v1551_v58 }
 0xe0e   :  { %v1023_v60 = vpop.permute.xlu1 %1022 }
 0xe0f   :  { %v1027_v6 = vmul.f32 %v1023_v60, %v1017_v38 }
 0xe11   :  { %v1039_v8 = vadd.f32 %v1037_v63, %v1027_v6 }
 0xe13   :  { %v1047_v4 = vrot.slane %v1039_v8, 4  ;;  %v5583_v28 = vpop.permute.xlu2 %1041 }
 0xe15   :  { %v1048_v36 = vsel %vm367_vm9, %v1047_v4, %v1046_v2 }
 0xe16   :  { %1049 = vrot.lane.b32.xlu0 %v1048_v36, %s5078_s9 }
 0xe1c   :  { %v5598_v35 = vpop.permute.xlu2 %1177 }
 0xe1e   :  { %1195 = vperm.xlu0 %4463, %v5312_v57  }
 0xe25   :  { %v1555_v55 = vpop.permute.xlu1 %1554 }
 0xe26   :  { %v1560_v7 = vmul.f32 %v1555_v55, %v1550_v5 }
 0xe28   :  { %v1572_v18 = vadd.f32 %v1570_v11, %v1560_v7 }
 0xe2a   :  { %v1576_v23 = vrot.slane %v1572_v18, 6 }
 0xe2d   :  { %v1567_v12 = vpop.permute.xlu1 %1566 }
 0xe2e   :  { %v1571_v21 = vmul.f32 %v1567_v12, %v5545_v13 }
 0xe30   :  { %v1573_v22 = vadd.f32 %v1571_v21, %v1561_v16 }
 0xe32   :  { %v1577_v26 = vrot.slane %v1573_v22, 5 }
 0xe34   :  { %v1578_v57 = vsel %vm367_vm9, %v1577_v26, %v1576_v23 }
 0xe35   :  { %1579 = vrot.lane.b32.xlu1 %v1578_v57, %s5087_s20  ;;  %v5581_v0 = vpop.permute.xlu1 %1059 }
 0xe36   :  { %v1062_v62 = vmul.f32 %v5581_v0, %v5501_v29 }
 0xe88   :  { %v1050_v27 = vpop.permute.xlu0 %1049 }
 0xe89   :  { %v1052_v14 = vmul.f32 %v1050_v27, %v5583_v28 }
 0xe8b   :  { %v1054_v31 = vrot.slane %v1052_v14, 1  ;;  %1056 = vst.msk [vmem:[#allocation2 + $0x5] sm:$0x1] %vm376_vm10, %v1052_v14  ;;  %v5589_v13 = vadd.f32 %v1062_v62, %v1052_v14 }
 0xe8d   :  { %1057 = vst.msk [vmem:[#allocation2 + $0xd] sm:$0x1] %vm376_vm10, %v1054_v31  ;;  %4341 = vmatmul.msk.f32.vlgmr.msrb.gmra.mxu0 %vm217_vm0, %v5589_v13  ;;  %v1165_v23 = vrot.slane %v5589_v13, 3 }
 0xe8e   :  { %2135 = vmatpush.msrb.mxu0 %v5409_v47 }
 0xe90   :  { %2136 = vmatpush.msrb.mxu0 %v5411_v48  ;;  %v5596_v34 = vpop.permute.xlu0 %1195 }
 0xe91   :  { %v1588_v39 = vmul.f32 %v5512_v37, %v5596_v34 }
 0xea7   :  { %v1580_v29 = vpop.permute.xlu1 %1579 }
 0xea8   :  { %v1582_v41 = vmul.f32 %v1580_v29, %v5598_v35 }
 0xeaa   :  { %v1584_v42 = vrot.slane %v1582_v41, 1  ;;  %1586 = vst.msk [vmem:[#allocation3 + $0x6] sm:$0x1] %vm376_vm10, %v1582_v41  ;;  %v5604_v25 = vadd.f32 %v1588_v39, %v1582_v41 }
 0xeac   :  { %1587 = vst.msk [vmem:[#allocation3 + $0xe] sm:$0x1] %vm376_vm10, %v1584_v42  ;;  %4352 = vmatmul.msk.f32.vlgmr.msra.gmra.mxu0 %vm217_vm0, %v5604_v25 }
 0xf0a   :  { %v1084_v47 = vpop.f32.mrf.mxu0 }
 0xf0b   :  { %v1085_v48 = vadd.f32 %v5517_v40, %v1084_v47 }
 0xf0d   :  { %v1089_v43 = vrot.slane %v1085_v48, 3  ;;  %v1088_v51 = vrot.slane %v1085_v48, 2 }
 0xf0f   :  { %1134 = vrot.lane.b32.xlu0 %v1089_v43, %s5076_s29  ;;  %v1093_v40 = vadd.f32 %v1089_v43, %v5291_v15 }
 0xf11   :  { %v4343_v52 = vmul.f32 -1.442695, %v1093_v40 }
 0xf13   :  { %4576 = vpow2.f32 %v4343_v52 }
 0xf19   :  { %v4577_v53 = vpop.eup %4576 }
 0xf1a   :  { %v1101_v54 = vadd.f32 1.0, %v4577_v53 }
 0xf1c   :  { %4578 = vrcp.f32 %v1101_v54  ;;  %v1128_v36 = vand.u32 2147483648, %v1101_v54  ;;  %vm1122_vm1 = vweird.f32 %v1101_v54  ;;  %v1126_v55 = vand.u32 2147483647, %v1101_v54 }
 0xf1e   :  { %v1129_v7 = vor.u32 1.1754944e-38, %v1128_v36  ;;  %vm1127_vm3 = vcmp.eq.f32.partialorder %v1126_v55, 8.507059e+37 }
 0xf22   :  { %v4579_v38 = vpop.eup %4578 }
 0xf23   :  { %v1118_v63 = vmul.f32 %v4579_v38, %v1101_v54  ;;  %vm1123_vm15 = vweird.f32 %v4579_v38 }
 0xf24   :  { %vm1124_vm2 = vmor %vm1122_vm1, %vm1123_vm15 }
 0xf25   :  { %v1119_v6 = vsub.f32 1.0, %v1118_v63 }
 0xf27   :  { %v1120_v8 = vmul.f32 %v4579_v38, %v1119_v6 }
 0xf29   :  { %v1610_v44 = vpop.f32.mrf.mxu0  ;;  %v1121_v4 = vadd.f32 %v4579_v38, %v1120_v8 }
 0xf2a   :  { %v1611_v37 = vadd.f32 %v5442_v61, %v1610_v44  ;;  %v1092_v61 = vadd.f32 %v1088_v51, %v5294_v17 }
 0xf2b   :  { %v1125_v3 = vsel %vm1124_vm2, %v4579_v38, %v1121_v4 }
 0xf2c   :  { %v1614_v45 = vrot.slane %v1611_v37, 3  ;;  %v1615_v46 = vrot.slane %v1611_v37, 4  ;;  %v4342_v59 = vmul.f32 -1.442695, %v1092_v61  ;;  %v5619_v11 = vsel %vm1127_vm3, %v1129_v7, %v1125_v3 }
 0xf2e   :  { %1618 = vrot.lane.b32.xlu1 %v1615_v46, %s5084_s6  ;;  %1616 = vrot.lane.b32.xlu2 %v1614_v45, %s5084_s6  ;;  %4580 = vpow2.f32 %v4342_v59 }
 0xf34   :  { %v4581_v60 = vpop.eup %4580 }
 0xf35   :  { %v1100_v1 = vadd.f32 1.0, %v4581_v60 }
 0xf36   :  { %1662 = vrot.lane.b32.xlu1 %v1614_v45, %s5080_s5  ;;  %1132 = vrot.lane.b32.xlu2 %v1088_v51, %s5076_s29 }
 0xf37   :  { %4582 = vrcp.f32 %v1100_v1  ;;  %v1113_v26 = vand.u32 2147483648, %v1100_v1  ;;  %vm1107_vm5 = vweird.f32 %v1100_v1  ;;  %v1111_v27 = vand.u32 2147483647, %v1100_v1 }
 0xf39   :  { %v1114_v14 = vor.u32 1.1754944e-38, %v1113_v26  ;;  %vm1112_vm7 = vcmp.eq.f32.partialorder %v1111_v27, 8.507059e+37 }
 0xf3d   :  { %v4583_v2 = vpop.eup %4582 }
 0xf3e   :  { %1664 = vrot.lane.b32.xlu2 %v1615_v46, %s5080_s5  ;;  %v1103_v5 = vmul.f32 %v4583_v2, %v1100_v1  ;;  %vm1108_vm4 = vweird.f32 %v4583_v2 }
 0xf3f   :  { %vm1109_vm6 = vmor %vm1107_vm5, %vm1108_vm4 }
 0xf40   :  { %v1104_v58 = vsub.f32 1.0, %v1103_v5 }
 0xf42   :  { %v1105_v16 = vmul.f32 %v4583_v2, %v1104_v58 }
 0xf44   :  { %v1106_v22 = vadd.f32 %v4583_v2, %v1105_v16 }
 0xf46   :  { %v1110_v62 = vsel %vm1109_vm6, %v4583_v2, %v1106_v22 }
 0xf47   :  { %v5626_v31 = vsel %vm1112_vm7, %v1114_v14, %v1110_v62  ;;  %v1694_v14 = vrot.slane %v5604_v25, 3 }
 0xf81   :  { %v1135_v10 = vpop.permute.xlu0 %1134 }
 0xf82   :  { %v1139_v12 = vmul.f32 %v1135_v10, %v5619_v11 }
 0xf84   :  { %1144 = vrot.lane.b32.xlu1 %v1139_v12, %s5077_s8  ;;  %v1164_v12 = vrot.slane %v5589_v13, 2 }
 0xf88   :  { %v1617_v18 = vpop.permute.xlu2 %1616 }
 0xf89   :  { %v1622_v21 = vadd.f32 %v1617_v18, %v5294_v17 }
 0xf8b   :  { %v4353_v57 = vmul.f32 -1.442695, %v1622_v21 }
 0xf8c   :  { %1168 = vrot.lane.b32.xlu1 %v1165_v23, %s5080_s5 }
 0xf8d   :  { %4584 = vpow2.f32 %v4353_v57 }
 0xf90   :  { %v1133_v29 = vpop.permute.xlu2 %1132 }
 0xf91   :  { %v1138_v39 = vmul.f32 %v1133_v29, %v5626_v31  ;;  %v1695_v29 = vrot.slane %v5604_v25, 4 }
 0xf93   :  { %v4585_v41 = vpop.eup %4584  ;;  %1142 = vrot.lane.b32.xlu0 %v1138_v39, %s5077_s8 }
 0xf94   :  { %v1630_v42 = vadd.f32 1.0, %v4585_v41 }
 0xf96   :  { %4586 = vrcp.f32 %v1630_v42  ;;  %v1643_v46 = vand.u32 2147483648, %v1630_v42  ;;  %vm1637_vm11 = vweird.f32 %v1630_v42  ;;  %v1641_v52 = vand.u32 2147483647, %v1630_v42 }
 0xf98   :  { %v1644_v61 = vor.u32 1.1754944e-38, %v1643_v46  ;;  %vm1642_vm13 = vcmp.eq.f32.partialorder %v1641_v52, 8.507059e+37  ;;  %v1665_v7 = vpop.permute.xlu2 %1664  ;;  %v1152_v46 = vsub.f32 1.0, %v5626_v31 }
 0xf9c   :  { %v4587_v47 = vpop.eup %4586 }
 0xf9d   :  { %v1633_v48 = vmul.f32 %v4587_v47, %v1630_v42  ;;  %vm1638_vm8 = vweird.f32 %v4587_v47 }
 0xf9e   :  { %vm1639_vm12 = vmor %vm1637_vm11, %vm1638_vm8 }
 0xf9f   :  { %v1634_v43 = vsub.f32 1.0, %v1633_v48 }
 0xfa0   :  { %v1619_v44 = vpop.permute.xlu1 %1618 }
 0xfa1   :  { %v1623_v37 = vadd.f32 %v1619_v44, %v5291_v15  ;;  %v1635_v45 = vmul.f32 %v4587_v47, %v1634_v43  ;;  %v1153_v43 = vsub.f32 1.0, %v5619_v11 }
 0xfa3   :  { %v4354_v51 = vmul.f32 -1.442695, %v1623_v37  ;;  %v1636_v40 = vadd.f32 %v4587_v47, %v1635_v45 }
 0xfa5   :  { %4588 = vpow2.f32 %v4354_v51  ;;  %v1640_v53 = vsel %vm1639_vm12, %v4587_v47, %v1636_v40 }
 0xfa6   :  { %v5631_v59 = vsel %vm1642_vm13, %v1644_v61, %v1640_v53 }
 0xfa8   :  { %v1663_v54 = vpop.permute.xlu1 %1662 }
 0xfa9   :  { %v1668_v38 = vmul.f32 %v1663_v54, %v5631_v59 }
 0xfab   :  { %v4589_v60 = vpop.eup %4588  ;;  %1672 = vrot.lane.b32.xlu2 %v1668_v38, %s5077_s8 }
 0xfac   :  { %v1631_v63 = vadd.f32 1.0, %v4589_v60 }
 0xfae   :  { %4590 = vrcp.f32 %v1631_v63  ;;  %v1658_v2 = vand.u32 2147483648, %v1631_v63  ;;  %v1656_v36 = vand.u32 2147483647, %v1631_v63  ;;  %vm1652_vm15 = vweird.f32 %v1631_v63 }
 0xfb0   :  { %v1659_v5 = vor.u32 1.1754944e-38, %v1658_v2  ;;  %vm1657_vm2 = vcmp.eq.f32.partialorder %v1656_v36, 8.507059e+37 }
 0xfb4   :  { %v4591_v1 = vpop.eup %4590 }
 0xfb5   :  { %v1648_v6 = vmul.f32 %v4591_v1, %v1631_v63  ;;  %vm1653_vm14 = vweird.f32 %v4591_v1 }
 0xfb6   :  { %vm1654_vm1 = vmor %vm1652_vm15, %vm1653_vm14 }
 0xfb7   :  { %v1649_v8 = vsub.f32 1.0, %v1648_v6  ;;  %v1682_v6 = vsub.f32 1.0, %v5631_v59 }
 0xfb9   :  { %v1650_v4 = vmul.f32 %v4591_v1, %v1649_v8 }
 0xfbb   :  { %v1651_v55 = vadd.f32 %v4591_v1, %v1650_v4 }
 0xfbd   :  { %v1655_v3 = vsel %vm1654_vm1, %v4591_v1, %v1651_v55 }
 0xfbe   :  { %v1660_v10 = vsel %vm1657_vm2, %v1659_v5, %v1655_v3 }
 0xfbf   :  { %v1669_v58 = vmul.f32 %v1665_v7, %v1660_v10  ;;  %v1683_v4 = vsub.f32 1.0, %v1660_v10 }
 0xfc1   :  { %1674 = vrot.lane.b32.xlu0 %v1669_v58, %s5077_s8 }
 0xfc9   :  { %1166 = vrot.lane.b32.xlu0 %v1164_v12, %s5080_s5 }
 0xff6   :  { %v1145_v16 = vpop.permute.xlu1 %1144 }
 0xff7   :  { %v1149_v18 = vadd.f32 %v1145_v16, %v5291_v15 }
 0xff9   :  { %4592 = vtanh.f32 %v1149_v18  ;;  %v1198_v18 = vmul.f32 %v5596_v34, %v5589_v13  ;;  %v1720_v13 = vmul.f32 %v5604_v25, %v5581_v0 }
 0xffe   :  { %v1169_v47 = vpop.permute.xlu1 %1168 }
 0xfff   :  { %v4593_v21 = vpop.eup %4592  ;;  %v1173_v45 = vmul.f32 %v1169_v47, %v5619_v11 }
0x1000   :  { %1158 = vrot.lane.b32.xlu2 %v4593_v21, %s5078_s9 }
0x1005   :  { %v1143_v22 = vpop.permute.xlu0 %1142  ;;  %v1673_v23 = vpop.permute.xlu2 %1672 }
0x1006   :  { %v1148_v26 = vadd.f32 %v1143_v22, %v5294_v17  ;;  %v1678_v57 = vadd.f32 %v1673_v23, %v5294_v17  ;;  %v4819_v23 = vld [vmem:[#allocation14] sm:$0xff] }
0x1008   :  { %4594 = vtanh.f32 %v1148_v26 }
0x1009   :  { %4596 = vtanh.f32 %v1678_v57 }
0x100e   :  { %v4595_v27 = vpop.eup %4594 }
0x100f   :  { %v4597_v62 = vpop.eup %4596  ;;  %1156 = vrot.lane.b32.xlu1 %v4595_v27, %s5078_s9 }
0x1010   :  { %1686 = vrot.lane.b32.xlu2 %v4597_v62, %s5078_s9 }
0x1017   :  { %1696 = vrot.lane.b32.xlu1 %v1694_v14, %s5087_s20  ;;  %v5683_v14 = vld [vmem:[%s6774_s0] ss:$0 sm:$0xff]  ;;  %s5093_s0 = smov 124  }
0x1018   :  { %1698 = vrot.lane.b32.xlu2 %v1695_v29, %s5087_s20 }
0x1033   :  { %v1675_v39 = vpop.permute.xlu0 %1674 }
0x1034   :  { %v1679_v41 = vadd.f32 %v1675_v39, %v5291_v15 }
0x1036   :  { %4598 = vtanh.f32 %v1679_v41 }
0x103b   :  { %v1167_v37 = vpop.permute.xlu0 %1166 }
0x103c   :  { %v4599_v42 = vpop.eup %4598  ;;  %v1172_v40 = vmul.f32 %v1167_v37, %v5626_v31 }
0x103d   :  { %1688 = vrot.lane.b32.xlu0 %v4599_v42, %s5078_s9 }
0x105a   :  { %v1159_v48 = vpop.permute.xlu2 %1158 }
0x105b   :  { %v1163_v44 = vmul.f32 %v1159_v48, %v1153_v43 }
0x105d   :  { %v1175_v52 = vadd.f32 %v1173_v45, %v1163_v44 }
0x105f   :  { %v1183_v54 = vrot.slane %v1175_v52, 5 }
0x106a   :  { %v1687_v63 = vpop.permute.xlu2 %1686 }
0x106b   :  { %v1692_v2 = vmul.f32 %v1687_v63, %v1682_v6 }
0x1072   :  { %v1699_v8 = vpop.permute.xlu2 %1698 }
0x1073   :  { %v1703_v31 = vmul.f32 %v1699_v8, %v1660_v10  ;;  %v4818_v10 = vld [vmem:[#allocation14 + $0x8] sm:$0xff] }
0x1081   :  { %v1157_v51 = vpop.permute.xlu1 %1156 }
0x1082   :  { %v1162_v53 = vmul.f32 %v1157_v51, %v1152_v46 }
0x1084   :  { %v1174_v61 = vadd.f32 %v1172_v40, %v1162_v53 }
0x1086   :  { %v1182_v38 = vrot.slane %v1174_v61, 6 }
0x1088   :  { %v1184_v60 = vsel %vm367_vm9, %v1183_v54, %v1182_v38 }
0x1089   :  { %1185 = vrot.lane.b32.xlu0 %v1184_v60, %s5078_s9  ;;  %v1697_v1 = vpop.permute.xlu1 %1696 }
0x108a   :  { %v1702_v11 = vmul.f32 %v1697_v1, %v5631_v59 }
0x108c   :  { %v1704_v55 = vadd.f32 %v1702_v11, %v1692_v2 }
0x108e   :  { %v1708_v7 = vrot.slane %v1704_v55, 5 }
0x10af   :  { %v1689_v36 = vpop.permute.xlu0 %1688 }
0x10b0   :  { %v1693_v5 = vmul.f32 %v1689_v36, %v1683_v4 }
0x10b2   :  { %v1705_v3 = vadd.f32 %v1703_v31, %v1693_v5 }
0x10b4   :  { %v1709_v58 = vrot.slane %v1705_v3, 4 }
0x10b6   :  { %v1710_v12 = vsel %vm367_vm9, %v1709_v58, %v1708_v7 }
0x10b7   :  { %1711 = vrot.lane.b32.xlu1 %v1710_v12, %s5087_s20 }
0x10fb   :  { %v1186_v16 = vpop.permute.xlu0 %1185 }
0x10fc   :  { %v1188_v59 = vmul.f32 %v1186_v16, %v5598_v35 }
0x10fe   :  { %v1190_v21 = vrot.slane %v1188_v59, 1  ;;  %1192 = vst.msk [vmem:[#allocation2 + $0x6] sm:$0x1] %vm376_vm10, %v1188_v59  ;;  %v5664_v22 = vadd.f32 %v1198_v18, %v1188_v59 }
0x1100   :  { %1193 = vst.msk [vmem:[#allocation2 + $0xe] sm:$0x1] %vm376_vm10, %v1190_v21  ;;  %4344 = vmatmul.msk.f32.vlgmr.msrb.gmra.mxu1 %vm217_vm0, %v5664_v22 }
0x1101   :  { %2264 = vmatpush.msrb.mxu1 %v4818_v10 }
0x1103   :  { %2265 = vmatpush.msrb.mxu1 %v4819_v23 }
0x1129   :  { %v1712_v26 = vpop.permute.xlu1 %1711 }
0x112a   :  { %v1714_v34 = vmul.f32 %v1712_v26, %v5583_v28 }
0x112c   :  { %v1716_v35 = vrot.slane %v1714_v34, 1  ;;  %1718 = vst.msk [vmem:[#allocation3 + $0x5] sm:$0x1] %vm376_vm10, %v1714_v34  ;;  %v5673_v57 = vadd.f32 %v1720_v13, %v1714_v34 }
0x112e   :  { %1719 = vst.msk [vmem:[#allocation3 + $0xd] sm:$0x1] %vm376_vm10, %v1716_v35  ;;  %4355 = vmatmul.msk.f32.vlgmr.msra.gmra.mxu1 %vm217_vm0, %v5673_v57  ;;  %v1826_v16 = vrot.slane %v5673_v57, 4  ;;  %v1827_v10 = vrot.slane %v5673_v57, 5 }
0x117d   :  { %v5678_v27 = vpop.f32.mrf.mxu1 }
0x11ab   :  { %v1742_v62 = vpop.f32.mrf.mxu1 }
0x11ac   :  { %v1743_v0 = vadd.f32 %v5683_v14, %v1742_v62 }
0x11ae   :  { %v1746_v28 = vrot.slane %v1743_v0, 4  ;;  %v1747_v25 = vrot.slane %v1743_v0, 5 }
0x11b0   :  { %1750 = vrot.lane.b32.xlu0 %v1747_v25, %s5084_s6  ;;  %1794 = vrot.lane.b32.xlu1 %v1746_v28, %s5080_s5 }
0x11b1   :  { %1748 = vrot.lane.b32.xlu2 %v1746_v28, %s5084_s6 }
0x11b9   :  { %1796 = vrot.lane.b32.xlu2 %v1747_v25, %s5080_s5 }
0x120b   :  { %v1749_v29 = vpop.permute.xlu2 %1748 }
0x120c   :  { %v1754_v39 = vadd.f32 %v1749_v29, %v5294_v17 }
0x120e   :  { %v4356_v41 = vmul.f32 -1.442695, %v1754_v39 }
0x1210   :  { %4600 = vpow2.f32 %v4356_v41 }
0x1213   :  { %v1797_v7 = vpop.permute.xlu2 %1796 }
0x1216   :  { %v4601_v42 = vpop.eup %4600 }
0x1217   :  { %v1762_v47 = vadd.f32 1.0, %v4601_v42 }
0x1219   :  { %4602 = vrcp.f32 %v1762_v47  ;;  %v1775_v46 = vand.u32 2147483648, %v1762_v47  ;;  %v1773_v40 = vand.u32 2147483647, %v1762_v47  ;;  %vm1769_vm4 = vweird.f32 %v1762_v47 }
0x121b   :  { %v1776_v61 = vor.u32 1.1754944e-38, %v1775_v46  ;;  %vm1774_vm6 = vcmp.eq.f32.partialorder %v1773_v40, 8.507059e+37  ;;  %v1852_v46 = vmul.f32 %v5673_v57, %v5493_v56 }
0x121f   :  { %v4603_v48 = vpop.eup %4602 }
0x1220   :  { %v1765_v43 = vmul.f32 %v4603_v48, %v1762_v47  ;;  %vm1770_vm3 = vweird.f32 %v4603_v48 }
0x1221   :  { %vm1771_vm5 = vmor %vm1769_vm4, %vm1770_vm3 }
0x1222   :  { %v1751_v44 = vpop.permute.xlu0 %1750  ;;  %v1766_v37 = vsub.f32 1.0, %v1765_v43  ;;  %v1795_v38 = vpop.permute.xlu1 %1794 }
0x1223   :  { %v1755_v45 = vadd.f32 %v1751_v44, %v5291_v15 }
0x1224   :  { %v1767_v51 = vmul.f32 %v4603_v48, %v1766_v37 }
0x1225   :  { %v4357_v52 = vmul.f32 -1.442695, %v1755_v45 }
0x1226   :  { %v1768_v53 = vadd.f32 %v4603_v48, %v1767_v51 }
0x1227   :  { %4604 = vpow2.f32 %v4357_v52 }
0x1228   :  { %v1772_v54 = vsel %vm1771_vm5, %v4603_v48, %v1768_v53 }
0x1229   :  { %v1777_v60 = vsel %vm1774_vm6, %v1776_v61, %v1772_v54 }
0x122a   :  { %v1800_v63 = vmul.f32 %v1795_v38, %v1777_v60  ;;  %v1814_v35 = vsub.f32 1.0, %v1777_v60 }
0x122c   :  { %1804 = vrot.lane.b32.xlu0 %v1800_v63, %s5077_s8 }
0x122d   :  { %v4605_v1 = vpop.eup %4604 }
0x122e   :  { %v1763_v6 = vadd.f32 1.0, %v4605_v1 }
0x1230   :  { %4606 = vrcp.f32 %v1763_v6  ;;  %v1790_v4 = vand.u32 2147483648, %v1763_v6  ;;  %v1788_v31 = vand.u32 2147483647, %v1763_v6  ;;  %vm1784_vm8 = vweird.f32 %v1763_v6 }
0x1232   :  { %v1791_v5 = vor.u32 1.1754944e-38, %v1790_v4  ;;  %vm1789_vm12 = vcmp.eq.f32.partialorder %v1788_v31, 8.507059e+37 }
0x1236   :  { %v4607_v11 = vpop.eup %4606 }
0x1237   :  { %v1780_v8 = vmul.f32 %v4607_v11, %v1763_v6  ;;  %vm1785_vm7 = vweird.f32 %v4607_v11 }
0x1238   :  { %vm1786_vm11 = vmor %vm1784_vm8, %vm1785_vm7 }
0x1239   :  { %v1781_v2 = vsub.f32 1.0, %v1780_v8 }
0x123b   :  { %v1782_v36 = vmul.f32 %v4607_v11, %v1781_v2 }
0x123d   :  { %v1783_v55 = vadd.f32 %v4607_v11, %v1782_v36 }
0x123f   :  { %v1787_v3 = vsel %vm1786_vm11, %v4607_v11, %v1783_v55 }
0x1240   :  { %v1792_v58 = vsel %vm1789_vm12, %v1791_v5, %v1787_v3 }
0x1241   :  { %v1801_v12 = vmul.f32 %v1797_v7, %v1792_v58  ;;  %v1815_v29 = vsub.f32 1.0, %v1792_v58 }
0x1243   :  { %1806 = vrot.lane.b32.xlu1 %v1801_v12, %s5077_s8 }
0x124b   :  { %1828 = vrot.lane.b32.xlu1 %v1826_v16, %s5087_s20 }
0x129e   :  { %v1805_v18 = vpop.permute.xlu0 %1804 }
0x129f   :  { %v1810_v59 = vadd.f32 %v1805_v18, %v5294_v17 }
0x12a1   :  { %4608 = vtanh.f32 %v1810_v59 }
0x12a7   :  { %v4609_v21 = vpop.eup %4608 }
0x12a8   :  { %1818 = vrot.lane.b32.xlu2 %v4609_v21, %s5078_s9 }
0x12b0   :  { %1830 = vrot.lane.b32.xlu2 %v1827_v10, %s5087_s20 }
0x12b5   :  { %v1807_v23 = vpop.permute.xlu1 %1806 }
0x12b6   :  { %v1811_v26 = vadd.f32 %v1807_v23, %v5291_v15 }
0x12b8   :  { %4610 = vtanh.f32 %v1811_v26 }
0x12bd   :  { %v1829_v62 = vpop.permute.xlu1 %1828 }
0x12be   :  { %v4611_v13 = vpop.eup %4610  ;;  %v1834_v25 = vmul.f32 %v1829_v62, %v1777_v60 }
0x12bf   :  { %1820 = vrot.lane.b32.xlu0 %v4611_v13, %s5078_s9 }
0x1302   :  { %v1819_v34 = vpop.permute.xlu2 %1818 }
0x1303   :  { %v1824_v0 = vmul.f32 %v1819_v34, %v1814_v35 }
0x1305   :  { %v1836_v41 = vadd.f32 %v1834_v25, %v1824_v0 }
0x1307   :  { %v1840_v43 = vrot.slane %v1836_v41, 4 }
0x130a   :  { %v1831_v28 = vpop.permute.xlu2 %1830 }
0x130b   :  { %v1835_v42 = vmul.f32 %v1831_v28, %v1792_v58 }
0x1331   :  { %v1821_v39 = vpop.permute.xlu0 %1820 }
0x1332   :  { %v1825_v47 = vmul.f32 %v1821_v39, %v1815_v29 }
0x1334   :  { %v1837_v48 = vadd.f32 %v1835_v42, %v1825_v47 }
0x1336   :  { %v1841_v44 = vrot.slane %v1837_v48, 3 }
0x1338   :  { %v1842_v37 = vsel %vm367_vm9, %v1841_v44, %v1840_v43 }
0x1339   :  { %1843 = vrot.lane.b32.xlu0 %v1842_v37, %s5087_s20 }
0x13ab   :  { %v1844_v45 = vpop.permute.xlu0 %1843 }
0x13ac   :  { %v1846_v51 = vmul.f32 %v1844_v45, %v5495_v24 }
0x13ae   :  { %v1848_v40 = vrot.slane %v1846_v51, 1  ;;  %1850 = vst.msk [vmem:[#allocation3 + $0x4] sm:$0x1] %vm376_vm10, %v1846_v51  ;;  %v5708_v52 = vadd.f32 %v1852_v46, %v1846_v51 }
0x13b0   :  { %1851 = vst.msk [vmem:[#allocation3 + $0xc] sm:$0x1] %vm376_vm10, %v1848_v40  ;;  %4358 = vmatmul.msk.f32.vlgmr.msrb.gmra.mxu2 %vm217_vm0, %v5708_v52  ;;  %v1958_v21 = vrot.slane %v5708_v52, 5  ;;  %v1959_v37 = vrot.slane %v5708_v52, 6 }
0x1433   :  { %v1874_v53 = vpop.f32.mrf.mxu2 }
0x1434   :  { %v1875_v61 = vadd.f32 %v5683_v14, %v1874_v53 }
0x1436   :  { %v1878_v54 = vrot.slane %v1875_v61, 5  ;;  %v1879_v38 = vrot.slane %v1875_v61, 6 }
0x1438   :  { %1882 = vrot.lane.b32.xlu2 %v1879_v38, %s5084_s6  ;;  %1926 = vrot.lane.b32.xlu0 %v1878_v54, %s5080_s5 }
0x1439   :  { %1880 = vrot.lane.b32.xlu1 %v1878_v54, %s5084_s6 }
0x1441   :  { %1928 = vrot.lane.b32.xlu1 %v1879_v38, %s5080_s5 }
0x1492   :  { %v1883_v56 = vpop.permute.xlu2 %1882 }
0x1493   :  { %v1887_v24 = vadd.f32 %v1883_v56, %v5291_v15 }
0x1495   :  { %v4360_v57 = vmul.f32 -1.442695, %v1887_v24 }
0x1497   :  { %4612 = vpow2.f32 %v4360_v57 }
0x149d   :  { %v4613_v60 = vpop.eup %4612 }
0x149e   :  { %v1895_v63 = vadd.f32 1.0, %v4613_v60 }
0x14a0   :  { %4614 = vrcp.f32 %v1895_v63  ;;  %v1922_v31 = vand.u32 2147483648, %v1895_v63  ;;  %vm1916_vm14 = vweird.f32 %v1895_v63  ;;  %v1920_v5 = vand.u32 2147483647, %v1895_v63 }
0x14a2   :  { %v1923_v7 = vor.u32 1.1754944e-38, %v1922_v31  ;;  %vm1921_vm1 = vcmp.eq.f32.partialorder %v1920_v5, 8.507059e+37 }
0x14a6   :  { %v4615_v1 = vpop.eup %4614 }
0x14a7   :  { %v1912_v6 = vmul.f32 %v4615_v1, %v1895_v63  ;;  %vm1917_vm13 = vweird.f32 %v4615_v1 }
0x14a8   :  { %vm1918_vm15 = vmor %vm1916_vm14, %vm1917_vm13 }
0x14a9   :  { %v1913_v11 = vsub.f32 1.0, %v1912_v6 }
0x14aa   :  { %v1927_v25 = vpop.permute.xlu0 %1926 }
0x14ab   :  { %v1881_v8 = vpop.permute.xlu1 %1880  ;;  %v1914_v2 = vmul.f32 %v4615_v1, %v1913_v11 }
0x14ac   :  { %v1886_v4 = vadd.f32 %v1881_v8, %v5294_v17  ;;  %v1984_v8 = vmul.f32 %v5708_v52, %v5421_v49 }
0x14ad   :  { %v1915_v36 = vadd.f32 %v4615_v1, %v1914_v2 }
0x14ae   :  { %v4359_v55 = vmul.f32 -1.442695, %v1886_v4 }
0x14af   :  { %v1919_v3 = vsel %vm1918_vm15, %v4615_v1, %v1915_v36 }
0x14b0   :  { %4616 = vpow2.f32 %v4359_v55  ;;  %v1924_v58 = vsel %vm1921_vm1, %v1923_v7, %v1919_v3 }
0x14b1   :  { %v1947_v54 = vsub.f32 1.0, %v1924_v58 }
0x14b3   :  { %v1929_v12 = vpop.permute.xlu1 %1928 }
0x14b4   :  { %v1933_v16 = vmul.f32 %v1929_v12, %v1924_v58 }
0x14b6   :  { %v4617_v18 = vpop.eup %4616  ;;  %1938 = vrot.lane.b32.xlu0 %v1933_v16, %s5077_s8 }
0x14b7   :  { %v1894_v59 = vadd.f32 1.0, %v4617_v18 }
0x14b9   :  { %4618 = vrcp.f32 %v1894_v59  ;;  %v1907_v13 = vand.u32 2147483648, %v1894_v59  ;;  %v1905_v35 = vand.u32 2147483647, %v1894_v59  ;;  %vm1901_vm3 = vweird.f32 %v1894_v59 }
0x14bb   :  { %v1908_v0 = vor.u32 1.1754944e-38, %v1907_v13  ;;  %vm1906_vm5 = vcmp.eq.f32.partialorder %v1905_v35, 8.507059e+37 }
0x14be   :  { %1960 = vrot.lane.b32.xlu0 %v1958_v21, %s5087_s20 }
0x14bf   :  { %v4619_v10 = vpop.eup %4618 }
0x14c0   :  { %v1897_v23 = vmul.f32 %v4619_v10, %v1894_v59  ;;  %vm1902_vm2 = vweird.f32 %v4619_v10 }
0x14c1   :  { %vm1903_vm4 = vmor %vm1901_vm3, %vm1902_vm2 }
0x14c2   :  { %v1898_v26 = vsub.f32 1.0, %v1897_v23 }
0x14c4   :  { %v1899_v34 = vmul.f32 %v4619_v10, %v1898_v26 }
0x14c6   :  { %v1900_v62 = vadd.f32 %v4619_v10, %v1899_v34 }
0x14c8   :  { %v1904_v28 = vsel %vm1903_vm4, %v4619_v10, %v1900_v62 }
0x14c9   :  { %v1909_v29 = vsel %vm1906_vm5, %v1908_v0, %v1904_v28 }
0x14ca   :  { %v1932_v39 = vmul.f32 %v1927_v25, %v1909_v29  ;;  %v1946_v46 = vsub.f32 1.0, %v1909_v29 }
0x14cc   :  { %1936 = vrot.lane.b32.xlu2 %v1932_v39, %s5077_s8 }
0x1526   :  { %v1937_v41 = vpop.permute.xlu2 %1936 }
0x1527   :  { %v1942_v42 = vadd.f32 %v1937_v41, %v5294_v17 }
0x1528   :  { %v1939_v47 = vpop.permute.xlu0 %1938 }
0x1529   :  { %4620 = vtanh.f32 %v1942_v42  ;;  %v1943_v48 = vadd.f32 %v1939_v47, %v5291_v15 }
0x152b   :  { %4622 = vtanh.f32 %v1943_v48 }
0x152f   :  { %v4621_v43 = vpop.eup %4620 }
0x1530   :  { %1950 = vrot.lane.b32.xlu1 %v4621_v43, %s5078_s9  ;;  %v1961_v51 = vpop.permute.xlu0 %1960 }
0x1531   :  { %v4623_v44 = vpop.eup %4622  ;;  %v1966_v61 = vmul.f32 %v1961_v51, %v1909_v29 }
0x1532   :  { %1952 = vrot.lane.b32.xlu2 %v4623_v44, %s5078_s9 }
0x1538   :  { %1962 = vrot.lane.b32.xlu1 %v1959_v37, %s5087_s20 }
0x158c   :  { %v1953_v53 = vpop.permute.xlu2 %1952 }
0x158d   :  { %v1957_v56 = vmul.f32 %v1953_v53, %v1947_v54 }
0x15a2   :  { %v1951_v45 = vpop.permute.xlu1 %1950 }
0x15a3   :  { %v1956_v40 = vmul.f32 %v1951_v45, %v1946_v46 }
0x15a5   :  { %v1968_v24 = vadd.f32 %v1966_v61, %v1956_v40 }
0x15a7   :  { %v1972_v63 = vrot.slane %v1968_v24, 3 }
0x15aa   :  { %v1963_v38 = vpop.permute.xlu1 %1962 }
0x15ab   :  { %v1967_v57 = vmul.f32 %v1963_v38, %v1924_v58 }
0x15ad   :  { %v1969_v60 = vadd.f32 %v1967_v57, %v1957_v56 }
0x15af   :  { %v1973_v1 = vrot.slane %v1969_v60, 2 }
0x15b1   :  { %v1974_v6 = vsel %vm367_vm9, %v1973_v1, %v1972_v63 }
0x15b2   :  { %1975 = vrot.lane.b32.xlu2 %v1974_v6, %s5087_s20 }
0x160c   :  { %v1976_v11 = vpop.permute.xlu2 %1975 }
0x160d   :  { %v1978_v2 = vmul.f32 %v1976_v11, %v5423_v50 }
0x160f   :  { %v1980_v4 = vrot.slane %v1978_v2, 1  ;;  %1982 = vst.msk [vmem:[#allocation3 + $0x3] sm:$0x1] %vm376_vm10, %v1978_v2  ;;  %v5736_v36 = vadd.f32 %v1984_v8, %v1978_v2 }
0x1611   :  { %1983 = vst.msk [vmem:[#allocation3 + $0xb] sm:$0x1] %vm376_vm10, %v1980_v4  ;;  %4361 = vmatmul.msk.f32.vlgmr.msra.gmra.mxu3 %vm217_vm0, %v5736_v36  ;;  %v2090_v61 = vrot.slane %v5736_v36, 6  ;;  %v2091_v63 = vrot.slane %v5736_v36, 7 }
0x1694   :  { %v2006_v31 = vpop.f32.mrf.mxu3 }
0x1695   :  { %v2007_v55 = vadd.f32 %v5683_v14, %v2006_v31 }
0x1697   :  { %v2010_v5 = vrot.slane %v2007_v55, 6  ;;  %v2011_v3 = vrot.slane %v2007_v55, 7 }
0x1699   :  { %2014 = vrot.lane.b32.xlu1 %v2011_v3, %s5084_s6  ;;  %2058 = vrot.lane.b32.xlu2 %v2010_v5, %s5080_s5 }
0x169a   :  { %2012 = vrot.lane.b32.xlu0 %v2010_v5, %s5084_s6 }
0x16a2   :  { %2060 = vrot.lane.b32.xlu0 %v2011_v3, %s5080_s5 }
0x16f3   :  { %v2059_v46 = vpop.permute.xlu2 %2058 }
0x170b   :  { %v2015_v49 = vpop.permute.xlu1 %2014 }
0x170c   :  { %v2019_v50 = vadd.f32 %v2015_v49, %v5291_v15  ;;  %v2013_v52 = vpop.permute.xlu0 %2012 }
0x170d   :  { %v2018_v7 = vadd.f32 %v2013_v52, %v5294_v17 }
0x170e   :  { %v4363_v58 = vmul.f32 -1.442695, %v2019_v50 }
0x170f   :  { %v4362_v12 = vmul.f32 -1.442695, %v2018_v7 }
0x1710   :  { %4624 = vpow2.f32 %v4363_v58 }
0x1711   :  { %4626 = vpow2.f32 %v4362_v12 }
0x1714   :  { %v2061_v37 = vpop.permute.xlu0 %2060 }
0x1716   :  { %v4625_v16 = vpop.eup %4624 }
0x1717   :  { %v4627_v18 = vpop.eup %4626  ;;  %v2027_v59 = vadd.f32 1.0, %v4625_v16  ;;  %v2116_v16 = vmul.f32 %v5736_v36, %v5377_v32 }
0x1718   :  { %v2026_v21 = vadd.f32 1.0, %v4627_v18 }
0x1719   :  { %4628 = vrcp.f32 %v2027_v59  ;;  %v2054_v35 = vand.u32 2147483648, %v2027_v59  ;;  %v2052_v28 = vand.u32 2147483647, %v2027_v59  ;;  %vm2048_vm8 = vweird.f32 %v2027_v59 }
0x171a   :  { %4630 = vrcp.f32 %v2026_v21  ;;  %v2039_v25 = vand.u32 2147483648, %v2026_v21  ;;  %v2037_v39 = vand.u32 2147483647, %v2026_v21  ;;  %vm2033_vm12 = vweird.f32 %v2026_v21 }
0x171b   :  { %v2055_v42 = vor.u32 1.1754944e-38, %v2054_v35  ;;  %vm2053_vm13 = vcmp.eq.f32.partialorder %v2052_v28, 8.507059e+37 }
0x171c   :  { %v2040_v43 = vor.u32 1.1754944e-38, %v2039_v25  ;;  %vm2038_vm15 = vcmp.eq.f32.partialorder %v2037_v39, 8.507059e+37 }
0x171f   :  { %v4629_v10 = vpop.eup %4628 }
0x1720   :  { %v4631_v23 = vpop.eup %4630  ;;  %v2044_v26 = vmul.f32 %v4629_v10, %v2027_v59  ;;  %vm2049_vm6 = vweird.f32 %v4629_v10 }
0x1721   :  { %v2029_v13 = vmul.f32 %v4631_v23, %v2026_v21  ;;  %vm2034_vm7 = vweird.f32 %v4631_v23  ;;  %vm2050_vm11 = vmor %vm2048_vm8, %vm2049_vm6 }
0x1722   :  { %v2045_v34 = vsub.f32 1.0, %v2044_v26  ;;  %vm2035_vm14 = vmor %vm2033_vm12, %vm2034_vm7 }
0x1723   :  { %v2030_v62 = vsub.f32 1.0, %v2029_v13 }
0x1724   :  { %v2046_v0 = vmul.f32 %v4629_v10, %v2045_v34 }
0x1725   :  { %v2031_v29 = vmul.f32 %v4631_v23, %v2030_v62 }
0x1726   :  { %v2047_v41 = vadd.f32 %v4629_v10, %v2046_v0 }
0x1727   :  { %v2032_v47 = vadd.f32 %v4631_v23, %v2031_v29 }
0x1728   :  { %v2051_v48 = vsel %vm2050_vm11, %v4629_v10, %v2047_v41 }
0x1729   :  { %v2056_v44 = vsel %vm2053_vm13, %v2055_v42, %v2051_v48  ;;  %v2036_v45 = vsel %vm2035_vm14, %v4631_v23, %v2032_v47 }
0x172a   :  { %v2065_v51 = vmul.f32 %v2061_v37, %v2056_v44  ;;  %v2041_v40 = vsel %vm2038_vm15, %v2040_v43, %v2036_v45  ;;  %v2079_v31 = vsub.f32 1.0, %v2056_v44 }
0x172b   :  { %v2064_v53 = vmul.f32 %v2059_v46, %v2041_v40  ;;  %v2078_v6 = vsub.f32 1.0, %v2041_v40 }
0x172c   :  { %2070 = vrot.lane.b32.xlu2 %v2065_v51, %s5077_s8 }
0x172d   :  { %2068 = vrot.lane.b32.xlu1 %v2064_v53, %s5077_s8 }
0x1734   :  { %2092 = vrot.lane.b32.xlu2 %v2090_v61, %s5087_s20 }
0x1786   :  { %v2071_v54 = vpop.permute.xlu2 %2070 }
0x1787   :  { %v2075_v38 = vadd.f32 %v2071_v54, %v5291_v15 }
0x1789   :  { %4632 = vtanh.f32 %v2075_v38 }
0x178e   :  { %v2093_v11 = vpop.permute.xlu2 %2092 }
0x178f   :  { %v4633_v56 = vpop.eup %4632  ;;  %v2098_v4 = vmul.f32 %v2093_v11, %v2041_v40 }
0x1790   :  { %2084 = vrot.lane.b32.xlu1 %v4633_v56, %s5078_s9 }
0x179f   :  { %v2069_v24 = vpop.permute.xlu1 %2068 }
0x17a0   :  { %v2074_v57 = vadd.f32 %v2069_v24, %v5294_v17 }
0x17a2   :  { %4634 = vtanh.f32 %v2074_v57 }
0x17a8   :  { %v4635_v60 = vpop.eup %4634 }
0x17a9   :  { %2082 = vrot.lane.b32.xlu0 %v4635_v60, %s5078_s9 }
0x17b1   :  { %2094 = vrot.lane.b32.xlu0 %v2091_v63, %s5087_s20 }
0x1802   :  { %v2085_v2 = vpop.permute.xlu1 %2084 }
0x1803   :  { %v2089_v5 = vmul.f32 %v2085_v2, %v2079_v31 }
0x181b   :  { %v2083_v1 = vpop.permute.xlu0 %2082 }
0x181c   :  { %v2088_v8 = vmul.f32 %v2083_v1, %v2078_v6 }
0x181e   :  { %v2100_v3 = vadd.f32 %v2098_v4, %v2088_v8 }
0x1820   :  { %v2104_v52 = vrot.slane %v2100_v3, 2 }
0x1823   :  { %v2095_v55 = vpop.permute.xlu0 %2094 }
0x1824   :  { %v2099_v49 = vmul.f32 %v2095_v55, %v2056_v44 }
0x1826   :  { %v2101_v50 = vadd.f32 %v2099_v49, %v2089_v5 }
0x1828   :  { %v2105_v7 = vrot.slane %v2101_v50, 1 }
0x182a   :  { %v2106_v58 = vsel %vm367_vm9, %v2105_v7, %v2104_v52 }
0x182b   :  { %2107 = vrot.lane.b32.xlu1 %v2106_v58, %s5087_s20 }
0x189d   :  { %v2108_v12 = vpop.permute.xlu1 %2107 }
0x189e   :  { %v2110_v18 = vmul.f32 %v2108_v12, %v5379_v33 }
0x18a0   :  { %v2112_v59 = vrot.slane %v2110_v18, 1  ;;  %2114 = vst.msk [vmem:[#allocation3 + $0x2] sm:$0x1] %vm376_vm10, %v2110_v18  ;;  %v5764_v21 = vadd.f32 %v2116_v16, %v2110_v18 }
0x18a2   :  { %2115 = vst.msk [vmem:[#allocation3 + $0xa] sm:$0x1] %vm376_vm10, %v2112_v59  ;;  %4364 = vmatmul.msk.f32.vlgmr.msrb.gmra.mxu0 %vm217_vm0, %v5764_v21  ;;  %v2221_v40 = vrot.slane %v5764_v21, 7 }
0x191f   :  { %v2138_v10 = vpop.f32.mrf.mxu0 }
0x1920   :  { %v2139_v23 = vadd.f32 %v5683_v14, %v2138_v10 }
0x1922   :  { %v2142_v26 = vrot.slane %v2139_v23, 7  ;;  %2145 = vrot.lane.b32.xlu0 %v2139_v23, %s5084_s6 }
0x1924   :  { %2189 = vrot.lane.b32.xlu1 %v2142_v26, %s5080_s5  ;;  %2143 = vrot.lane.b32.xlu2 %v2142_v26, %s5084_s6 }
0x192c   :  { %2191 = vrot.lane.b32.xlu2 %v2139_v23, %s5080_s5 }
0x197e   :  { %v2144_v32 = vpop.permute.xlu2 %2143 }
0x197f   :  { %v2149_v33 = vadd.f32 %v2144_v32, %v5294_v17 }
0x1981   :  { %v4365_v36 = vmul.f32 -1.442695, %v2149_v33 }
0x1983   :  { %4636 = vpow2.f32 %v4365_v36  ;;  %v2245_v36 = vmul.f32 %v5764_v21, %v5345_v19 }
0x1986   :  { %v2192_v1 = vpop.permute.xlu2 %2191 }
0x1989   :  { %v4637_v13 = vpop.eup %4636 }
0x198a   :  { %v2157_v34 = vadd.f32 1.0, %v4637_v13 }
0x198c   :  { %4638 = vrcp.f32 %v2157_v34  ;;  %v2170_v29 = vand.u32 2147483648, %v2157_v34  ;;  %v2168_v42 = vand.u32 2147483647, %v2157_v34  ;;  %vm2164_vm2 = vweird.f32 %v2157_v34 }
0x198e   :  { %v2171_v48 = vor.u32 1.1754944e-38, %v2170_v29  ;;  %vm2169_vm4 = vcmp.eq.f32.partialorder %v2168_v42, 8.507059e+37 }
0x1992   :  { %v4639_v35 = vpop.eup %4638 }
0x1993   :  { %v2160_v62 = vmul.f32 %v4639_v35, %v2157_v34  ;;  %vm2165_vm1 = vweird.f32 %v4639_v35 }
0x1994   :  { %v2146_v0 = vpop.permute.xlu0 %2145  ;;  %vm2166_vm3 = vmor %vm2164_vm2, %vm2165_vm1 }
0x1995   :  { %v2150_v28 = vadd.f32 %v2146_v0, %v5291_v15  ;;  %v2161_v25 = vsub.f32 1.0, %v2160_v62 }
0x1996   :  { %v2190_v44 = vpop.permute.xlu1 %2189 }
0x1997   :  { %v4366_v39 = vmul.f32 -1.442695, %v2150_v28  ;;  %v2162_v41 = vmul.f32 %v4639_v35, %v2161_v25  ;;  %v4821_v25 = vld [vmem:[#allocation13] ss:$0 sm:$0xff] }
0x1998   :  { %v1221_v19 = vadd.f32 %v4821_v25, %v5678_v27 }
0x1999   :  { %4640 = vpow2.f32 %v4366_v39  ;;  %v2163_v47 = vadd.f32 %v4639_v35, %v2162_v41 }
0x199b   :  { %v2167_v43 = vsel %vm2166_vm3, %v4639_v35, %v2163_v47 }
0x199c   :  { %v2172_v37 = vsel %vm2169_vm4, %v2171_v48, %v2167_v43 }
0x199d   :  { %v2195_v45 = vmul.f32 %v2190_v44, %v2172_v37  ;;  %v2209_v49 = vsub.f32 1.0, %v2172_v37 }
0x199f   :  { %v4641_v46 = vpop.eup %4640  ;;  %2199 = vrot.lane.b32.xlu0 %v2195_v45, %s5077_s8 }
0x19a0   :  { %v2158_v51 = vadd.f32 1.0, %v4641_v46 }
0x19a2   :  { %4642 = vrcp.f32 %v2158_v51  ;;  %v2185_v38 = vand.u32 2147483648, %v2158_v51  ;;  %v2183_v24 = vand.u32 2147483647, %v2158_v51  ;;  %vm2179_vm6 = vweird.f32 %v2158_v51 }
0x19a4   :  { %v2186_v60 = vor.u32 1.1754944e-38, %v2185_v38  ;;  %vm2184_vm8 = vcmp.eq.f32.partialorder %v2183_v24, 8.507059e+37 }
0x19a7   :  { %2222 = vrot.lane.b32.xlu0 %v2221_v40, %s5087_s20 }
0x19a8   :  { %v4643_v53 = vpop.eup %4642 }
0x19a9   :  { %v2175_v61 = vmul.f32 %v4643_v53, %v2158_v51  ;;  %vm2180_vm5 = vweird.f32 %v4643_v53 }
0x19aa   :  { %vm2181_vm7 = vmor %vm2179_vm6, %vm2180_vm5 }
0x19ab   :  { %v2176_v54 = vsub.f32 1.0, %v2175_v61 }
0x19ad   :  { %v2177_v56 = vmul.f32 %v4643_v53, %v2176_v54 }
0x19af   :  { %v2178_v57 = vadd.f32 %v4643_v53, %v2177_v56 }
0x19b1   :  { %v2182_v63 = vsel %vm2181_vm7, %v4643_v53, %v2178_v57 }
0x19b2   :  { %v2187_v6 = vsel %vm2184_vm8, %v2186_v60, %v2182_v63 }
0x19b3   :  { %v2196_v11 = vmul.f32 %v2192_v1, %v2187_v6  ;;  %v2210_v16 = vsub.f32 1.0, %v2187_v6 }
0x19b5   :  { %2201 = vrot.lane.b32.xlu1 %v2196_v11, %s5077_s8 }
0x1a11   :  { %v2200_v8 = vpop.permute.xlu0 %2199 }
0x1a12   :  { %v2205_v2 = vadd.f32 %v2200_v8, %v5294_v17 }
0x1a14   :  { %4644 = vtanh.f32 %v2205_v2 }
0x1a19   :  { %v2223_v50 = vpop.permute.xlu0 %2222 }
0x1a1a   :  { %v4645_v4 = vpop.eup %4644  ;;  %v2228_v7 = vmul.f32 %v2223_v50, %v2172_v37 }
0x1a1b   :  { %2213 = vrot.lane.b32.xlu2 %v4645_v4, %s5078_s9 }
0x1a23   :  { %2224 = vrot.lane.b32.xlu2 %v5764_v21, %s5087_s20  ;;  %v1225_v21 = vrot.slane %v1221_v19, 2 }
0x1a25   :  { %v1229_v57 = vadd.f32 %v1225_v21, %v5291_v15 }
0x1a27   :  { %v2202_v31 = vpop.permute.xlu1 %2201  ;;  %v4346_v63 = vmul.f32 -1.442695, %v1229_v57 }
0x1a28   :  { %v2206_v55 = vadd.f32 %v2202_v31, %v5291_v15 }
0x1a2a   :  { %4646 = vtanh.f32 %v2206_v55 }
0x1a30   :  { %v4647_v5 = vpop.eup %4646 }
0x1a31   :  { %2215 = vrot.lane.b32.xlu1 %v4647_v5, %s5078_s9 }
0x1a75   :  { %v2214_v3 = vpop.permute.xlu2 %2213 }
0x1a76   :  { %v2219_v52 = vmul.f32 %v2214_v3, %v2209_v49 }
0x1a78   :  { %v2230_v12 = vadd.f32 %v2228_v7, %v2219_v52 }
0x1a7a   :  { %v2234_v23 = vrot.slane %v2230_v12, 1 }
0x1a7d   :  { %v2225_v58 = vpop.permute.xlu2 %2224 }
0x1a7e   :  { %v2229_v59 = vmul.f32 %v2225_v58, %v2187_v6 }
0x1aa3   :  { %v2216_v18 = vpop.permute.xlu1 %2215 }
0x1aa4   :  { %v2220_v10 = vmul.f32 %v2216_v18, %v2210_v16 }
0x1aa6   :  { %v2231_v26 = vadd.f32 %v2229_v59, %v2220_v10 }
0x1aa8   :  { %v2235_v32 = vsel %vm367_vm9, %v2231_v26, %v2234_v23 }
0x1aa9   :  { %2236 = vrot.lane.b32.xlu0 %v2235_v32, %s5087_s20 }
0x1b1b   :  { %v2237_v33 = vpop.permute.xlu0 %2236 }
0x1b1c   :  { %v2239_v13 = vmul.f32 %v2237_v33, %v5347_v20  ;;  %v1224_v20 = vrot.slane %v1221_v19, 1 }
0x1b1e   :  { %v2241_v34 = vrot.slane %v2239_v13, 1  ;;  %2243 = vst.msk [vmem:[#allocation3 + $0x1] sm:$0x1] %vm376_vm10, %v2239_v13  ;;  %v5792_v35 = vadd.f32 %v2245_v36, %v2239_v13 }
0x1b20   :  { %2244 = vst.msk [vmem:[#allocation3 + $0x9] sm:$0x1] %vm376_vm10, %v2241_v34  ;;  %4367 = vmatmul.msk.f32.vlgmr.msrb.gmra.mxu1 %vm217_vm0, %v5792_v35  ;;  %v2350_v60 = vrot.slane %v5792_v35, 1 }
0x1b9d   :  { %v2267_v62 = vpop.f32.mrf.mxu1 }
0x1b9e   :  { %v2268_v0 = vadd.f32 %v5683_v14, %v2267_v62  ;;  %v1228_v14 = vadd.f32 %v1224_v20, %v5294_v17 }
0x1ba0   :  { %2272 = vrot.lane.b32.xlu2 %v2268_v0, %s5084_s6  ;;  %v2271_v28 = vrot.slane %v2268_v0, 1  ;;  %v4345_v29 = vmul.f32 -1.442695, %v1228_v14 }
0x1ba2   :  { %2320 = vrot.lane.b32.xlu0 %v2271_v28, %s5080_s5  ;;  %2274 = vrot.lane.b32.xlu1 %v2271_v28, %s5084_s6  ;;  %4648 = vpow2.f32 %v4345_v29 }
0x1ba8   :  { %1268 = vrot.lane.b32.xlu2 %v1224_v20, %s5076_s29  ;;  %v4649_v39 = vpop.eup %4648 }
0x1ba9   :  { %v1236_v41 = vadd.f32 1.0, %v4649_v39 }
0x1baa   :  { %1270 = vrot.lane.b32.xlu0 %v1225_v21, %s5076_s29  ;;  %2318 = vrot.lane.b32.xlu1 %v2268_v0, %s5080_s5 }
0x1bab   :  { %4650 = vrcp.f32 %v1236_v41  ;;  %v1249_v45 = vand.u32 2147483648, %v1236_v41  ;;  %vm1243_vm12 = vweird.f32 %v1236_v41  ;;  %v1247_v51 = vand.u32 2147483647, %v1236_v41 }
0x1bad   :  { %v1250_v53 = vor.u32 1.1754944e-38, %v1249_v45  ;;  %vm1248_vm14 = vcmp.eq.f32.partialorder %v1247_v51, 8.507059e+37 }
0x1bb1   :  { %v4651_v27 = vpop.eup %4650 }
0x1bb2   :  { %v1239_v42 = vmul.f32 %v4651_v27, %v1236_v41  ;;  %vm1244_vm11 = vweird.f32 %v4651_v27 }
0x1bb3   :  { %vm1245_vm13 = vmor %vm1243_vm12, %vm1244_vm11 }
0x1bb4   :  { %v1240_v47 = vsub.f32 1.0, %v1239_v42 }
0x1bb6   :  { %v1241_v48 = vmul.f32 %v4651_v27, %v1240_v47 }
0x1bb8   :  { %v1242_v37 = vadd.f32 %v4651_v27, %v1241_v48 }
0x1bba   :  { %v1246_v40 = vsel %vm1245_vm13, %v4651_v27, %v1242_v37 }
0x1bbb   :  { %v5807_v61 = vsel %vm1248_vm14, %v1250_v53, %v1246_v40  ;;  %v1301_v53 = vrot.slane %v5664_v22, 2  ;;  %vm2403_vm14 = vcmask 58368  }
0x1bfa   :  { %v2273_v43 = vpop.permute.xlu2 %2272 }
0x1bfb   :  { %v2278_v44 = vadd.f32 %v2273_v43, %v5294_v17 }
0x1bfd   :  { %v4368_v46 = vmul.f32 -1.442695, %v2278_v44 }
0x1bff   :  { %4652 = vpow2.f32 %v4368_v46 }
0x1c02   :  { %v1269_v54 = vpop.permute.xlu2 %1268 }
0x1c03   :  { %v1274_v38 = vmul.f32 %v1269_v54, %v5807_v61 }
0x1c05   :  { %v4653_v56 = vpop.eup %4652  ;;  %1278 = vrot.lane.b32.xlu0 %v1274_v38, %s5077_s8 }
0x1c06   :  { %v2286_v24 = vadd.f32 1.0, %v4653_v56 }
0x1c08   :  { %4654 = vrcp.f32 %v2286_v24  ;;  %v2299_v55 = vand.u32 2147483648, %v2286_v24  ;;  %vm2293_vm1 = vweird.f32 %v2286_v24  ;;  %v2297_v49 = vand.u32 2147483647, %v2286_v24 }
0x1c09   :  { %4656 = vpow2.f32 %v4346_v63 }
0x1c0a   :  { %v2300_v7 = vor.u32 1.1754944e-38, %v2299_v55  ;;  %vm2298_vm3 = vcmp.eq.f32.partialorder %v2297_v49, 8.507059e+37 }
0x1c0d   :  { %2353 = vrot.lane.b32.xlu0 %v2350_v60, %s5087_s20  ;;  %v1300_v60 = vrot.slane %v5664_v22, 1 }
0x1c0e   :  { %v4655_v1 = vpop.eup %4654 }
0x1c0f   :  { %v2289_v6 = vmul.f32 %v4655_v1, %v2286_v24  ;;  %vm2294_vm15 = vweird.f32 %v4655_v1  ;;  %v4657_v5 = vpop.eup %4656 }
0x1c10   :  { %vm2295_vm2 = vmor %vm2293_vm1, %vm2294_vm15  ;;  %v1237_v52 = vadd.f32 1.0, %v4657_v5  ;;  %vm2541_vm15 = vcmask 392192  }
0x1c11   :  { %v2290_v11 = vsub.f32 1.0, %v2289_v6 }
0x1c12   :  { %v1264_v39 = vand.u32 2147483648, %v1237_v52  ;;  %vm1258_vm11 = vweird.f32 %v1237_v52  ;;  %v1262_v41 = vand.u32 2147483647, %v1237_v52 }
0x1c13   :  { %v2291_v8 = vmul.f32 %v4655_v1, %v2290_v11 }
0x1c14   :  { %v2275_v2 = vpop.permute.xlu1 %2274  ;;  %v2321_v0 = vpop.permute.xlu0 %2320  ;;  %v1265_v42 = vor.u32 1.1754944e-38, %v1264_v39  ;;  %vm1263_vm13 = vcmp.eq.f32.partialorder %v1262_v41, 8.507059e+37  ;;  %v2418_v41 = vld [vmem:[%s6775_s4 + $0x18] sm:$0xff] }
0x1c15   :  { %v2279_v4 = vadd.f32 %v2275_v2, %v5291_v15  ;;  %v2292_v31 = vadd.f32 %v4655_v1, %v2291_v8  ;;  %2441 = vmatpush.msra.mxu2 %v2418_v41 }
0x1c17   :  { %v4369_v3 = vmul.f32 -1.442695, %v2279_v4  ;;  %v2296_v50 = vsel %vm2295_vm2, %v4655_v1, %v2292_v31 }
0x1c18   :  { %v5815_v58 = vsel %vm2298_vm3, %v2300_v7, %v2296_v50 }
0x1c19   :  { %4658 = vpow2.f32 %v4369_v3 }
0x1c1a   :  { %4660 = vrcp.f32 %v1237_v52 }
0x1c1c   :  { %v2319_v12 = vpop.permute.xlu1 %2318  ;;  %v1271_v47 = vpop.permute.xlu0 %1270 }
0x1c1d   :  { %v2324_v16 = vmul.f32 %v2319_v12, %v5815_v58 }
0x1c1f   :  { %v4659_v18 = vpop.eup %4658  ;;  %2328 = vrot.lane.b32.xlu2 %v2324_v16, %s5077_s8 }
0x1c20   :  { %v2287_v59 = vadd.f32 1.0, %v4659_v18  ;;  %v4661_v10 = vpop.eup %4660 }
0x1c21   :  { %v1254_v23 = vmul.f32 %v4661_v10, %v1237_v52  ;;  %vm1259_vm8 = vweird.f32 %v4661_v10  ;;  %v1288_v52 = vsub.f32 1.0, %v5807_v61 }
0x1c22   :  { %4662 = vrcp.f32 %v2287_v59  ;;  %v2314_v13 = vand.u32 2147483648, %v2287_v59  ;;  %v2312_v62 = vand.u32 2147483647, %v2287_v59  ;;  %vm2308_vm5 = vweird.f32 %v2287_v59  ;;  %vm1260_vm12 = vmor %vm1258_vm11, %vm1259_vm8 }
0x1c23   :  { %v1255_v36 = vsub.f32 1.0, %v1254_v23 }
0x1c24   :  { %v2315_v19 = vor.u32 1.1754944e-38, %v2314_v13  ;;  %vm2313_vm7 = vcmp.eq.f32.partialorder %v2312_v62, 8.507059e+37  ;;  %v2453_v13 = vld [vmem:[#allocation16 + $0x18] sm:$0xff] }
0x1c25   :  { %v1256_v28 = vmul.f32 %v4661_v10, %v1255_v36  ;;  %2476 = vmatpush.msrb.mxu3 %v2453_v13 }
0x1c27   :  { %v1257_v14 = vadd.f32 %v4661_v10, %v1256_v28 }
0x1c28   :  { %v4663_v26 = vpop.eup %4662 }
0x1c29   :  { %v2304_v32 = vmul.f32 %v4663_v26, %v2287_v59  ;;  %vm2309_vm4 = vweird.f32 %v4663_v26  ;;  %v1261_v27 = vsel %vm1260_vm12, %v4661_v10, %v1257_v14 }
0x1c2a   :  { %vm2310_vm6 = vmor %vm2308_vm5, %vm2309_vm4  ;;  %v1266_v48 = vsel %vm1263_vm13, %v1265_v42, %v1261_v27  ;;  %v2416_v27 = vld [vmem:[%s6775_s4 + $0x8] sm:$0xff]  ;;  %v2415_v42 = vld [vmem:[%s6775_s4] sm:$0xff]  ;;  %vm2902_vm13 = vcmask 1042434  }
0x1c2b   :  { %v2305_v33 = vsub.f32 1.0, %v2304_v32  ;;  %v1275_v43 = vmul.f32 %v1271_v47, %v1266_v48  ;;  %v1289_v18 = vsub.f32 1.0, %v1266_v48 }
0x1c2d   :  { %v2306_v34 = vmul.f32 %v4663_v26, %v2305_v33 }
0x1c2f   :  { %v2307_v25 = vadd.f32 %v4663_v26, %v2306_v34  ;;  %v2452_v34 = vld [vmem:[#allocation16 + $0x10] sm:$0xff] }
0x1c30   :  { %2477 = vmatpush.msrb.mxu3 %v2452_v34 }
0x1c31   :  { %v2311_v20 = vsel %vm2310_vm6, %v4663_v26, %v2307_v25  ;;  %vm2722_vm6 = vcmask 523264  }
0x1c32   :  { %v2316_v21 = vsel %vm2313_vm7, %v2315_v19, %v2311_v20 }
0x1c33   :  { %v2325_v29 = vmul.f32 %v2321_v0, %v2316_v21  ;;  %v2339_v1 = vsub.f32 1.0, %v2316_v21  ;;  %v2451_v0 = vld [vmem:[#allocation16 + $0x8] sm:$0xff] }
0x1c34   :  { %2478 = vmatpush.msrb.mxu3 %v2451_v0 }
0x1c35   :  { %2330 = vrot.lane.b32.xlu1 %v2325_v29, %s5077_s8 }
0x1c3d   :  { %1280 = vrot.lane.b32.xlu1 %v1275_v43, %s5077_s8 }
0x1c77   :  { %v1279_v44 = vpop.permute.xlu0 %1278 }
0x1c78   :  { %v1284_v37 = vadd.f32 %v1279_v44, %v5294_v17 }
0x1c79   :  { %v2329_v45 = vpop.permute.xlu2 %2328 }
0x1c7a   :  { %4664 = vtanh.f32 %v1284_v37  ;;  %v2334_v46 = vadd.f32 %v2329_v45, %v5294_v17 }
0x1c7c   :  { %4666 = vtanh.f32 %v2334_v46 }
0x1c7f   :  { %v2354_v6 = vpop.permute.xlu0 %2353 }
0x1c80   :  { %v4665_v51 = vpop.eup %4664  ;;  %v2358_v8 = vmul.f32 %v2354_v6, %v2316_v21 }
0x1c81   :  { %1292 = vrot.lane.b32.xlu0 %v4665_v51, %s5078_s9 }
0x1c82   :  { %v4667_v40 = vpop.eup %4666 }
0x1c83   :  { %2342 = vrot.lane.b32.xlu1 %v4667_v40, %s5078_s9 }
0x1c89   :  { %1304 = vrot.lane.b32.xlu0 %v1301_v53, %s5080_s5 }
0x1ca7   :  { %v2331_v54 = vpop.permute.xlu1 %2330 }
0x1ca8   :  { %v2335_v38 = vadd.f32 %v2331_v54, %v5291_v15 }
0x1caa   :  { %4668 = vtanh.f32 %v2335_v38 }
0x1caf   :  { %v1281_v56 = vpop.permute.xlu1 %1280 }
0x1cb0   :  { %v4669_v24 = vpop.eup %4668  ;;  %v1285_v57 = vadd.f32 %v1281_v56, %v5291_v15  ;;  %v2338_v15 = vsub.f32 1.0, %v5815_v58 }
0x1cb1   :  { %2344 = vrot.lane.b32.xlu2 %v4669_v24, %s5078_s9 }
0x1cb2   :  { %4670 = vtanh.f32 %v1285_v57 }
0x1cb8   :  { %v4671_v17 = vpop.eup %4670 }
0x1cb9   :  { %2351 = vrot.lane.b32.xlu2 %v5792_v35, %s5087_s20  ;;  %1294 = vrot.lane.b32.xlu1 %v4671_v17, %s5078_s9 }
0x1cc1   :  { %1302 = vrot.lane.b32.xlu2 %v1300_v60, %s5080_s5 }
0x1cf3   :  { %v1293_v22 = vpop.permute.xlu0 %1292 }
0x1cf4   :  { %v1298_v16 = vmul.f32 %v1293_v22, %v1288_v52  ;;  %v5906_v22 = vld [vmem:[%s6729_s13 + $0x10] sm:$0xff]  ;;  %v4472_v52 = vld [vmem:[%s6728_s12] ss:$0 sm:$0xff] }
0x1cf5   :  { %v2343_v2 = vpop.permute.xlu1 %2342 }
0x1cf6   :  { %v2348_v55 = vmul.f32 %v2343_v2, %v2338_v15 }
0x1cfb   :  { %v1305_v12 = vpop.permute.xlu0 %1304 }
0x1cfc   :  { %v1309_v10 = vmul.f32 %v1305_v12, %v1266_v48 }
0x1d0b   :  { %v2345_v63 = vpop.permute.xlu2 %2344 }
0x1d0c   :  { %v2349_v11 = vmul.f32 %v2345_v63, %v2339_v1 }
0x1d0e   :  { %v2360_v4 = vadd.f32 %v2358_v8, %v2349_v11 }
0x1d10   :  { %v2363_v35 = vrot.slane %v2360_v4, 7 }
0x1d13   :  { %v2352_v31 = vpop.permute.xlu2 %2351 }
0x1d14   :  { %v2357_v5 = vmul.f32 %v2352_v31, %v5815_v58 }
0x1d16   :  { %v2359_v3 = vadd.f32 %v2357_v5, %v2348_v55 }
0x1d18   :  { %v2364_v49 = vsel %vm367_vm9, %v2363_v35, %v2359_v3  ;;  %v5889_v35 = vld [vmem:[%s6729_s13 + $0x28] sm:$0xff]  ;;  %v5894_v3 = vld [vmem:[%s6729_s13 + $0x20] sm:$0xff] }
0x1d19   :  { %2365 = vrot.lane.b32.xlu1 %v2364_v49, %s5087_s20  ;;  %2555 = vmatpush.msra.mxu0 %v5889_v35  ;;  %v5900_v49 = vld [vmem:[%s6729_s13 + $0x18] sm:$0xff] }
0x1d1b   :  { %v1303_v50 = vpop.permute.xlu2 %1302  ;;  %2556 = vmatpush.msra.mxu0 %v5894_v3 }
0x1d1c   :  { %v1308_v7 = vmul.f32 %v1303_v50, %v5807_v61  ;;  %v5846_v61 = vld [vmem:[%s6773_s28] sm:$0x3]  ;;  %v5912_v50 = vld [vmem:[%s6729_s13 + $0x8] sm:$0xff] }
0x1d1d   :  { %v2404_v62 = vsel %vm2403_vm14, %v5846_v61, 0.0  ;;  %2557 = vmatpush.msra.mxu0 %v5900_v49  ;;  %vm2663_vm5 = vcmp.gt.f32.partialorder %v5846_v61, 0.0 }
0x1d1e   :  { %v1310_v23 = vadd.f32 %v1308_v7, %v1298_v16 }
0x1d1f   :  { %2558 = vmatpush.msra.mxu0 %v5906_v22 }
0x1d20   :  { %v1318_v32 = vrot.slane %v1310_v23, 7  ;;  %v5940_v23 = vld [vmem:[%s6776_s11] sm:$0x1f] }
0x1d21   :  { %2559 = vmatpush.msra.mxu0 %v5912_v50 }
0x1d2b   :  { %v1295_v59 = vpop.permute.xlu1 %1294 }
0x1d2c   :  { %v1299_v26 = vmul.f32 %v1295_v59, %v1289_v18  ;;  %v5923_v18 = vld [vmem:[%s6729_s13] sm:$0xff]  ;;  %v2488_v59 = vld [vmem:[%s6776_s11 + $0x8] sm:$0x1f]  ;;  %s6782_s13 = sld [smem:[#allocation41_spill]] }
0x1d2d   :  { %2560 = vmatpush.msra.mxu0 %v5923_v18 }
0x1d2e   :  { %v1311_v58 = vadd.f32 %v1309_v10, %v1299_v26  ;;  %v5935_v10 = vrot.slane %v2488_v59, 7 }
0x1d2f   :  { %2924 = vmatpush.msrb.mxu0 %v5889_v35 }
0x1d30   :  { %v1319_v33 = vrot.slane %v1311_v58, 6  ;;  %v5945_v26 = vsel %vm367_vm9, %v5935_v10, %v5940_v23 }
0x1d31   :  { %2925 = vmatpush.msrb.mxu0 %v5894_v3 }
0x1d32   :  { %v1320_v36 = vsel %vm367_vm9, %v1319_v33, %v1318_v32  ;;  %v5953_v33 = vld [vmem:[%s6730_s14] ss:$0 sm:$0xff] }
0x1d33   :  { %1321 = vrot.lane.b32.xlu2 %v1320_v36, %s5078_s9  ;;  %2926 = vmatpush.msrb.mxu0 %v5900_v49 }
0x1d35   :  { %2927 = vmatpush.msrb.mxu0 %v5906_v22 }
0x1d37   :  { %2928 = vmatpush.msrb.mxu0 %v5912_v50 }
0x1d39   :  { %2929 = vmatpush.msrb.mxu0 %v5923_v18 }
0x1d5c   :  { %2405 = vadd.xlane.f32.xlu2 %v2404_v62 }
0x1d8b   :  { %v2366_v28 = vpop.permute.xlu1 %2365 }
0x1d8c   :  { %v2368_v25 = vmul.f32 %v2366_v28, %v5317_v9  ;;  %v2450_v9 = vld [vmem:[#allocation16] sm:$0xff] }
0x1d8d   :  { %v1322_v19 = vpop.permute.xlu2 %1321  ;;  %2479 = vmatpush.msrb.mxu3 %v2450_v9 }
0x1d8e   :  { %v2370_v20 = vrot.slane %v2368_v25, 1  ;;  %2372 = vst.msk [vmem:[#allocation3] sm:$0x1] %vm376_vm10, %v2368_v25  ;;  %v1324_v21 = vmul.f32 %v1322_v19, %v5508_v30  ;;  %v2417_v30 = vld [vmem:[%s6775_s4 + $0x10] sm:$0xff] }
0x1d8f   :  { %2442 = vmatpush.msra.mxu2 %v2417_v30 }
0x1d90   :  { %2373 = vst.msk [vmem:[#allocation3 + $0x8] sm:$0x1] %vm376_vm10, %v2370_v20  ;;  %v1326_v14 = vrot.slane %v1324_v21, 1 }
0x1d91   :  { %1328 = vst.msk [vmem:[#allocation2 + $0x7] sm:$0x1] %vm376_vm10, %v1324_v21  ;;  %2443 = vmatpush.msra.mxu2 %v2416_v27 }
0x1d92   :  { %1329 = vst.msk [vmem:[#allocation2 + $0xf] sm:$0x1] %vm376_vm10, %v1326_v14  ;;  %vm2388_vm10 = vcmask 261120  }
0x1d93   :  { %2444 = vmatpush.msra.mxu2 %v2415_v42 }
0x1d95   :  { %v2376_v29 = vld [vmem:[#allocation3] sm:$0xff] }
0x1d96   :  { %2380 = vrot.lane.b32.xlu1 %v2376_v29, %s5080_s5 }
0x1d97   :  { %v2377_v39 = vld [vmem:[#allocation3 + $0x8] sm:$0xff] }
0x1d98   :  { %2382 = vrot.lane.b32.xlu0 %v2377_v39, %s5080_s5  ;;  %v2374_v43 = vld [vmem:[#allocation2] sm:$0xff] }
0x1d99   :  { %v2375_v51 = vld [vmem:[#allocation2 + $0x8] sm:$0xff] }
0x1dcf   :  { %v2406_v47 = vpop.xlane.xlu2 %2405 }
0x1dd0   :  { %v2407_v44 = vmax.f32 %v2406_v47, 1.0 }
0x1dd2   :  { %4672 = vrcp.f32 %v2407_v44  ;;  %v5962_v44 = vld [vmem:[#allocation17 + $0x10] sm:$0xff] }
0x1dd8   :  { %v4673_v63 = vpop.eup %4672 }
0x1dd9   :  { %v2410_v8 = vrot.slane %v4673_v63, 1 }
0x1e08   :  { %v2381_v48 = vpop.permute.xlu1 %2380 }
0x1e09   :  { %v5871_v37 = vsel %vm217_vm0, %v2374_v43, %v2381_v48  ;;  %v5960_v43 = vld [vmem:[#allocation17 + $0x18] sm:$0xff] }
0x1e0a   :  { %v2389_v45 = vsel %vm2388_vm10, %v5871_v37, 0.0  ;;  %v2383_v46 = vpop.permute.xlu0 %2382  ;;  %4371 = vmatmul.msk.f32.vlgmr.msrb.gmra.mxu3 %vm2388_vm10, %v5871_v37  ;;  %2626 = vmatpush.msra.mxu1 %v5960_v43 }
0x1e0b   :  { %v2390_v40 = vrot.slane %v2389_v45, 4  ;;  %v5878_v53 = vsel %vm217_vm0, %v2375_v51, %v2383_v46  ;;  %v5968_v46 = vld [vmem:[#allocation17] sm:$0xff] }
0x1e0c   :  { %v2396_v54 = vsel %vm2388_vm10, %v5878_v53, 0.0  ;;  %2627 = vmatpush.msra.mxu1 %v5962_v44  ;;  %6778 = vst [vmem:[#allocation27_spill] sm:$0xff] %v5968_v46 }
0x1e0d   :  { %v2397_v38 = vrot.slane %v2396_v54, 4  ;;  %v2391_v56 = vadd.f32 %v2390_v40, %v2389_v45  ;;  %v5965_v45 = vld [vmem:[#allocation17 + $0x8] sm:$0xff] }
0x1e0e   :  { %6777 = vst [vmem:[#allocation26_spill] sm:$0xff] %v5965_v45  ;;  %2628 = vmatpush.msra.mxu1 %v5965_v45 }
0x1e0f   :  { %v2398_v24 = vadd.f32 %v2397_v38, %v2396_v54  ;;  %v2392_v57 = vrot.slane %v2391_v56, 2 }
0x1e10   :  { %2629 = vmatpush.msra.mxu1 %v5968_v46 }
0x1e11   :  { %v2393_v17 = vadd.f32 %v2392_v57, %v2391_v56  ;;  %v2399_v60 = vrot.slane %v2398_v24, 2 }
0x1e12   :  { %4372 = vmatmul.msk.f32.gmra.mxu3 %vm2388_vm10, %v5878_v53 }
0x1e13   :  { %v2394_v1 = vrot.slane %v2393_v17, 1  ;;  %v2400_v6 = vadd.f32 %v2399_v60, %v2398_v24 }
0x1e15   :  { %v2401_v11 = vrot.slane %v2400_v6, 1  ;;  %v2395_v2 = vadd.f32 %v2394_v1, %v2393_v17  ;;  %v4476_v17 = vld [vmem:[#allocation4] ss:$0 sm:$0xff] }
0x1e16   :  { %2658 = vperm.xlu2 %4464, %v4476_v17   ;;  %v4471_v1 = vld [vmem:[%s6732_s16] ss:$0 sm:$0xff]  ;;  %v6030_v17 = vld [vmem:[%s6737_s21 + $0x28] sm:$0xff] }
0x1e17   :  { %v2402_v15 = vadd.f32 %v2401_v11, %v2400_v6  ;;  %v2413_v31 = vmul.f32 %v4673_v63, %v2395_v2  ;;  %v5980_v63 = vld [vmem:[%s6734_s18] ss:$0 sm:$0xff] }
0x1e19   :  { %v2414_v4 = vmul.f32 %v2410_v8, %v2402_v15 }
0x1e1b   :  { %v2425_v55 = vrot.slane %v2414_v4, 7 }
0x1e1d   :  { %v2426_v5 = vsel %vm367_vm9, %v2425_v55, %v2413_v31 }
0x1e1e   :  { %4370 = vmatmul.msk.f32.vlgmr.msra.gmra.mxu2 %vm2388_vm10, %v2426_v5 }
0x1e8d   :  { %v2481_v60 = vpop.f32.mrf.mxu3 }
0x1e8e   :  { %v5986_v2 = vadd.f32 %v4471_v1, %v2481_v60  ;;  %v6036_v60 = vld [vmem:[%s6737_s21 + $0x20] sm:$0xff] }
0x1e95   :  { %v2484_v8 = vpop.f32.mrf.mxu3 }
0x1e96   :  { %v5988_v31 = vadd.f32 %v4471_v1, %v2484_v8  ;;  %v6042_v1 = vld [vmem:[%s6737_s21 + $0x18] sm:$0xff]  ;;  %v6059_v8 = vld [vmem:[%s6737_s21] sm:$0xff] }
0x1ea1   :  { %v2446_v7 = vpop.f32.mrf.mxu2 }
0x1ea2   :  { %v2447_v12 = vadd.f32 %v4472_v52, %v2446_v7  ;;  %v5995_v7 = vld [vmem:[%s6735_s19] ss:$0 sm:$0xff] }
0x1ea4   :  { %4674 = vtanh.f32 %v2447_v12 }
0x1eaa   :  { %v4675_v16 = vpop.eup %4674 }
0x1eab   :  { %2534 = vrot.lane.b32.xlu0 %v4675_v16, %s5080_s5 }
0x1f1d   :  { %v2535_v58 = vpop.permute.xlu0 %2534 }
0x1f1e   :  { %v2537_v32 = vsel %vm217_vm0, %v5945_v26, %v2535_v58 }
0x1f1f   :  { %4373 = vmatmul.msk.f32.vlgmr.msra.gmra.mxu0 %vm2541_vm15, %v2537_v32 }
0x1f9c   :  { %v2562_v36 = vpop.f32.mrf.mxu0 }
0x1f9d   :  { %v2563_v13 = vadd.f32 %v5953_v33, %v2562_v36 }
0x1f9f   :  { %2585 = vrot.lane.b32.xlu1 %v2563_v13, %s5077_s8  ;;  %v4374_v34 = vmul.f32 -1.442695, %v2563_v13 }
0x1fa1   :  { %4676 = vpow2.f32 %v4374_v34  ;;  %v6001_v34 = vpop.permute.xlu2 %2658 }
0x1fa7   :  { %v4677_v62 = vpop.eup %4676 }
0x1fa8   :  { %v2568_v0 = vadd.f32 1.0, %v4677_v62 }
0x1faa   :  { %4678 = vrcp.f32 %v2568_v0  ;;  %v2580_v14 = vand.u32 2147483648, %v2568_v0  ;;  %vm2574_vm2 = vweird.f32 %v2568_v0  ;;  %v2578_v29 = vand.u32 2147483647, %v2568_v0 }
0x1fac   :  { %v2581_v9 = vor.u32 1.1754944e-38, %v2580_v14  ;;  %vm2579_vm4 = vcmp.eq.f32.partialorder %v2578_v29, 8.507059e+37 }
0x1fb0   :  { %v4679_v28 = vpop.eup %4678 }
0x1fb1   :  { %v2570_v25 = vmul.f32 %v4679_v28, %v2568_v0  ;;  %vm2575_vm1 = vweird.f32 %v4679_v28 }
0x1fb2   :  { %vm2576_vm3 = vmor %vm2574_vm2, %vm2575_vm1  ;;  %vm2796_vm1 = vcmask 654336  }
0x1fb3   :  { %v2571_v19 = vsub.f32 1.0, %v2570_v25 }
0x1fb5   :  { %v2572_v20 = vmul.f32 %v4679_v28, %v2571_v19 }
0x1fb7   :  { %v2573_v21 = vadd.f32 %v4679_v28, %v2572_v20 }
0x1fb9   :  { %v2577_v39 = vsel %vm2576_vm3, %v4679_v28, %v2573_v21 }
0x1fba   :  { %v2582_v30 = vsel %vm2579_vm4, %v2581_v9, %v2577_v39 }
0x1fbb   :  { %v2595_v40 = vsub.f32 1.0, %v2582_v30 }
0x2011   :  { %v2586_v41 = vpop.permute.xlu1 %2585 }
0x2012   :  { %v2588_v27 = vmul.f32 %v2586_v41, %v2582_v30 }
0x2014   :  { %2590 = vrot.lane.b32.xlu0 %v2588_v27, %s5087_s20 }
0x201c   :  { %2601 = vrot.lane.b32.xlu0 %v4675_v16, %s5077_s8 }
0x2086   :  { %v2591_v42 = vpop.permute.xlu0 %2590 }
0x2087   :  { %v2593_v47 = vadd.f32 %v2591_v42, %v2563_v13  ;;  %v2666_v13 = vlaneseq }
0x2089   :  { %4680 = vtanh.f32 %v2593_v47  ;;  %v6003_v0 = vand.u32 127, %v2666_v13  ;;  %v2686_v47 = vshrl.u32 %v2666_v13, 7 }
0x208b   :  { %4465 = vset.pattern.permute.xlu1 %v2686_v47  ;;  %4466 = vset.pattern.permute.xlu0 %v2686_v47 }
0x208c   :  { %4467 = vset.pattern.permute.xlu2 %v2686_v47 }
0x208e   :  { %v2602_v51 = vpop.permute.xlu0 %2601 }
0x208f   :  { %v4681_v48 = vpop.eup %4680  ;;  %v2604_v38 = vmul.f32 %v2602_v51, %v2582_v30 }
0x2090   :  { %2597 = vrot.lane.b32.xlu1 %v4681_v48, %s5076_s29 }
0x2102   :  { %v2598_v54 = vpop.permute.xlu1 %2597 }
0x2103   :  { %v2600_v56 = vmul.f32 %v2598_v54, %v2595_v40 }
0x2105   :  { %v5972_v24 = vadd.f32 %v2604_v38, %v2600_v56  ;;  %v6018_v56 = vld [vmem:[%s6737_s21 + $0x38] sm:$0xff] }
0x2106   :  { %2734 = vmatpush.msrb.mxu2 %v6018_v56 }
0x2107   :  { %2610 = vrot.lane.b32.xlu1 %v5972_v24, %s5076_s29 }
0x2179   :  { %v2611_v57 = vpop.permute.xlu1 %2610 }
0x217a   :  { %4375 = vmatmul.msk.f32.vlgmr.msra.gmra.mxu1 %vm2388_vm10, %v2611_v57  ;;  %v6024_v57 = vld [vmem:[%s6737_s21 + $0x30] sm:$0xff] }
0x217b   :  { %2735 = vmatpush.msrb.mxu2 %v6024_v57 }
0x217d   :  { %2736 = vmatpush.msrb.mxu2 %v6030_v17 }
0x217f   :  { %2737 = vmatpush.msrb.mxu2 %v6036_v60 }
0x2181   :  { %2738 = vmatpush.msrb.mxu2 %v6042_v1 }
0x21f7   :  { %v2631_v6 = vpop.f32.mrf.mxu1 }
0x21f8   :  { %v2632_v11 = vadd.f32 %v5980_v63, %v2631_v6  ;;  %v6048_v6 = vld [vmem:[%s6737_s21 + $0x10] sm:$0xff] }
0x21f9   :  { %2739 = vmatpush.msrb.mxu2 %v6048_v6 }
0x21fa   :  { %v2635_v15 = vrot.slane %v2632_v11, 1  ;;  %v2636_v4 = vperm.slane %v2632_v11, 0  ;;  %v6054_v11 = vld [vmem:[%s6737_s21 + $0x8] sm:$0xff] }
0x21fb   :  { %2740 = vmatpush.msrb.mxu2 %v6054_v11 }
0x21fc   :  { %v2637_v55 = vperm.slane %v2635_v15, 0  ;;  %v2640_v5 = vadd.f32 %v2636_v4, %v5986_v2 }
0x21fd   :  { %2741 = vmatpush.msrb.mxu2 %v6059_v8 }
0x21fe   :  { %v2641_v52 = vadd.f32 %v2637_v55, %v5988_v31  ;;  %4682 = vtanh.f32 %v2640_v5 }
0x21ff   :  { %3081 = vmatpush.msra.mxu2 %v6018_v56 }
0x2200   :  { %4684 = vtanh.f32 %v2641_v52 }
0x2201   :  { %3082 = vmatpush.msra.mxu2 %v6024_v57 }
0x2203   :  { %3083 = vmatpush.msra.mxu2 %v6030_v17 }
0x2204   :  { %v4683_v12 = vpop.eup %4682 }
0x2205   :  { %v2647_v16 = vmul.f32 %v4683_v12, %v5995_v7  ;;  %3084 = vmatpush.msra.mxu2 %v6036_v60 }
0x2206   :  { %v4685_v59 = vpop.eup %4684 }
0x2207   :  { %v2649_v58 = vsel %vm2388_vm10, %v2647_v16, 0.0  ;;  %v2648_v32 = vmul.f32 %v4685_v59, %v5995_v7  ;;  %3085 = vmatpush.msra.mxu2 %v6042_v1 }
0x2208   :  { %2650 = vadd.xlane.f32.xlu0 %v2649_v58 }
0x2209   :  { %v2652_v36 = vsel %vm2388_vm10, %v2648_v32, 0.0  ;;  %3086 = vmatpush.msra.mxu2 %v6048_v6 }
0x220a   :  { %2653 = vadd.xlane.f32.xlu1 %v2652_v36 }
0x220b   :  { %3087 = vmatpush.msra.mxu2 %v6054_v11 }
0x220d   :  { %3088 = vmatpush.msra.mxu2 %v6059_v8 }
0x227b   :  { %v2651_v62 = vpop.xlane.xlu0 %2650 }
0x227c   :  { %v2661_v28 = vadd.f32 %v6001_v34, %v2651_v62 }
0x227d   :  { %v2654_v25 = vpop.xlane.xlu1 %2653 }
0x227e   :  { %v2662_v19 = vadd.f32 %v6001_v34, %v2654_v25  ;;  %v2668_v20 = vperm.slane %v2661_v28, %v6003_v0 }
0x2280   :  { %v2669_v21 = vperm.slane %v2662_v19, %v6003_v0 }
0x2282   :  { %v2670_v14 = vsel %vm367_vm9, %v2669_v21, %v2668_v20 }
0x2283   :  { %v2672_v29 = vsel %vm2663_vm5, %v2670_v14, -1e+30 }
0x2284   :  { %v2673_v39 = vsel %vm2403_vm14, %v2672_v29, -inf }
0x2285   :  { %2674 = vmax.xlane.f32.xlu2 %v2673_v39  ;;  %v6090_v39 = vld [vmem:[%s6738_s22] ss:$0 sm:$0xff] }
0x22f8   :  { %v2675_v9 = vpop.xlane.xlu2 %2674 }
0x22f9   :  { %v2676_v41 = vsub.f32 %v2672_v29, %v2675_v9 }
0x22fb   :  { %v2677_v30 = vmul.f32 1.442695, %v2676_v41 }
0x22fd   :  { %4686 = vpow2.f32 %v2677_v30 }
0x2303   :  { %v4687_v27 = vpop.eup %4686 }
0x2304   :  { %v2679_v42 = vsel %vm2403_vm14, %v4687_v27, 0.0 }
0x2305   :  { %2680 = vadd.xlane.f32.xlu0 %v2679_v42 }
0x2378   :  { %v2681_v48 = vpop.xlane.xlu0 %2680 }
0x2379   :  { %4688 = vrcp.f32 %v2681_v48 }
0x237f   :  { %v4689_v51 = vpop.eup %4688 }
0x2380   :  { %v2683_v40 = vmul.f32 %v4689_v51, %v4687_v27 }
0x2382   :  { %v2691_v54 = vperm.slane %v2683_v40, 1  ;;  %v2684_v38 = vperm.slane %v2683_v40, 0 }
0x2384   :  { %2696 = vperm.xlu0 %4466, %v2691_v54   ;;  %2689 = vperm.xlu1 %4465, %v2684_v38  }
0x23f6   :  { %v2697_v15 = vpop.permute.xlu0 %2696  ;;  %v2690_v4 = vpop.permute.xlu1 %2689 }
0x23f7   :  { %v2699_v55 = vmul.f32 %v2697_v15, %v5878_v53  ;;  %v2698_v5 = vmul.f32 %v2690_v4, %v5871_v37 }
0x23f9   :  { %v2707_v52 = vsel %vm2388_vm10, %v2699_v55, 0.0  ;;  %v2700_v12 = vsel %vm2388_vm10, %v2698_v5, 0.0 }
0x23fa   :  { %v2708_v16 = vrot.slane %v2707_v52, 4  ;;  %v2701_v59 = vrot.slane %v2700_v12, 4 }
0x23fc   :  { %v2709_v58 = vadd.f32 %v2708_v16, %v2707_v52  ;;  %v2702_v32 = vadd.f32 %v2701_v59, %v2700_v12 }
0x23fe   :  { %v2710_v36 = vrot.slane %v2709_v58, 2  ;;  %v2703_v13 = vrot.slane %v2702_v32, 2 }
0x2400   :  { %v2711_v62 = vadd.f32 %v2710_v36, %v2709_v58  ;;  %v2704_v28 = vadd.f32 %v2703_v13, %v2702_v32  ;;  %v6099_v32 = vld [vmem:[%s6739_s23 + $0x48] sm:$0xff]  ;;  %v6104_v36 = vld [vmem:[%s6739_s23 + $0x40] sm:$0xff]  ;;  %v6110_v13 = vld [vmem:[%s6739_s23 + $0x38] sm:$0xff] }
0x2401   :  { %2806 = vmatpush.msra.mxu3 %v6099_v32 }
0x2402   :  { %v2712_v25 = vrot.slane %v2711_v62, 1  ;;  %v2705_v19 = vrot.slane %v2704_v28, 1 }
0x2403   :  { %2807 = vmatpush.msra.mxu3 %v6104_v36 }
0x2404   :  { %v2713_v20 = vadd.f32 %v2712_v25, %v2711_v62  ;;  %v2706_v21 = vadd.f32 %v2705_v19, %v2704_v28  ;;  %v6116_v62 = vld [vmem:[%s6739_s23 + $0x30] sm:$0xff] }
0x2405   :  { %2808 = vmatpush.msra.mxu3 %v6110_v13 }
0x2406   :  { %v2716_v14 = vsel %vm367_vm9, %v2713_v20, %v2706_v21 }
0x2407   :  { %v2718_v29 = vsel %vm2388_vm10, %v2716_v14, %v5972_v24  ;;  %2809 = vmatpush.msra.mxu3 %v6116_v62 }
0x2408   :  { %4376 = vmatmul.msk.f32.vlgmr.msrb.gmra.mxu2 %vm2722_vm6, %v2718_v29 }
0x2409   :  { %3430 = vmatpush.msrb.mxu2 %v6018_v56 }
0x240b   :  { %3431 = vmatpush.msrb.mxu2 %v6024_v57 }
0x240d   :  { %3432 = vmatpush.msrb.mxu2 %v6030_v17 }
0x240f   :  { %3433 = vmatpush.msrb.mxu2 %v6036_v60 }
0x2411   :  { %3434 = vmatpush.msrb.mxu2 %v6042_v1 }
0x2413   :  { %3435 = vmatpush.msrb.mxu2 %v6048_v6 }
0x2415   :  { %3436 = vmatpush.msrb.mxu2 %v6054_v11 }
0x2417   :  { %3437 = vmatpush.msrb.mxu2 %v6059_v8 }
0x248b   :  { %v2743_v9 = vpop.f32.mrf.mxu2 }
0x248c   :  { %v2744_v41 = vadd.f32 %v6090_v39, %v2743_v9  ;;  %v6131_v9 = vld [vmem:[%s6739_s23 + $0x28] sm:$0xff] }
0x248d   :  { %2810 = vmatpush.msra.mxu3 %v6131_v9 }
0x248e   :  { %2766 = vrot.lane.b32.xlu1 %v2744_v41, %s5077_s8  ;;  %v4377_v30 = vmul.f32 -1.442695, %v2744_v41 }
0x2490   :  { %4690 = vpow2.f32 %v4377_v30  ;;  %v6154_v30 = vld [vmem:[%s6739_s23 + $0x8] sm:$0xff] }
0x2496   :  { %v4691_v27 = vpop.eup %4690 }
0x2497   :  { %v2749_v42 = vadd.f32 1.0, %v4691_v27  ;;  %v6161_v27 = vld [vmem:[%s6739_s23] sm:$0xff] }
0x2499   :  { %4692 = vrcp.f32 %v2749_v42  ;;  %v2761_v38 = vand.u32 2147483648, %v2749_v42  ;;  %vm2755_vm8 = vweird.f32 %v2749_v42  ;;  %v2759_v15 = vand.u32 2147483647, %v2749_v42 }
0x249b   :  { %v2762_v55 = vor.u32 1.1754944e-38, %v2761_v38  ;;  %vm2760_vm12 = vcmp.eq.f32.partialorder %v2759_v15, 8.507059e+37 }
0x249f   :  { %v4693_v47 = vpop.eup %4692 }
0x24a0   :  { %v2751_v48 = vmul.f32 %v4693_v47, %v2749_v42  ;;  %vm2756_vm7 = vweird.f32 %v4693_v47  ;;  %v6177_v42 = vsel %vm2902_vm13, %v5935_v10, %v5940_v23 }
0x24a1   :  { %vm2757_vm11 = vmor %vm2755_vm8, %vm2756_vm7 }
0x24a2   :  { %v2752_v51 = vsub.f32 1.0, %v2751_v48 }
0x24a4   :  { %v2753_v40 = vmul.f32 %v4693_v47, %v2752_v51 }
0x24a6   :  { %v2754_v54 = vadd.f32 %v4693_v47, %v2753_v40 }
0x24a8   :  { %v2758_v4 = vsel %vm2757_vm11, %v4693_v47, %v2754_v54 }
0x24a9   :  { %v2763_v52 = vsel %vm2760_vm12, %v2762_v55, %v2758_v4  ;;  %v6200_v4 = vld [vmem:[%s6741_s25 + $0x10] sm:$0xff]  ;;  %v6207_v55 = vld [vmem:[%s6741_s25 + $0x8] sm:$0xff] }
0x24aa   :  { %v2776_v28 = vsub.f32 1.0, %v2763_v52  ;;  %v2782_v19 = vmul.f32 %v2763_v52, %v5972_v24  ;;  %v6137_v24 = vld [vmem:[%s6739_s23 + $0x20] sm:$0xff] }
0x24ab   :  { %2811 = vmatpush.msra.mxu3 %v6137_v24 }
0x2500   :  { %v2767_v5 = vpop.permute.xlu1 %2766 }
0x2501   :  { %v2769_v12 = vmul.f32 %v2767_v5, %v2763_v52  ;;  %v6214_v5 = vld [vmem:[%s6741_s25] sm:$0xff] }
0x2503   :  { %2771 = vrot.lane.b32.xlu2 %v2769_v12, %s5087_s20 }
0x255d   :  { %v2772_v16 = vpop.permute.xlu2 %2771 }
0x255e   :  { %v2774_v59 = vadd.f32 %v2772_v16, %v2744_v41  ;;  %v6143_v41 = vld [vmem:[%s6739_s23 + $0x18] sm:$0xff]  ;;  %v6233_v16 = vld [vmem:[%s6740_s24] ss:$0 sm:$0xff] }
0x255f   :  { %2812 = vmatpush.msra.mxu3 %v6143_v41 }
0x2560   :  { %4694 = vtanh.f32 %v2774_v59 }
0x2566   :  { %v4695_v58 = vpop.eup %4694 }
0x2567   :  { %2778 = vrot.lane.b32.xlu1 %v4695_v58, %s5076_s29 }
0x25d9   :  { %v2779_v25 = vpop.permute.xlu1 %2778 }
0x25da   :  { %v2781_v20 = vmul.f32 %v2779_v25, %v2776_v28 }
0x25dc   :  { %v6121_v21 = vadd.f32 %v2782_v19, %v2781_v20 }
0x25de   :  { %v2905_v29 = vrot.slane %v6121_v21, 7  ;;  %2785 = vrot.lane.b32.xlu0 %v6121_v21, %s5078_s9 }
0x25e0   :  { %2906 = vrot.lane.b32.xlu1 %v2905_v29, %s5078_s9 }
0x25e8   :  { %2788 = vrot.lane.b32.xlu1 %v2716_v14, %s5084_s6  ;;  %v6149_v14 = vld [vmem:[%s6739_s23 + $0x10] sm:$0xff]  ;;  %s5091_s23 = smov 126  }
0x25e9   :  { %2813 = vmatpush.msra.mxu3 %v6149_v14 }
0x25eb   :  { %2814 = vmatpush.msra.mxu3 %v6154_v30 }
0x25ed   :  { %2815 = vmatpush.msra.mxu3 %v6161_v27 }
0x25ef   :  { %3152 = vmatpush.msrb.mxu3 %v6099_v32 }
0x25f1   :  { %3153 = vmatpush.msrb.mxu3 %v6104_v36 }
0x25f3   :  { %3154 = vmatpush.msrb.mxu3 %v6110_v13 }
0x25f5   :  { %3155 = vmatpush.msrb.mxu3 %v6116_v62 }
0x25f7   :  { %3156 = vmatpush.msrb.mxu3 %v6131_v9 }
0x25f9   :  { %3157 = vmatpush.msrb.mxu3 %v6137_v24 }
0x25fb   :  { %3158 = vmatpush.msrb.mxu3 %v6143_v41 }
0x25fd   :  { %3159 = vmatpush.msrb.mxu3 %v6149_v14 }
0x25ff   :  { %3160 = vmatpush.msrb.mxu3 %v6154_v30 }
0x2601   :  { %3161 = vmatpush.msrb.mxu3 %v6161_v27 }
0x2650   :  { %v2786_v40 = vpop.permute.xlu0 %2785 }
0x2651   :  { %v2791_v54 = vsel %vm217_vm0, %v5945_v26, %v2786_v40  ;;  %v6195_v26 = vld [vmem:[%s6741_s25 + $0x18] sm:$0xff] }
0x2652   :  { %v2907_v47 = vpop.permute.xlu1 %2906  ;;  %2839 = vmatpush.msrb.mxu1 %v6195_v26  ;;  %3182 = vmatpush.msra.mxu0 %v6195_v26 }
0x2653   :  { %v2909_v48 = vsel %vm217_vm0, %v6177_v42, %v2907_v47 }
0x2654   :  { %v2911_v51 = vrot.slane %v2909_v48, 1  ;;  %2840 = vmatpush.msrb.mxu1 %v6200_v4  ;;  %3183 = vmatpush.msra.mxu0 %v6200_v4 }
0x2656   :  { %4380 = vmatmul.msk.f32.vlgmr.msrb.gmra.mxu0 %vm2541_vm15, %v2911_v51  ;;  %2841 = vmatpush.msrb.mxu1 %v6207_v55 }
0x2657   :  { %3184 = vmatpush.msra.mxu0 %v6207_v55 }
0x2658   :  { %2842 = vmatpush.msrb.mxu1 %v6214_v5 }
0x2659   :  { %3185 = vmatpush.msra.mxu0 %v6214_v5 }
0x265a   :  { %v2789_v38 = vpop.permute.xlu1 %2788  ;;  %2989 = vmatpush.msra.mxu1 %v5960_v43 }
0x265b   :  { %v2792_v15 = vsel %vm2541_vm15, %v2791_v54, %v2789_v38  ;;  %3338 = vmatpush.msrb.mxu0 %v5960_v43 }
0x265c   :  { %4378 = vmatmul.msk.f32.vlgmr.msra.gmra.mxu3 %vm2796_vm1, %v2792_v15  ;;  %2990 = vmatpush.msra.mxu1 %v5962_v44 }
0x265d   :  { %3622 = vmatpush.msra.mxu3 %v5889_v35  ;;  %3339 = vmatpush.msrb.mxu0 %v5962_v44 }
0x265e   :  { %2991 = vmatpush.msra.mxu1 %v5965_v45 }
0x265f   :  { %3623 = vmatpush.msra.mxu3 %v5894_v3  ;;  %3340 = vmatpush.msrb.mxu0 %v5965_v45 }
0x2660   :  { %2992 = vmatpush.msra.mxu1 %v5968_v46 }
0x2661   :  { %3624 = vmatpush.msra.mxu3 %v5900_v49  ;;  %3341 = vmatpush.msrb.mxu0 %v5968_v46 }
0x2663   :  { %3625 = vmatpush.msra.mxu3 %v5906_v22 }
0x2665   :  { %3626 = vmatpush.msra.mxu3 %v5912_v50 }
0x2667   :  { %3627 = vmatpush.msra.mxu3 %v5923_v18 }
0x26d3   :  { %v2931_v52 = vpop.f32.mrf.mxu0 }
0x26d4   :  { %v2932_v12 = vadd.f32 %v5953_v33, %v2931_v52 }
0x26d6   :  { %2954 = vrot.lane.b32.xlu0 %v2932_v12, %s5077_s8  ;;  %v4381_v25 = vmul.f32 -1.442695, %v2932_v12 }
0x26df   :  { %v2817_v59 = vpop.f32.mrf.mxu3 }
0x26e0   :  { %v2818_v58 = vadd.f32 %v6233_v16, %v2817_v59 }
0x26e2   :  { %4696 = vtanh.f32 %v2818_v58 }
0x26e3   :  { %4698 = vpow2.f32 %v4381_v25 }
0x26e8   :  { %v4697_v28 = vpop.eup %4696 }
0x26e9   :  { %4379 = vmatmul.msk.f32.vlgmr.msrb.gmra.mxu1 %vm2388_vm10, %v4697_v28  ;;  %v4699_v19 = vpop.eup %4698 }
0x26ea   :  { %3273 = vmatpush.msrb.mxu1 %v5889_v35  ;;  %v2937_v20 = vadd.f32 1.0, %v4699_v19 }
0x26ec   :  { %3274 = vmatpush.msrb.mxu1 %v5894_v3  ;;  %4700 = vrcp.f32 %v2937_v20  ;;  %v2949_v54 = vand.u32 2147483648, %v2937_v20  ;;  %vm2943_vm3 = vweird.f32 %v2937_v20  ;;  %v2947_v38 = vand.u32 2147483647, %v2937_v20 }
0x26ee   :  { %3275 = vmatpush.msrb.mxu1 %v5900_v49  ;;  %v2950_v52 = vor.u32 1.1754944e-38, %v2949_v54  ;;  %vm2948_vm7 = vcmp.eq.f32.partialorder %v2947_v38, 8.507059e+37 }
0x26f0   :  { %3276 = vmatpush.msrb.mxu1 %v5906_v22 }
0x26f2   :  { %3277 = vmatpush.msrb.mxu1 %v5912_v50  ;;  %v4701_v29 = vpop.eup %4700 }
0x26f3   :  { %v2939_v47 = vmul.f32 %v4701_v29, %v2937_v20  ;;  %vm2944_vm2 = vweird.f32 %v4701_v29 }
0x26f4   :  { %3278 = vmatpush.msrb.mxu1 %v5923_v18  ;;  %vm2945_vm4 = vmor %vm2943_vm3, %vm2944_vm2  ;;  %vm3251_vm2 = vcmask 1043459  }
0x26f5   :  { %v2940_v48 = vsub.f32 1.0, %v2939_v47 }
0x26f7   :  { %v2941_v51 = vmul.f32 %v4701_v29, %v2940_v48 }
0x26f9   :  { %v2942_v40 = vadd.f32 %v4701_v29, %v2941_v51 }
0x26fb   :  { %v2946_v15 = vsel %vm2945_vm4, %v4701_v29, %v2942_v40 }
0x26fc   :  { %v2951_v58 = vsel %vm2948_vm7, %v2950_v52, %v2946_v15 }
0x26fd   :  { %v2964_v47 = vsub.f32 1.0, %v2951_v58  ;;  %v2970_v51 = vmul.f32 %v2951_v58, %v6121_v21 }
0x2748   :  { %v2955_v59 = vpop.permute.xlu0 %2954 }
0x2749   :  { %v2957_v28 = vmul.f32 %v2955_v59, %v2951_v58 }
0x274b   :  { %2959 = vrot.lane.b32.xlu2 %v2957_v28, %s5087_s20 }
0x27a5   :  { %v2960_v25 = vpop.permute.xlu2 %2959 }
0x27a6   :  { %v2962_v19 = vadd.f32 %v2960_v25, %v2932_v12 }
0x27a8   :  { %4702 = vtanh.f32 %v2962_v19 }
0x27ae   :  { %v4703_v46 = vpop.eup %4702 }
0x27af   :  { %2966 = vrot.lane.b32.xlu1 %v4703_v46, %s5076_s29  ;;  %v6261_v46 = vpop.f32.mrf.mxu1 }
0x27b0   :  { %6779 = vst [vmem:[#allocation28_spill] sm:$0xff] %v6261_v46 }
0x2821   :  { %v2967_v48 = vpop.permute.xlu1 %2966 }
0x2822   :  { %v2969_v20 = vmul.f32 %v2967_v48, %v2964_v47 }
0x2824   :  { %v6246_v45 = vadd.f32 %v2970_v51, %v2969_v20 }
0x2826   :  { %2973 = vrot.lane.b32.xlu0 %v6246_v45, %s5076_s29 }
0x2898   :  { %v2974_v29 = vpop.permute.xlu0 %2973 }
0x2899   :  { %4382 = vmatmul.msk.f32.vlgmr.msra.gmra.mxu1 %vm2388_vm10, %v2974_v29 }
0x289a   :  { %3501 = vmatpush.msra.mxu1 %v6099_v32 }
0x289c   :  { %3502 = vmatpush.msra.mxu1 %v6104_v36 }
0x289e   :  { %3503 = vmatpush.msra.mxu1 %v6110_v13 }
0x28a0   :  { %3504 = vmatpush.msra.mxu1 %v6116_v62 }
0x28a2   :  { %3505 = vmatpush.msra.mxu1 %v6131_v9 }
0x28a4   :  { %3506 = vmatpush.msra.mxu1 %v6137_v24 }
0x28a6   :  { %3507 = vmatpush.msra.mxu1 %v6143_v41 }
0x28a8   :  { %3508 = vmatpush.msra.mxu1 %v6149_v14 }
0x28aa   :  { %3509 = vmatpush.msra.mxu1 %v6154_v30 }
0x28ac   :  { %3510 = vmatpush.msra.mxu1 %v6161_v27 }
0x2916   :  { %v2994_v21 = vpop.f32.mrf.mxu1 }
0x2917   :  { %v2995_v12 = vadd.f32 %v5980_v63, %v2994_v21 }
0x2919   :  { %v2998_v40 = vrot.slane %v2995_v12, 1  ;;  %v2999_v54 = vperm.slane %v2995_v12, 0 }
0x291b   :  { %v3000_v38 = vperm.slane %v2998_v40, 0  ;;  %v3003_v15 = vadd.f32 %v2999_v54, %v5986_v2 }
0x291d   :  { %v3004_v52 = vadd.f32 %v3000_v38, %v5988_v31  ;;  %4704 = vtanh.f32 %v3003_v15 }
0x291f   :  { %4706 = vtanh.f32 %v3004_v52 }
0x2923   :  { %v4705_v59 = vpop.eup %4704 }
0x2924   :  { %v3007_v58 = vmul.f32 %v4705_v59, %v5995_v7 }
0x2925   :  { %v4707_v28 = vpop.eup %4706 }
0x2926   :  { %v3009_v25 = vsel %vm2388_vm10, %v3007_v58, 0.0  ;;  %v3008_v19 = vmul.f32 %v4707_v28, %v5995_v7 }
0x2927   :  { %3010 = vadd.xlane.f32.xlu2 %v3009_v25 }
0x2928   :  { %v3012_v47 = vsel %vm2388_vm10, %v3008_v19, 0.0 }
0x2929   :  { %3013 = vadd.xlane.f32.xlu1 %v3012_v47 }
0x299a   :  { %v3011_v48 = vpop.xlane.xlu2 %3010 }
0x299b   :  { %v3015_v51 = vadd.f32 %v3011_v48, %v6001_v34 }
0x299c   :  { %v3014_v20 = vpop.xlane.xlu1 %3013 }
0x299d   :  { %v3016_v29 = vadd.f32 %v3014_v20, %v6001_v34  ;;  %v3019_v21 = vperm.slane %v3015_v51, %v6003_v0 }
0x299f   :  { %v3020_v12 = vperm.slane %v3016_v29, %v6003_v0 }
0x29a1   :  { %v3021_v40 = vsel %vm367_vm9, %v3020_v12, %v3019_v21 }
0x29a2   :  { %v3023_v54 = vsel %vm2663_vm5, %v3021_v40, -1e+30 }
0x29a3   :  { %v3024_v38 = vsel %vm2403_vm14, %v3023_v54, -inf }
0x29a4   :  { %3025 = vmax.xlane.f32.xlu0 %v3024_v38 }
0x2a17   :  { %v3026_v15 = vpop.xlane.xlu0 %3025 }
0x2a18   :  { %v3027_v52 = vsub.f32 %v3023_v54, %v3026_v15 }
0x2a1a   :  { %v3028_v59 = vmul.f32 1.442695, %v3027_v52 }
0x2a1c   :  { %4708 = vpow2.f32 %v3028_v59 }
0x2a22   :  { %v4709_v58 = vpop.eup %4708 }
0x2a23   :  { %v3030_v28 = vsel %vm2403_vm14, %v4709_v58, 0.0 }
0x2a24   :  { %3031 = vadd.xlane.f32.xlu2 %v3030_v28 }
0x2a97   :  { %v3032_v25 = vpop.xlane.xlu2 %3031 }
0x2a98   :  { %4710 = vrcp.f32 %v3032_v25 }
0x2a9e   :  { %v4711_v19 = vpop.eup %4710 }
0x2a9f   :  { %v3034_v47 = vmul.f32 %v4711_v19, %v4709_v58 }
0x2aa1   :  { %v3042_v48 = vperm.slane %v3034_v47, 1  ;;  %v3035_v51 = vperm.slane %v3034_v47, 0 }
0x2aa3   :  { %3047 = vperm.xlu2 %4467, %v3042_v48   ;;  %3040 = vperm.xlu1 %4465, %v3035_v51  }
0x2afd   :  { %v3048_v20 = vpop.permute.xlu2 %3047 }
0x2afe   :  { %v3050_v29 = vmul.f32 %v3048_v20, %v5878_v53 }
0x2b00   :  { %v3058_v21 = vsel %vm2388_vm10, %v3050_v29, 0.0 }
0x2b01   :  { %v3059_v12 = vrot.slane %v3058_v21, 4 }
0x2b03   :  { %v3060_v40 = vadd.f32 %v3059_v12, %v3058_v21 }
0x2b05   :  { %v3061_v15 = vrot.slane %v3060_v40, 2 }
0x2b07   :  { %v3062_v28 = vadd.f32 %v3061_v15, %v3060_v40 }
0x2b09   :  { %v3063_v19 = vrot.slane %v3062_v28, 1 }
0x2b0b   :  { %v3064_v51 = vadd.f32 %v3063_v19, %v3062_v28 }
0x2b15   :  { %v3041_v54 = vpop.permute.xlu1 %3040 }
0x2b16   :  { %v3049_v38 = vmul.f32 %v3041_v54, %v5871_v37 }
0x2b18   :  { %v3051_v52 = vsel %vm2388_vm10, %v3049_v38, 0.0 }
0x2b19   :  { %v3052_v59 = vrot.slane %v3051_v52, 4 }
0x2b1b   :  { %v3053_v58 = vadd.f32 %v3052_v59, %v3051_v52 }
0x2b1d   :  { %v3054_v25 = vrot.slane %v3053_v58, 2 }
0x2b1f   :  { %v3055_v47 = vadd.f32 %v3054_v25, %v3053_v58 }
0x2b21   :  { %v3056_v48 = vrot.slane %v3055_v47, 1 }
0x2b23   :  { %v3057_v46 = vadd.f32 %v3056_v48, %v3055_v47 }
0x2b25   :  { %v3067_v20 = vsel %vm367_vm9, %v3064_v51, %v3057_v46  ;;  %v3136_v29 = vsel %vm2902_vm13, %v3064_v51, %v3057_v46 }
0x2b26   :  { %v3069_v21 = vsel %vm2388_vm10, %v3067_v20, %v6246_v45 }
0x2b27   :  { %4383 = vmatmul.msk.f32.vlgmr.msra.gmra.mxu2 %vm2722_vm6, %v3069_v21 }
0x2b28   :  { %3779 = vmatpush.msra.mxu2 %v6018_v56 }
0x2b2a   :  { %3780 = vmatpush.msra.mxu2 %v6024_v57 }
0x2b2c   :  { %3781 = vmatpush.msra.mxu2 %v6030_v17 }
0x2b2e   :  { %3782 = vmatpush.msra.mxu2 %v6036_v60 }
0x2b30   :  { %3783 = vmatpush.msra.mxu2 %v6042_v1 }
0x2b32   :  { %3784 = vmatpush.msra.mxu2 %v6048_v6 }
0x2b34   :  { %3785 = vmatpush.msra.mxu2 %v6054_v11 }
0x2b36   :  { %3786 = vmatpush.msra.mxu2 %v6059_v8 }
0x2baa   :  { %v3090_v46 = vpop.f32.mrf.mxu2 }
0x2bab   :  { %v3091_v12 = vadd.f32 %v6090_v39, %v3090_v46 }
0x2bad   :  { %3113 = vrot.lane.b32.xlu0 %v3091_v12, %s5077_s8  ;;  %v4384_v40 = vmul.f32 -1.442695, %v3091_v12 }
0x2baf   :  { %4712 = vpow2.f32 %v4384_v40 }
0x2bb5   :  { %v4713_v54 = vpop.eup %4712 }
0x2bb6   :  { %v3096_v38 = vadd.f32 1.0, %v4713_v54 }
0x2bb8   :  { %4714 = vrcp.f32 %v3096_v38  ;;  %v3108_v25 = vand.u32 2147483648, %v3096_v38  ;;  %vm3102_vm11 = vweird.f32 %v3096_v38  ;;  %v3106_v19 = vand.u32 2147483647, %v3096_v38 }
0x2bba   :  { %v3109_v48 = vor.u32 1.1754944e-38, %v3108_v25  ;;  %vm3107_vm13 = vcmp.eq.f32.partialorder %v3106_v19, 8.507059e+37 }
0x2bbe   :  { %v4715_v15 = vpop.eup %4714 }
0x2bbf   :  { %v3098_v52 = vmul.f32 %v4715_v15, %v3096_v38  ;;  %vm3103_vm8 = vweird.f32 %v4715_v15 }
0x2bc0   :  { %vm3104_vm12 = vmor %vm3102_vm11, %vm3103_vm8 }
0x2bc1   :  { %v3099_v59 = vsub.f32 1.0, %v3098_v52 }
0x2bc3   :  { %v3100_v28 = vmul.f32 %v4715_v15, %v3099_v59 }
0x2bc5   :  { %v3101_v58 = vadd.f32 %v4715_v15, %v3100_v28 }
0x2bc7   :  { %v3105_v47 = vsel %vm3104_vm12, %v4715_v15, %v3101_v58 }
0x2bc8   :  { %v3110_v20 = vsel %vm3107_vm13, %v3109_v48, %v3105_v47 }
0x2bc9   :  { %v3123_v52 = vsub.f32 1.0, %v3110_v20  ;;  %v3129_v38 = vmul.f32 %v3110_v20, %v6246_v45 }
0x2c1f   :  { %v3114_v51 = vpop.permute.xlu0 %3113 }
0x2c20   :  { %v3116_v21 = vmul.f32 %v3114_v51, %v3110_v20 }
0x2c22   :  { %3118 = vrot.lane.b32.xlu1 %v3116_v21, %s5087_s20 }
0x2c94   :  { %v3119_v46 = vpop.permute.xlu1 %3118 }
0x2c95   :  { %v3121_v40 = vadd.f32 %v3119_v46, %v3091_v12 }
0x2c97   :  { %4716 = vtanh.f32 %v3121_v40 }
0x2c9d   :  { %v4717_v54 = vpop.eup %4716 }
0x2c9e   :  { %3125 = vrot.lane.b32.xlu0 %v4717_v54, %s5076_s29 }
0x2ca6   :  { %3137 = vrot.lane.b32.xlu0 %v3136_v29, %s5084_s6  ;;  %v6311_v29 = vsel %vm3251_vm2, %v5935_v10, %v5940_v23 }
0x2d10   :  { %v3126_v59 = vpop.permute.xlu0 %3125 }
0x2d11   :  { %v3128_v15 = vmul.f32 %v3126_v59, %v3123_v52 }
0x2d13   :  { %v6302_v28 = vadd.f32 %v3129_v38, %v3128_v15 }
0x2d15   :  { %v3132_v58 = vrot.slane %v6302_v28, 7  ;;  %v3254_v25 = vrot.slane %v6302_v28, 6 }
0x2d17   :  { %3255 = vrot.lane.b32.xlu2 %v3254_v25, %s5078_s9  ;;  %3133 = vrot.lane.b32.xlu1 %v3132_v58, %s5078_s9 }
0x2d18   :  { %v3138_v47 = vpop.permute.xlu0 %3137 }
0x2d71   :  { %v3256_v12 = vpop.permute.xlu2 %3255 }
0x2d72   :  { %v3258_v45 = vsel %vm217_vm0, %v6311_v29, %v3256_v12 }
0x2d73   :  { %v3260_v19 = vrot.slane %v3258_v45, 2 }
0x2d75   :  { %4387 = vmatmul.msk.f32.vlgmr.msrb.gmra.mxu1 %vm2541_vm15, %v3260_v19 }
0x2d76   :  { %3971 = vmatpush.msrb.mxu1 %v5889_v35 }
0x2d78   :  { %3972 = vmatpush.msrb.mxu1 %v5894_v3 }
0x2d7a   :  { %3973 = vmatpush.msrb.mxu1 %v5900_v49 }
0x2d7c   :  { %3974 = vmatpush.msrb.mxu1 %v5906_v22 }
0x2d7e   :  { %3975 = vmatpush.msrb.mxu1 %v5912_v50 }
0x2d80   :  { %3976 = vmatpush.msrb.mxu1 %v5923_v18 }
0x2d89   :  { %v3134_v23 = vpop.permute.xlu1 %3133 }
0x2d8a   :  { %v3140_v48 = vsel %vm217_vm0, %v6177_v42, %v3134_v23 }
0x2d8b   :  { %v3141_v51 = vsel %vm2541_vm15, %v3140_v48, %v3138_v47 }
0x2d8c   :  { %v3143_v20 = vrot.slane %v3141_v51, 1 }
0x2d8e   :  { %4385 = vmatmul.msk.f32.vlgmr.msrb.gmra.mxu3 %vm2796_vm1, %v3143_v20 }
0x2d8f   :  { %3850 = vmatpush.msrb.mxu3 %v6099_v32 }
0x2d91   :  { %3851 = vmatpush.msrb.mxu3 %v6104_v36 }
0x2d93   :  { %3852 = vmatpush.msrb.mxu3 %v6110_v13 }
0x2d95   :  { %3853 = vmatpush.msrb.mxu3 %v6116_v62 }
0x2d97   :  { %3854 = vmatpush.msrb.mxu3 %v6131_v9 }
0x2d99   :  { %3855 = vmatpush.msrb.mxu3 %v6137_v24 }
0x2d9b   :  { %3856 = vmatpush.msrb.mxu3 %v6143_v41 }
0x2d9d   :  { %3857 = vmatpush.msrb.mxu3 %v6149_v14 }
0x2d9f   :  { %3858 = vmatpush.msrb.mxu3 %v6154_v30 }
0x2da1   :  { %3859 = vmatpush.msrb.mxu3 %v6161_v27 }
0x2df2   :  { %v3280_v35 = vpop.f32.mrf.mxu1 }
0x2df3   :  { %v3281_v3 = vadd.f32 %v5953_v33, %v3280_v35 }
0x2df5   :  { %3303 = vrot.lane.b32.xlu2 %v3281_v3, %s5077_s8  ;;  %v4388_v18 = vmul.f32 -1.442695, %v3281_v3 }
0x2e11   :  { %v3163_v49 = vpop.f32.mrf.mxu3 }
0x2e12   :  { %v3164_v22 = vadd.f32 %v6233_v16, %v3163_v49 }
0x2e14   :  { %4718 = vtanh.f32 %v3164_v22 }
0x2e15   :  { %4720 = vpow2.f32 %v4388_v18 }
0x2e1a   :  { %v4719_v50 = vpop.eup %4718 }
0x2e1b   :  { %4386 = vmatmul.msk.f32.vlgmr.msra.gmra.mxu0 %vm2388_vm10, %v4719_v50  ;;  %v4721_v33 = vpop.eup %4720  ;;  %v6781_v50 = vld [vmem:[#allocation27_spill] sm:$0xff] }
0x2e1c   :  { %3531 = vmatpush.msra.mxu0 %v6195_v26  ;;  %v3286_v42 = vadd.f32 1.0, %v4721_v33 }
0x2e1e   :  { %3532 = vmatpush.msra.mxu0 %v6200_v4  ;;  %4722 = vrcp.f32 %v3286_v42  ;;  %v3298_v59 = vand.u32 2147483648, %v3286_v42  ;;  %vm3292_vm4 = vweird.f32 %v3286_v42  ;;  %v3296_v38 = vand.u32 2147483647, %v3286_v42 }
0x2e20   :  { %3533 = vmatpush.msra.mxu0 %v6207_v55  ;;  %v3299_v58 = vor.u32 1.1754944e-38, %v3298_v59  ;;  %vm3297_vm8 = vcmp.eq.f32.partialorder %v3296_v38, 8.507059e+37 }
0x2e22   :  { %3534 = vmatpush.msra.mxu0 %v6214_v5 }
0x2e24   :  { %v4723_v21 = vpop.eup %4722 }
0x2e25   :  { %v3288_v46 = vmul.f32 %v4723_v21, %v3286_v42  ;;  %vm3293_vm3 = vweird.f32 %v4723_v21 }
0x2e26   :  { %vm3294_vm7 = vmor %vm3292_vm4, %vm3293_vm3  ;;  %vm3600_vm3 = vcmask 1044484  }
0x2e27   :  { %v3289_v40 = vsub.f32 1.0, %v3288_v46 }
0x2e29   :  { %v3290_v54 = vmul.f32 %v4723_v21, %v3289_v40 }
0x2e2b   :  { %v3291_v52 = vadd.f32 %v4723_v21, %v3290_v54 }
0x2e2d   :  { %v3295_v15 = vsel %vm3294_vm7, %v4723_v21, %v3291_v52 }
0x2e2e   :  { %v3300_v12 = vsel %vm3297_vm8, %v3299_v58, %v3295_v15 }
0x2e2f   :  { %v3313_v48 = vsub.f32 1.0, %v3300_v12  ;;  %v3319_v20 = vmul.f32 %v3300_v12, %v6302_v28 }
0x2e4f   :  { %v3304_v25 = vpop.permute.xlu2 %3303 }
0x2e50   :  { %v3306_v45 = vmul.f32 %v3304_v25, %v3300_v12 }
0x2e52   :  { %3308 = vrot.lane.b32.xlu1 %v3306_v45, %s5087_s20 }
0x2e98   :  { %v6356_v18 = vpop.f32.mrf.mxu0 }
0x2ec4   :  { %v3309_v19 = vpop.permute.xlu1 %3308 }
0x2ec5   :  { %v3311_v23 = vadd.f32 %v3309_v19, %v3281_v3  ;;  %v6780_v3 = vld [vmem:[#allocation26_spill] sm:$0xff] }
0x2ec7   :  { %4724 = vtanh.f32 %v3311_v23 }
0x2ecd   :  { %v4725_v47 = vpop.eup %4724 }
0x2ece   :  { %3315 = vrot.lane.b32.xlu0 %v4725_v47, %s5076_s29 }
0x2f40   :  { %v3316_v51 = vpop.permute.xlu0 %3315 }
0x2f41   :  { %v3318_v35 = vmul.f32 %v3316_v51, %v3313_v48 }
0x2f43   :  { %v6347_v49 = vadd.f32 %v3319_v20, %v3318_v35 }
0x2f45   :  { %3322 = vrot.lane.b32.xlu2 %v6347_v49, %s5076_s29 }
0x2f9f   :  { %v3323_v22 = vpop.permute.xlu2 %3322 }
0x2fa0   :  { %4389 = vmatmul.msk.f32.vlgmr.msrb.gmra.mxu0 %vm2388_vm10, %v3323_v22 }
0x2fa1   :  { %3687 = vmatpush.msrb.mxu0 %v5960_v43 }
0x2fa3   :  { %3688 = vmatpush.msrb.mxu0 %v5962_v44 }
0x2fa5   :  { %3689 = vmatpush.msrb.mxu0 %v6780_v3 }
0x2fa7   :  { %3690 = vmatpush.msrb.mxu0 %v6781_v50 }
0x301d   :  { %v3343_v28 = vpop.f32.mrf.mxu0 }
0x301e   :  { %v3344_v33 = vadd.f32 %v5980_v63, %v3343_v28 }
0x3020   :  { %v3347_v42 = vrot.slane %v3344_v33, 1  ;;  %v3348_v21 = vperm.slane %v3344_v33, 0 }
0x3022   :  { %v3349_v46 = vperm.slane %v3347_v42, 0  ;;  %v3352_v40 = vadd.f32 %v3348_v21, %v5986_v2 }
0x3024   :  { %v3353_v54 = vadd.f32 %v3349_v46, %v5988_v31  ;;  %4726 = vtanh.f32 %v3352_v40 }
0x3026   :  { %4728 = vtanh.f32 %v3353_v54 }
0x302a   :  { %v4727_v43 = vpop.eup %4726 }
0x302b   :  { %v3356_v44 = vmul.f32 %v4727_v43, %v5995_v7 }
0x302c   :  { %v4729_v52 = vpop.eup %4728 }
0x302d   :  { %v3358_v59 = vsel %vm2388_vm10, %v3356_v44, 0.0  ;;  %v3357_v38 = vmul.f32 %v4729_v52, %v5995_v7 }
0x302e   :  { %3359 = vadd.xlane.f32.xlu1 %v3358_v59 }
0x302f   :  { %v3361_v63 = vsel %vm2388_vm10, %v3357_v38, 0.0 }
0x3030   :  { %3362 = vadd.xlane.f32.xlu0 %v3361_v63 }
0x30a1   :  { %v3360_v15 = vpop.xlane.xlu1 %3359 }
0x30a2   :  { %v3364_v58 = vadd.f32 %v3360_v15, %v6001_v34 }
0x30a3   :  { %v3363_v25 = vpop.xlane.xlu0 %3362 }
0x30a4   :  { %v3365_v12 = vadd.f32 %v3363_v25, %v6001_v34  ;;  %v3368_v45 = vperm.slane %v3364_v58, %v6003_v0 }
0x30a6   :  { %v3369_v19 = vperm.slane %v3365_v12, %v6003_v0 }
0x30a8   :  { %v3370_v23 = vsel %vm367_vm9, %v3369_v19, %v3368_v45 }
0x30a9   :  { %v3372_v47 = vsel %vm2663_vm5, %v3370_v23, -1e+30 }
0x30aa   :  { %v3373_v7 = vsel %vm2403_vm14, %v3372_v47, -inf }
0x30ab   :  { %3374 = vmax.xlane.f32.xlu2 %v3373_v7 }
0x311e   :  { %v3375_v48 = vpop.xlane.xlu2 %3374 }
0x311f   :  { %v3376_v51 = vsub.f32 %v3372_v47, %v3375_v48 }
0x3121   :  { %v3377_v20 = vmul.f32 1.442695, %v3376_v51 }
0x3123   :  { %4730 = vpow2.f32 %v3377_v20 }
0x3129   :  { %v4731_v35 = vpop.eup %4730 }
0x312a   :  { %v3379_v22 = vsel %vm2403_vm14, %v4731_v35, 0.0 }
0x312b   :  { %3380 = vadd.xlane.f32.xlu1 %v3379_v22 }
0x319e   :  { %v3381_v3 = vpop.xlane.xlu1 %3380 }
0x319f   :  { %4732 = vrcp.f32 %v3381_v3 }
0x31a5   :  { %v4733_v50 = vpop.eup %4732 }
0x31a6   :  { %v3383_v28 = vmul.f32 %v4733_v50, %v4731_v35 }
0x31a8   :  { %v3391_v33 = vperm.slane %v3383_v28, 1  ;;  %v3384_v42 = vperm.slane %v3383_v28, 0 }
0x31aa   :  { %3396 = vperm.xlu2 %4467, %v3391_v33   ;;  %3389 = vperm.xlu0 %4466, %v3384_v42  }
0x3204   :  { %v3397_v21 = vpop.permute.xlu2 %3396 }
0x3205   :  { %v3399_v46 = vmul.f32 %v3397_v21, %v5878_v53 }
0x3207   :  { %v3407_v40 = vsel %vm2388_vm10, %v3399_v46, 0.0 }
0x3208   :  { %v3408_v54 = vrot.slane %v3407_v40, 4 }
0x320a   :  { %v3409_v43 = vadd.f32 %v3408_v54, %v3407_v40 }
0x320c   :  { %v3410_v59 = vrot.slane %v3409_v43, 2 }
0x320e   :  { %v3411_v15 = vadd.f32 %v3410_v59, %v3409_v43 }
0x3210   :  { %v3412_v12 = vrot.slane %v3411_v15, 1 }
0x3212   :  { %v3413_v23 = vadd.f32 %v3412_v12, %v3411_v15  ;;  %v6406_v15 = vld [vmem:[%s6776_s11] sm:$0x1f] }
0x321c   :  { %v3390_v44 = vpop.permute.xlu0 %3389 }
0x321d   :  { %v3398_v52 = vmul.f32 %v3390_v44, %v5871_v37 }
0x321f   :  { %v3400_v38 = vsel %vm2388_vm10, %v3398_v52, 0.0 }
0x3220   :  { %v3401_v63 = vrot.slane %v3400_v38, 4 }
0x3222   :  { %v3402_v58 = vadd.f32 %v3401_v63, %v3400_v38 }
0x3224   :  { %v3403_v25 = vrot.slane %v3402_v58, 2 }
0x3226   :  { %v3404_v45 = vadd.f32 %v3403_v25, %v3402_v58 }
0x3228   :  { %v3405_v19 = vrot.slane %v3404_v45, 1 }
0x322a   :  { %v3406_v47 = vadd.f32 %v3405_v19, %v3404_v45 }
0x322c   :  { %v3416_v7 = vsel %vm367_vm9, %v3413_v23, %v3406_v47  ;;  %v3485_v48 = vsel %vm3251_vm2, %v3413_v23, %v3406_v47 }
0x322d   :  { %v3418_v51 = vsel %vm2388_vm10, %v3416_v7, %v6347_v49 }
0x322e   :  { %4390 = vmatmul.msk.f32.vlgmr.msrb.gmra.mxu2 %vm2722_vm6, %v3418_v51 }
0x322f   :  { %4128 = vmatpush.msrb.mxu2 %v6018_v56 }
0x3231   :  { %4129 = vmatpush.msrb.mxu2 %v6024_v57 }
0x3233   :  { %4130 = vmatpush.msrb.mxu2 %v6030_v17 }
0x3235   :  { %4131 = vmatpush.msrb.mxu2 %v6036_v60 }
0x3237   :  { %4132 = vmatpush.msrb.mxu2 %v6042_v1 }
0x3239   :  { %4133 = vmatpush.msrb.mxu2 %v6048_v6 }
0x323b   :  { %4134 = vmatpush.msrb.mxu2 %v6054_v11 }
0x323d   :  { %4135 = vmatpush.msrb.mxu2 %v6059_v8 }
0x32b1   :  { %v3439_v20 = vpop.f32.mrf.mxu2 }
0x32b2   :  { %v3440_v35 = vadd.f32 %v6090_v39, %v3439_v20 }
0x32b4   :  { %3462 = vrot.lane.b32.xlu1 %v3440_v35, %s5077_s8  ;;  %v4391_v56 = vmul.f32 -1.442695, %v3440_v35 }
0x32b6   :  { %4734 = vpow2.f32 %v4391_v56 }
0x32bc   :  { %v4735_v57 = vpop.eup %4734 }
0x32bd   :  { %v3445_v22 = vadd.f32 1.0, %v4735_v57 }
0x32bf   :  { %4736 = vrcp.f32 %v3445_v22  ;;  %v3457_v6 = vand.u32 2147483648, %v3445_v22  ;;  %vm3451_vm12 = vweird.f32 %v3445_v22  ;;  %v3455_v11 = vand.u32 2147483647, %v3445_v22 }
0x32c1   :  { %v3458_v28 = vor.u32 1.1754944e-38, %v3457_v6  ;;  %vm3456_vm2 = vcmp.eq.f32.partialorder %v3455_v11, 8.507059e+37 }
0x32c5   :  { %v4737_v17 = vpop.eup %4736 }
0x32c6   :  { %v3447_v60 = vmul.f32 %v4737_v17, %v3445_v22  ;;  %vm3452_vm11 = vweird.f32 %v4737_v17 }
0x32c7   :  { %vm3453_vm13 = vmor %vm3451_vm12, %vm3452_vm11 }
0x32c8   :  { %v3448_v3 = vsub.f32 1.0, %v3447_v60 }
0x32ca   :  { %v3449_v1 = vmul.f32 %v4737_v17, %v3448_v3 }
0x32cc   :  { %v3450_v50 = vadd.f32 %v4737_v17, %v3449_v1 }
0x32ce   :  { %v3454_v8 = vsel %vm3453_vm13, %v4737_v17, %v3450_v50 }
0x32cf   :  { %v3459_v33 = vsel %vm3456_vm2, %v3458_v28, %v3454_v8  ;;  %v4825_v8 = vld [vmem:[#allocation17 + $0x18] sm:$0xff]  ;;  %v4826_v28 = vld [vmem:[#allocation17 + $0x10] sm:$0xff] }
0x32d0   :  { %v3472_v54 = vsub.f32 1.0, %v3459_v33  ;;  %v3478_v44 = vmul.f32 %v3459_v33, %v6347_v49  ;;  %v6411_v49 = vsel %vm3600_vm3, %v5935_v10, %v6406_v15 }
0x3326   :  { %v3463_v39 = vpop.permute.xlu1 %3462 }
0x3327   :  { %v3465_v42 = vmul.f32 %v3463_v39, %v3459_v33  ;;  %v4827_v39 = vld [vmem:[#allocation17 + $0x8] sm:$0xff]  ;;  %v4828_v33 = vld [vmem:[#allocation17] sm:$0xff] }
0x3329   :  { %3467 = vrot.lane.b32.xlu0 %v3465_v42, %s5087_s20 }
0x339b   :  { %v3468_v21 = vpop.permute.xlu0 %3467 }
0x339c   :  { %v3470_v46 = vadd.f32 %v3468_v21, %v3440_v35 }
0x339e   :  { %4738 = vtanh.f32 %v3470_v46  ;;  %v6456_v46 = vld [vmem:[%s6734_s18] ss:$0 sm:$0xff] }
0x33a4   :  { %v4739_v40 = vpop.eup %4738 }
0x33a5   :  { %3474 = vrot.lane.b32.xlu2 %v4739_v40, %s5076_s29 }
0x33ad   :  { %3486 = vrot.lane.b32.xlu2 %v3485_v48, %s5084_s6 }
0x33ff   :  { %v3475_v43 = vpop.permute.xlu2 %3474 }
0x3400   :  { %v3477_v52 = vmul.f32 %v3475_v43, %v3472_v54 }
0x3402   :  { %v6397_v59 = vadd.f32 %v3478_v44, %v3477_v52 }
0x3404   :  { %v3481_v38 = vrot.slane %v6397_v59, 6  ;;  %v3603_v63 = vrot.slane %v6397_v59, 5 }
0x3406   :  { %3604 = vrot.lane.b32.xlu0 %v3603_v63, %s5078_s9  ;;  %3482 = vrot.lane.b32.xlu1 %v3481_v38, %s5078_s9  ;;  %v6464_v63 = vld [vmem:[%s6735_s19] ss:$0 sm:$0xff] }
0x3407   :  { %v3487_v12 = vpop.permute.xlu2 %3486 }
0x3478   :  { %v3605_v58 = vpop.permute.xlu0 %3604  ;;  %v3483_v25 = vpop.permute.xlu1 %3482 }
0x3479   :  { %v3607_v45 = vsel %vm217_vm0, %v6411_v49, %v3605_v58  ;;  %v3489_v19 = vsel %vm217_vm0, %v6311_v29, %v3483_v25 }
0x347a   :  { %v3609_v23 = vrot.slane %v3607_v45, 3  ;;  %v3490_v47 = vsel %vm2541_vm15, %v3489_v19, %v3487_v12 }
0x347b   :  { %v3492_v7 = vrot.slane %v3490_v47, 2 }
0x347c   :  { %4394 = vmatmul.msk.f32.vlgmr.msra.gmra.mxu3 %vm2541_vm15, %v3609_v23 }
0x347d   :  { %4392 = vmatmul.msk.f32.vlgmr.msra.gmra.mxu1 %vm2796_vm1, %v3492_v7 }
0x347e   :  { %4199 = vmatpush.msra.mxu1 %v6099_v32 }
0x3480   :  { %4200 = vmatpush.msra.mxu1 %v6104_v36 }
0x3482   :  { %4201 = vmatpush.msra.mxu1 %v6110_v13  ;;  %v6434_v13 = vld [vmem:[%s6730_s14] ss:$0 sm:$0xff] }
0x3484   :  { %4202 = vmatpush.msra.mxu1 %v6116_v62 }
0x3486   :  { %4203 = vmatpush.msra.mxu1 %v6131_v9 }
0x3488   :  { %4204 = vmatpush.msra.mxu1 %v6137_v24 }
0x348a   :  { %4205 = vmatpush.msra.mxu1 %v6143_v41 }
0x348c   :  { %4206 = vmatpush.msra.mxu1 %v6149_v14 }
0x348e   :  { %4207 = vmatpush.msra.mxu1 %v6154_v30 }
0x3490   :  { %4208 = vmatpush.msra.mxu1 %v6161_v27 }
0x34fa   :  { %v3512_v29 = vpop.f32.mrf.mxu1 }
0x34fb   :  { %v3513_v32 = vadd.f32 %v6233_v16, %v3512_v29 }
0x34fd   :  { %4740 = vtanh.f32 %v3513_v32 }
0x34ff   :  { %v3629_v36 = vpop.f32.mrf.mxu3 }
0x3500   :  { %v3630_v62 = vadd.f32 %v6434_v13, %v3629_v36 }
0x3502   :  { %3652 = vrot.lane.b32.xlu0 %v3630_v62, %s5077_s8  ;;  %v4395_v24 = vmul.f32 -1.442695, %v3630_v62 }
0x3503   :  { %v4741_v9 = vpop.eup %4740 }
0x3504   :  { %4393 = vmatmul.msk.f32.vlgmr.msra.gmra.mxu0 %vm2388_vm10, %v4741_v9  ;;  %4742 = vpow2.f32 %v4395_v24 }
0x3505   :  { %3880 = vmatpush.msra.mxu0 %v6195_v26 }
0x3507   :  { %3881 = vmatpush.msra.mxu0 %v6200_v4 }
0x3509   :  { %3882 = vmatpush.msra.mxu0 %v6207_v55 }
0x350a   :  { %v4743_v41 = vpop.eup %4742 }
0x350b   :  { %3883 = vmatpush.msra.mxu0 %v6214_v5  ;;  %v3635_v14 = vadd.f32 1.0, %v4743_v41 }
0x350d   :  { %4744 = vrcp.f32 %v3635_v14  ;;  %v3647_v20 = vand.u32 2147483648, %v3635_v14  ;;  %vm3641_vm7 = vweird.f32 %v3635_v14  ;;  %v3645_v26 = vand.u32 2147483647, %v3635_v14 }
0x350f   :  { %v3648_v35 = vor.u32 1.1754944e-38, %v3647_v20  ;;  %vm3646_vm11 = vcmp.eq.f32.partialorder %v3645_v26, 8.507059e+37 }
0x3513   :  { %v4745_v30 = vpop.eup %4744 }
0x3514   :  { %v3637_v27 = vmul.f32 %v4745_v30, %v3635_v14  ;;  %vm3642_vm4 = vweird.f32 %v4745_v30 }
0x3515   :  { %vm3643_vm8 = vmor %vm3641_vm7, %vm3642_vm4  ;;  %vm3949_vm4 = vcmask 1045509  }
0x3516   :  { %v3638_v16 = vsub.f32 1.0, %v3637_v27 }
0x3518   :  { %v3639_v48 = vmul.f32 %v4745_v30, %v3638_v16 }
0x351a   :  { %v3640_v51 = vadd.f32 %v4745_v30, %v3639_v48 }
0x351c   :  { %v3644_v4 = vsel %vm3643_vm8, %v4745_v30, %v3640_v51 }
0x351d   :  { %v3649_v5 = vsel %vm3646_vm11, %v3648_v35, %v3644_v4 }
0x351e   :  { %v3662_v60 = vsub.f32 1.0, %v3649_v5  ;;  %v3668_v1 = vmul.f32 %v3649_v5, %v6397_v59 }
0x3574   :  { %v3653_v55 = vpop.permute.xlu0 %3652 }
0x3575   :  { %v3655_v56 = vmul.f32 %v3653_v55, %v3649_v5 }
0x3577   :  { %3657 = vrot.lane.b32.xlu1 %v3655_v56, %s5087_s20 }
0x3581   :  { %v6451_v42 = vpop.f32.mrf.mxu0 }
0x35e9   :  { %v3658_v57 = vpop.permute.xlu1 %3657 }
0x35ea   :  { %v3660_v22 = vadd.f32 %v3658_v57, %v3630_v62 }
0x35ec   :  { %4746 = vtanh.f32 %v3660_v22 }
0x35f2   :  { %v4747_v17 = vpop.eup %4746 }
0x35f3   :  { %3664 = vrot.lane.b32.xlu2 %v4747_v17, %s5076_s29 }
0x364d   :  { %v3665_v3 = vpop.permute.xlu2 %3664 }
0x364e   :  { %v3667_v50 = vmul.f32 %v3665_v3, %v3662_v60 }
0x3650   :  { %v6446_v6 = vadd.f32 %v3668_v1, %v3667_v50 }
0x3652   :  { %3671 = vrot.lane.b32.xlu0 %v6446_v6, %s5076_s29 }
0x36c4   :  { %v3672_v11 = vpop.permute.xlu0 %3671 }
0x36c5   :  { %4396 = vmatmul.msk.f32.vlgmr.msrb.gmra.mxu0 %vm2388_vm10, %v3672_v11 }
0x36c6   :  { %4036 = vmatpush.msrb.mxu0 %v4825_v8 }
0x36c8   :  { %4037 = vmatpush.msrb.mxu0 %v4826_v28 }
0x36ca   :  { %4038 = vmatpush.msrb.mxu0 %v4827_v39 }
0x36cc   :  { %4039 = vmatpush.msrb.mxu0 %v4828_v33 }
0x3742   :  { %v3692_v21 = vpop.f32.mrf.mxu0 }
0x3743   :  { %v3693_v40 = vadd.f32 %v6456_v46, %v3692_v21 }
0x3745   :  { %v3696_v54 = vrot.slane %v3693_v40, 1  ;;  %v3697_v43 = vperm.slane %v3693_v40, 0 }
0x3747   :  { %v3698_v44 = vperm.slane %v3696_v54, 0  ;;  %v3701_v52 = vadd.f32 %v3697_v43, %v5986_v2 }
0x3749   :  { %v3702_v59 = vadd.f32 %v3698_v44, %v5988_v31  ;;  %4748 = vtanh.f32 %v3701_v52 }
0x374b   :  { %4750 = vtanh.f32 %v3702_v59  ;;  %v6491_v59 = vld [vmem:[%s6738_s22] ss:$0 sm:$0xff] }
0x374f   :  { %v4749_v38 = vpop.eup %4748 }
0x3750   :  { %v3705_v58 = vmul.f32 %v6464_v63, %v4749_v38 }
0x3751   :  { %v4751_v25 = vpop.eup %4750 }
0x3752   :  { %v3707_v12 = vsel %vm2388_vm10, %v3705_v58, 0.0  ;;  %v3706_v45 = vmul.f32 %v6464_v63, %v4751_v25 }
0x3753   :  { %3708 = vadd.xlane.f32.xlu1 %v3707_v12 }
0x3754   :  { %v3710_v19 = vsel %vm2388_vm10, %v3706_v45, 0.0 }
0x3755   :  { %3711 = vadd.xlane.f32.xlu2 %v3710_v19 }
0x37c6   :  { %v3709_v23 = vpop.xlane.xlu1 %3708 }
0x37c7   :  { %v3713_v47 = vadd.f32 %v3709_v23, %v6001_v34 }
0x37c8   :  { %v3712_v7 = vpop.xlane.xlu2 %3711 }
0x37c9   :  { %v3714_v29 = vadd.f32 %v3712_v7, %v6001_v34  ;;  %v3717_v32 = vperm.slane %v3713_v47, %v6003_v0 }
0x37cb   :  { %v3718_v36 = vperm.slane %v3714_v29, %v6003_v0 }
0x37cd   :  { %v3719_v62 = vsel %vm367_vm9, %v3718_v36, %v3717_v32 }
0x37ce   :  { %v3721_v9 = vsel %vm2663_vm5, %v3719_v62, -1e+30 }
0x37cf   :  { %v3722_v24 = vsel %vm2403_vm14, %v3721_v9, -inf }
0x37d0   :  { %3723 = vmax.xlane.f32.xlu0 %v3722_v24 }
0x3843   :  { %v3724_v41 = vpop.xlane.xlu0 %3723 }
0x3844   :  { %v3725_v14 = vsub.f32 %v3721_v9, %v3724_v41 }
0x3846   :  { %v3726_v30 = vmul.f32 1.442695, %v3725_v14 }
0x3848   :  { %4752 = vpow2.f32 %v3726_v30 }
0x384e   :  { %v4753_v27 = vpop.eup %4752 }
0x384f   :  { %v3728_v16 = vsel %vm2403_vm14, %v4753_v27, 0.0 }
0x3850   :  { %3729 = vadd.xlane.f32.xlu1 %v3728_v16 }
0x38c3   :  { %v3730_v48 = vpop.xlane.xlu1 %3729 }
0x38c4   :  { %4754 = vrcp.f32 %v3730_v48 }
0x38ca   :  { %v4755_v51 = vpop.eup %4754 }
0x38cb   :  { %v3732_v20 = vmul.f32 %v4755_v51, %v4753_v27 }
0x38cd   :  { %v3740_v26 = vperm.slane %v3732_v20, 1  ;;  %v3733_v4 = vperm.slane %v3732_v20, 0 }
0x38cf   :  { %3745 = vperm.xlu0 %4466, %v3740_v26   ;;  %3738 = vperm.xlu2 %4467, %v3733_v4  }
0x3929   :  { %v3739_v35 = vpop.permute.xlu2 %3738 }
0x392a   :  { %v3747_v55 = vmul.f32 %v3739_v35, %v5871_v37 }
0x392c   :  { %v3749_v5 = vsel %vm2388_vm10, %v3747_v55, 0.0  ;;  %v6508_v55 = vsel %vm3949_vm4, %v5935_v10, %v6406_v15 }
0x392d   :  { %v3750_v56 = vrot.slane %v3749_v5, 4 }
0x392f   :  { %v3751_v57 = vadd.f32 %v3750_v56, %v3749_v5 }
0x3931   :  { %v3752_v60 = vrot.slane %v3751_v57, 2 }
0x3933   :  { %v3753_v50 = vadd.f32 %v3752_v60, %v3751_v57 }
0x3935   :  { %v3754_v28 = vrot.slane %v3753_v50, 1 }
0x3937   :  { %v3755_v21 = vadd.f32 %v3754_v28, %v3753_v50  ;;  %v6522_v50 = vld [vmem:[%s6740_s24] ss:$0 sm:$0xff]  ;;  %v4835_v28 = vld [vmem:[%s6741_s25 + $0x8] sm:$0xff] }
0x3941   :  { %v3746_v22 = vpop.permute.xlu0 %3745 }
0x3942   :  { %v3748_v17 = vmul.f32 %v3746_v22, %v5878_v53 }
0x3944   :  { %v3756_v3 = vsel %vm2388_vm10, %v3748_v17, 0.0 }
0x3945   :  { %v3757_v1 = vrot.slane %v3756_v3, 4 }
0x3947   :  { %v3758_v11 = vadd.f32 %v3757_v1, %v3756_v3 }
0x3949   :  { %v3759_v8 = vrot.slane %v3758_v11, 2 }
0x394b   :  { %v3760_v39 = vadd.f32 %v3759_v8, %v3758_v11  ;;  %v4833_v8 = vld [vmem:[%s6741_s25 + $0x18] sm:$0xff] }
0x394d   :  { %v3761_v33 = vrot.slane %v3760_v39, 1 }
0x394f   :  { %v3762_v40 = vadd.f32 %v3761_v33, %v3760_v39  ;;  %v4836_v39 = vld [vmem:[%s6741_s25] sm:$0xff] }
0x3951   :  { %v3765_v54 = vsel %vm367_vm9, %v3762_v40, %v3755_v21  ;;  %v3834_v43 = vsel %vm3600_vm3, %v3762_v40, %v3755_v21 }
0x3952   :  { %v3767_v44 = vsel %vm2388_vm10, %v3765_v54, %v6446_v6 }
0x3953   :  { %4397 = vmatmul.msk.f32.vlgmr.msra.gmra.mxu2 %vm2722_vm6, %v3767_v44 }
0x39d6   :  { %v3788_v52 = vpop.f32.mrf.mxu2 }
0x39d7   :  { %v3789_v38 = vadd.f32 %v6491_v59, %v3788_v52 }
0x39d9   :  { %3811 = vrot.lane.b32.xlu1 %v3789_v38, %s5077_s8  ;;  %v4398_v58 = vmul.f32 -1.442695, %v3789_v38 }
0x39db   :  { %4756 = vpow2.f32 %v4398_v58 }
0x39e1   :  { %v4757_v25 = vpop.eup %4756 }
0x39e2   :  { %v3794_v12 = vadd.f32 1.0, %v4757_v25 }
0x39e4   :  { %4758 = vrcp.f32 %v3794_v12  ;;  %v3806_v29 = vand.u32 2147483648, %v3794_v12  ;;  %vm3800_vm13 = vweird.f32 %v3794_v12  ;;  %v3804_v32 = vand.u32 2147483647, %v3794_v12 }
0x39e6   :  { %v3807_v62 = vor.u32 1.1754944e-38, %v3806_v29  ;;  %vm3805_vm3 = vcmp.eq.f32.partialorder %v3804_v32, 8.507059e+37 }
0x39ea   :  { %v4759_v45 = vpop.eup %4758 }
0x39eb   :  { %v3796_v19 = vmul.f32 %v4759_v45, %v3794_v12  ;;  %vm3801_vm12 = vweird.f32 %v4759_v45 }
0x39ec   :  { %vm3802_vm2 = vmor %vm3800_vm13, %vm3801_vm12 }
0x39ed   :  { %v3797_v23 = vsub.f32 1.0, %v3796_v19 }
0x39ef   :  { %v3798_v47 = vmul.f32 %v4759_v45, %v3797_v23 }
0x39f1   :  { %v3799_v7 = vadd.f32 %v4759_v45, %v3798_v47 }
0x39f3   :  { %v3803_v36 = vsel %vm3802_vm2, %v4759_v45, %v3799_v7 }
0x39f4   :  { %v3808_v24 = vsel %vm3805_vm3, %v3807_v62, %v3803_v36  ;;  %vm4299_vm3 = vcmask 0  }
0x39f5   :  { %v3821_v16 = vsub.f32 1.0, %v3808_v24  ;;  %v3827_v51 = vmul.f32 %v3808_v24, %v6446_v6 }
0x3a4b   :  { %v3812_v9 = vpop.permute.xlu1 %3811 }
0x3a4c   :  { %v3814_v41 = vmul.f32 %v3812_v9, %v3808_v24 }
0x3a4e   :  { %3816 = vrot.lane.b32.xlu0 %v3814_v41, %s5087_s20 }
0x3ac0   :  { %v3817_v14 = vpop.permute.xlu0 %3816 }
0x3ac1   :  { %v3819_v30 = vadd.f32 %v3817_v14, %v3789_v38 }
0x3ac3   :  { %4760 = vtanh.f32 %v3819_v30 }
0x3ac9   :  { %v4761_v27 = vpop.eup %4760 }
0x3aca   :  { %3823 = vrot.lane.b32.xlu2 %v4761_v27, %s5076_s29 }
0x3ad2   :  { %3835 = vrot.lane.b32.xlu2 %v3834_v43, %s5084_s6 }
0x3b24   :  { %v3824_v48 = vpop.permute.xlu2 %3823 }
0x3b25   :  { %v3826_v20 = vmul.f32 %v3824_v48, %v3821_v16 }
0x3b27   :  { %v6499_v26 = vadd.f32 %v3827_v51, %v3826_v20 }
0x3b29   :  { %v3830_v4 = vrot.slane %v6499_v26, 5  ;;  %v3952_v35 = vrot.slane %v6499_v26, 4 }
0x3b2b   :  { %3953 = vrot.lane.b32.xlu0 %v3952_v35, %s5078_s9  ;;  %3831 = vrot.lane.b32.xlu1 %v3830_v4, %s5078_s9 }
0x3b2c   :  { %v3836_v6 = vpop.permute.xlu2 %3835 }
0x3b9d   :  { %v3954_v5 = vpop.permute.xlu0 %3953  ;;  %v3832_v56 = vpop.permute.xlu1 %3831 }
0x3b9e   :  { %v3956_v57 = vsel %vm217_vm0, %v6508_v55, %v3954_v5  ;;  %v3838_v22 = vsel %vm217_vm0, %v6411_v49, %v3832_v56 }
0x3b9f   :  { %v3958_v17 = vrot.slane %v3956_v57, 4  ;;  %v3839_v60 = vsel %vm2541_vm15, %v3838_v22, %v3836_v6 }
0x3ba0   :  { %v3841_v3 = vrot.slane %v3839_v60, 3 }
0x3ba1   :  { %4401 = vmatmul.msk.f32.vlgmr.msrb.gmra.mxu1 %vm2541_vm15, %v3958_v17 }
0x3ba2   :  { %4399 = vmatmul.msk.f32.vlgmr.msrb.gmra.mxu3 %vm2796_vm1, %v3841_v3 }
0x3c1e   :  { %v3978_v1 = vpop.f32.mrf.mxu1 }
0x3c1f   :  { %v3979_v10 = vadd.f32 %v6434_v13, %v3978_v1  ;;  %v4834_v13 = vld [vmem:[%s6741_s25 + $0x10] sm:$0xff] }
0x3c21   :  { %4001 = vrot.lane.b32.xlu0 %v3979_v10, %s5077_s8  ;;  %v4402_v33 = vmul.f32 -1.442695, %v3979_v10 }
0x3c25   :  { %v3861_v15 = vpop.f32.mrf.mxu3 }
0x3c26   :  { %v3862_v49 = vadd.f32 %v6522_v50, %v3861_v15 }
0x3c28   :  { %4762 = vtanh.f32 %v3862_v49 }
0x3c29   :  { %4764 = vpow2.f32 %v4402_v33 }
0x3c2e   :  { %v4763_v11 = vpop.eup %4762 }
0x3c2f   :  { %4400 = vmatmul.msk.f32.vlgmr.msra.gmra.mxu0 %vm2388_vm10, %v4763_v11  ;;  %v4765_v21 = vpop.eup %4764 }
0x3c30   :  { %4229 = vmatpush.msra.mxu0 %v4833_v8  ;;  %v3984_v40 = vadd.f32 1.0, %v4765_v21 }
0x3c32   :  { %4230 = vmatpush.msra.mxu0 %v4834_v13  ;;  %4766 = vrcp.f32 %v3984_v40  ;;  %v3996_v58 = vand.u32 2147483648, %v3984_v40  ;;  %vm3990_vm8 = vweird.f32 %v3984_v40  ;;  %v3994_v25 = vand.u32 2147483647, %v3984_v40 }
0x3c34   :  { %4231 = vmatpush.msra.mxu0 %v4835_v28  ;;  %v3997_v45 = vor.u32 1.1754944e-38, %v3996_v58  ;;  %vm3995_vm12 = vcmp.eq.f32.partialorder %v3994_v25, 8.507059e+37 }
0x3c36   :  { %4232 = vmatpush.msra.mxu0 %v4836_v39 }
0x3c38   :  { %v4767_v54 = vpop.eup %4766 }
0x3c39   :  { %v3986_v43 = vmul.f32 %v4767_v54, %v3984_v40  ;;  %vm3991_vm7 = vweird.f32 %v4767_v54 }
0x3c3a   :  { %vm3992_vm11 = vmor %vm3990_vm8, %vm3991_vm7 }
0x3c3b   :  { %v3987_v44 = vsub.f32 1.0, %v3986_v43 }
0x3c3d   :  { %v3988_v52 = vmul.f32 %v4767_v54, %v3987_v44 }
0x3c3f   :  { %v3989_v38 = vadd.f32 %v4767_v54, %v3988_v52 }
0x3c41   :  { %v3993_v12 = vsel %vm3992_vm11, %v4767_v54, %v3989_v38 }
0x3c42   :  { %v3998_v23 = vsel %vm3995_vm12, %v3997_v45, %v3993_v12 }
0x3c43   :  { %v4011_v36 = vsub.f32 1.0, %v3998_v23  ;;  %v4017_v9 = vmul.f32 %v3998_v23, %v6499_v26 }
0x3c93   :  { %v4002_v19 = vpop.permute.xlu0 %4001 }
0x3c94   :  { %v4004_v47 = vmul.f32 %v4002_v19, %v3998_v23 }
0x3c96   :  { %4006 = vrot.lane.b32.xlu1 %v4004_v47, %s5087_s20 }
0x3cac   :  { %v6546_v30 = vpop.f32.mrf.mxu0 }
0x3d08   :  { %v4007_v7 = vpop.permute.xlu1 %4006 }
0x3d09   :  { %v4009_v29 = vadd.f32 %v4007_v7, %v3979_v10 }
0x3d0b   :  { %4768 = vtanh.f32 %v4009_v29 }
0x3d11   :  { %v4769_v32 = vpop.eup %4768 }
0x3d12   :  { %4013 = vrot.lane.b32.xlu2 %v4769_v32, %s5076_s29 }
0x3d6c   :  { %v4014_v62 = vpop.permute.xlu2 %4013 }
0x3d6d   :  { %v4016_v24 = vmul.f32 %v4014_v62, %v4011_v36 }
0x3d6f   :  { %v6541_v41 = vadd.f32 %v4017_v9, %v4016_v24  ;;  %v6579_v24 = vld [vmem:[%s6782_s13] ss:$0 sm:$0xff]  ;;  %s5094_s13 = smov [#allocation19]  }
0x3d71   :  { %4020 = vrot.lane.b32.xlu0 %v6541_v41, %s5076_s29 }
0x3de3   :  { %v4021_v14 = vpop.permute.xlu0 %4020 }
0x3de4   :  { %4403 = vmatmul.msk.f32.vlgmr.msrb.gmra.mxu0 %vm2388_vm10, %v4021_v14  ;;  %v6583_v14 = vadd.f32 %v6579_v24, %v6546_v30 }
0x3e61   :  { %v4041_v27 = vpop.f32.mrf.mxu0 }
0x3e62   :  { %v4042_v16 = vadd.f32 %v6456_v46, %v4041_v27 }
0x3e64   :  { %v4045_v48 = vrot.slane %v4042_v16, 1  ;;  %v4046_v51 = vperm.slane %v4042_v16, 0 }
0x3e66   :  { %v4047_v20 = vperm.slane %v4045_v48, 0  ;;  %v4050_v4 = vadd.f32 %v4046_v51, %v5986_v2 }
0x3e68   :  { %v4051_v26 = vadd.f32 %v4047_v20, %v5988_v31  ;;  %4770 = vtanh.f32 %v4050_v4 }
0x3e6a   :  { %4772 = vtanh.f32 %v4051_v26 }
0x3e6e   :  { %v4771_v35 = vpop.eup %4770 }
0x3e6f   :  { %v4054_v5 = vmul.f32 %v6464_v63, %v4771_v35 }
0x3e70   :  { %v4773_v56 = vpop.eup %4772 }
0x3e71   :  { %v4056_v6 = vsel %vm2388_vm10, %v4054_v5, 0.0  ;;  %v4055_v57 = vmul.f32 %v6464_v63, %v4773_v56 }
0x3e72   :  { %4057 = vadd.xlane.f32.xlu1 %v4056_v6 }
0x3e73   :  { %v4059_v46 = vsel %vm2388_vm10, %v4055_v57, 0.0 }
0x3e74   :  { %4060 = vadd.xlane.f32.xlu2 %v4059_v46 }
0x3ee5   :  { %v4058_v22 = vpop.xlane.xlu1 %4057 }
0x3ee6   :  { %v4062_v17 = vadd.f32 %v4058_v22, %v6001_v34 }
0x3ee7   :  { %v4061_v2 = vpop.xlane.xlu2 %4060 }
0x3ee8   :  { %v4063_v31 = vadd.f32 %v4061_v2, %v6001_v34  ;;  %v4066_v60 = vperm.slane %v4062_v17, %v6003_v0 }
0x3eea   :  { %v4067_v3 = vperm.slane %v4063_v31, %v6003_v0 }
0x3eec   :  { %v4068_v1 = vsel %vm367_vm9, %v4067_v3, %v4066_v60  ;;  %v6591_v60 = vadd.f32 %v6579_v24, %v6356_v18 }
0x3eed   :  { %v4070_v10 = vsel %vm2663_vm5, %v4068_v1, -1e+30 }
0x3eee   :  { %v4071_v63 = vsel %vm2403_vm14, %v4070_v10, -inf }
0x3eef   :  { %4072 = vmax.xlane.f32.xlu0 %v4071_v63 }
0x3f62   :  { %v4073_v15 = vpop.xlane.xlu0 %4072 }
0x3f63   :  { %v4074_v49 = vsub.f32 %v4070_v10, %v4073_v15 }
0x3f65   :  { %v4075_v11 = vmul.f32 1.442695, %v4074_v49 }
0x3f67   :  { %4774 = vpow2.f32 %v4075_v11 }
0x3f6d   :  { %v4775_v8 = vpop.eup %4774 }
0x3f6e   :  { %v4077_v13 = vsel %vm2403_vm14, %v4775_v8, 0.0  ;;  %vm2850_vm14 = vcmask 156672  }
0x3f6f   :  { %4078 = vadd.xlane.f32.xlu1 %v4077_v13  ;;  %v3890_v27 = vsel %vm2850_vm14, %v6583_v14, -inf  ;;  %v3192_v3 = vsel %vm2850_vm14, %v6591_v60, -inf  ;;  %v3537_v13 = vadd.f32 %v6579_v24, %v6451_v42 }
0x3fe2   :  { %v4079_v34 = vpop.xlane.xlu1 %4078 }
0x3fe3   :  { %4776 = vrcp.f32 %v4079_v34 }
0x3fe9   :  { %v4777_v28 = vpop.eup %4776 }
0x3fea   :  { %v4081_v0 = vmul.f32 %v4777_v28, %v4775_v8 }
0x3fec   :  { %v4089_v39 = vperm.slane %v4081_v0, 1  ;;  %v4082_v33 = vperm.slane %v4081_v0, 0 }
0x3fee   :  { %4094 = vperm.xlu0 %4466, %v4089_v39   ;;  %4087 = vperm.xlu2 %4467, %v4082_v33   ;;  %v3541_v39 = vsel %vm2850_vm14, %v3537_v13, -inf }
0x4048   :  { %v4088_v61 = vpop.permute.xlu2 %4087 }
0x4049   :  { %v4096_v21 = vmul.f32 %v4088_v61, %v5871_v37  ;;  %v6783_v61 = vld [vmem:[#allocation28_spill] sm:$0xff] }
0x404b   :  { %v4098_v40 = vsel %vm2388_vm10, %v4096_v21, 0.0  ;;  %v6610_v21 = vadd.f32 %v6579_v24, %v6783_v61 }
0x404c   :  { %v4099_v54 = vrot.slane %v4098_v40, 4 }
0x404e   :  { %v4100_v43 = vadd.f32 %v4099_v54, %v4098_v40  ;;  %v2851_v40 = vsel %vm2850_vm14, %v6610_v21, -inf }
0x4050   :  { %v4101_v38 = vrot.slane %v4100_v43, 2 }
0x4052   :  { %v4102_v12 = vadd.f32 %v4101_v38, %v4100_v43  ;;  %v3554_v43 = vrot.slane %v3537_v13, 1 }
0x4054   :  { %v4103_v23 = vrot.slane %v4102_v12, 1 }
0x4056   :  { %v4104_v29 = vadd.f32 %v4103_v23, %v4102_v12 }
0x4060   :  { %v4095_v44 = vpop.permute.xlu0 %4094 }
0x4061   :  { %v4097_v52 = vmul.f32 %v4095_v44, %v5878_v53 }
0x4063   :  { %v4105_v58 = vsel %vm2388_vm10, %v4097_v52, 0.0 }
0x4064   :  { %v4106_v25 = vrot.slane %v4105_v58, 4 }
0x4066   :  { %v4107_v45 = vadd.f32 %v4106_v25, %v4105_v58 }
0x4068   :  { %v4108_v19 = vrot.slane %v4107_v45, 2 }
0x406a   :  { %v4109_v47 = vadd.f32 %v4108_v19, %v4107_v45 }
0x406c   :  { %v4110_v7 = vrot.slane %v4109_v47, 1 }
0x406e   :  { %v4111_v32 = vadd.f32 %v4110_v7, %v4109_v47 }
0x4070   :  { %v4114_v37 = vsel %vm367_vm9, %v4111_v32, %v4104_v29  ;;  %v4183_v36 = vsel %vm3949_vm4, %v4111_v32, %v4104_v29 }
0x4071   :  { %v4116_v62 = vsel %vm2388_vm10, %v4114_v37, %v6541_v41 }
0x4072   :  { %4404 = vmatmul.msk.f32.vlgmr.msrb.gmra.mxu2 %vm2722_vm6, %v4116_v62 }
0x40f5   :  { %v4137_v53 = vpop.f32.mrf.mxu2 }
0x40f6   :  { %v4138_v9 = vadd.f32 %v6491_v59, %v4137_v53 }
0x40f8   :  { %4160 = vrot.lane.b32.xlu1 %v4138_v9, %s5077_s8  ;;  %v4405_v16 = vmul.f32 -1.442695, %v4138_v9 }
0x40fa   :  { %4778 = vpow2.f32 %v4405_v16 }
0x4100   :  { %4184 = vrot.lane.b32.xlu1 %v4183_v36, %s5084_s6  ;;  %v4779_v59 = vpop.eup %4778  ;;  %s6785_s6 = sld [smem:[#allocation42_spill]] }
0x4101   :  { %v4143_v48 = vadd.f32 1.0, %v4779_v59 }
0x4103   :  { %4780 = vrcp.f32 %v4143_v48  ;;  %v4155_v5 = vand.u32 2147483648, %v4143_v48  ;;  %vm4149_vm6 = vweird.f32 %v4143_v48  ;;  %v4153_v30 = vand.u32 2147483647, %v4143_v48 }
0x4105   :  { %v4156_v6 = vor.u32 1.1754944e-38, %v4155_v5  ;;  %vm4154_vm2 = vcmp.eq.f32.partialorder %v4153_v30, 8.507059e+37 }
0x4109   :  { %v4781_v51 = vpop.eup %4780 }
0x410a   :  { %v4145_v20 = vmul.f32 %v4781_v51, %v4143_v48  ;;  %vm4150_vm5 = vweird.f32 %v4781_v51 }
0x410b   :  { %vm4151_vm13 = vmor %vm4149_vm6, %vm4150_vm5 }
0x410c   :  { %v4146_v4 = vsub.f32 1.0, %v4145_v20 }
0x410e   :  { %v4147_v26 = vmul.f32 %v4781_v51, %v4146_v4 }
0x4110   :  { %v4148_v35 = vadd.f32 %v4781_v51, %v4147_v26 }
0x4112   :  { %v4152_v56 = vsel %vm4151_vm13, %v4781_v51, %v4148_v35  ;;  %v3205_v35 = vrot.slane %v6591_v60, 1 }
0x4113   :  { %v4157_v46 = vsel %vm4154_vm2, %v4156_v6, %v4152_v56 }
0x4114   :  { %v4170_v1 = vsub.f32 1.0, %v4157_v46  ;;  %v4176_v63 = vmul.f32 %v4157_v46, %v6541_v41 }
0x412a   :  { %3891 = vmax.xlane.f32.xlu1 %v3890_v27 }
0x416a   :  { %v4161_v57 = vpop.permute.xlu1 %4160 }
0x416b   :  { %v4163_v22 = vmul.f32 %v4161_v57, %v4157_v46 }
0x416d   :  { %4165 = vrot.lane.b32.xlu2 %v4163_v22, %s5087_s20  ;;  %s4308_s20 = sshll.u32 %s6785_s6, 4  ;;  %s4309_s20 = int_to_ptr.hbm [resolvable:$true] %s4308_s20 }
0x4172   :  { %v4185_v8 = vpop.permute.xlu1 %4184 }
0x419d   :  { %v6599_v34 = vpop.xlane.xlu1 %3891 }
0x419e   :  { %v3893_v0 = vsub.f32 %v6583_v14, %v6599_v34 }
0x41a0   :  { %v3894_v33 = vmul.f32 1.442695, %v3893_v0 }
0x41c7   :  { %v4166_v17 = vpop.permute.xlu2 %4165 }
0x41c8   :  { %v4168_v2 = vadd.f32 %v4166_v17, %v4138_v9 }
0x41ca   :  { %4782 = vtanh.f32 %v4168_v2 }
0x41d0   :  { %v4783_v31 = vpop.eup %4782 }
0x41d1   :  { %4172 = vrot.lane.b32.xlu0 %v4783_v31, %s5076_s29  ;;  %s4306_s29 = sshll.u32 %s5094_s13, 4  ;;  %s4307_s29 = int_to_ptr.vmem [resolvable:$true] %s4306_s29 }
0x41fb   :  { %3193 = vmax.xlane.f32.xlu0 %v3192_v3 }
0x4243   :  { %v4173_v10 = vpop.permute.xlu0 %4172 }
0x4244   :  { %v4175_v15 = vmul.f32 %v4173_v10, %v4170_v1 }
0x4246   :  { %v4177_v49 = vadd.f32 %v4176_v63, %v4175_v15 }
0x4248   :  { %v4179_v11 = vrot.slane %v4177_v49, 4 }
0x424a   :  { %4180 = vrot.lane.b32.xlu2 %v4179_v11, %s5078_s9  ;;  %s6784_s9 = sld [smem:[#allocation32_spill]] }
0x4250   :  { %v3540_v44 = vld [vmem:[%s6784_s9 + $0xa] sm:$0x1]  ;;  %v3539_v25 = vld [vmem:[%s6784_s9 + $0x2] sm:$0x1]  ;;  %v3190_v6 = vld [vmem:[%s6784_s9 + $0x1] sm:$0x1] }
0x4251   :  { %v3558_v38 = vmul.f32 %v3554_v43, %v3540_v44  ;;  %v3557_v45 = vmul.f32 %v3539_v25, %v3537_v13  ;;  %v4238_v46 = vld [vmem:[%s6784_s9 + $0xc] sm:$0x1]  ;;  %v3208_v22 = vmul.f32 %v3190_v6, %v6591_v60  ;;  %v4237_v3 = vld [vmem:[%s6784_s9 + $0x4] sm:$0x1]  ;;  %v2864_v43 = vrot.slane %v6610_v21, 1 }
0x4253   :  { %v3561_v12 = vrot.slane %v3558_v38, 7 }
0x4255   :  { %v3562_v19 = vsel %vm367_vm9, %v3561_v12, %v3557_v45  ;;  %v6673_v45 = vld [vmem:[#allocation8] sm:$0x3] }
0x4256   :  { %v3564_v23 = vsel %vm2850_vm14, %v3562_v19, 0.0 }
0x426e   :  { %v6601_v18 = vpop.xlane.xlu0 %3193 }
0x426f   :  { %v3195_v28 = vsub.f32 %v6591_v60, %v6601_v18 }
0x4271   :  { %v3196_v41 = vmul.f32 1.442695, %v3195_v28  ;;  %v3889_v28 = vld [vmem:[%s6784_s9 + $0xb] sm:$0x1] }
0x4273   :  { %4784 = vpow2.f32 %v3196_v41  ;;  %3542 = vmax.xlane.f32.xlu2 %v3541_v39 }
0x4274   :  { %4786 = vpow2.f32 %v3894_v33 }
0x4279   :  { %v4785_v42 = vpop.eup %4784 }
0x427a   :  { %v3198_v54 = vsel %vm2850_vm14, %v4785_v42, 0.0  ;;  %v4787_v52 = vpop.eup %4786 }
0x427b   :  { %2852 = vmax.xlane.f32.xlu2 %v2851_v40  ;;  %3199 = vadd.xlane.f32.xlu1 %v3198_v54  ;;  %v3896_v58 = vsel %vm2850_vm14, %v4787_v52, 0.0  ;;  %v3888_v54 = vld [vmem:[%s6784_s9 + $0x3] sm:$0x1]  ;;  %v2848_v52 = vld [vmem:[%s6784_s9 + $0x8] sm:$0x1] }
0x427c   :  { %v3906_v25 = vmul.f32 %v3888_v54, %v6583_v14 }
0x4283   :  { %3897 = vadd.xlane.f32.xlu2 %v3896_v58 }
0x428b   :  { %3565 = vadd.xlane.f32.xlu2 %v3564_v23 }
0x42a4   :  { %v4181_v47 = vpop.permute.xlu2 %4180 }
0x42a5   :  { %v4187_v7 = vsel %vm217_vm0, %v6508_v55, %v4181_v47  ;;  %vm2877_vm0 = vcmask 1024  }
0x42a6   :  { %v4188_v29 = vsel %vm2541_vm15, %v4187_v7, %v4185_v8  ;;  %v2868_v7 = vmul.f32 %v2864_v43, %v2848_v52  ;;  %vm3916_vm15 = vcmask 25624  }
0x42a7   :  { %v4190_v32 = vrot.slane %v4188_v29, 4 }
0x42a9   :  { %4406 = vmatmul.msk.f32.vlgmr.msra.gmra.mxu1 %vm2796_vm1, %v4190_v32  ;;  %vm4265_vm1 = vcmask 33824  }
0x42e6   :  { %v6628_v37 = vpop.xlane.xlu2 %3542 }
0x42e7   :  { %v3544_v48 = vsub.f32 %v3537_v13, %v6628_v37  ;;  %v3903_v13 = vrot.slane %v6583_v14, 1  ;;  %v2847_v14 = vld [vmem:[%s6784_s9] sm:$0x1] }
0x42e9   :  { %v3545_v51 = vmul.f32 1.442695, %v3544_v48  ;;  %v3907_v33 = vmul.f32 %v3903_v13, %v3889_v28 }
0x42eb   :  { %v3910_v44 = vrot.slane %v3907_v33, 7 }
0x42ed   :  { %v3911_v47 = vsel %vm367_vm9, %v3910_v44, %v3906_v25 }
0x42ee   :  { %v6630_v36 = vpop.xlane.xlu2 %2852  ;;  %v3200_v49 = vpop.xlane.xlu1 %3199 }
0x42ef   :  { %v2854_v62 = vsub.f32 %v6610_v21, %v6630_v36 }
0x42f1   :  { %v2855_v53 = vmul.f32 1.442695, %v2854_v62 }
0x42f3   :  { %4788 = vpow2.f32 %v2855_v53 }
0x42f6   :  { %v3898_v39 = vpop.xlane.xlu2 %3897 }
0x42f9   :  { %v4789_v9 = vpop.eup %4788 }
0x42fa   :  { %v2857_v27 = vsel %vm2850_vm14, %v4789_v9, 0.0  ;;  %v3913_v9 = vsel %vm2850_vm14, %v3911_v47, 0.0 }
0x42fb   :  { %2858 = vadd.xlane.f32.xlu2 %v2857_v27 }
0x42fe   :  { %v3566_v32 = vpop.xlane.xlu2 %3565 }
0x4326   :  { %v4210_v16 = vpop.f32.mrf.mxu1 }
0x4327   :  { %v4211_v55 = vadd.f32 %v6522_v50, %v4210_v16  ;;  %v3191_v50 = vld [vmem:[%s6784_s9 + $0x9] sm:$0x1]  ;;  %v2867_v16 = vmul.f32 %v2847_v14, %v6610_v21 }
0x4328   :  { %v3209_v30 = vmul.f32 %v3205_v35, %v3191_v50 }
0x4329   :  { %4790 = vtanh.f32 %v4211_v55 }
0x432a   :  { %4792 = vpow2.f32 %v3545_v51 }
0x432b   :  { %4794 = vlog2.f32 %v3200_v49 }
0x432f   :  { %v4791_v59 = vpop.eup %4790 }
0x4330   :  { %4407 = vmatmul.msk.f32.vlgmr.msra.gmra.mxu0 %vm2388_vm10, %v4791_v59  ;;  %v4793_v5 = vpop.eup %4792  ;;  %vm3567_vm10 = vcmask 17424  }
0x4331   :  { %v3547_v56 = vsel %vm2850_vm14, %v4793_v5, 0.0  ;;  %v4795_v0 = vpop.eup %4794 }
0x4332   :  { %v3202_v42 = vmul.f32 0.6931472, %v4795_v0 }
0x4334   :  { %v3203_v58 = vadd.f32 %v3202_v42, %v6601_v18  ;;  %v2871_v18 = vrot.slane %v2868_v7, 7  ;;  %v3568_v7 = vsel %vm3567_vm10, %v6673_v45, 0.0 }
0x436e   :  { %v2859_v59 = vpop.xlane.xlu2 %2858 }
0x43ad   :  { %v4234_v20 = vpop.f32.mrf.mxu0 }
0x43ae   :  { %v4235_v4 = vadd.f32 %v6579_v24, %v4234_v20  ;;  %v3212_v24 = vrot.slane %v3209_v30, 7 }
0x43b0   :  { %v4239_v26 = vsel %vm2850_vm14, %v4235_v4, -inf  ;;  %v4252_v57 = vrot.slane %v4235_v4, 1  ;;  %v3213_v17 = vsel %vm367_vm9, %v3212_v24, %v3208_v22  ;;  %v4255_v10 = vmul.f32 %v4237_v3, %v4235_v4 }
0x43b1   :  { %4240 = vmax.xlane.f32.xlu0 %v4239_v26  ;;  %v3215_v31 = vsel %vm2850_vm14, %v3213_v17, 0.0 }
0x43b2   :  { %v4256_v2 = vmul.f32 %v4252_v57, %v4238_v46 }
0x43b4   :  { %v4259_v1 = vrot.slane %v4256_v2, 7 }
0x43b6   :  { %v4260_v63 = vsel %vm367_vm9, %v4259_v1, %v4255_v10 }
0x43b7   :  { %v4262_v15 = vsel %vm2850_vm14, %v4260_v63, 0.0 }
0x43b9   :  { %3548 = vadd.xlane.f32.xlu0 %v3547_v56 }
0x43c1   :  { %3216 = vadd.xlane.f32.xlu0 %v3215_v31 }
0x43c9   :  { %4263 = vadd.xlane.f32.xlu0 %v4262_v15 }
0x4424   :  { %v4241_v11 = vpop.xlane.xlu0 %4240 }
0x4425   :  { %v4242_v60 = vsub.f32 %v4235_v4, %v4241_v11 }
0x4427   :  { %v4243_v8 = vmul.f32 1.442695, %v4242_v60 }
0x4429   :  { %4796 = vpow2.f32 %v4243_v8 }
0x442c   :  { %v3549_v41 = vpop.xlane.xlu0 %3548 }
0x442d   :  { %4798 = vlog2.f32 %v3549_v41 }
0x442e   :  { %4800 = vlog2.f32 %v3898_v39 }
0x442f   :  { %v4797_v61 = vpop.eup %4796 }
0x4430   :  { %v4245_v40 = vsel %vm2850_vm14, %v4797_v61, 0.0 }
0x4431   :  { %4246 = vadd.xlane.f32.xlu1 %v4245_v40 }
0x4433   :  { %v4799_v38 = vpop.eup %4798 }
0x4434   :  { %v3551_v12 = vmul.f32 0.6931472, %v4799_v38  ;;  %v3217_v19 = vpop.xlane.xlu0 %3216  ;;  %v4801_v48 = vpop.eup %4800 }
0x4435   :  { %v3227_v23 = vsub.f32 %v3203_v58, %v3217_v19  ;;  %v3900_v20 = vmul.f32 0.6931472, %v4801_v48 }
0x4436   :  { %v3552_v29 = vadd.f32 %v3551_v12, %v6628_v37  ;;  %v2872_v37 = vsel %vm367_vm9, %v2871_v18, %v2867_v16  ;;  %vm3218_vm9 = vcmask 9224  }
0x4437   :  { %v3228_v62 = vmul.f32 %v3227_v23, %v6673_v45  ;;  %v2874_v55 = vsel %vm2850_vm14, %v2872_v37, 0.0  ;;  %v3901_v26 = vadd.f32 %v3900_v20, %v6599_v34  ;;  %v3219_v47 = vsel %vm3218_vm9, %v6673_v45, 0.0 }
0x4438   :  { %v3576_v53 = vsub.f32 %v3552_v29, %v3566_v32  ;;  %v3220_v29 = vrot.slane %v3219_v47, 4  ;;  %v3569_v32 = vrot.slane %v3568_v7, 4 }
0x4439   :  { %3914 = vadd.xlane.f32.xlu1 %v3913_v9  ;;  %3230 = vrot.lane.b32.xlu0 %v3228_v62, %s5090_s1 }
0x443a   :  { %v3577_v27 = vmul.f32 %v3576_v53, %v6673_v45  ;;  %v3221_v62 = vadd.f32 %v3220_v29, %v3219_v47  ;;  %v3570_v53 = vadd.f32 %v3569_v32, %v3568_v7 }
0x443c   :  { %3579 = vrot.lane.b32.xlu2 %v3577_v27, %s5091_s23  ;;  %v4264_v6 = vpop.xlane.xlu0 %4263  ;;  %v3222_v9 = vrot.slane %v3221_v62, 2  ;;  %v3571_v14 = vrot.slane %v3570_v53, 2 }
0x443e   :  { %v3223_v18 = vadd.f32 %v3222_v9, %v3221_v62  ;;  %v3572_v27 = vadd.f32 %v3571_v14, %v3570_v53 }
0x4440   :  { %v3224_v16 = vrot.slane %v3223_v18, 1  ;;  %v3573_v37 = vrot.slane %v3572_v27, 1 }
0x4441   :  { %2875 = vadd.xlane.f32.xlu1 %v2874_v55 }
0x4442   :  { %v3225_v55 = vadd.f32 %v3224_v16, %v3223_v18 }
0x4444   :  { %v3226_v48 = vmax.f32 %v3225_v55, 1.0 }
0x4496   :  { %v3580_v3 = vpop.permute.xlu2 %3579 }
0x4497   :  { %v3582_v1 = vsel %vm2877_vm0, %v3580_v3, 0.0 }
0x44a4   :  { %v4247_v51 = vpop.xlane.xlu1 %4246 }
0x44a5   :  { %4802 = vlog2.f32 %v4247_v51 }
0x44a6   :  { %4804 = vlog2.f32 %v2859_v59  ;;  %v3574_v59 = vadd.f32 %v3573_v37, %v3572_v27 }
0x44a7   :  { %4806 = vrcp.f32 %v3226_v48 }
0x44a8   :  { %v3575_v51 = vmax.f32 %v3574_v59, 1.0 }
0x44aa   :  { %4808 = vrcp.f32 %v3575_v51 }
0x44ab   :  { %v4803_v4 = vpop.eup %4802  ;;  %v3231_v10 = vpop.permute.xlu0 %3230 }
0x44ac   :  { %v4805_v35 = vpop.eup %4804  ;;  %v4249_v21 = vmul.f32 0.6931472, %v4803_v4  ;;  %v3915_v50 = vpop.xlane.xlu1 %3914  ;;  %v3233_v63 = vsel %vm2877_vm0, %v3231_v10, 0.0  ;;  %v3917_v10 = vsel %vm3916_vm15, %v6673_v45, 0.0 }
0x44ad   :  { %v3925_v5 = vsub.f32 %v3901_v26, %v3915_v50  ;;  %v2861_v56 = vmul.f32 0.6931472, %v4805_v35  ;;  %v4807_v20 = vpop.eup %4806 }
0x44ae   :  { %v4250_v30 = vadd.f32 %v4249_v21, %v4241_v11 }
0x44af   :  { %v3926_v57 = vmul.f32 %v3925_v5, %v6673_v45  ;;  %v2862_v22 = vadd.f32 %v2861_v56, %v6630_v36 }
0x44b0   :  { %v4274_v24 = vsub.f32 %v4250_v30, %v4264_v6  ;;  %v4809_v4 = vpop.eup %4808 }
0x44b1   :  { %3928 = vrot.lane.b32.xlu1 %v3926_v57, %s5092_s26 }
0x44b2   :  { %v4275_v46 = vmul.f32 %v4274_v24, %v6673_v45 }
0x44b4   :  { %v2876_v17 = vpop.xlane.xlu1 %2875  ;;  %4277 = vrot.lane.b32.xlu0 %v4275_v46, %s5093_s0 }
0x44b5   :  { %v2886_v34 = vsub.f32 %v2862_v22, %v2876_v17 }
0x44b7   :  { %v2887_v2 = vmul.f32 %v2886_v34, %v6673_v45 }
0x44b9   :  { %v2888_v31 = vsel %vm2877_vm0, %v2887_v2, 0.0 }
0x44ba   :  { %2889 = vadd.xlane.f32.xlu2 %v2888_v31 }
0x44db   :  { %3583 = vadd.xlane.f32.xlu1 %v3582_v1 }
0x44de   :  { %3234 = vadd.xlane.f32.xlu0 %v3233_v63  ;;  %v3918_v63 = vrot.slane %v3917_v10, 4 }
0x4523   :  { %v3929_v36 = vpop.permute.xlu1 %3928 }
0x4524   :  { %v3931_v15 = vsel %vm2877_vm0, %v3929_v36, 0.0  ;;  %v4266_v36 = vsel %vm4265_vm1, %v6673_v45, 0.0 }
0x4525   :  { %3932 = vadd.xlane.f32.xlu2 %v3931_v15  ;;  %v4267_v15 = vrot.slane %v4266_v36, 4 }
0x4526   :  { %v4278_v49 = vpop.permute.xlu0 %4277 }
0x4527   :  { %v4280_v11 = vsel %vm2877_vm0, %v4278_v49, 0.0  ;;  %v3919_v49 = vadd.f32 %v3918_v63, %v3917_v10 }
0x4528   :  { %4281 = vadd.xlane.f32.xlu0 %v4280_v11  ;;  %v4268_v11 = vadd.f32 %v4267_v15, %v4266_v36 }
0x452d   :  { %v2890_v60 = vpop.xlane.xlu2 %2889 }
0x452e   :  { %v2891_v8 = vrot.slane %v2890_v60, 4 }
0x4530   :  { %v2892_v13 = vadd.f32 %v2891_v8, %v2890_v60  ;;  %v3920_v60 = vrot.slane %v3919_v49, 2  ;;  %v4269_v8 = vrot.slane %v4268_v11, 2 }
0x4532   :  { %v2893_v28 = vrot.slane %v2892_v13, 2 }
0x4534   :  { %v2894_v0 = vadd.f32 %v2893_v28, %v2892_v13  ;;  %v3921_v13 = vadd.f32 %v3920_v60, %v3919_v49  ;;  %v4270_v28 = vadd.f32 %v4269_v8, %v4268_v11 }
0x4536   :  { %v2895_v41 = vrot.slane %v2894_v0, 1 }
0x4538   :  { %v2896_v39 = vadd.f32 %v2895_v41, %v2894_v0  ;;  %v3922_v0 = vrot.slane %v3921_v13, 1  ;;  %v4271_v41 = vrot.slane %v4270_v28, 1 }
0x453a   :  { %4408 = vpush %v2896_v39  ;;  %v3923_v39 = vadd.f32 %v3922_v0, %v3921_v13 }
0x454e   :  { %v3584_v33 = vpop.xlane.xlu1 %3583 }
0x454f   :  { %v3585_v61 = vrot.slane %v3584_v33, 4 }
0x4551   :  { %v3586_v42 = vadd.f32 %v3585_v61, %v3584_v33  ;;  %v3235_v40 = vpop.xlane.xlu0 %3234  ;;  %v4272_v33 = vadd.f32 %v4271_v41, %v4270_v28  ;;  %v3924_v61 = vmax.f32 %v3923_v39, 1.0 }
0x4552   :  { %v3236_v54 = vrot.slane %v3235_v40, 4 }
0x4553   :  { %v3587_v43 = vrot.slane %v3586_v42, 2  ;;  %4810 = vrcp.f32 %v3924_v61 }
0x4554   :  { %v3237_v44 = vadd.f32 %v3236_v54, %v3235_v40 }
0x4555   :  { %v3588_v52 = vadd.f32 %v3587_v43, %v3586_v42  ;;  %v4273_v42 = vmax.f32 %v4272_v33, 1.0 }
0x4556   :  { %v3238_v38 = vrot.slane %v3237_v44, 2 }
0x4557   :  { %v3589_v25 = vrot.slane %v3588_v52, 1  ;;  %4812 = vrcp.f32 %v4273_v42 }
0x4558   :  { %v3239_v58 = vadd.f32 %v3238_v38, %v3237_v44 }
0x4559   :  { %v3590_v23 = vadd.f32 %v3589_v25, %v3588_v52  ;;  %v4811_v40 = vpop.eup %4810 }
0x455a   :  { %v3240_v12 = vrot.slane %v3239_v58, 1 }
0x455c   :  { %v3241_v19 = vadd.f32 %v3240_v12, %v3239_v58  ;;  %v2878_v58 = vsel %vm2877_vm0, %v6673_v45, 0.0 }
0x455d   :  { %v4813_v43 = vpop.eup %4812  ;;  %v2879_v25 = vrot.slane %v2878_v58, 4 }
0x455e   :  { %4410 = vpush %v3241_v19 }
0x455f   :  { %4412 = vpush %v3590_v23  ;;  %v2880_v12 = vadd.f32 %v2879_v25, %v2878_v58 }
0x4561   :  { %v2881_v19 = vrot.slane %v2880_v12, 2 }
0x4563   :  { %v2882_v23 = vadd.f32 %v2881_v19, %v2880_v12 }
0x4565   :  { %v2883_v47 = vrot.slane %v2882_v23, 1 }
0x4567   :  { %v2884_v7 = vadd.f32 %v2883_v47, %v2882_v23 }
0x4569   :  { %v2885_v29 = vmax.f32 %v2884_v7, 1.0 }
0x456b   :  { %s6702_s27 = spop %4408  ;;  %4814 = vrcp.f32 %v2885_v29 }
0x456c   :  { %v2899_v62 = vstv %s6702_s27 }
0x4571   :  { %v4815_v32 = vpop.eup %4814 }
0x4572   :  { %v2900_v9 = vmul.f32 %v4815_v32, %v2899_v62 }
0x458f   :  { %s4411_s24 = spop %4410 }
0x4590   :  { %v3244_v26 = vstv %s4411_s24  ;;  %s4413_s12 = spop %4412 }
0x4591   :  { %v3245_v35 = vmul.f32 %v4807_v20, %v3244_v26  ;;  %v3593_v21 = vstv %s4413_s12 }
0x4592   :  { %v3594_v50 = vmul.f32 %v4809_v4, %v3593_v21 }
0x4593   :  { %3247 = vrot.lane.b32.xlu1 %v3245_v35, %s5090_s1 }
0x4594   :  { %3596 = vrot.lane.b32.xlu2 %v3594_v50, %s5091_s23 }
0x4598   :  { %v3933_v5 = vpop.xlane.xlu2 %3932 }
0x4599   :  { %v3934_v30 = vrot.slane %v3933_v5, 4 }
0x459b   :  { %v3935_v56 = vadd.f32 %v3934_v30, %v3933_v5  ;;  %v4282_v6 = vpop.xlane.xlu0 %4281 }
0x459c   :  { %v4283_v57 = vrot.slane %v4282_v6, 4 }
0x459d   :  { %v3936_v24 = vrot.slane %v3935_v56, 2 }
0x459e   :  { %v4284_v46 = vadd.f32 %v4283_v57, %v4282_v6 }
0x459f   :  { %v3937_v22 = vadd.f32 %v3936_v24, %v3935_v56 }
0x45a0   :  { %v4285_v17 = vrot.slane %v4284_v46, 2 }
0x45a1   :  { %v3938_v34 = vrot.slane %v3937_v22, 1 }
0x45a2   :  { %v4286_v2 = vadd.f32 %v4285_v17, %v4284_v46 }
0x45a3   :  { %v3939_v31 = vadd.f32 %v3938_v34, %v3937_v22 }
0x45a4   :  { %v4287_v3 = vrot.slane %v4286_v2, 1 }
0x45a5   :  { %4414 = vpush %v3939_v31 }
0x45a6   :  { %v4288_v1 = vadd.f32 %v4287_v3, %v4286_v2 }
0x45a8   :  { %4416 = vpush %v4288_v1 }
0x45d6   :  { %s4415_s25 = spop %4414 }
0x45d7   :  { %v3942_v54 = vstv %s4415_s25 }
0x45d8   :  { %v3943_v44 = vmul.f32 %v4811_v40, %v3942_v54 }
0x45d9   :  { %s4417_s5 = spop %4416 }
0x45da   :  { %v4291_v52 = vstv %s4417_s5  ;;  %3945 = vrot.lane.b32.xlu0 %v3943_v44, %s5092_s26 }
0x45db   :  { %v4292_v38 = vmul.f32 %v4813_v43, %v4291_v52 }
0x45dd   :  { %4294 = vrot.lane.b32.xlu1 %v4292_v38, %s5093_s0 }
0x45ee   :  { %v3597_v18 = vpop.permute.xlu2 %3596 }
0x4605   :  { %v3248_v53 = vpop.permute.xlu1 %3247 }
0x4606   :  { %v3250_v14 = vadd.f32 %v3248_v53, %v2900_v9 }
0x4608   :  { %v3599_v27 = vadd.f32 %v3597_v18, %v3250_v14 }
0x464c   :  { %v3946_v16 = vpop.permute.xlu0 %3945 }
0x464d   :  { %v3948_v37 = vadd.f32 %v3946_v16, %v3599_v27 }
0x464f   :  { %v4295_v55 = vpop.permute.xlu1 %4294 }
0x4650   :  { %v4297_v45 = vadd.f32 %v4295_v55, %v3948_v37 }
0x4652   :  { %v4298_v59 = vmul.f32 0.2, %v4297_v45 }
0x4654   :  { %4300 = vst.msk [vmem:[#allocation19] sm:$0x1] %vm4299_vm3, %v4298_v59 }
0x4655   :  { %4311 = dma.vmem_to_hbm [thread:$0]  %s4307_s29, 16, %s4309_s20, [#allocation7]  }
0x4656   :  { %5063 = dma.done.wait [#allocation7], 16  }
0x4657   :  { %5064 = vsyncadd [#allocation7], 4294967280 }
0x4658   :  { %4316 = vsyncpa [#allocation6], 1 }
0x4659   :  { %4317 = vsyncpa [#allocation9], 1 }
0x465a   :  { %4318 = vsyncpa [#allocation12], 1 }
0x465b   :  { %4319 = vsyncpa [#allocation15], 1 }
0x465c   :  { %4320 = vsyncpa [#allocation18], 1 }
0x465d   :  { %4321 = vsyncpa [#allocation7], 1 }

</bundles_post_ra>
